<compile_context>
chip_gen: v7x
topology: tpu7x:2x2x1
jax: 0.10.0
libtpu: 0.0.40
codegen_flags: <defaults>
</compile_context>

<pallas_src>
import jax
import jax.numpy as jnp
from jax.experimental import pallas as pl
from jax.experimental.pallas import tpu as pltpu


TB_ALIGN = 16  # bf16 sublane pack: keeps the bf16 working sequence one full tile/step


def _round_up(n, m):
    return ((n + m - 1) // m) * m


def _vmem_capacity_bytes():
    """Physical VMEM per TensorCore (128 MiB v5e/v6e, 64 MiB v7x); conservative fallback."""
    try:
        info = pltpu.get_tpu_info()
        cap = getattr(info, "vmem_capacity_bytes", None)
        if cap:
            return int(cap)
    except Exception:
        pass
    return 64 * 1024 * 1024


def _sigmoid(z):
    # sigmoid(z) == 0.5 * (1 + tanh(z/2)): one EUP push (tanh) + cheap VPU mul/add,
    # instead of exp + reciprocal, on the serial recurrent path.
    return 0.5 * (jnp.tanh(0.5 * z) + 1.0)


# ----------------------------------------------------------------------------
# Pallas kernel: LayerNorm + stacked LSTM + residual for one batch tile.
# ----------------------------------------------------------------------------
def _lstm_block_kernel(x_ref, gamma_ref, beta_ref, wih_ref, whh_ref, b_ref,
                       out_ref, seq_ref, gates_x_ref):
    # x_ref:       (TB, T, D)   f32   batch-major input tile (caller layout)
    # gamma/beta:  (1, 1, D)    f32   LayerNorm affine params
    # wih_ref:     (L, D, 4D)   bf16  input->gates weights (pre-transposed)
    # whh_ref:     (L, D, 4D)   bf16  hidden->gates weights (pre-transposed)
    # b_ref:       (L, 1, 4D)   f32   combined bias (b_ih + b_hh)
    # out_ref:     (TB, T, D)   f32   batch-major output tile
    # seq_ref:     (T, TB, D)   bf16  scratch: time-major working sequence
    # gates_x_ref: (T, TB, 4D)  f32   scratch: hoisted input projection
    TB, T, D = x_ref.shape
    L = wih_ref.shape[0]
    eps = 1e-5

    # ---- LayerNorm over the feature dim (computed in the caller's layout) ----
    x = x_ref[...]
    mean = jnp.mean(x, axis=-1, keepdims=True)
    xc = x - mean
    var = jnp.mean(xc * xc, axis=-1, keepdims=True)
    y = (xc * jax.lax.rsqrt(var + eps)) * gamma_ref[...] + beta_ref[...]

    # One in-VMEM reorder to time-major (replaces the full-tensor HBM transpose the
    # wrapper used to do).  This is also the single bf16 cast feeding layer 0's
    # hoisted projection.  seq_ref[t] is one contiguous (TB, D) tile.
    for t in range(T):  # T is static
        seq_ref[t] = y[:, t, :].astype(jnp.bfloat16)

    # Fully unroll short time loops; partially unroll long ones so the LLO scheduler
    # can overlap step t's gate math with step t+1's prologue.
    unroll = True if T <= 16 else 4

    # ---- Stacked LSTM layers (static Python loop over layers) ----
    for l in range(L):
        wih = wih_ref[l]   # (D, 4D) bf16
        whh = whh_ref[l]   # (D, 4D) bf16
        bias = b_ref[l]    # (1, 4D) f32

        # Hoisted input projection: one large MXU matmul over all timesteps,
        # reading the bf16 working sequence directly (bias folded in once).
        gx = jnp.dot(seq_ref[...].reshape(T * TB, D), wih,
                     preferred_element_type=jnp.float32) + bias
        gates_x_ref[...] = gx.reshape(T, TB, 4 * D)

        def step(t, carry, whh=whh):
            h, c = carry
            # Only the small recurrent matmul stays on the sequential path.
            gates = gates_x_ref[t] + jnp.dot(
                h.astype(jnp.bfloat16), whh, preferred_element_type=jnp.float32)
            i_g = _sigmoid(gates[:, 0 * D:1 * D])
            f_g = _sigmoid(gates[:, 1 * D:2 * D])
            g_g = jnp.tanh(gates[:, 2 * D:3 * D])
            o_g = _sigmoid(gates[:, 3 * D:4 * D])
            c_new = f_g * c + i_g * g_g
            h_new = o_g * jnp.tanh(c_new)
            # Overwrite the working sequence with this layer's output (bf16);
            # the f32 h/c carries keep the recurrence itself at full precision.
            seq_ref[t] = h_new.astype(jnp.bfloat16)
            return h_new, c_new

        h0 = jnp.zeros((TB, D), jnp.float32)
        c0 = jnp.zeros((TB, D), jnp.float32)
        jax.lax.fori_loop(0, T, step, (h0, c0), unroll=unroll)

    # ---- Dropout(p=0) is identity; residual add written in the caller's layout ----
    for t in range(T):  # static per-t stores: in-VMEM "transpose back"
        out_ref[:, t, :] = x_ref[:, t, :] + seq_ref[t].astype(jnp.float32)


# ----------------------------------------------------------------------------
# Wrapper (layout plumbing + pallas_call with a batch-tile grid)
# ----------------------------------------------------------------------------
@jax.jit
def lstm_module_forward(x, ln_gamma, ln_beta, w_ih, w_hh, b):
    """x: (B, T, D) float32 (batch_first, as in the PyTorch module). Returns (B, T, D)."""
    B, T, D = x.shape
    L = w_ih.shape[0]

    # ---- VMEM budgeting (per generation: 128 MiB v5e/v6e, 64 MiB v7x) ----
    vmem_cap = _vmem_capacity_bytes()
    vmem_limit = (vmem_cap * 7) // 8          # scoped limit, headroom for Mosaic internals
    vmem_budget = (vmem_cap * 3) // 4         # what our buffers are allowed to use

    # Bytes of VMEM per batch row: double-buffered f32 x/out blocks, bf16 working
    # sequence, f32 hoisted-gates scratch.
    bytes_per_row = T * D * (2 * 4 + 2 * 4 + 2 + 4 * 4)
    weight_bytes = 2 * (2 * L * D * 4 * D * 2) + 2 * (L * 4 * D * 4)  # 2x-buffered
    avail = vmem_budget - weight_bytes
    tb_cap_vmem = max(TB_ALIGN, (avail // bytes_per_row) // TB_ALIGN * TB_ALIGN)

    # ---- Batch tile: 16-aligned, capped at 256 rows (fills the v6e/v7x MXU) and by
    # the VMEM budget.  Prefer >= 2 grid steps when the batch allows it, so the
    # "parallel" axis can shard across both v7x TensorCores and BlockSpec pipelining
    # has a next tile to prefetch. ----
    tb_cap = min(256, tb_cap_vmem)
    B_a = _round_up(B, TB_ALIGN)
    num_tiles = pl.cdiv(B_a, tb_cap)
    if num_tiles == 1 and B_a >= 2 * TB_ALIGN:
        num_tiles = 2
    TB = _round_up(pl.cdiv(B_a, num_tiles), TB_ALIGN)
    B_pad = TB * num_tiles

    x_f32 = x.astype(jnp.float32)
    if B_pad != B:
        # Zero-padded rows go through LayerNorm with var=0 -> output 0*gamma+beta
        # (finite); they are computed and discarded, never read by real rows.
        x_f32 = jnp.pad(x_f32, ((0, B_pad - B), (0, 0), (0, 0)))

    gamma = ln_gamma.reshape(1, 1, D).astype(jnp.float32)
    beta = ln_beta.reshape(1, 1, D).astype(jnp.float32)
    wih_bf = w_ih.astype(jnp.bfloat16)                         # (L, D, 4D)
    whh_bf = w_hh.astype(jnp.bfloat16)                         # (L, D, 4D)
    b_f32 = b.astype(jnp.float32)                              # (L, 1, 4D)

    # Kernel reads/writes the caller's batch-major layout directly (no HBM transposes).
    xo_spec = pl.BlockSpec((TB, T, D), lambda i: (i, 0, 0))

    def full_spec(shape):
        return pl.BlockSpec(shape, lambda i: (0,) * len(shape))

    out = pl.pallas_call(
        _lstm_block_kernel,
        out_shape=jax.ShapeDtypeStruct((B_pad, T, D), jnp.float32),
        grid=(B_pad // TB,),
        in_specs=[
            xo_spec,                        # x
            full_spec((1, 1, D)),           # gamma
            full_spec((1, 1, D)),           # beta
            full_spec((L, D, 4 * D)),       # W_ih (bf16)
            full_spec((L, D, 4 * D)),       # W_hh (bf16)
            full_spec((L, 1, 4 * D)),       # bias
        ],
        out_specs=xo_spec,
        scratch_shapes=[
            pltpu.VMEM((T, TB, D), jnp.bfloat16),      # time-major working sequence
            pltpu.VMEM((T, TB, 4 * D), jnp.float32),   # hoisted input-gates scratch
        ],
        compiler_params=pltpu.CompilerParams(
            dimension_semantics=("parallel",),
            vmem_limit_bytes=int(vmem_limit)),
    )(x_f32, gamma, beta, wih_bf, whh_bf, b_f32)

    return out[:B]


# ----------------------------------------------------------------------------
# Pure-JAX reference (f32, highest precision) for a correctness self-check
# ----------------------------------------------------------------------------
def reference_forward(x, ln_gamma, ln_beta, w_ih, w_hh, b):
    B, T, D = x.shape
    mean = x.mean(-1, keepdims=True)
    var = ((x - mean) ** 2).mean(-1, keepdims=True)
    y = (x - mean) / jnp.sqrt(var + 1e-5) * ln_gamma + ln_beta
    L = w_ih.shape[0]
    hi = jax.lax.Precision.HIGHEST
    seq = y
    for l in range(L):
        wih, whh, bl = w_ih[l], w_hh[l], b[l]
        h = jnp.zeros((B, D), jnp.float32)
        c = jnp.zeros((B, D), jnp.float32)
        outs = []
        for t in range(T):
            x_t = seq[:, t, :]
            gates = (jnp.dot(x_t, wih, precision=hi)
                     + jnp.dot(h, whh, precision=hi) + bl)
            i_g = jax.nn.sigmoid(gates[:, :D])
            f_g = jax.nn.sigmoid(gates[:, D:2 * D])
            g_g = jnp.tanh(gates[:, 2 * D:3 * D])
            o_g = jax.nn.sigmoid(gates[:, 3 * D:])
            c = f_g * c + i_g * g_g
            h = o_g * jnp.tanh(c)
            outs.append(h)
        seq = jnp.stack(outs, axis=1)
    return x + seq  # dropout p=0.0 -> identity


# ----------------------------------------------------------------------------
# Deterministic parameter construction + demo run
# ----------------------------------------------------------------------------
def make_params(key, dim, num_layers):
    """PyTorch-style init: LSTM params ~ U(-1/sqrt(D), 1/sqrt(D)); LN weight=1, bias=0."""
    bound = 1.0 / jnp.sqrt(jnp.float32(dim))
    keys = jax.random.split(key, 4)
    # Stored pre-transposed for the kernel: (L, D, 4D).
    w_ih = jax.random.uniform(keys[0], (num_layers, dim, 4 * dim),
                              jnp.float32, -bound, bound)
    w_hh = jax.random.uniform(keys[1], (num_layers, dim, 4 * dim),
                              jnp.float32, -bound, bound)
    b_ih = jax.random.uniform(keys[2], (num_layers, 1, 4 * dim),
                              jnp.float32, -bound, bound)
    b_hh = jax.random.uniform(keys[3], (num_layers, 1, 4 * dim),
                              jnp.float32, -bound, bound)
    b = b_ih + b_hh  # combined, as used in both kernel and reference
    ln_gamma = jnp.ones((dim,), jnp.float32)
    ln_beta = jnp.zeros((dim,), jnp.float32)
    return ln_gamma, ln_beta, w_ih, w_hh, b


if __name__ == "__main__":
    # dim=128 matches the module default (and keeps gate slices lane-aligned).
    B, T, D, L = 2, 8, 128, 3

    key = jax.random.PRNGKey(0)
    k_x, k_p = jax.random.split(key)
    x = jax.random.normal(k_x, (B, T, D), jnp.float32)
    ln_gamma, ln_beta, w_ih, w_hh, b = make_params(k_p, D, L)

    out = lstm_module_forward(x, ln_gamma, ln_beta, w_ih, w_hh, b)
    out = jax.block_until_ready(out)

    ref = reference_forward(x, ln_gamma, ln_beta, w_ih, w_hh, b)
    assert out.shape == (B, T, D)
    assert bool(jnp.all(jnp.isfinite(out)))
    # bf16 MXU operands / bf16 working sequence (f32 accumulation and f32 h/c state)
    # vs. an f32-highest reference: tolerance loosened accordingly.
    err = float(jnp.max(jnp.abs(out - ref)))
    assert err < 5e-2, f"max abs err = {err}"

    print("KERNEL_OK")
</pallas_src>

<mosaic_0001>
module attributes {stable_mosaic.version = 11 : i64} {
  func.func @_lstm_block_kernel(%arg0: i32, %arg1: memref<16x8x128xf32, #tpu.memory_space<vmem>>, %arg2: memref<1x1x128xf32, #tpu.memory_space<vmem>>, %arg3: memref<1x1x128xf32, #tpu.memory_space<vmem>>, %arg4: memref<3x128x512xbf16, #tpu.memory_space<vmem>>, %arg5: memref<3x128x512xbf16, #tpu.memory_space<vmem>>, %arg6: memref<3x1x512xf32, #tpu.memory_space<vmem>>, %arg7: memref<16x8x128xf32, #tpu.memory_space<vmem>>, %arg8: memref<8x16x128xbf16, #tpu.memory_space<vmem>>, %arg9: memref<8x16x512xf32, #tpu.memory_space<vmem>>) attributes {dimension_semantics = [#tpu.dimension_semantics<parallel>], iteration_bounds = array<i64: 1>, scalar_prefetch = 0 : i64, scratch_operands = 2 : i64, tpu.core_type = #tpu.core_type<tc>, window_params = [{transform_indices = @transform_0, window_bounds = array<i64: 16, 8, 128>}, {pipeline_mode = #tpu.pipeline_mode<synchronous>, transform_indices = @transform_1, window_bounds = array<i64: 1, 1, 128>}, {pipeline_mode = #tpu.pipeline_mode<synchronous>, transform_indices = @transform_2, window_bounds = array<i64: 1, 1, 128>}, {pipeline_mode = #tpu.pipeline_mode<synchronous>, transform_indices = @transform_3, window_bounds = array<i64: 3, 128, 512>}, {pipeline_mode = #tpu.pipeline_mode<synchronous>, transform_indices = @transform_4, window_bounds = array<i64: 3, 128, 512>}, {pipeline_mode = #tpu.pipeline_mode<synchronous>, transform_indices = @transform_5, window_bounds = array<i64: 3, 1, 512>}, {transform_indices = @transform_6, window_bounds = array<i64: 16, 8, 128>}]} {
    %c0 = arith.constant 0 : index
    %c0_0 = arith.constant 0 : index
    %c0_1 = arith.constant 0 : index
    %0 = vector.load %arg1[%c0, %c0_0, %c0_1] : memref<16x8x128xf32, #tpu.memory_space<vmem>>, vector<16x8x128xf32>
    %cst = arith.constant dense<0.000000e+00> : vector<16x8xf32>
    %1 = vector.multi_reduction <add>, %0, %cst [2] : vector<16x8x128xf32> to vector<16x8xf32>
    %2 = vector.shape_cast %1 : vector<16x8xf32> to vector<16x8x1xf32>
    %cst_2 = arith.constant 1.280000e+02 : f32
    %3 = vector.broadcast %cst_2 : f32 to vector<16x8x1xf32>
    %4 = arith.divf %2, %3 : vector<16x8x1xf32>
    %5 = vector.broadcast %4 : vector<16x8x1xf32> to vector<16x8x128xf32>
    %6 = arith.subf %0, %5 : vector<16x8x128xf32>
    %7 = arith.mulf %6, %6 : vector<16x8x128xf32>
    %cst_3 = arith.constant dense<0.000000e+00> : vector<16x8xf32>
    %8 = vector.multi_reduction <add>, %7, %cst_3 [2] : vector<16x8x128xf32> to vector<16x8xf32>
    %9 = vector.shape_cast %8 : vector<16x8xf32> to vector<16x8x1xf32>
    %cst_4 = arith.constant 1.280000e+02 : f32
    %10 = vector.broadcast %cst_4 : f32 to vector<16x8x1xf32>
    %11 = arith.divf %9, %10 : vector<16x8x1xf32>
    %cst_5 = arith.constant 9.99999974E-6 : f32
    %12 = vector.broadcast %cst_5 : f32 to vector<16x8x1xf32>
    %13 = arith.addf %11, %12 : vector<16x8x1xf32>
    %14 = math.rsqrt %13 : vector<16x8x1xf32>
    %15 = vector.broadcast %14 : vector<16x8x1xf32> to vector<16x8x128xf32>
    %16 = arith.mulf %6, %15 : vector<16x8x128xf32>
    %c0_6 = arith.constant 0 : index
    %c0_7 = arith.constant 0 : index
    %c0_8 = arith.constant 0 : index
    %17 = vector.load %arg2[%c0_6, %c0_7, %c0_8] : memref<1x1x128xf32, #tpu.memory_space<vmem>>, vector<1x1x128xf32>
    %18 = vector.broadcast %17 : vector<1x1x128xf32> to vector<16x8x128xf32>
    %19 = arith.mulf %16, %18 : vector<16x8x128xf32>
    %c0_9 = arith.constant 0 : index
    %c0_10 = arith.constant 0 : index
    %c0_11 = arith.constant 0 : index
    %20 = vector.load %arg3[%c0_9, %c0_10, %c0_11] : memref<1x1x128xf32, #tpu.memory_space<vmem>>, vector<1x1x128xf32>
    %21 = vector.broadcast %20 : vector<1x1x128xf32> to vector<16x8x128xf32>
    %22 = arith.addf %19, %21 : vector<16x8x128xf32>
    %23 = vector.extract_strided_slice %22 {offsets = [0, 0, 0], sizes = [16, 1, 128], strides = [1, 1, 1]} : vector<16x8x128xf32> to vector<16x1x128xf32>
    %24 = vector.shape_cast %23 : vector<16x1x128xf32> to vector<16x128xf32>
    %25 = arith.truncf %24 : vector<16x128xf32> to vector<16x128xbf16>
    %c0_12 = arith.constant 0 : index
    %c0_13 = arith.constant 0 : index
    %c0_14 = arith.constant 0 : index
    %26 = vector.load %arg8[%c0_12, %c0_13, %c0_14] : memref<8x16x128xbf16, #tpu.memory_space<vmem>>, vector<1x16x128xbf16>
    %27 = vector.shape_cast %26 : vector<1x16x128xbf16> to vector<16x128xbf16>
    %28 = vector.shape_cast %25 : vector<16x128xbf16> to vector<1x16x128xbf16>
    tpu.vector_store %arg8[%c0_12, %c0_13, %c0_14], %28 {strides = array<i32>} : memref<8x16x128xbf16, #tpu.memory_space<vmem>>, vector<1x16x128xbf16>,
    %29 = vector.extract_strided_slice %22 {offsets = [0, 1, 0], sizes = [16, 1, 128], strides = [1, 1, 1]} : vector<16x8x128xf32> to vector<16x1x128xf32>
    %30 = vector.shape_cast %29 : vector<16x1x128xf32> to vector<16x128xf32>
    %31 = arith.truncf %30 : vector<16x128xf32> to vector<16x128xbf16>
    %c1 = arith.constant 1 : index
    %c0_15 = arith.constant 0 : index
    %c0_16 = arith.constant 0 : index
    %32 = vector.load %arg8[%c1, %c0_15, %c0_16] : memref<8x16x128xbf16, #tpu.memory_space<vmem>>, vector<1x16x128xbf16>
    %33 = vector.shape_cast %32 : vector<1x16x128xbf16> to vector<16x128xbf16>
    %34 = vector.shape_cast %31 : vector<16x128xbf16> to vector<1x16x128xbf16>
    tpu.vector_store %arg8[%c1, %c0_15, %c0_16], %34 {strides = array<i32>} : memref<8x16x128xbf16, #tpu.memory_space<vmem>>, vector<1x16x128xbf16>,
    %35 = vector.extract_strided_slice %22 {offsets = [0, 2, 0], sizes = [16, 1, 128], strides = [1, 1, 1]} : vector<16x8x128xf32> to vector<16x1x128xf32>
    %36 = vector.shape_cast %35 : vector<16x1x128xf32> to vector<16x128xf32>
    %37 = arith.truncf %36 : vector<16x128xf32> to vector<16x128xbf16>
    %c2 = arith.constant 2 : index
    %c0_17 = arith.constant 0 : index
    %c0_18 = arith.constant 0 : index
    %38 = vector.load %arg8[%c2, %c0_17, %c0_18] : memref<8x16x128xbf16, #tpu.memory_space<vmem>>, vector<1x16x128xbf16>
    %39 = vector.shape_cast %38 : vector<1x16x128xbf16> to vector<16x128xbf16>
    %40 = vector.shape_cast %37 : vector<16x128xbf16> to vector<1x16x128xbf16>
    tpu.vector_store %arg8[%c2, %c0_17, %c0_18], %40 {strides = array<i32>} : memref<8x16x128xbf16, #tpu.memory_space<vmem>>, vector<1x16x128xbf16>,
    %41 = vector.extract_strided_slice %22 {offsets = [0, 3, 0], sizes = [16, 1, 128], strides = [1, 1, 1]} : vector<16x8x128xf32> to vector<16x1x128xf32>
    %42 = vector.shape_cast %41 : vector<16x1x128xf32> to vector<16x128xf32>
    %43 = arith.truncf %42 : vector<16x128xf32> to vector<16x128xbf16>
    %c3 = arith.constant 3 : index
    %c0_19 = arith.constant 0 : index
    %c0_20 = arith.constant 0 : index
    %44 = vector.load %arg8[%c3, %c0_19, %c0_20] : memref<8x16x128xbf16, #tpu.memory_space<vmem>>, vector<1x16x128xbf16>
    %45 = vector.shape_cast %44 : vector<1x16x128xbf16> to vector<16x128xbf16>
    %46 = vector.shape_cast %43 : vector<16x128xbf16> to vector<1x16x128xbf16>
    tpu.vector_store %arg8[%c3, %c0_19, %c0_20], %46 {strides = array<i32>} : memref<8x16x128xbf16, #tpu.memory_space<vmem>>, vector<1x16x128xbf16>,
    %47 = vector.extract_strided_slice %22 {offsets = [0, 4, 0], sizes = [16, 1, 128], strides = [1, 1, 1]} : vector<16x8x128xf32> to vector<16x1x128xf32>
    %48 = vector.shape_cast %47 : vector<16x1x128xf32> to vector<16x128xf32>
    %49 = arith.truncf %48 : vector<16x128xf32> to vector<16x128xbf16>
    %c4 = arith.constant 4 : index
    %c0_21 = arith.constant 0 : index
    %c0_22 = arith.constant 0 : index
    %50 = vector.load %arg8[%c4, %c0_21, %c0_22] : memref<8x16x128xbf16, #tpu.memory_space<vmem>>, vector<1x16x128xbf16>
    %51 = vector.shape_cast %50 : vector<1x16x128xbf16> to vector<16x128xbf16>
    %52 = vector.shape_cast %49 : vector<16x128xbf16> to vector<1x16x128xbf16>
    tpu.vector_store %arg8[%c4, %c0_21, %c0_22], %52 {strides = array<i32>} : memref<8x16x128xbf16, #tpu.memory_space<vmem>>, vector<1x16x128xbf16>,
    %53 = vector.extract_strided_slice %22 {offsets = [0, 5, 0], sizes = [16, 1, 128], strides = [1, 1, 1]} : vector<16x8x128xf32> to vector<16x1x128xf32>
    %54 = vector.shape_cast %53 : vector<16x1x128xf32> to vector<16x128xf32>
    %55 = arith.truncf %54 : vector<16x128xf32> to vector<16x128xbf16>
    %c5 = arith.constant 5 : index
    %c0_23 = arith.constant 0 : index
    %c0_24 = arith.constant 0 : index
    %56 = vector.load %arg8[%c5, %c0_23, %c0_24] : memref<8x16x128xbf16, #tpu.memory_space<vmem>>, vector<1x16x128xbf16>
    %57 = vector.shape_cast %56 : vector<1x16x128xbf16> to vector<16x128xbf16>
    %58 = vector.shape_cast %55 : vector<16x128xbf16> to vector<1x16x128xbf16>
    tpu.vector_store %arg8[%c5, %c0_23, %c0_24], %58 {strides = array<i32>} : memref<8x16x128xbf16, #tpu.memory_space<vmem>>, vector<1x16x128xbf16>,
    %59 = vector.extract_strided_slice %22 {offsets = [0, 6, 0], sizes = [16, 1, 128], strides = [1, 1, 1]} : vector<16x8x128xf32> to vector<16x1x128xf32>
    %60 = vector.shape_cast %59 : vector<16x1x128xf32> to vector<16x128xf32>
    %61 = arith.truncf %60 : vector<16x128xf32> to vector<16x128xbf16>
    %c6 = arith.constant 6 : index
    %c0_25 = arith.constant 0 : index
    %c0_26 = arith.constant 0 : index
    %62 = vector.load %arg8[%c6, %c0_25, %c0_26] : memref<8x16x128xbf16, #tpu.memory_space<vmem>>, vector<1x16x128xbf16>
    %63 = vector.shape_cast %62 : vector<1x16x128xbf16> to vector<16x128xbf16>
    %64 = vector.shape_cast %61 : vector<16x128xbf16> to vector<1x16x128xbf16>
    tpu.vector_store %arg8[%c6, %c0_25, %c0_26], %64 {strides = array<i32>} : memref<8x16x128xbf16, #tpu.memory_space<vmem>>, vector<1x16x128xbf16>,
    %65 = vector.extract_strided_slice %22 {offsets = [0, 7, 0], sizes = [16, 1, 128], strides = [1, 1, 1]} : vector<16x8x128xf32> to vector<16x1x128xf32>
    %66 = vector.shape_cast %65 : vector<16x1x128xf32> to vector<16x128xf32>
    %67 = arith.truncf %66 : vector<16x128xf32> to vector<16x128xbf16>
    %c7 = arith.constant 7 : index
    %c0_27 = arith.constant 0 : index
    %c0_28 = arith.constant 0 : index
    %68 = vector.load %arg8[%c7, %c0_27, %c0_28] : memref<8x16x128xbf16, #tpu.memory_space<vmem>>, vector<1x16x128xbf16>
    %69 = vector.shape_cast %68 : vector<1x16x128xbf16> to vector<16x128xbf16>
    %70 = vector.shape_cast %67 : vector<16x128xbf16> to vector<1x16x128xbf16>
    tpu.vector_store %arg8[%c7, %c0_27, %c0_28], %70 {strides = array<i32>} : memref<8x16x128xbf16, #tpu.memory_space<vmem>>, vector<1x16x128xbf16>,
    %c0_29 = arith.constant 0 : index
    %c0_30 = arith.constant 0 : index
    %c0_31 = arith.constant 0 : index
    %71 = vector.load %arg4[%c0_29, %c0_30, %c0_31] : memref<3x128x512xbf16, #tpu.memory_space<vmem>>, vector<1x128x512xbf16>
    %72 = vector.shape_cast %71 : vector<1x128x512xbf16> to vector<128x512xbf16>
    %c0_32 = arith.constant 0 : index
    %c0_33 = arith.constant 0 : index
    %c0_34 = arith.constant 0 : index
    %73 = vector.load %arg5[%c0_32, %c0_33, %c0_34] : memref<3x128x512xbf16, #tpu.memory_space<vmem>>, vector<1x128x512xbf16>
    %74 = vector.shape_cast %73 : vector<1x128x512xbf16> to vector<128x512xbf16>
    %c0_35 = arith.constant 0 : index
    %c0_36 = arith.constant 0 : index
    %c0_37 = arith.constant 0 : index
    %75 = vector.load %arg6[%c0_35, %c0_36, %c0_37] : memref<3x1x512xf32, #tpu.memory_space<vmem>>, vector<1x1x512xf32>
    %76 = vector.shape_cast %75 : vector<1x1x512xf32> to vector<1x512xf32>
    %c0_38 = arith.constant 0 : index
    %c0_39 = arith.constant 0 : index
    %c0_40 = arith.constant 0 : index
    %77 = vector.load %arg8[%c0_38, %c0_39, %c0_40] : memref<8x16x128xbf16, #tpu.memory_space<vmem>>, vector<8x16x128xbf16>
    %78 = vector.shape_cast %77 : vector<8x16x128xbf16> to vector<128x128xbf16>
    %cst_41 = arith.constant dense<0.000000e+00> : vector<128x512xf32>
    %79 = tpu.matmul %78, %72, %cst_41 {dimension_numbers = #tpu.dot_dimension_numbers<[1], [0], [0], [1], [0, 0, 1, 1], [], []>} : vector<128x128xbf16>, vector<128x512xbf16>, vector<128x512xf32> -> vector<128x512xf32>
    %80 = vector.broadcast %76 : vector<1x512xf32> to vector<128x512xf32>
    %81 = arith.addf %79, %80 : vector<128x512xf32>
    %82 = vector.shape_cast %81 : vector<128x512xf32> to vector<8x16x512xf32>
    %c0_42 = arith.constant 0 : index
    %c0_43 = arith.constant 0 : index
    %c0_44 = arith.constant 0 : index
    %83 = vector.load %arg9[%c0_42, %c0_43, %c0_44] : memref<8x16x512xf32, #tpu.memory_space<vmem>>, vector<8x16x512xf32>
    tpu.vector_store %arg9[%c0_42, %c0_43, %c0_44], %82 {strides = array<i32>} : memref<8x16x512xf32, #tpu.memory_space<vmem>>, vector<8x16x512xf32>,
    %cst_45 = arith.constant 0.000000e+00 : f32
    %84 = vector.broadcast %cst_45 : f32 to vector<16x128xf32>
    %cst_46 = arith.constant 0.000000e+00 : f32
    %85 = vector.broadcast %cst_46 : f32 to vector<16x128xf32>
    %c0_i32 = arith.constant 0 : i32
    %86 = arith.index_cast %c0_i32 : i32 to index
    %c0_47 = arith.constant 0 : index
    %c0_48 = arith.constant 0 : index
    %87 = vector.load %arg9[%86, %c0_47, %c0_48] : memref<8x16x512xf32, #tpu.memory_space<vmem>>, vector<1x16x512xf32>
    %88 = vector.shape_cast %87 : vector<1x16x512xf32> to vector<16x512xf32>
    %89 = arith.truncf %84 : vector<16x128xf32> to vector<16x128xbf16>
    %cst_49 = arith.constant dense<0.000000e+00> : vector<16x512xf32>
    %90 = tpu.matmul %89, %74, %cst_49 {dimension_numbers = #tpu.dot_dimension_numbers<[1], [0], [0], [1], [0, 0, 1, 1], [], []>} : vector<16x128xbf16>, vector<128x512xbf16>, vector<16x512xf32> -> vector<16x512xf32>
    %91 = arith.addf %88, %90 : vector<16x512xf32>
    %92 = vector.extract_strided_slice %91 {offsets = [0, 0], sizes = [16, 128], strides = [1, 1]} : vector<16x512xf32> to vector<16x128xf32>
    %cst_50 = arith.constant 5.000000e-01 : f32
    %93 = vector.broadcast %cst_50 : f32 to vector<16x128xf32>
    %94 = arith.mulf %93, %92 : vector<16x128xf32>
    %95 = math.tanh %94 : vector<16x128xf32>
    %cst_51 = arith.constant 1.000000e+00 : f32
    %96 = vector.broadcast %cst_51 : f32 to vector<16x128xf32>
    %97 = arith.addf %95, %96 : vector<16x128xf32>
    %cst_52 = arith.constant 5.000000e-01 : f32
    %98 = vector.broadcast %cst_52 : f32 to vector<16x128xf32>
    %99 = arith.mulf %98, %97 : vector<16x128xf32>
    %100 = vector.extract_strided_slice %91 {offsets = [0, 128], sizes = [16, 128], strides = [1, 1]} : vector<16x512xf32> to vector<16x128xf32>
    %cst_53 = arith.constant 5.000000e-01 : f32
    %101 = vector.broadcast %cst_53 : f32 to vector<16x128xf32>
    %102 = arith.mulf %101, %100 : vector<16x128xf32>
    %103 = math.tanh %102 : vector<16x128xf32>
    %cst_54 = arith.constant 1.000000e+00 : f32
    %104 = vector.broadcast %cst_54 : f32 to vector<16x128xf32>
    %105 = arith.addf %103, %104 : vector<16x128xf32>
    %cst_55 = arith.constant 5.000000e-01 : f32
    %106 = vector.broadcast %cst_55 : f32 to vector<16x128xf32>
    %107 = arith.mulf %106, %105 : vector<16x128xf32>
    %108 = vector.extract_strided_slice %91 {offsets = [0, 256], sizes = [16, 128], strides = [1, 1]} : vector<16x512xf32> to vector<16x128xf32>
    %109 = math.tanh %108 : vector<16x128xf32>
    %110 = vector.extract_strided_slice %91 {offsets = [0, 384], sizes = [16, 128], strides = [1, 1]} : vector<16x512xf32> to vector<16x128xf32>
    %cst_56 = arith.constant 5.000000e-01 : f32
    %111 = vector.broadcast %cst_56 : f32 to vector<16x128xf32>
    %112 = arith.mulf %111, %110 : vector<16x128xf32>
    %113 = math.tanh %112 : vector<16x128xf32>
    %cst_57 = arith.constant 1.000000e+00 : f32
    %114 = vector.broadcast %cst_57 : f32 to vector<16x128xf32>
    %115 = arith.addf %113, %114 : vector<16x128xf32>
    %cst_58 = arith.constant 5.000000e-01 : f32
    %116 = vector.broadcast %cst_58 : f32 to vector<16x128xf32>
    %117 = arith.mulf %116, %115 : vector<16x128xf32>
    %118 = arith.mulf %107, %85 : vector<16x128xf32>
    %119 = arith.mulf %99, %109 : vector<16x128xf32>
    %120 = arith.addf %118, %119 : vector<16x128xf32>
    %121 = math.tanh %120 : vector<16x128xf32>
    %122 = arith.mulf %117, %121 : vector<16x128xf32>
    %123 = arith.truncf %122 : vector<16x128xf32> to vector<16x128xbf16>
    %124 = arith.index_cast %c0_i32 : i32 to index
    %c0_59 = arith.constant 0 : index
    %c0_60 = arith.constant 0 : index
    %125 = vector.load %arg8[%124, %c0_59, %c0_60] : memref<8x16x128xbf16, #tpu.memory_space<vmem>>, vector<1x16x128xbf16>
    %126 = vector.shape_cast %125 : vector<1x16x128xbf16> to vector<16x128xbf16>
    %127 = vector.shape_cast %123 : vector<16x128xbf16> to vector<1x16x128xbf16>
    tpu.vector_store %arg8[%124, %c0_59, %c0_60], %127 {strides = array<i32>} : memref<8x16x128xbf16, #tpu.memory_space<vmem>>, vector<1x16x128xbf16>,
    %c1_i32 = arith.constant 1 : i32
    %128 = arith.index_cast %c1_i32 : i32 to index
    %c0_61 = arith.constant 0 : index
    %c0_62 = arith.constant 0 : index
    %129 = vector.load %arg9[%128, %c0_61, %c0_62] : memref<8x16x512xf32, #tpu.memory_space<vmem>>, vector<1x16x512xf32>
    %130 = vector.shape_cast %129 : vector<1x16x512xf32> to vector<16x512xf32>
    %131 = arith.truncf %122 : vector<16x128xf32> to vector<16x128xbf16>
    %cst_63 = arith.constant dense<0.000000e+00> : vector<16x512xf32>
    %132 = tpu.matmul %131, %74, %cst_63 {dimension_numbers = #tpu.dot_dimension_numbers<[1], [0], [0], [1], [0, 0, 1, 1], [], []>} : vector<16x128xbf16>, vector<128x512xbf16>, vector<16x512xf32> -> vector<16x512xf32>
    %133 = arith.addf %130, %132 : vector<16x512xf32>
    %134 = vector.extract_strided_slice %133 {offsets = [0, 0], sizes = [16, 128], strides = [1, 1]} : vector<16x512xf32> to vector<16x128xf32>
    %cst_64 = arith.constant 5.000000e-01 : f32
    %135 = vector.broadcast %cst_64 : f32 to vector<16x128xf32>
    %136 = arith.mulf %135, %134 : vector<16x128xf32>
    %137 = math.tanh %136 : vector<16x128xf32>
    %cst_65 = arith.constant 1.000000e+00 : f32
    %138 = vector.broadcast %cst_65 : f32 to vector<16x128xf32>
    %139 = arith.addf %137, %138 : vector<16x128xf32>
    %cst_66 = arith.constant 5.000000e-01 : f32
    %140 = vector.broadcast %cst_66 : f32 to vector<16x128xf32>
    %141 = arith.mulf %140, %139 : vector<16x128xf32>
    %142 = vector.extract_strided_slice %133 {offsets = [0, 128], sizes = [16, 128], strides = [1, 1]} : vector<16x512xf32> to vector<16x128xf32>
    %cst_67 = arith.constant 5.000000e-01 : f32
    %143 = vector.broadcast %cst_67 : f32 to vector<16x128xf32>
    %144 = arith.mulf %143, %142 : vector<16x128xf32>
    %145 = math.tanh %144 : vector<16x128xf32>
    %cst_68 = arith.constant 1.000000e+00 : f32
    %146 = vector.broadcast %cst_68 : f32 to vector<16x128xf32>
    %147 = arith.addf %145, %146 : vector<16x128xf32>
    %cst_69 = arith.constant 5.000000e-01 : f32
    %148 = vector.broadcast %cst_69 : f32 to vector<16x128xf32>
    %149 = arith.mulf %148, %147 : vector<16x128xf32>
    %150 = vector.extract_strided_slice %133 {offsets = [0, 256], sizes = [16, 128], strides = [1, 1]} : vector<16x512xf32> to vector<16x128xf32>
    %151 = math.tanh %150 : vector<16x128xf32>
    %152 = vector.extract_strided_slice %133 {offsets = [0, 384], sizes = [16, 128], strides = [1, 1]} : vector<16x512xf32> to vector<16x128xf32>
    %cst_70 = arith.constant 5.000000e-01 : f32
    %153 = vector.broadcast %cst_70 : f32 to vector<16x128xf32>
    %154 = arith.mulf %153, %152 : vector<16x128xf32>
    %155 = math.tanh %154 : vector<16x128xf32>
    %cst_71 = arith.constant 1.000000e+00 : f32
    %156 = vector.broadcast %cst_71 : f32 to vector<16x128xf32>
    %157 = arith.addf %155, %156 : vector<16x128xf32>
    %cst_72 = arith.constant 5.000000e-01 : f32
    %158 = vector.broadcast %cst_72 : f32 to vector<16x128xf32>
    %159 = arith.mulf %158, %157 : vector<16x128xf32>
    %160 = arith.mulf %149, %120 : vector<16x128xf32>
    %161 = arith.mulf %141, %151 : vector<16x128xf32>
    %162 = arith.addf %160, %161 : vector<16x128xf32>
    %163 = math.tanh %162 : vector<16x128xf32>
    %164 = arith.mulf %159, %163 : vector<16x128xf32>
    %165 = arith.truncf %164 : vector<16x128xf32> to vector<16x128xbf16>
    %166 = arith.index_cast %c1_i32 : i32 to index
    %c0_73 = arith.constant 0 : index
    %c0_74 = arith.constant 0 : index
    %167 = vector.load %arg8[%166, %c0_73, %c0_74] : memref<8x16x128xbf16, #tpu.memory_space<vmem>>, vector<1x16x128xbf16>
    %168 = vector.shape_cast %167 : vector<1x16x128xbf16> to vector<16x128xbf16>
    %169 = vector.shape_cast %165 : vector<16x128xbf16> to vector<1x16x128xbf16>
    tpu.vector_store %arg8[%166, %c0_73, %c0_74], %169 {strides = array<i32>} : memref<8x16x128xbf16, #tpu.memory_space<vmem>>, vector<1x16x128xbf16>,
    %c2_i32 = arith.constant 2 : i32
    %170 = arith.index_cast %c2_i32 : i32 to index
    %c0_75 = arith.constant 0 : index
    %c0_76 = arith.constant 0 : index
    %171 = vector.load %arg9[%170, %c0_75, %c0_76] : memref<8x16x512xf32, #tpu.memory_space<vmem>>, vector<1x16x512xf32>
    %172 = vector.shape_cast %171 : vector<1x16x512xf32> to vector<16x512xf32>
    %173 = arith.truncf %164 : vector<16x128xf32> to vector<16x128xbf16>
    %cst_77 = arith.constant dense<0.000000e+00> : vector<16x512xf32>
    %174 = tpu.matmul %173, %74, %cst_77 {dimension_numbers = #tpu.dot_dimension_numbers<[1], [0], [0], [1], [0, 0, 1, 1], [], []>} : vector<16x128xbf16>, vector<128x512xbf16>, vector<16x512xf32> -> vector<16x512xf32>
    %175 = arith.addf %172, %174 : vector<16x512xf32>
    %176 = vector.extract_strided_slice %175 {offsets = [0, 0], sizes = [16, 128], strides = [1, 1]} : vector<16x512xf32> to vector<16x128xf32>
    %cst_78 = arith.constant 5.000000e-01 : f32
    %177 = vector.broadcast %cst_78 : f32 to vector<16x128xf32>
    %178 = arith.mulf %177, %176 : vector<16x128xf32>
    %179 = math.tanh %178 : vector<16x128xf32>
    %cst_79 = arith.constant 1.000000e+00 : f32
    %180 = vector.broadcast %cst_79 : f32 to vector<16x128xf32>
    %181 = arith.addf %179, %180 : vector<16x128xf32>
    %cst_80 = arith.constant 5.000000e-01 : f32
    %182 = vector.broadcast %cst_80 : f32 to vector<16x128xf32>
    %183 = arith.mulf %182, %181 : vector<16x128xf32>
    %184 = vector.extract_strided_slice %175 {offsets = [0, 128], sizes = [16, 128], strides = [1, 1]} : vector<16x512xf32> to vector<16x128xf32>
    %cst_81 = arith.constant 5.000000e-01 : f32
    %185 = vector.broadcast %cst_81 : f32 to vector<16x128xf32>
    %186 = arith.mulf %185, %184 : vector<16x128xf32>
    %187 = math.tanh %186 : vector<16x128xf32>
    %cst_82 = arith.constant 1.000000e+00 : f32
    %188 = vector.broadcast %cst_82 : f32 to vector<16x128xf32>
    %189 = arith.addf %187, %188 : vector<16x128xf32>
    %cst_83 = arith.constant 5.000000e-01 : f32
    %190 = vector.broadcast %cst_83 : f32 to vector<16x128xf32>
    %191 = arith.mulf %190, %189 : vector<16x128xf32>
    %192 = vector.extract_strided_slice %175 {offsets = [0, 256], sizes = [16, 128], strides = [1, 1]} : vector<16x512xf32> to vector<16x128xf32>
    %193 = math.tanh %192 : vector<16x128xf32>
    %194 = vector.extract_strided_slice %175 {offsets = [0, 384], sizes = [16, 128], strides = [1, 1]} : vector<16x512xf32> to vector<16x128xf32>
    %cst_84 = arith.constant 5.000000e-01 : f32
    %195 = vector.broadcast %cst_84 : f32 to vector<16x128xf32>
    %196 = arith.mulf %195, %194 : vector<16x128xf32>
    %197 = math.tanh %196 : vector<16x128xf32>
    %cst_85 = arith.constant 1.000000e+00 : f32
    %198 = vector.broadcast %cst_85 : f32 to vector<16x128xf32>
    %199 = arith.addf %197, %198 : vector<16x128xf32>
    %cst_86 = arith.constant 5.000000e-01 : f32
    %200 = vector.broadcast %cst_86 : f32 to vector<16x128xf32>
    %201 = arith.mulf %200, %199 : vector<16x128xf32>
    %202 = arith.mulf %191, %162 : vector<16x128xf32>
    %203 = arith.mulf %183, %193 : vector<16x128xf32>
    %204 = arith.addf %202, %203 : vector<16x128xf32>
    %205 = math.tanh %204 : vector<16x128xf32>
    %206 = arith.mulf %201, %205 : vector<16x128xf32>
    %207 = arith.truncf %206 : vector<16x128xf32> to vector<16x128xbf16>
    %208 = arith.index_cast %c2_i32 : i32 to index
    %c0_87 = arith.constant 0 : index
    %c0_88 = arith.constant 0 : index
    %209 = vector.load %arg8[%208, %c0_87, %c0_88] : memref<8x16x128xbf16, #tpu.memory_space<vmem>>, vector<1x16x128xbf16>
    %210 = vector.shape_cast %209 : vector<1x16x128xbf16> to vector<16x128xbf16>
    %211 = vector.shape_cast %207 : vector<16x128xbf16> to vector<1x16x128xbf16>
    tpu.vector_store %arg8[%208, %c0_87, %c0_88], %211 {strides = array<i32>} : memref<8x16x128xbf16, #tpu.memory_space<vmem>>, vector<1x16x128xbf16>,
    %c3_i32 = arith.constant 3 : i32
    %212 = arith.index_cast %c3_i32 : i32 to index
    %c0_89 = arith.constant 0 : index
    %c0_90 = arith.constant 0 : index
    %213 = vector.load %arg9[%212, %c0_89, %c0_90] : memref<8x16x512xf32, #tpu.memory_space<vmem>>, vector<1x16x512xf32>
    %214 = vector.shape_cast %213 : vector<1x16x512xf32> to vector<16x512xf32>
    %215 = arith.truncf %206 : vector<16x128xf32> to vector<16x128xbf16>
    %cst_91 = arith.constant dense<0.000000e+00> : vector<16x512xf32>
    %216 = tpu.matmul %215, %74, %cst_91 {dimension_numbers = #tpu.dot_dimension_numbers<[1], [0], [0], [1], [0, 0, 1, 1], [], []>} : vector<16x128xbf16>, vector<128x512xbf16>, vector<16x512xf32> -> vector<16x512xf32>
    %217 = arith.addf %214, %216 : vector<16x512xf32>
    %218 = vector.extract_strided_slice %217 {offsets = [0, 0], sizes = [16, 128], strides = [1, 1]} : vector<16x512xf32> to vector<16x128xf32>
    %cst_92 = arith.constant 5.000000e-01 : f32
    %219 = vector.broadcast %cst_92 : f32 to vector<16x128xf32>
    %220 = arith.mulf %219, %218 : vector<16x128xf32>
    %221 = math.tanh %220 : vector<16x128xf32>
    %cst_93 = arith.constant 1.000000e+00 : f32
    %222 = vector.broadcast %cst_93 : f32 to vector<16x128xf32>
    %223 = arith.addf %221, %222 : vector<16x128xf32>
    %cst_94 = arith.constant 5.000000e-01 : f32
    %224 = vector.broadcast %cst_94 : f32 to vector<16x128xf32>
    %225 = arith.mulf %224, %223 : vector<16x128xf32>
    %226 = vector.extract_strided_slice %217 {offsets = [0, 128], sizes = [16, 128], strides = [1, 1]} : vector<16x512xf32> to vector<16x128xf32>
    %cst_95 = arith.constant 5.000000e-01 : f32
    %227 = vector.broadcast %cst_95 : f32 to vector<16x128xf32>
    %228 = arith.mulf %227, %226 : vector<16x128xf32>
    %229 = math.tanh %228 : vector<16x128xf32>
    %cst_96 = arith.constant 1.000000e+00 : f32
    %230 = vector.broadcast %cst_96 : f32 to vector<16x128xf32>
    %231 = arith.addf %229, %230 : vector<16x128xf32>
    %cst_97 = arith.constant 5.000000e-01 : f32
    %232 = vector.broadcast %cst_97 : f32 to vector<16x128xf32>
    %233 = arith.mulf %232, %231 : vector<16x128xf32>
    %234 = vector.extract_strided_slice %217 {offsets = [0, 256], sizes = [16, 128], strides = [1, 1]} : vector<16x512xf32> to vector<16x128xf32>
    %235 = math.tanh %234 : vector<16x128xf32>
    %236 = vector.extract_strided_slice %217 {offsets = [0, 384], sizes = [16, 128], strides = [1, 1]} : vector<16x512xf32> to vector<16x128xf32>
    %cst_98 = arith.constant 5.000000e-01 : f32
    %237 = vector.broadcast %cst_98 : f32 to vector<16x128xf32>
    %238 = arith.mulf %237, %236 : vector<16x128xf32>
    %239 = math.tanh %238 : vector<16x128xf32>
    %cst_99 = arith.constant 1.000000e+00 : f32
    %240 = vector.broadcast %cst_99 : f32 to vector<16x128xf32>
    %241 = arith.addf %239, %240 : vector<16x128xf32>
    %cst_100 = arith.constant 5.000000e-01 : f32
    %242 = vector.broadcast %cst_100 : f32 to vector<16x128xf32>
    %243 = arith.mulf %242, %241 : vector<16x128xf32>
    %244 = arith.mulf %233, %204 : vector<16x128xf32>
    %245 = arith.mulf %225, %235 : vector<16x128xf32>
    %246 = arith.addf %244, %245 : vector<16x128xf32>
    %247 = math.tanh %246 : vector<16x128xf32>
    %248 = arith.mulf %243, %247 : vector<16x128xf32>
    %249 = arith.truncf %248 : vector<16x128xf32> to vector<16x128xbf16>
    %250 = arith.index_cast %c3_i32 : i32 to index
    %c0_101 = arith.constant 0 : index
    %c0_102 = arith.constant 0 : index
    %251 = vector.load %arg8[%250, %c0_101, %c0_102] : memref<8x16x128xbf16, #tpu.memory_space<vmem>>, vector<1x16x128xbf16>
    %252 = vector.shape_cast %251 : vector<1x16x128xbf16> to vector<16x128xbf16>
    %253 = vector.shape_cast %249 : vector<16x128xbf16> to vector<1x16x128xbf16>
    tpu.vector_store %arg8[%250, %c0_101, %c0_102], %253 {strides = array<i32>} : memref<8x16x128xbf16, #tpu.memory_space<vmem>>, vector<1x16x128xbf16>,
    %c4_i32 = arith.constant 4 : i32
    %254 = arith.index_cast %c4_i32 : i32 to index
    %c0_103 = arith.constant 0 : index
    %c0_104 = arith.constant 0 : index
    %255 = vector.load %arg9[%254, %c0_103, %c0_104] : memref<8x16x512xf32, #tpu.memory_space<vmem>>, vector<1x16x512xf32>
    %256 = vector.shape_cast %255 : vector<1x16x512xf32> to vector<16x512xf32>
    %257 = arith.truncf %248 : vector<16x128xf32> to vector<16x128xbf16>
    %cst_105 = arith.constant dense<0.000000e+00> : vector<16x512xf32>
    %258 = tpu.matmul %257, %74, %cst_105 {dimension_numbers = #tpu.dot_dimension_numbers<[1], [0], [0], [1], [0, 0, 1, 1], [], []>} : vector<16x128xbf16>, vector<128x512xbf16>, vector<16x512xf32> -> vector<16x512xf32>
    %259 = arith.addf %256, %258 : vector<16x512xf32>
    %260 = vector.extract_strided_slice %259 {offsets = [0, 0], sizes = [16, 128], strides = [1, 1]} : vector<16x512xf32> to vector<16x128xf32>
    %cst_106 = arith.constant 5.000000e-01 : f32
    %261 = vector.broadcast %cst_106 : f32 to vector<16x128xf32>
    %262 = arith.mulf %261, %260 : vector<16x128xf32>
    %263 = math.tanh %262 : vector<16x128xf32>
    %cst_107 = arith.constant 1.000000e+00 : f32
    %264 = vector.broadcast %cst_107 : f32 to vector<16x128xf32>
    %265 = arith.addf %263, %264 : vector<16x128xf32>
    %cst_108 = arith.constant 5.000000e-01 : f32
    %266 = vector.broadcast %cst_108 : f32 to vector<16x128xf32>
    %267 = arith.mulf %266, %265 : vector<16x128xf32>
    %268 = vector.extract_strided_slice %259 {offsets = [0, 128], sizes = [16, 128], strides = [1, 1]} : vector<16x512xf32> to vector<16x128xf32>
    %cst_109 = arith.constant 5.000000e-01 : f32
    %269 = vector.broadcast %cst_109 : f32 to vector<16x128xf32>
    %270 = arith.mulf %269, %268 : vector<16x128xf32>
    %271 = math.tanh %270 : vector<16x128xf32>
    %cst_110 = arith.constant 1.000000e+00 : f32
    %272 = vector.broadcast %cst_110 : f32 to vector<16x128xf32>
    %273 = arith.addf %271, %272 : vector<16x128xf32>
    %cst_111 = arith.constant 5.000000e-01 : f32
    %274 = vector.broadcast %cst_111 : f32 to vector<16x128xf32>
    %275 = arith.mulf %274, %273 : vector<16x128xf32>
    %276 = vector.extract_strided_slice %259 {offsets = [0, 256], sizes = [16, 128], strides = [1, 1]} : vector<16x512xf32> to vector<16x128xf32>
    %277 = math.tanh %276 : vector<16x128xf32>
    %278 = vector.extract_strided_slice %259 {offsets = [0, 384], sizes = [16, 128], strides = [1, 1]} : vector<16x512xf32> to vector<16x128xf32>
    %cst_112 = arith.constant 5.000000e-01 : f32
    %279 = vector.broadcast %cst_112 : f32 to vector<16x128xf32>
    %280 = arith.mulf %279, %278 : vector<16x128xf32>
    %281 = math.tanh %280 : vector<16x128xf32>
    %cst_113 = arith.constant 1.000000e+00 : f32
    %282 = vector.broadcast %cst_113 : f32 to vector<16x128xf32>
    %283 = arith.addf %281, %282 : vector<16x128xf32>
    %cst_114 = arith.constant 5.000000e-01 : f32
    %284 = vector.broadcast %cst_114 : f32 to vector<16x128xf32>
    %285 = arith.mulf %284, %283 : vector<16x128xf32>
    %286 = arith.mulf %275, %246 : vector<16x128xf32>
    %287 = arith.mulf %267, %277 : vector<16x128xf32>
    %288 = arith.addf %286, %287 : vector<16x128xf32>
    %289 = math.tanh %288 : vector<16x128xf32>
    %290 = arith.mulf %285, %289 : vector<16x128xf32>
    %291 = arith.truncf %290 : vector<16x128xf32> to vector<16x128xbf16>
    %292 = arith.index_cast %c4_i32 : i32 to index
    %c0_115 = arith.constant 0 : index
    %c0_116 = arith.constant 0 : index
    %293 = vector.load %arg8[%292, %c0_115, %c0_116] : memref<8x16x128xbf16, #tpu.memory_space<vmem>>, vector<1x16x128xbf16>
    %294 = vector.shape_cast %293 : vector<1x16x128xbf16> to vector<16x128xbf16>
    %295 = vector.shape_cast %291 : vector<16x128xbf16> to vector<1x16x128xbf16>
    tpu.vector_store %arg8[%292, %c0_115, %c0_116], %295 {strides = array<i32>} : memref<8x16x128xbf16, #tpu.memory_space<vmem>>, vector<1x16x128xbf16>,
    %c5_i32 = arith.constant 5 : i32
    %296 = arith.index_cast %c5_i32 : i32 to index
    %c0_117 = arith.constant 0 : index
    %c0_118 = arith.constant 0 : index
    %297 = vector.load %arg9[%296, %c0_117, %c0_118] : memref<8x16x512xf32, #tpu.memory_space<vmem>>, vector<1x16x512xf32>
    %298 = vector.shape_cast %297 : vector<1x16x512xf32> to vector<16x512xf32>
    %299 = arith.truncf %290 : vector<16x128xf32> to vector<16x128xbf16>
    %cst_119 = arith.constant dense<0.000000e+00> : vector<16x512xf32>
    %300 = tpu.matmul %299, %74, %cst_119 {dimension_numbers = #tpu.dot_dimension_numbers<[1], [0], [0], [1], [0, 0, 1, 1], [], []>} : vector<16x128xbf16>, vector<128x512xbf16>, vector<16x512xf32> -> vector<16x512xf32>
    %301 = arith.addf %298, %300 : vector<16x512xf32>
    %302 = vector.extract_strided_slice %301 {offsets = [0, 0], sizes = [16, 128], strides = [1, 1]} : vector<16x512xf32> to vector<16x128xf32>
    %cst_120 = arith.constant 5.000000e-01 : f32
    %303 = vector.broadcast %cst_120 : f32 to vector<16x128xf32>
    %304 = arith.mulf %303, %302 : vector<16x128xf32>
    %305 = math.tanh %304 : vector<16x128xf32>
    %cst_121 = arith.constant 1.000000e+00 : f32
    %306 = vector.broadcast %cst_121 : f32 to vector<16x128xf32>
    %307 = arith.addf %305, %306 : vector<16x128xf32>
    %cst_122 = arith.constant 5.000000e-01 : f32
    %308 = vector.broadcast %cst_122 : f32 to vector<16x128xf32>
    %309 = arith.mulf %308, %307 : vector<16x128xf32>
    %310 = vector.extract_strided_slice %301 {offsets = [0, 128], sizes = [16, 128], strides = [1, 1]} : vector<16x512xf32> to vector<16x128xf32>
    %cst_123 = arith.constant 5.000000e-01 : f32
    %311 = vector.broadcast %cst_123 : f32 to vector<16x128xf32>
    %312 = arith.mulf %311, %310 : vector<16x128xf32>
    %313 = math.tanh %312 : vector<16x128xf32>
    %cst_124 = arith.constant 1.000000e+00 : f32
    %314 = vector.broadcast %cst_124 : f32 to vector<16x128xf32>
    %315 = arith.addf %313, %314 : vector<16x128xf32>
    %cst_125 = arith.constant 5.000000e-01 : f32
    %316 = vector.broadcast %cst_125 : f32 to vector<16x128xf32>
    %317 = arith.mulf %316, %315 : vector<16x128xf32>
    %318 = vector.extract_strided_slice %301 {offsets = [0, 256], sizes = [16, 128], strides = [1, 1]} : vector<16x512xf32> to vector<16x128xf32>
    %319 = math.tanh %318 : vector<16x128xf32>
    %320 = vector.extract_strided_slice %301 {offsets = [0, 384], sizes = [16, 128], strides = [1, 1]} : vector<16x512xf32> to vector<16x128xf32>
    %cst_126 = arith.constant 5.000000e-01 : f32
    %321 = vector.broadcast %cst_126 : f32 to vector<16x128xf32>
    %322 = arith.mulf %321, %320 : vector<16x128xf32>
    %323 = math.tanh %322 : vector<16x128xf32>
    %cst_127 = arith.constant 1.000000e+00 : f32
    %324 = vector.broadcast %cst_127 : f32 to vector<16x128xf32>
    %325 = arith.addf %323, %324 : vector<16x128xf32>
    %cst_128 = arith.constant 5.000000e-01 : f32
    %326 = vector.broadcast %cst_128 : f32 to vector<16x128xf32>
    %327 = arith.mulf %326, %325 : vector<16x128xf32>
    %328 = arith.mulf %317, %288 : vector<16x128xf32>
    %329 = arith.mulf %309, %319 : vector<16x128xf32>
    %330 = arith.addf %328, %329 : vector<16x128xf32>
    %331 = math.tanh %330 : vector<16x128xf32>
    %332 = arith.mulf %327, %331 : vector<16x128xf32>
    %333 = arith.truncf %332 : vector<16x128xf32> to vector<16x128xbf16>
    %334 = arith.index_cast %c5_i32 : i32 to index
    %c0_129 = arith.constant 0 : index
    %c0_130 = arith.constant 0 : index
    %335 = vector.load %arg8[%334, %c0_129, %c0_130] : memref<8x16x128xbf16, #tpu.memory_space<vmem>>, vector<1x16x128xbf16>
    %336 = vector.shape_cast %335 : vector<1x16x128xbf16> to vector<16x128xbf16>
    %337 = vector.shape_cast %333 : vector<16x128xbf16> to vector<1x16x128xbf16>
    tpu.vector_store %arg8[%334, %c0_129, %c0_130], %337 {strides = array<i32>} : memref<8x16x128xbf16, #tpu.memory_space<vmem>>, vector<1x16x128xbf16>,
    %c6_i32 = arith.constant 6 : i32
    %338 = arith.index_cast %c6_i32 : i32 to index
    %c0_131 = arith.constant 0 : index
    %c0_132 = arith.constant 0 : index
    %339 = vector.load %arg9[%338, %c0_131, %c0_132] : memref<8x16x512xf32, #tpu.memory_space<vmem>>, vector<1x16x512xf32>
    %340 = vector.shape_cast %339 : vector<1x16x512xf32> to vector<16x512xf32>
    %341 = arith.truncf %332 : vector<16x128xf32> to vector<16x128xbf16>
    %cst_133 = arith.constant dense<0.000000e+00> : vector<16x512xf32>
    %342 = tpu.matmul %341, %74, %cst_133 {dimension_numbers = #tpu.dot_dimension_numbers<[1], [0], [0], [1], [0, 0, 1, 1], [], []>} : vector<16x128xbf16>, vector<128x512xbf16>, vector<16x512xf32> -> vector<16x512xf32>
    %343 = arith.addf %340, %342 : vector<16x512xf32>
    %344 = vector.extract_strided_slice %343 {offsets = [0, 0], sizes = [16, 128], strides = [1, 1]} : vector<16x512xf32> to vector<16x128xf32>
    %cst_134 = arith.constant 5.000000e-01 : f32
    %345 = vector.broadcast %cst_134 : f32 to vector<16x128xf32>
    %346 = arith.mulf %345, %344 : vector<16x128xf32>
    %347 = math.tanh %346 : vector<16x128xf32>
    %cst_135 = arith.constant 1.000000e+00 : f32
    %348 = vector.broadcast %cst_135 : f32 to vector<16x128xf32>
    %349 = arith.addf %347, %348 : vector<16x128xf32>
    %cst_136 = arith.constant 5.000000e-01 : f32
    %350 = vector.broadcast %cst_136 : f32 to vector<16x128xf32>
    %351 = arith.mulf %350, %349 : vector<16x128xf32>
    %352 = vector.extract_strided_slice %343 {offsets = [0, 128], sizes = [16, 128], strides = [1, 1]} : vector<16x512xf32> to vector<16x128xf32>
    %cst_137 = arith.constant 5.000000e-01 : f32
    %353 = vector.broadcast %cst_137 : f32 to vector<16x128xf32>
    %354 = arith.mulf %353, %352 : vector<16x128xf32>
    %355 = math.tanh %354 : vector<16x128xf32>
    %cst_138 = arith.constant 1.000000e+00 : f32
    %356 = vector.broadcast %cst_138 : f32 to vector<16x128xf32>
    %357 = arith.addf %355, %356 : vector<16x128xf32>
    %cst_139 = arith.constant 5.000000e-01 : f32
    %358 = vector.broadcast %cst_139 : f32 to vector<16x128xf32>
    %359 = arith.mulf %358, %357 : vector<16x128xf32>
    %360 = vector.extract_strided_slice %343 {offsets = [0, 256], sizes = [16, 128], strides = [1, 1]} : vector<16x512xf32> to vector<16x128xf32>
    %361 = math.tanh %360 : vector<16x128xf32>
    %362 = vector.extract_strided_slice %343 {offsets = [0, 384], sizes = [16, 128], strides = [1, 1]} : vector<16x512xf32> to vector<16x128xf32>
    %cst_140 = arith.constant 5.000000e-01 : f32
    %363 = vector.broadcast %cst_140 : f32 to vector<16x128xf32>
    %364 = arith.mulf %363, %362 : vector<16x128xf32>
    %365 = math.tanh %364 : vector<16x128xf32>
    %cst_141 = arith.constant 1.000000e+00 : f32
    %366 = vector.broadcast %cst_141 : f32 to vector<16x128xf32>
    %367 = arith.addf %365, %366 : vector<16x128xf32>
    %cst_142 = arith.constant 5.000000e-01 : f32
    %368 = vector.broadcast %cst_142 : f32 to vector<16x128xf32>
    %369 = arith.mulf %368, %367 : vector<16x128xf32>
    %370 = arith.mulf %359, %330 : vector<16x128xf32>
    %371 = arith.mulf %351, %361 : vector<16x128xf32>
    %372 = arith.addf %370, %371 : vector<16x128xf32>
    %373 = math.tanh %372 : vector<16x128xf32>
    %374 = arith.mulf %369, %373 : vector<16x128xf32>
    %375 = arith.truncf %374 : vector<16x128xf32> to vector<16x128xbf16>
    %376 = arith.index_cast %c6_i32 : i32 to index
    %c0_143 = arith.constant 0 : index
    %c0_144 = arith.constant 0 : index
    %377 = vector.load %arg8[%376, %c0_143, %c0_144] : memref<8x16x128xbf16, #tpu.memory_space<vmem>>, vector<1x16x128xbf16>
    %378 = vector.shape_cast %377 : vector<1x16x128xbf16> to vector<16x128xbf16>
    %379 = vector.shape_cast %375 : vector<16x128xbf16> to vector<1x16x128xbf16>
    tpu.vector_store %arg8[%376, %c0_143, %c0_144], %379 {strides = array<i32>} : memref<8x16x128xbf16, #tpu.memory_space<vmem>>, vector<1x16x128xbf16>,
    %c7_i32 = arith.constant 7 : i32
    %380 = arith.index_cast %c7_i32 : i32 to index
    %c0_145 = arith.constant 0 : index
    %c0_146 = arith.constant 0 : index
    %381 = vector.load %arg9[%380, %c0_145, %c0_146] : memref<8x16x512xf32, #tpu.memory_space<vmem>>, vector<1x16x512xf32>
    %382 = vector.shape_cast %381 : vector<1x16x512xf32> to vector<16x512xf32>
    %383 = arith.truncf %374 : vector<16x128xf32> to vector<16x128xbf16>
    %cst_147 = arith.constant dense<0.000000e+00> : vector<16x512xf32>
    %384 = tpu.matmul %383, %74, %cst_147 {dimension_numbers = #tpu.dot_dimension_numbers<[1], [0], [0], [1], [0, 0, 1, 1], [], []>} : vector<16x128xbf16>, vector<128x512xbf16>, vector<16x512xf32> -> vector<16x512xf32>
    %385 = arith.addf %382, %384 : vector<16x512xf32>
    %386 = vector.extract_strided_slice %385 {offsets = [0, 0], sizes = [16, 128], strides = [1, 1]} : vector<16x512xf32> to vector<16x128xf32>
    %cst_148 = arith.constant 5.000000e-01 : f32
    %387 = vector.broadcast %cst_148 : f32 to vector<16x128xf32>
    %388 = arith.mulf %387, %386 : vector<16x128xf32>
    %389 = math.tanh %388 : vector<16x128xf32>
    %cst_149 = arith.constant 1.000000e+00 : f32
    %390 = vector.broadcast %cst_149 : f32 to vector<16x128xf32>
    %391 = arith.addf %389, %390 : vector<16x128xf32>
    %cst_150 = arith.constant 5.000000e-01 : f32
    %392 = vector.broadcast %cst_150 : f32 to vector<16x128xf32>
    %393 = arith.mulf %392, %391 : vector<16x128xf32>
    %394 = vector.extract_strided_slice %385 {offsets = [0, 128], sizes = [16, 128], strides = [1, 1]} : vector<16x512xf32> to vector<16x128xf32>
    %cst_151 = arith.constant 5.000000e-01 : f32
    %395 = vector.broadcast %cst_151 : f32 to vector<16x128xf32>
    %396 = arith.mulf %395, %394 : vector<16x128xf32>
    %397 = math.tanh %396 : vector<16x128xf32>
    %cst_152 = arith.constant 1.000000e+00 : f32
    %398 = vector.broadcast %cst_152 : f32 to vector<16x128xf32>
    %399 = arith.addf %397, %398 : vector<16x128xf32>
    %cst_153 = arith.constant 5.000000e-01 : f32
    %400 = vector.broadcast %cst_153 : f32 to vector<16x128xf32>
    %401 = arith.mulf %400, %399 : vector<16x128xf32>
    %402 = vector.extract_strided_slice %385 {offsets = [0, 256], sizes = [16, 128], strides = [1, 1]} : vector<16x512xf32> to vector<16x128xf32>
    %403 = math.tanh %402 : vector<16x128xf32>
    %404 = vector.extract_strided_slice %385 {offsets = [0, 384], sizes = [16, 128], strides = [1, 1]} : vector<16x512xf32> to vector<16x128xf32>
    %cst_154 = arith.constant 5.000000e-01 : f32
    %405 = vector.broadcast %cst_154 : f32 to vector<16x128xf32>
    %406 = arith.mulf %405, %404 : vector<16x128xf32>
    %407 = math.tanh %406 : vector<16x128xf32>
    %cst_155 = arith.constant 1.000000e+00 : f32
    %408 = vector.broadcast %cst_155 : f32 to vector<16x128xf32>
    %409 = arith.addf %407, %408 : vector<16x128xf32>
    %cst_156 = arith.constant 5.000000e-01 : f32
    %410 = vector.broadcast %cst_156 : f32 to vector<16x128xf32>
    %411 = arith.mulf %410, %409 : vector<16x128xf32>
    %412 = arith.mulf %401, %372 : vector<16x128xf32>
    %413 = arith.mulf %393, %403 : vector<16x128xf32>
    %414 = arith.addf %412, %413 : vector<16x128xf32>
    %415 = math.tanh %414 : vector<16x128xf32>
    %416 = arith.mulf %411, %415 : vector<16x128xf32>
    %417 = arith.truncf %416 : vector<16x128xf32> to vector<16x128xbf16>
    %418 = arith.index_cast %c7_i32 : i32 to index
    %c0_157 = arith.constant 0 : index
    %c0_158 = arith.constant 0 : index
    %419 = vector.load %arg8[%418, %c0_157, %c0_158] : memref<8x16x128xbf16, #tpu.memory_space<vmem>>, vector<1x16x128xbf16>
    %420 = vector.shape_cast %419 : vector<1x16x128xbf16> to vector<16x128xbf16>
    %421 = vector.shape_cast %417 : vector<16x128xbf16> to vector<1x16x128xbf16>
    tpu.vector_store %arg8[%418, %c0_157, %c0_158], %421 {strides = array<i32>} : memref<8x16x128xbf16, #tpu.memory_space<vmem>>, vector<1x16x128xbf16>,
    %c8_i32 = arith.constant 8 : i32
    %c1_159 = arith.constant 1 : index
    %c0_160 = arith.constant 0 : index
    %c0_161 = arith.constant 0 : index
    %422 = vector.load %arg4[%c1_159, %c0_160, %c0_161] : memref<3x128x512xbf16, #tpu.memory_space<vmem>>, vector<1x128x512xbf16>
    %423 = vector.shape_cast %422 : vector<1x128x512xbf16> to vector<128x512xbf16>
    %c1_162 = arith.constant 1 : index
    %c0_163 = arith.constant 0 : index
    %c0_164 = arith.constant 0 : index
    %424 = vector.load %arg5[%c1_162, %c0_163, %c0_164] : memref<3x128x512xbf16, #tpu.memory_space<vmem>>, vector<1x128x512xbf16>
    %425 = vector.shape_cast %424 : vector<1x128x512xbf16> to vector<128x512xbf16>
    %c1_165 = arith.constant 1 : index
    %c0_166 = arith.constant 0 : index
    %c0_167 = arith.constant 0 : index
    %426 = vector.load %arg6[%c1_165, %c0_166, %c0_167] : memref<3x1x512xf32, #tpu.memory_space<vmem>>, vector<1x1x512xf32>
    %427 = vector.shape_cast %426 : vector<1x1x512xf32> to vector<1x512xf32>
    %c0_168 = arith.constant 0 : index
    %c0_169 = arith.constant 0 : index
    %c0_170 = arith.constant 0 : index
    %428 = vector.load %arg8[%c0_168, %c0_169, %c0_170] : memref<8x16x128xbf16, #tpu.memory_space<vmem>>, vector<8x16x128xbf16>
    %429 = vector.shape_cast %428 : vector<8x16x128xbf16> to vector<128x128xbf16>
    %cst_171 = arith.constant dense<0.000000e+00> : vector<128x512xf32>
    %430 = tpu.matmul %429, %423, %cst_171 {dimension_numbers = #tpu.dot_dimension_numbers<[1], [0], [0], [1], [0, 0, 1, 1], [], []>} : vector<128x128xbf16>, vector<128x512xbf16>, vector<128x512xf32> -> vector<128x512xf32>
    %431 = vector.broadcast %427 : vector<1x512xf32> to vector<128x512xf32>
    %432 = arith.addf %430, %431 : vector<128x512xf32>
    %433 = vector.shape_cast %432 : vector<128x512xf32> to vector<8x16x512xf32>
    %c0_172 = arith.constant 0 : index
    %c0_173 = arith.constant 0 : index
    %c0_174 = arith.constant 0 : index
    %434 = vector.load %arg9[%c0_172, %c0_173, %c0_174] : memref<8x16x512xf32, #tpu.memory_space<vmem>>, vector<8x16x512xf32>
    tpu.vector_store %arg9[%c0_172, %c0_173, %c0_174], %433 {strides = array<i32>} : memref<8x16x512xf32, #tpu.memory_space<vmem>>, vector<8x16x512xf32>,
    %cst_175 = arith.constant 0.000000e+00 : f32
    %435 = vector.broadcast %cst_175 : f32 to vector<16x128xf32>
    %cst_176 = arith.constant 0.000000e+00 : f32
    %436 = vector.broadcast %cst_176 : f32 to vector<16x128xf32>
    %c0_i32_177 = arith.constant 0 : i32
    %437 = arith.index_cast %c0_i32_177 : i32 to index
    %c0_178 = arith.constant 0 : index
    %c0_179 = arith.constant 0 : index
    %438 = vector.load %arg9[%437, %c0_178, %c0_179] : memref<8x16x512xf32, #tpu.memory_space<vmem>>, vector<1x16x512xf32>
    %439 = vector.shape_cast %438 : vector<1x16x512xf32> to vector<16x512xf32>
    %440 = arith.truncf %435 : vector<16x128xf32> to vector<16x128xbf16>
    %cst_180 = arith.constant dense<0.000000e+00> : vector<16x512xf32>
    %441 = tpu.matmul %440, %425, %cst_180 {dimension_numbers = #tpu.dot_dimension_numbers<[1], [0], [0], [1], [0, 0, 1, 1], [], []>} : vector<16x128xbf16>, vector<128x512xbf16>, vector<16x512xf32> -> vector<16x512xf32>
    %442 = arith.addf %439, %441 : vector<16x512xf32>
    %443 = vector.extract_strided_slice %442 {offsets = [0, 0], sizes = [16, 128], strides = [1, 1]} : vector<16x512xf32> to vector<16x128xf32>
    %cst_181 = arith.constant 5.000000e-01 : f32
    %444 = vector.broadcast %cst_181 : f32 to vector<16x128xf32>
    %445 = arith.mulf %444, %443 : vector<16x128xf32>
    %446 = math.tanh %445 : vector<16x128xf32>
    %cst_182 = arith.constant 1.000000e+00 : f32
    %447 = vector.broadcast %cst_182 : f32 to vector<16x128xf32>
    %448 = arith.addf %446, %447 : vector<16x128xf32>
    %cst_183 = arith.constant 5.000000e-01 : f32
    %449 = vector.broadcast %cst_183 : f32 to vector<16x128xf32>
    %450 = arith.mulf %449, %448 : vector<16x128xf32>
    %451 = vector.extract_strided_slice %442 {offsets = [0, 128], sizes = [16, 128], strides = [1, 1]} : vector<16x512xf32> to vector<16x128xf32>
    %cst_184 = arith.constant 5.000000e-01 : f32
    %452 = vector.broadcast %cst_184 : f32 to vector<16x128xf32>
    %453 = arith.mulf %452, %451 : vector<16x128xf32>
    %454 = math.tanh %453 : vector<16x128xf32>
    %cst_185 = arith.constant 1.000000e+00 : f32
    %455 = vector.broadcast %cst_185 : f32 to vector<16x128xf32>
    %456 = arith.addf %454, %455 : vector<16x128xf32>
    %cst_186 = arith.constant 5.000000e-01 : f32
    %457 = vector.broadcast %cst_186 : f32 to vector<16x128xf32>
    %458 = arith.mulf %457, %456 : vector<16x128xf32>
    %459 = vector.extract_strided_slice %442 {offsets = [0, 256], sizes = [16, 128], strides = [1, 1]} : vector<16x512xf32> to vector<16x128xf32>
    %460 = math.tanh %459 : vector<16x128xf32>
    %461 = vector.extract_strided_slice %442 {offsets = [0, 384], sizes = [16, 128], strides = [1, 1]} : vector<16x512xf32> to vector<16x128xf32>
    %cst_187 = arith.constant 5.000000e-01 : f32
    %462 = vector.broadcast %cst_187 : f32 to vector<16x128xf32>
    %463 = arith.mulf %462, %461 : vector<16x128xf32>
    %464 = math.tanh %463 : vector<16x128xf32>
    %cst_188 = arith.constant 1.000000e+00 : f32
    %465 = vector.broadcast %cst_188 : f32 to vector<16x128xf32>
    %466 = arith.addf %464, %465 : vector<16x128xf32>
    %cst_189 = arith.constant 5.000000e-01 : f32
    %467 = vector.broadcast %cst_189 : f32 to vector<16x128xf32>
    %468 = arith.mulf %467, %466 : vector<16x128xf32>
    %469 = arith.mulf %458, %436 : vector<16x128xf32>
    %470 = arith.mulf %450, %460 : vector<16x128xf32>
    %471 = arith.addf %469, %470 : vector<16x128xf32>
    %472 = math.tanh %471 : vector<16x128xf32>
    %473 = arith.mulf %468, %472 : vector<16x128xf32>
    %474 = arith.truncf %473 : vector<16x128xf32> to vector<16x128xbf16>
    %475 = arith.index_cast %c0_i32_177 : i32 to index
    %c0_190 = arith.constant 0 : index
    %c0_191 = arith.constant 0 : index
    %476 = vector.load %arg8[%475, %c0_190, %c0_191] : memref<8x16x128xbf16, #tpu.memory_space<vmem>>, vector<1x16x128xbf16>
    %477 = vector.shape_cast %476 : vector<1x16x128xbf16> to vector<16x128xbf16>
    %478 = vector.shape_cast %474 : vector<16x128xbf16> to vector<1x16x128xbf16>
    tpu.vector_store %arg8[%475, %c0_190, %c0_191], %478 {strides = array<i32>} : memref<8x16x128xbf16, #tpu.memory_space<vmem>>, vector<1x16x128xbf16>,
    %c1_i32_192 = arith.constant 1 : i32
    %479 = arith.index_cast %c1_i32_192 : i32 to index
    %c0_193 = arith.constant 0 : index
    %c0_194 = arith.constant 0 : index
    %480 = vector.load %arg9[%479, %c0_193, %c0_194] : memref<8x16x512xf32, #tpu.memory_space<vmem>>, vector<1x16x512xf32>
    %481 = vector.shape_cast %480 : vector<1x16x512xf32> to vector<16x512xf32>
    %482 = arith.truncf %473 : vector<16x128xf32> to vector<16x128xbf16>
    %cst_195 = arith.constant dense<0.000000e+00> : vector<16x512xf32>
    %483 = tpu.matmul %482, %425, %cst_195 {dimension_numbers = #tpu.dot_dimension_numbers<[1], [0], [0], [1], [0, 0, 1, 1], [], []>} : vector<16x128xbf16>, vector<128x512xbf16>, vector<16x512xf32> -> vector<16x512xf32>
    %484 = arith.addf %481, %483 : vector<16x512xf32>
    %485 = vector.extract_strided_slice %484 {offsets = [0, 0], sizes = [16, 128], strides = [1, 1]} : vector<16x512xf32> to vector<16x128xf32>
    %cst_196 = arith.constant 5.000000e-01 : f32
    %486 = vector.broadcast %cst_196 : f32 to vector<16x128xf32>
    %487 = arith.mulf %486, %485 : vector<16x128xf32>
    %488 = math.tanh %487 : vector<16x128xf32>
    %cst_197 = arith.constant 1.000000e+00 : f32
    %489 = vector.broadcast %cst_197 : f32 to vector<16x128xf32>
    %490 = arith.addf %488, %489 : vector<16x128xf32>
    %cst_198 = arith.constant 5.000000e-01 : f32
    %491 = vector.broadcast %cst_198 : f32 to vector<16x128xf32>
    %492 = arith.mulf %491, %490 : vector<16x128xf32>
    %493 = vector.extract_strided_slice %484 {offsets = [0, 128], sizes = [16, 128], strides = [1, 1]} : vector<16x512xf32> to vector<16x128xf32>
    %cst_199 = arith.constant 5.000000e-01 : f32
    %494 = vector.broadcast %cst_199 : f32 to vector<16x128xf32>
    %495 = arith.mulf %494, %493 : vector<16x128xf32>
    %496 = math.tanh %495 : vector<16x128xf32>
    %cst_200 = arith.constant 1.000000e+00 : f32
    %497 = vector.broadcast %cst_200 : f32 to vector<16x128xf32>
    %498 = arith.addf %496, %497 : vector<16x128xf32>
    %cst_201 = arith.constant 5.000000e-01 : f32
    %499 = vector.broadcast %cst_201 : f32 to vector<16x128xf32>
    %500 = arith.mulf %499, %498 : vector<16x128xf32>
    %501 = vector.extract_strided_slice %484 {offsets = [0, 256], sizes = [16, 128], strides = [1, 1]} : vector<16x512xf32> to vector<16x128xf32>
    %502 = math.tanh %501 : vector<16x128xf32>
    %503 = vector.extract_strided_slice %484 {offsets = [0, 384], sizes = [16, 128], strides = [1, 1]} : vector<16x512xf32> to vector<16x128xf32>
    %cst_202 = arith.constant 5.000000e-01 : f32
    %504 = vector.broadcast %cst_202 : f32 to vector<16x128xf32>
    %505 = arith.mulf %504, %503 : vector<16x128xf32>
    %506 = math.tanh %505 : vector<16x128xf32>
    %cst_203 = arith.constant 1.000000e+00 : f32
    %507 = vector.broadcast %cst_203 : f32 to vector<16x128xf32>
    %508 = arith.addf %506, %507 : vector<16x128xf32>
    %cst_204 = arith.constant 5.000000e-01 : f32
    %509 = vector.broadcast %cst_204 : f32 to vector<16x128xf32>
    %510 = arith.mulf %509, %508 : vector<16x128xf32>
    %511 = arith.mulf %500, %471 : vector<16x128xf32>
    %512 = arith.mulf %492, %502 : vector<16x128xf32>
    %513 = arith.addf %511, %512 : vector<16x128xf32>
    %514 = math.tanh %513 : vector<16x128xf32>
    %515 = arith.mulf %510, %514 : vector<16x128xf32>
    %516 = arith.truncf %515 : vector<16x128xf32> to vector<16x128xbf16>
    %517 = arith.index_cast %c1_i32_192 : i32 to index
    %c0_205 = arith.constant 0 : index
    %c0_206 = arith.constant 0 : index
    %518 = vector.load %arg8[%517, %c0_205, %c0_206] : memref<8x16x128xbf16, #tpu.memory_space<vmem>>, vector<1x16x128xbf16>
    %519 = vector.shape_cast %518 : vector<1x16x128xbf16> to vector<16x128xbf16>
    %520 = vector.shape_cast %516 : vector<16x128xbf16> to vector<1x16x128xbf16>
    tpu.vector_store %arg8[%517, %c0_205, %c0_206], %520 {strides = array<i32>} : memref<8x16x128xbf16, #tpu.memory_space<vmem>>, vector<1x16x128xbf16>,
    %c2_i32_207 = arith.constant 2 : i32
    %521 = arith.index_cast %c2_i32_207 : i32 to index
    %c0_208 = arith.constant 0 : index
    %c0_209 = arith.constant 0 : index
    %522 = vector.load %arg9[%521, %c0_208, %c0_209] : memref<8x16x512xf32, #tpu.memory_space<vmem>>, vector<1x16x512xf32>
    %523 = vector.shape_cast %522 : vector<1x16x512xf32> to vector<16x512xf32>
    %524 = arith.truncf %515 : vector<16x128xf32> to vector<16x128xbf16>
    %cst_210 = arith.constant dense<0.000000e+00> : vector<16x512xf32>
    %525 = tpu.matmul %524, %425, %cst_210 {dimension_numbers = #tpu.dot_dimension_numbers<[1], [0], [0], [1], [0, 0, 1, 1], [], []>} : vector<16x128xbf16>, vector<128x512xbf16>, vector<16x512xf32> -> vector<16x512xf32>
    %526 = arith.addf %523, %525 : vector<16x512xf32>
    %527 = vector.extract_strided_slice %526 {offsets = [0, 0], sizes = [16, 128], strides = [1, 1]} : vector<16x512xf32> to vector<16x128xf32>
    %cst_211 = arith.constant 5.000000e-01 : f32
    %528 = vector.broadcast %cst_211 : f32 to vector<16x128xf32>
    %529 = arith.mulf %528, %527 : vector<16x128xf32>
    %530 = math.tanh %529 : vector<16x128xf32>
    %cst_212 = arith.constant 1.000000e+00 : f32
    %531 = vector.broadcast %cst_212 : f32 to vector<16x128xf32>
    %532 = arith.addf %530, %531 : vector<16x128xf32>
    %cst_213 = arith.constant 5.000000e-01 : f32
    %533 = vector.broadcast %cst_213 : f32 to vector<16x128xf32>
    %534 = arith.mulf %533, %532 : vector<16x128xf32>
    %535 = vector.extract_strided_slice %526 {offsets = [0, 128], sizes = [16, 128], strides = [1, 1]} : vector<16x512xf32> to vector<16x128xf32>
    %cst_214 = arith.constant 5.000000e-01 : f32
    %536 = vector.broadcast %cst_214 : f32 to vector<16x128xf32>
    %537 = arith.mulf %536, %535 : vector<16x128xf32>
    %538 = math.tanh %537 : vector<16x128xf32>
    %cst_215 = arith.constant 1.000000e+00 : f32
    %539 = vector.broadcast %cst_215 : f32 to vector<16x128xf32>
    %540 = arith.addf %538, %539 : vector<16x128xf32>
    %cst_216 = arith.constant 5.000000e-01 : f32
    %541 = vector.broadcast %cst_216 : f32 to vector<16x128xf32>
    %542 = arith.mulf %541, %540 : vector<16x128xf32>
    %543 = vector.extract_strided_slice %526 {offsets = [0, 256], sizes = [16, 128], strides = [1, 1]} : vector<16x512xf32> to vector<16x128xf32>
    %544 = math.tanh %543 : vector<16x128xf32>
    %545 = vector.extract_strided_slice %526 {offsets = [0, 384], sizes = [16, 128], strides = [1, 1]} : vector<16x512xf32> to vector<16x128xf32>
    %cst_217 = arith.constant 5.000000e-01 : f32
    %546 = vector.broadcast %cst_217 : f32 to vector<16x128xf32>
    %547 = arith.mulf %546, %545 : vector<16x128xf32>
    %548 = math.tanh %547 : vector<16x128xf32>
    %cst_218 = arith.constant 1.000000e+00 : f32
    %549 = vector.broadcast %cst_218 : f32 to vector<16x128xf32>
    %550 = arith.addf %548, %549 : vector<16x128xf32>
    %cst_219 = arith.constant 5.000000e-01 : f32
    %551 = vector.broadcast %cst_219 : f32 to vector<16x128xf32>
    %552 = arith.mulf %551, %550 : vector<16x128xf32>
    %553 = arith.mulf %542, %513 : vector<16x128xf32>
    %554 = arith.mulf %534, %544 : vector<16x128xf32>
    %555 = arith.addf %553, %554 : vector<16x128xf32>
    %556 = math.tanh %555 : vector<16x128xf32>
    %557 = arith.mulf %552, %556 : vector<16x128xf32>
    %558 = arith.truncf %557 : vector<16x128xf32> to vector<16x128xbf16>
    %559 = arith.index_cast %c2_i32_207 : i32 to index
    %c0_220 = arith.constant 0 : index
    %c0_221 = arith.constant 0 : index
    %560 = vector.load %arg8[%559, %c0_220, %c0_221] : memref<8x16x128xbf16, #tpu.memory_space<vmem>>, vector<1x16x128xbf16>
    %561 = vector.shape_cast %560 : vector<1x16x128xbf16> to vector<16x128xbf16>
    %562 = vector.shape_cast %558 : vector<16x128xbf16> to vector<1x16x128xbf16>
    tpu.vector_store %arg8[%559, %c0_220, %c0_221], %562 {strides = array<i32>} : memref<8x16x128xbf16, #tpu.memory_space<vmem>>, vector<1x16x128xbf16>,
    %c3_i32_222 = arith.constant 3 : i32
    %563 = arith.index_cast %c3_i32_222 : i32 to index
    %c0_223 = arith.constant 0 : index
    %c0_224 = arith.constant 0 : index
    %564 = vector.load %arg9[%563, %c0_223, %c0_224] : memref<8x16x512xf32, #tpu.memory_space<vmem>>, vector<1x16x512xf32>
    %565 = vector.shape_cast %564 : vector<1x16x512xf32> to vector<16x512xf32>
    %566 = arith.truncf %557 : vector<16x128xf32> to vector<16x128xbf16>
    %cst_225 = arith.constant dense<0.000000e+00> : vector<16x512xf32>
    %567 = tpu.matmul %566, %425, %cst_225 {dimension_numbers = #tpu.dot_dimension_numbers<[1], [0], [0], [1], [0, 0, 1, 1], [], []>} : vector<16x128xbf16>, vector<128x512xbf16>, vector<16x512xf32> -> vector<16x512xf32>
    %568 = arith.addf %565, %567 : vector<16x512xf32>
    %569 = vector.extract_strided_slice %568 {offsets = [0, 0], sizes = [16, 128], strides = [1, 1]} : vector<16x512xf32> to vector<16x128xf32>
    %cst_226 = arith.constant 5.000000e-01 : f32
    %570 = vector.broadcast %cst_226 : f32 to vector<16x128xf32>
    %571 = arith.mulf %570, %569 : vector<16x128xf32>
    %572 = math.tanh %571 : vector<16x128xf32>
    %cst_227 = arith.constant 1.000000e+00 : f32
    %573 = vector.broadcast %cst_227 : f32 to vector<16x128xf32>
    %574 = arith.addf %572, %573 : vector<16x128xf32>
    %cst_228 = arith.constant 5.000000e-01 : f32
    %575 = vector.broadcast %cst_228 : f32 to vector<16x128xf32>
    %576 = arith.mulf %575, %574 : vector<16x128xf32>
    %577 = vector.extract_strided_slice %568 {offsets = [0, 128], sizes = [16, 128], strides = [1, 1]} : vector<16x512xf32> to vector<16x128xf32>
    %cst_229 = arith.constant 5.000000e-01 : f32
    %578 = vector.broadcast %cst_229 : f32 to vector<16x128xf32>
    %579 = arith.mulf %578, %577 : vector<16x128xf32>
    %580 = math.tanh %579 : vector<16x128xf32>
    %cst_230 = arith.constant 1.000000e+00 : f32
    %581 = vector.broadcast %cst_230 : f32 to vector<16x128xf32>
    %582 = arith.addf %580, %581 : vector<16x128xf32>
    %cst_231 = arith.constant 5.000000e-01 : f32
    %583 = vector.broadcast %cst_231 : f32 to vector<16x128xf32>
    %584 = arith.mulf %583, %582 : vector<16x128xf32>
    %585 = vector.extract_strided_slice %568 {offsets = [0, 256], sizes = [16, 128], strides = [1, 1]} : vector<16x512xf32> to vector<16x128xf32>
    %586 = math.tanh %585 : vector<16x128xf32>
    %587 = vector.extract_strided_slice %568 {offsets = [0, 384], sizes = [16, 128], strides = [1, 1]} : vector<16x512xf32> to vector<16x128xf32>
    %cst_232 = arith.constant 5.000000e-01 : f32
    %588 = vector.broadcast %cst_232 : f32 to vector<16x128xf32>
    %589 = arith.mulf %588, %587 : vector<16x128xf32>
    %590 = math.tanh %589 : vector<16x128xf32>
    %cst_233 = arith.constant 1.000000e+00 : f32
    %591 = vector.broadcast %cst_233 : f32 to vector<16x128xf32>
    %592 = arith.addf %590, %591 : vector<16x128xf32>
    %cst_234 = arith.constant 5.000000e-01 : f32
    %593 = vector.broadcast %cst_234 : f32 to vector<16x128xf32>
    %594 = arith.mulf %593, %592 : vector<16x128xf32>
    %595 = arith.mulf %584, %555 : vector<16x128xf32>
    %596 = arith.mulf %576, %586 : vector<16x128xf32>
    %597 = arith.addf %595, %596 : vector<16x128xf32>
    %598 = math.tanh %597 : vector<16x128xf32>
    %599 = arith.mulf %594, %598 : vector<16x128xf32>
    %600 = arith.truncf %599 : vector<16x128xf32> to vector<16x128xbf16>
    %601 = arith.index_cast %c3_i32_222 : i32 to index
    %c0_235 = arith.constant 0 : index
    %c0_236 = arith.constant 0 : index
    %602 = vector.load %arg8[%601, %c0_235, %c0_236] : memref<8x16x128xbf16, #tpu.memory_space<vmem>>, vector<1x16x128xbf16>
    %603 = vector.shape_cast %602 : vector<1x16x128xbf16> to vector<16x128xbf16>
    %604 = vector.shape_cast %600 : vector<16x128xbf16> to vector<1x16x128xbf16>
    tpu.vector_store %arg8[%601, %c0_235, %c0_236], %604 {strides = array<i32>} : memref<8x16x128xbf16, #tpu.memory_space<vmem>>, vector<1x16x128xbf16>,
    %c4_i32_237 = arith.constant 4 : i32
    %605 = arith.index_cast %c4_i32_237 : i32 to index
    %c0_238 = arith.constant 0 : index
    %c0_239 = arith.constant 0 : index
    %606 = vector.load %arg9[%605, %c0_238, %c0_239] : memref<8x16x512xf32, #tpu.memory_space<vmem>>, vector<1x16x512xf32>
    %607 = vector.shape_cast %606 : vector<1x16x512xf32> to vector<16x512xf32>
    %608 = arith.truncf %599 : vector<16x128xf32> to vector<16x128xbf16>
    %cst_240 = arith.constant dense<0.000000e+00> : vector<16x512xf32>
    %609 = tpu.matmul %608, %425, %cst_240 {dimension_numbers = #tpu.dot_dimension_numbers<[1], [0], [0], [1], [0, 0, 1, 1], [], []>} : vector<16x128xbf16>, vector<128x512xbf16>, vector<16x512xf32> -> vector<16x512xf32>
    %610 = arith.addf %607, %609 : vector<16x512xf32>
    %611 = vector.extract_strided_slice %610 {offsets = [0, 0], sizes = [16, 128], strides = [1, 1]} : vector<16x512xf32> to vector<16x128xf32>
    %cst_241 = arith.constant 5.000000e-01 : f32
    %612 = vector.broadcast %cst_241 : f32 to vector<16x128xf32>
    %613 = arith.mulf %612, %611 : vector<16x128xf32>
    %614 = math.tanh %613 : vector<16x128xf32>
    %cst_242 = arith.constant 1.000000e+00 : f32
    %615 = vector.broadcast %cst_242 : f32 to vector<16x128xf32>
    %616 = arith.addf %614, %615 : vector<16x128xf32>
    %cst_243 = arith.constant 5.000000e-01 : f32
    %617 = vector.broadcast %cst_243 : f32 to vector<16x128xf32>
    %618 = arith.mulf %617, %616 : vector<16x128xf32>
    %619 = vector.extract_strided_slice %610 {offsets = [0, 128], sizes = [16, 128], strides = [1, 1]} : vector<16x512xf32> to vector<16x128xf32>
    %cst_244 = arith.constant 5.000000e-01 : f32
    %620 = vector.broadcast %cst_244 : f32 to vector<16x128xf32>
    %621 = arith.mulf %620, %619 : vector<16x128xf32>
    %622 = math.tanh %621 : vector<16x128xf32>
    %cst_245 = arith.constant 1.000000e+00 : f32
    %623 = vector.broadcast %cst_245 : f32 to vector<16x128xf32>
    %624 = arith.addf %622, %623 : vector<16x128xf32>
    %cst_246 = arith.constant 5.000000e-01 : f32
    %625 = vector.broadcast %cst_246 : f32 to vector<16x128xf32>
    %626 = arith.mulf %625, %624 : vector<16x128xf32>
    %627 = vector.extract_strided_slice %610 {offsets = [0, 256], sizes = [16, 128], strides = [1, 1]} : vector<16x512xf32> to vector<16x128xf32>
    %628 = math.tanh %627 : vector<16x128xf32>
    %629 = vector.extract_strided_slice %610 {offsets = [0, 384], sizes = [16, 128], strides = [1, 1]} : vector<16x512xf32> to vector<16x128xf32>
    %cst_247 = arith.constant 5.000000e-01 : f32
    %630 = vector.broadcast %cst_247 : f32 to vector<16x128xf32>
    %631 = arith.mulf %630, %629 : vector<16x128xf32>
    %632 = math.tanh %631 : vector<16x128xf32>
    %cst_248 = arith.constant 1.000000e+00 : f32
    %633 = vector.broadcast %cst_248 : f32 to vector<16x128xf32>
    %634 = arith.addf %632, %633 : vector<16x128xf32>
    %cst_249 = arith.constant 5.000000e-01 : f32
    %635 = vector.broadcast %cst_249 : f32 to vector<16x128xf32>
    %636 = arith.mulf %635, %634 : vector<16x128xf32>
    %637 = arith.mulf %626, %597 : vector<16x128xf32>
    %638 = arith.mulf %618, %628 : vector<16x128xf32>
    %639 = arith.addf %637, %638 : vector<16x128xf32>
    %640 = math.tanh %639 : vector<16x128xf32>
    %641 = arith.mulf %636, %640 : vector<16x128xf32>
    %642 = arith.truncf %641 : vector<16x128xf32> to vector<16x128xbf16>
    %643 = arith.index_cast %c4_i32_237 : i32 to index
    %c0_250 = arith.constant 0 : index
    %c0_251 = arith.constant 0 : index
    %644 = vector.load %arg8[%643, %c0_250, %c0_251] : memref<8x16x128xbf16, #tpu.memory_space<vmem>>, vector<1x16x128xbf16>
    %645 = vector.shape_cast %644 : vector<1x16x128xbf16> to vector<16x128xbf16>
    %646 = vector.shape_cast %642 : vector<16x128xbf16> to vector<1x16x128xbf16>
    tpu.vector_store %arg8[%643, %c0_250, %c0_251], %646 {strides = array<i32>} : memref<8x16x128xbf16, #tpu.memory_space<vmem>>, vector<1x16x128xbf16>,
    %c5_i32_252 = arith.constant 5 : i32
    %647 = arith.index_cast %c5_i32_252 : i32 to index
    %c0_253 = arith.constant 0 : index
    %c0_254 = arith.constant 0 : index
    %648 = vector.load %arg9[%647, %c0_253, %c0_254] : memref<8x16x512xf32, #tpu.memory_space<vmem>>, vector<1x16x512xf32>
    %649 = vector.shape_cast %648 : vector<1x16x512xf32> to vector<16x512xf32>
    %650 = arith.truncf %641 : vector<16x128xf32> to vector<16x128xbf16>
    %cst_255 = arith.constant dense<0.000000e+00> : vector<16x512xf32>
    %651 = tpu.matmul %650, %425, %cst_255 {dimension_numbers = #tpu.dot_dimension_numbers<[1], [0], [0], [1], [0, 0, 1, 1], [], []>} : vector<16x128xbf16>, vector<128x512xbf16>, vector<16x512xf32> -> vector<16x512xf32>
    %652 = arith.addf %649, %651 : vector<16x512xf32>
    %653 = vector.extract_strided_slice %652 {offsets = [0, 0], sizes = [16, 128], strides = [1, 1]} : vector<16x512xf32> to vector<16x128xf32>
    %cst_256 = arith.constant 5.000000e-01 : f32
    %654 = vector.broadcast %cst_256 : f32 to vector<16x128xf32>
    %655 = arith.mulf %654, %653 : vector<16x128xf32>
    %656 = math.tanh %655 : vector<16x128xf32>
    %cst_257 = arith.constant 1.000000e+00 : f32
    %657 = vector.broadcast %cst_257 : f32 to vector<16x128xf32>
    %658 = arith.addf %656, %657 : vector<16x128xf32>
    %cst_258 = arith.constant 5.000000e-01 : f32
    %659 = vector.broadcast %cst_258 : f32 to vector<16x128xf32>
    %660 = arith.mulf %659, %658 : vector<16x128xf32>
    %661 = vector.extract_strided_slice %652 {offsets = [0, 128], sizes = [16, 128], strides = [1, 1]} : vector<16x512xf32> to vector<16x128xf32>
    %cst_259 = arith.constant 5.000000e-01 : f32
    %662 = vector.broadcast %cst_259 : f32 to vector<16x128xf32>
    %663 = arith.mulf %662, %661 : vector<16x128xf32>
    %664 = math.tanh %663 : vector<16x128xf32>
    %cst_260 = arith.constant 1.000000e+00 : f32
    %665 = vector.broadcast %cst_260 : f32 to vector<16x128xf32>
    %666 = arith.addf %664, %665 : vector<16x128xf32>
    %cst_261 = arith.constant 5.000000e-01 : f32
    %667 = vector.broadcast %cst_261 : f32 to vector<16x128xf32>
    %668 = arith.mulf %667, %666 : vector<16x128xf32>
    %669 = vector.extract_strided_slice %652 {offsets = [0, 256], sizes = [16, 128], strides = [1, 1]} : vector<16x512xf32> to vector<16x128xf32>
    %670 = math.tanh %669 : vector<16x128xf32>
    %671 = vector.extract_strided_slice %652 {offsets = [0, 384], sizes = [16, 128], strides = [1, 1]} : vector<16x512xf32> to vector<16x128xf32>
    %cst_262 = arith.constant 5.000000e-01 : f32
    %672 = vector.broadcast %cst_262 : f32 to vector<16x128xf32>
    %673 = arith.mulf %672, %671 : vector<16x128xf32>
    %674 = math.tanh %673 : vector<16x128xf32>
    %cst_263 = arith.constant 1.000000e+00 : f32
    %675 = vector.broadcast %cst_263 : f32 to vector<16x128xf32>
    %676 = arith.addf %674, %675 : vector<16x128xf32>
    %cst_264 = arith.constant 5.000000e-01 : f32
    %677 = vector.broadcast %cst_264 : f32 to vector<16x128xf32>
    %678 = arith.mulf %677, %676 : vector<16x128xf32>
    %679 = arith.mulf %668, %639 : vector<16x128xf32>
    %680 = arith.mulf %660, %670 : vector<16x128xf32>
    %681 = arith.addf %679, %680 : vector<16x128xf32>
    %682 = math.tanh %681 : vector<16x128xf32>
    %683 = arith.mulf %678, %682 : vector<16x128xf32>
    %684 = arith.truncf %683 : vector<16x128xf32> to vector<16x128xbf16>
    %685 = arith.index_cast %c5_i32_252 : i32 to index
    %c0_265 = arith.constant 0 : index
    %c0_266 = arith.constant 0 : index
    %686 = vector.load %arg8[%685, %c0_265, %c0_266] : memref<8x16x128xbf16, #tpu.memory_space<vmem>>, vector<1x16x128xbf16>
    %687 = vector.shape_cast %686 : vector<1x16x128xbf16> to vector<16x128xbf16>
    %688 = vector.shape_cast %684 : vector<16x128xbf16> to vector<1x16x128xbf16>
    tpu.vector_store %arg8[%685, %c0_265, %c0_266], %688 {strides = array<i32>} : memref<8x16x128xbf16, #tpu.memory_space<vmem>>, vector<1x16x128xbf16>,
    %c6_i32_267 = arith.constant 6 : i32
    %689 = arith.index_cast %c6_i32_267 : i32 to index
    %c0_268 = arith.constant 0 : index
    %c0_269 = arith.constant 0 : index
    %690 = vector.load %arg9[%689, %c0_268, %c0_269] : memref<8x16x512xf32, #tpu.memory_space<vmem>>, vector<1x16x512xf32>
    %691 = vector.shape_cast %690 : vector<1x16x512xf32> to vector<16x512xf32>
    %692 = arith.truncf %683 : vector<16x128xf32> to vector<16x128xbf16>
    %cst_270 = arith.constant dense<0.000000e+00> : vector<16x512xf32>
    %693 = tpu.matmul %692, %425, %cst_270 {dimension_numbers = #tpu.dot_dimension_numbers<[1], [0], [0], [1], [0, 0, 1, 1], [], []>} : vector<16x128xbf16>, vector<128x512xbf16>, vector<16x512xf32> -> vector<16x512xf32>
    %694 = arith.addf %691, %693 : vector<16x512xf32>
    %695 = vector.extract_strided_slice %694 {offsets = [0, 0], sizes = [16, 128], strides = [1, 1]} : vector<16x512xf32> to vector<16x128xf32>
    %cst_271 = arith.constant 5.000000e-01 : f32
    %696 = vector.broadcast %cst_271 : f32 to vector<16x128xf32>
    %697 = arith.mulf %696, %695 : vector<16x128xf32>
    %698 = math.tanh %697 : vector<16x128xf32>
    %cst_272 = arith.constant 1.000000e+00 : f32
    %699 = vector.broadcast %cst_272 : f32 to vector<16x128xf32>
    %700 = arith.addf %698, %699 : vector<16x128xf32>
    %cst_273 = arith.constant 5.000000e-01 : f32
    %701 = vector.broadcast %cst_273 : f32 to vector<16x128xf32>
    %702 = arith.mulf %701, %700 : vector<16x128xf32>
    %703 = vector.extract_strided_slice %694 {offsets = [0, 128], sizes = [16, 128], strides = [1, 1]} : vector<16x512xf32> to vector<16x128xf32>
    %cst_274 = arith.constant 5.000000e-01 : f32
    %704 = vector.broadcast %cst_274 : f32 to vector<16x128xf32>
    %705 = arith.mulf %704, %703 : vector<16x128xf32>
    %706 = math.tanh %705 : vector<16x128xf32>
    %cst_275 = arith.constant 1.000000e+00 : f32
    %707 = vector.broadcast %cst_275 : f32 to vector<16x128xf32>
    %708 = arith.addf %706, %707 : vector<16x128xf32>
    %cst_276 = arith.constant 5.000000e-01 : f32
    %709 = vector.broadcast %cst_276 : f32 to vector<16x128xf32>
    %710 = arith.mulf %709, %708 : vector<16x128xf32>
    %711 = vector.extract_strided_slice %694 {offsets = [0, 256], sizes = [16, 128], strides = [1, 1]} : vector<16x512xf32> to vector<16x128xf32>
    %712 = math.tanh %711 : vector<16x128xf32>
    %713 = vector.extract_strided_slice %694 {offsets = [0, 384], sizes = [16, 128], strides = [1, 1]} : vector<16x512xf32> to vector<16x128xf32>
    %cst_277 = arith.constant 5.000000e-01 : f32
    %714 = vector.broadcast %cst_277 : f32 to vector<16x128xf32>
    %715 = arith.mulf %714, %713 : vector<16x128xf32>
    %716 = math.tanh %715 : vector<16x128xf32>
    %cst_278 = arith.constant 1.000000e+00 : f32
    %717 = vector.broadcast %cst_278 : f32 to vector<16x128xf32>
    %718 = arith.addf %716, %717 : vector<16x128xf32>
    %cst_279 = arith.constant 5.000000e-01 : f32
    %719 = vector.broadcast %cst_279 : f32 to vector<16x128xf32>
    %720 = arith.mulf %719, %718 : vector<16x128xf32>
    %721 = arith.mulf %710, %681 : vector<16x128xf32>
    %722 = arith.mulf %702, %712 : vector<16x128xf32>
    %723 = arith.addf %721, %722 : vector<16x128xf32>
    %724 = math.tanh %723 : vector<16x128xf32>
    %725 = arith.mulf %720, %724 : vector<16x128xf32>
    %726 = arith.truncf %725 : vector<16x128xf32> to vector<16x128xbf16>
    %727 = arith.index_cast %c6_i32_267 : i32 to index
    %c0_280 = arith.constant 0 : index
    %c0_281 = arith.constant 0 : index
    %728 = vector.load %arg8[%727, %c0_280, %c0_281] : memref<8x16x128xbf16, #tpu.memory_space<vmem>>, vector<1x16x128xbf16>
    %729 = vector.shape_cast %728 : vector<1x16x128xbf16> to vector<16x128xbf16>
    %730 = vector.shape_cast %726 : vector<16x128xbf16> to vector<1x16x128xbf16>
    tpu.vector_store %arg8[%727, %c0_280, %c0_281], %730 {strides = array<i32>} : memref<8x16x128xbf16, #tpu.memory_space<vmem>>, vector<1x16x128xbf16>,
    %c7_i32_282 = arith.constant 7 : i32
    %731 = arith.index_cast %c7_i32_282 : i32 to index
    %c0_283 = arith.constant 0 : index
    %c0_284 = arith.constant 0 : index
    %732 = vector.load %arg9[%731, %c0_283, %c0_284] : memref<8x16x512xf32, #tpu.memory_space<vmem>>, vector<1x16x512xf32>
    %733 = vector.shape_cast %732 : vector<1x16x512xf32> to vector<16x512xf32>
    %734 = arith.truncf %725 : vector<16x128xf32> to vector<16x128xbf16>
    %cst_285 = arith.constant dense<0.000000e+00> : vector<16x512xf32>
    %735 = tpu.matmul %734, %425, %cst_285 {dimension_numbers = #tpu.dot_dimension_numbers<[1], [0], [0], [1], [0, 0, 1, 1], [], []>} : vector<16x128xbf16>, vector<128x512xbf16>, vector<16x512xf32> -> vector<16x512xf32>
    %736 = arith.addf %733, %735 : vector<16x512xf32>
    %737 = vector.extract_strided_slice %736 {offsets = [0, 0], sizes = [16, 128], strides = [1, 1]} : vector<16x512xf32> to vector<16x128xf32>
    %cst_286 = arith.constant 5.000000e-01 : f32
    %738 = vector.broadcast %cst_286 : f32 to vector<16x128xf32>
    %739 = arith.mulf %738, %737 : vector<16x128xf32>
    %740 = math.tanh %739 : vector<16x128xf32>
    %cst_287 = arith.constant 1.000000e+00 : f32
    %741 = vector.broadcast %cst_287 : f32 to vector<16x128xf32>
    %742 = arith.addf %740, %741 : vector<16x128xf32>
    %cst_288 = arith.constant 5.000000e-01 : f32
    %743 = vector.broadcast %cst_288 : f32 to vector<16x128xf32>
    %744 = arith.mulf %743, %742 : vector<16x128xf32>
    %745 = vector.extract_strided_slice %736 {offsets = [0, 128], sizes = [16, 128], strides = [1, 1]} : vector<16x512xf32> to vector<16x128xf32>
    %cst_289 = arith.constant 5.000000e-01 : f32
    %746 = vector.broadcast %cst_289 : f32 to vector<16x128xf32>
    %747 = arith.mulf %746, %745 : vector<16x128xf32>
    %748 = math.tanh %747 : vector<16x128xf32>
    %cst_290 = arith.constant 1.000000e+00 : f32
    %749 = vector.broadcast %cst_290 : f32 to vector<16x128xf32>
    %750 = arith.addf %748, %749 : vector<16x128xf32>
    %cst_291 = arith.constant 5.000000e-01 : f32
    %751 = vector.broadcast %cst_291 : f32 to vector<16x128xf32>
    %752 = arith.mulf %751, %750 : vector<16x128xf32>
    %753 = vector.extract_strided_slice %736 {offsets = [0, 256], sizes = [16, 128], strides = [1, 1]} : vector<16x512xf32> to vector<16x128xf32>
    %754 = math.tanh %753 : vector<16x128xf32>
    %755 = vector.extract_strided_slice %736 {offsets = [0, 384], sizes = [16, 128], strides = [1, 1]} : vector<16x512xf32> to vector<16x128xf32>
    %cst_292 = arith.constant 5.000000e-01 : f32
    %756 = vector.broadcast %cst_292 : f32 to vector<16x128xf32>
    %757 = arith.mulf %756, %755 : vector<16x128xf32>
    %758 = math.tanh %757 : vector<16x128xf32>
    %cst_293 = arith.constant 1.000000e+00 : f32
    %759 = vector.broadcast %cst_293 : f32 to vector<16x128xf32>
    %760 = arith.addf %758, %759 : vector<16x128xf32>
    %cst_294 = arith.constant 5.000000e-01 : f32
    %761 = vector.broadcast %cst_294 : f32 to vector<16x128xf32>
    %762 = arith.mulf %761, %760 : vector<16x128xf32>
    %763 = arith.mulf %752, %723 : vector<16x128xf32>
    %764 = arith.mulf %744, %754 : vector<16x128xf32>
    %765 = arith.addf %763, %764 : vector<16x128xf32>
    %766 = math.tanh %765 : vector<16x128xf32>
    %767 = arith.mulf %762, %766 : vector<16x128xf32>
    %768 = arith.truncf %767 : vector<16x128xf32> to vector<16x128xbf16>
    %769 = arith.index_cast %c7_i32_282 : i32 to index
    %c0_295 = arith.constant 0 : index
    %c0_296 = arith.constant 0 : index
    %770 = vector.load %arg8[%769, %c0_295, %c0_296] : memref<8x16x128xbf16, #tpu.memory_space<vmem>>, vector<1x16x128xbf16>
    %771 = vector.shape_cast %770 : vector<1x16x128xbf16> to vector<16x128xbf16>
    %772 = vector.shape_cast %768 : vector<16x128xbf16> to vector<1x16x128xbf16>
    tpu.vector_store %arg8[%769, %c0_295, %c0_296], %772 {strides = array<i32>} : memref<8x16x128xbf16, #tpu.memory_space<vmem>>, vector<1x16x128xbf16>,
    %c8_i32_297 = arith.constant 8 : i32
    %c2_298 = arith.constant 2 : index
    %c0_299 = arith.constant 0 : index
    %c0_300 = arith.constant 0 : index
    %773 = vector.load %arg4[%c2_298, %c0_299, %c0_300] : memref<3x128x512xbf16, #tpu.memory_space<vmem>>, vector<1x128x512xbf16>
    %774 = vector.shape_cast %773 : vector<1x128x512xbf16> to vector<128x512xbf16>
    %c2_301 = arith.constant 2 : index
    %c0_302 = arith.constant 0 : index
    %c0_303 = arith.constant 0 : index
    %775 = vector.load %arg5[%c2_301, %c0_302, %c0_303] : memref<3x128x512xbf16, #tpu.memory_space<vmem>>, vector<1x128x512xbf16>
    %776 = vector.shape_cast %775 : vector<1x128x512xbf16> to vector<128x512xbf16>
    %c2_304 = arith.constant 2 : index
    %c0_305 = arith.constant 0 : index
    %c0_306 = arith.constant 0 : index
    %777 = vector.load %arg6[%c2_304, %c0_305, %c0_306] : memref<3x1x512xf32, #tpu.memory_space<vmem>>, vector<1x1x512xf32>
    %778 = vector.shape_cast %777 : vector<1x1x512xf32> to vector<1x512xf32>
    %c0_307 = arith.constant 0 : index
    %c0_308 = arith.constant 0 : index
    %c0_309 = arith.constant 0 : index
    %779 = vector.load %arg8[%c0_307, %c0_308, %c0_309] : memref<8x16x128xbf16, #tpu.memory_space<vmem>>, vector<8x16x128xbf16>
    %780 = vector.shape_cast %779 : vector<8x16x128xbf16> to vector<128x128xbf16>
    %cst_310 = arith.constant dense<0.000000e+00> : vector<128x512xf32>
    %781 = tpu.matmul %780, %774, %cst_310 {dimension_numbers = #tpu.dot_dimension_numbers<[1], [0], [0], [1], [0, 0, 1, 1], [], []>} : vector<128x128xbf16>, vector<128x512xbf16>, vector<128x512xf32> -> vector<128x512xf32>
    %782 = vector.broadcast %778 : vector<1x512xf32> to vector<128x512xf32>
    %783 = arith.addf %781, %782 : vector<128x512xf32>
    %784 = vector.shape_cast %783 : vector<128x512xf32> to vector<8x16x512xf32>
    %c0_311 = arith.constant 0 : index
    %c0_312 = arith.constant 0 : index
    %c0_313 = arith.constant 0 : index
    %785 = vector.load %arg9[%c0_311, %c0_312, %c0_313] : memref<8x16x512xf32, #tpu.memory_space<vmem>>, vector<8x16x512xf32>
    tpu.vector_store %arg9[%c0_311, %c0_312, %c0_313], %784 {strides = array<i32>} : memref<8x16x512xf32, #tpu.memory_space<vmem>>, vector<8x16x512xf32>,
    %cst_314 = arith.constant 0.000000e+00 : f32
    %786 = vector.broadcast %cst_314 : f32 to vector<16x128xf32>
    %cst_315 = arith.constant 0.000000e+00 : f32
    %787 = vector.broadcast %cst_315 : f32 to vector<16x128xf32>
    %c0_i32_316 = arith.constant 0 : i32
    %788 = arith.index_cast %c0_i32_316 : i32 to index
    %c0_317 = arith.constant 0 : index
    %c0_318 = arith.constant 0 : index
    %789 = vector.load %arg9[%788, %c0_317, %c0_318] : memref<8x16x512xf32, #tpu.memory_space<vmem>>, vector<1x16x512xf32>
    %790 = vector.shape_cast %789 : vector<1x16x512xf32> to vector<16x512xf32>
    %791 = arith.truncf %786 : vector<16x128xf32> to vector<16x128xbf16>
    %cst_319 = arith.constant dense<0.000000e+00> : vector<16x512xf32>
    %792 = tpu.matmul %791, %776, %cst_319 {dimension_numbers = #tpu.dot_dimension_numbers<[1], [0], [0], [1], [0, 0, 1, 1], [], []>} : vector<16x128xbf16>, vector<128x512xbf16>, vector<16x512xf32> -> vector<16x512xf32>
    %793 = arith.addf %790, %792 : vector<16x512xf32>
    %794 = vector.extract_strided_slice %793 {offsets = [0, 0], sizes = [16, 128], strides = [1, 1]} : vector<16x512xf32> to vector<16x128xf32>
    %cst_320 = arith.constant 5.000000e-01 : f32
    %795 = vector.broadcast %cst_320 : f32 to vector<16x128xf32>
    %796 = arith.mulf %795, %794 : vector<16x128xf32>
    %797 = math.tanh %796 : vector<16x128xf32>
    %cst_321 = arith.constant 1.000000e+00 : f32
    %798 = vector.broadcast %cst_321 : f32 to vector<16x128xf32>
    %799 = arith.addf %797, %798 : vector<16x128xf32>
    %cst_322 = arith.constant 5.000000e-01 : f32
    %800 = vector.broadcast %cst_322 : f32 to vector<16x128xf32>
    %801 = arith.mulf %800, %799 : vector<16x128xf32>
    %802 = vector.extract_strided_slice %793 {offsets = [0, 128], sizes = [16, 128], strides = [1, 1]} : vector<16x512xf32> to vector<16x128xf32>
    %cst_323 = arith.constant 5.000000e-01 : f32
    %803 = vector.broadcast %cst_323 : f32 to vector<16x128xf32>
    %804 = arith.mulf %803, %802 : vector<16x128xf32>
    %805 = math.tanh %804 : vector<16x128xf32>
    %cst_324 = arith.constant 1.000000e+00 : f32
    %806 = vector.broadcast %cst_324 : f32 to vector<16x128xf32>
    %807 = arith.addf %805, %806 : vector<16x128xf32>
    %cst_325 = arith.constant 5.000000e-01 : f32
    %808 = vector.broadcast %cst_325 : f32 to vector<16x128xf32>
    %809 = arith.mulf %808, %807 : vector<16x128xf32>
    %810 = vector.extract_strided_slice %793 {offsets = [0, 256], sizes = [16, 128], strides = [1, 1]} : vector<16x512xf32> to vector<16x128xf32>
    %811 = math.tanh %810 : vector<16x128xf32>
    %812 = vector.extract_strided_slice %793 {offsets = [0, 384], sizes = [16, 128], strides = [1, 1]} : vector<16x512xf32> to vector<16x128xf32>
    %cst_326 = arith.constant 5.000000e-01 : f32
    %813 = vector.broadcast %cst_326 : f32 to vector<16x128xf32>
    %814 = arith.mulf %813, %812 : vector<16x128xf32>
    %815 = math.tanh %814 : vector<16x128xf32>
    %cst_327 = arith.constant 1.000000e+00 : f32
    %816 = vector.broadcast %cst_327 : f32 to vector<16x128xf32>
    %817 = arith.addf %815, %816 : vector<16x128xf32>
    %cst_328 = arith.constant 5.000000e-01 : f32
    %818 = vector.broadcast %cst_328 : f32 to vector<16x128xf32>
    %819 = arith.mulf %818, %817 : vector<16x128xf32>
    %820 = arith.mulf %809, %787 : vector<16x128xf32>
    %821 = arith.mulf %801, %811 : vector<16x128xf32>
    %822 = arith.addf %820, %821 : vector<16x128xf32>
    %823 = math.tanh %822 : vector<16x128xf32>
    %824 = arith.mulf %819, %823 : vector<16x128xf32>
    %825 = arith.truncf %824 : vector<16x128xf32> to vector<16x128xbf16>
    %826 = arith.index_cast %c0_i32_316 : i32 to index
    %c0_329 = arith.constant 0 : index
    %c0_330 = arith.constant 0 : index
    %827 = vector.load %arg8[%826, %c0_329, %c0_330] : memref<8x16x128xbf16, #tpu.memory_space<vmem>>, vector<1x16x128xbf16>
    %828 = vector.shape_cast %827 : vector<1x16x128xbf16> to vector<16x128xbf16>
    %829 = vector.shape_cast %825 : vector<16x128xbf16> to vector<1x16x128xbf16>
    tpu.vector_store %arg8[%826, %c0_329, %c0_330], %829 {strides = array<i32>} : memref<8x16x128xbf16, #tpu.memory_space<vmem>>, vector<1x16x128xbf16>,
    %c1_i32_331 = arith.constant 1 : i32
    %830 = arith.index_cast %c1_i32_331 : i32 to index
    %c0_332 = arith.constant 0 : index
    %c0_333 = arith.constant 0 : index
    %831 = vector.load %arg9[%830, %c0_332, %c0_333] : memref<8x16x512xf32, #tpu.memory_space<vmem>>, vector<1x16x512xf32>
    %832 = vector.shape_cast %831 : vector<1x16x512xf32> to vector<16x512xf32>
    %833 = arith.truncf %824 : vector<16x128xf32> to vector<16x128xbf16>
    %cst_334 = arith.constant dense<0.000000e+00> : vector<16x512xf32>
    %834 = tpu.matmul %833, %776, %cst_334 {dimension_numbers = #tpu.dot_dimension_numbers<[1], [0], [0], [1], [0, 0, 1, 1], [], []>} : vector<16x128xbf16>, vector<128x512xbf16>, vector<16x512xf32> -> vector<16x512xf32>
    %835 = arith.addf %832, %834 : vector<16x512xf32>
    %836 = vector.extract_strided_slice %835 {offsets = [0, 0], sizes = [16, 128], strides = [1, 1]} : vector<16x512xf32> to vector<16x128xf32>
    %cst_335 = arith.constant 5.000000e-01 : f32
    %837 = vector.broadcast %cst_335 : f32 to vector<16x128xf32>
    %838 = arith.mulf %837, %836 : vector<16x128xf32>
    %839 = math.tanh %838 : vector<16x128xf32>
    %cst_336 = arith.constant 1.000000e+00 : f32
    %840 = vector.broadcast %cst_336 : f32 to vector<16x128xf32>
    %841 = arith.addf %839, %840 : vector<16x128xf32>
    %cst_337 = arith.constant 5.000000e-01 : f32
    %842 = vector.broadcast %cst_337 : f32 to vector<16x128xf32>
    %843 = arith.mulf %842, %841 : vector<16x128xf32>
    %844 = vector.extract_strided_slice %835 {offsets = [0, 128], sizes = [16, 128], strides = [1, 1]} : vector<16x512xf32> to vector<16x128xf32>
    %cst_338 = arith.constant 5.000000e-01 : f32
    %845 = vector.broadcast %cst_338 : f32 to vector<16x128xf32>
    %846 = arith.mulf %845, %844 : vector<16x128xf32>
    %847 = math.tanh %846 : vector<16x128xf32>
    %cst_339 = arith.constant 1.000000e+00 : f32
    %848 = vector.broadcast %cst_339 : f32 to vector<16x128xf32>
    %849 = arith.addf %847, %848 : vector<16x128xf32>
    %cst_340 = arith.constant 5.000000e-01 : f32
    %850 = vector.broadcast %cst_340 : f32 to vector<16x128xf32>
    %851 = arith.mulf %850, %849 : vector<16x128xf32>
    %852 = vector.extract_strided_slice %835 {offsets = [0, 256], sizes = [16, 128], strides = [1, 1]} : vector<16x512xf32> to vector<16x128xf32>
    %853 = math.tanh %852 : vector<16x128xf32>
    %854 = vector.extract_strided_slice %835 {offsets = [0, 384], sizes = [16, 128], strides = [1, 1]} : vector<16x512xf32> to vector<16x128xf32>
    %cst_341 = arith.constant 5.000000e-01 : f32
    %855 = vector.broadcast %cst_341 : f32 to vector<16x128xf32>
    %856 = arith.mulf %855, %854 : vector<16x128xf32>
    %857 = math.tanh %856 : vector<16x128xf32>
    %cst_342 = arith.constant 1.000000e+00 : f32
    %858 = vector.broadcast %cst_342 : f32 to vector<16x128xf32>
    %859 = arith.addf %857, %858 : vector<16x128xf32>
    %cst_343 = arith.constant 5.000000e-01 : f32
    %860 = vector.broadcast %cst_343 : f32 to vector<16x128xf32>
    %861 = arith.mulf %860, %859 : vector<16x128xf32>
    %862 = arith.mulf %851, %822 : vector<16x128xf32>
    %863 = arith.mulf %843, %853 : vector<16x128xf32>
    %864 = arith.addf %862, %863 : vector<16x128xf32>
    %865 = math.tanh %864 : vector<16x128xf32>
    %866 = arith.mulf %861, %865 : vector<16x128xf32>
    %867 = arith.truncf %866 : vector<16x128xf32> to vector<16x128xbf16>
    %868 = arith.index_cast %c1_i32_331 : i32 to index
    %c0_344 = arith.constant 0 : index
    %c0_345 = arith.constant 0 : index
    %869 = vector.load %arg8[%868, %c0_344, %c0_345] : memref<8x16x128xbf16, #tpu.memory_space<vmem>>, vector<1x16x128xbf16>
    %870 = vector.shape_cast %869 : vector<1x16x128xbf16> to vector<16x128xbf16>
    %871 = vector.shape_cast %867 : vector<16x128xbf16> to vector<1x16x128xbf16>
    tpu.vector_store %arg8[%868, %c0_344, %c0_345], %871 {strides = array<i32>} : memref<8x16x128xbf16, #tpu.memory_space<vmem>>, vector<1x16x128xbf16>,
    %c2_i32_346 = arith.constant 2 : i32
    %872 = arith.index_cast %c2_i32_346 : i32 to index
    %c0_347 = arith.constant 0 : index
    %c0_348 = arith.constant 0 : index
    %873 = vector.load %arg9[%872, %c0_347, %c0_348] : memref<8x16x512xf32, #tpu.memory_space<vmem>>, vector<1x16x512xf32>
    %874 = vector.shape_cast %873 : vector<1x16x512xf32> to vector<16x512xf32>
    %875 = arith.truncf %866 : vector<16x128xf32> to vector<16x128xbf16>
    %cst_349 = arith.constant dense<0.000000e+00> : vector<16x512xf32>
    %876 = tpu.matmul %875, %776, %cst_349 {dimension_numbers = #tpu.dot_dimension_numbers<[1], [0], [0], [1], [0, 0, 1, 1], [], []>} : vector<16x128xbf16>, vector<128x512xbf16>, vector<16x512xf32> -> vector<16x512xf32>
    %877 = arith.addf %874, %876 : vector<16x512xf32>
    %878 = vector.extract_strided_slice %877 {offsets = [0, 0], sizes = [16, 128], strides = [1, 1]} : vector<16x512xf32> to vector<16x128xf32>
    %cst_350 = arith.constant 5.000000e-01 : f32
    %879 = vector.broadcast %cst_350 : f32 to vector<16x128xf32>
    %880 = arith.mulf %879, %878 : vector<16x128xf32>
    %881 = math.tanh %880 : vector<16x128xf32>
    %cst_351 = arith.constant 1.000000e+00 : f32
    %882 = vector.broadcast %cst_351 : f32 to vector<16x128xf32>
    %883 = arith.addf %881, %882 : vector<16x128xf32>
    %cst_352 = arith.constant 5.000000e-01 : f32
    %884 = vector.broadcast %cst_352 : f32 to vector<16x128xf32>
    %885 = arith.mulf %884, %883 : vector<16x128xf32>
    %886 = vector.extract_strided_slice %877 {offsets = [0, 128], sizes = [16, 128], strides = [1, 1]} : vector<16x512xf32> to vector<16x128xf32>
    %cst_353 = arith.constant 5.000000e-01 : f32
    %887 = vector.broadcast %cst_353 : f32 to vector<16x128xf32>
    %888 = arith.mulf %887, %886 : vector<16x128xf32>
    %889 = math.tanh %888 : vector<16x128xf32>
    %cst_354 = arith.constant 1.000000e+00 : f32
    %890 = vector.broadcast %cst_354 : f32 to vector<16x128xf32>
    %891 = arith.addf %889, %890 : vector<16x128xf32>
    %cst_355 = arith.constant 5.000000e-01 : f32
    %892 = vector.broadcast %cst_355 : f32 to vector<16x128xf32>
    %893 = arith.mulf %892, %891 : vector<16x128xf32>
    %894 = vector.extract_strided_slice %877 {offsets = [0, 256], sizes = [16, 128], strides = [1, 1]} : vector<16x512xf32> to vector<16x128xf32>
    %895 = math.tanh %894 : vector<16x128xf32>
    %896 = vector.extract_strided_slice %877 {offsets = [0, 384], sizes = [16, 128], strides = [1, 1]} : vector<16x512xf32> to vector<16x128xf32>
    %cst_356 = arith.constant 5.000000e-01 : f32
    %897 = vector.broadcast %cst_356 : f32 to vector<16x128xf32>
    %898 = arith.mulf %897, %896 : vector<16x128xf32>
    %899 = math.tanh %898 : vector<16x128xf32>
    %cst_357 = arith.constant 1.000000e+00 : f32
    %900 = vector.broadcast %cst_357 : f32 to vector<16x128xf32>
    %901 = arith.addf %899, %900 : vector<16x128xf32>
    %cst_358 = arith.constant 5.000000e-01 : f32
    %902 = vector.broadcast %cst_358 : f32 to vector<16x128xf32>
    %903 = arith.mulf %902, %901 : vector<16x128xf32>
    %904 = arith.mulf %893, %864 : vector<16x128xf32>
    %905 = arith.mulf %885, %895 : vector<16x128xf32>
    %906 = arith.addf %904, %905 : vector<16x128xf32>
    %907 = math.tanh %906 : vector<16x128xf32>
    %908 = arith.mulf %903, %907 : vector<16x128xf32>
    %909 = arith.truncf %908 : vector<16x128xf32> to vector<16x128xbf16>
    %910 = arith.index_cast %c2_i32_346 : i32 to index
    %c0_359 = arith.constant 0 : index
    %c0_360 = arith.constant 0 : index
    %911 = vector.load %arg8[%910, %c0_359, %c0_360] : memref<8x16x128xbf16, #tpu.memory_space<vmem>>, vector<1x16x128xbf16>
    %912 = vector.shape_cast %911 : vector<1x16x128xbf16> to vector<16x128xbf16>
    %913 = vector.shape_cast %909 : vector<16x128xbf16> to vector<1x16x128xbf16>
    tpu.vector_store %arg8[%910, %c0_359, %c0_360], %913 {strides = array<i32>} : memref<8x16x128xbf16, #tpu.memory_space<vmem>>, vector<1x16x128xbf16>,
    %c3_i32_361 = arith.constant 3 : i32
    %914 = arith.index_cast %c3_i32_361 : i32 to index
    %c0_362 = arith.constant 0 : index
    %c0_363 = arith.constant 0 : index
    %915 = vector.load %arg9[%914, %c0_362, %c0_363] : memref<8x16x512xf32, #tpu.memory_space<vmem>>, vector<1x16x512xf32>
    %916 = vector.shape_cast %915 : vector<1x16x512xf32> to vector<16x512xf32>
    %917 = arith.truncf %908 : vector<16x128xf32> to vector<16x128xbf16>
    %cst_364 = arith.constant dense<0.000000e+00> : vector<16x512xf32>
    %918 = tpu.matmul %917, %776, %cst_364 {dimension_numbers = #tpu.dot_dimension_numbers<[1], [0], [0], [1], [0, 0, 1, 1], [], []>} : vector<16x128xbf16>, vector<128x512xbf16>, vector<16x512xf32> -> vector<16x512xf32>
    %919 = arith.addf %916, %918 : vector<16x512xf32>
    %920 = vector.extract_strided_slice %919 {offsets = [0, 0], sizes = [16, 128], strides = [1, 1]} : vector<16x512xf32> to vector<16x128xf32>
    %cst_365 = arith.constant 5.000000e-01 : f32
    %921 = vector.broadcast %cst_365 : f32 to vector<16x128xf32>
    %922 = arith.mulf %921, %920 : vector<16x128xf32>
    %923 = math.tanh %922 : vector<16x128xf32>
    %cst_366 = arith.constant 1.000000e+00 : f32
    %924 = vector.broadcast %cst_366 : f32 to vector<16x128xf32>
    %925 = arith.addf %923, %924 : vector<16x128xf32>
    %cst_367 = arith.constant 5.000000e-01 : f32
    %926 = vector.broadcast %cst_367 : f32 to vector<16x128xf32>
    %927 = arith.mulf %926, %925 : vector<16x128xf32>
    %928 = vector.extract_strided_slice %919 {offsets = [0, 128], sizes = [16, 128], strides = [1, 1]} : vector<16x512xf32> to vector<16x128xf32>
    %cst_368 = arith.constant 5.000000e-01 : f32
    %929 = vector.broadcast %cst_368 : f32 to vector<16x128xf32>
    %930 = arith.mulf %929, %928 : vector<16x128xf32>
    %931 = math.tanh %930 : vector<16x128xf32>
    %cst_369 = arith.constant 1.000000e+00 : f32
    %932 = vector.broadcast %cst_369 : f32 to vector<16x128xf32>
    %933 = arith.addf %931, %932 : vector<16x128xf32>
    %cst_370 = arith.constant 5.000000e-01 : f32
    %934 = vector.broadcast %cst_370 : f32 to vector<16x128xf32>
    %935 = arith.mulf %934, %933 : vector<16x128xf32>
    %936 = vector.extract_strided_slice %919 {offsets = [0, 256], sizes = [16, 128], strides = [1, 1]} : vector<16x512xf32> to vector<16x128xf32>
    %937 = math.tanh %936 : vector<16x128xf32>
    %938 = vector.extract_strided_slice %919 {offsets = [0, 384], sizes = [16, 128], strides = [1, 1]} : vector<16x512xf32> to vector<16x128xf32>
    %cst_371 = arith.constant 5.000000e-01 : f32
    %939 = vector.broadcast %cst_371 : f32 to vector<16x128xf32>
    %940 = arith.mulf %939, %938 : vector<16x128xf32>
    %941 = math.tanh %940 : vector<16x128xf32>
    %cst_372 = arith.constant 1.000000e+00 : f32
    %942 = vector.broadcast %cst_372 : f32 to vector<16x128xf32>
    %943 = arith.addf %941, %942 : vector<16x128xf32>
    %cst_373 = arith.constant 5.000000e-01 : f32
    %944 = vector.broadcast %cst_373 : f32 to vector<16x128xf32>
    %945 = arith.mulf %944, %943 : vector<16x128xf32>
    %946 = arith.mulf %935, %906 : vector<16x128xf32>
    %947 = arith.mulf %927, %937 : vector<16x128xf32>
    %948 = arith.addf %946, %947 : vector<16x128xf32>
    %949 = math.tanh %948 : vector<16x128xf32>
    %950 = arith.mulf %945, %949 : vector<16x128xf32>
    %951 = arith.truncf %950 : vector<16x128xf32> to vector<16x128xbf16>
    %952 = arith.index_cast %c3_i32_361 : i32 to index
    %c0_374 = arith.constant 0 : index
    %c0_375 = arith.constant 0 : index
    %953 = vector.load %arg8[%952, %c0_374, %c0_375] : memref<8x16x128xbf16, #tpu.memory_space<vmem>>, vector<1x16x128xbf16>
    %954 = vector.shape_cast %953 : vector<1x16x128xbf16> to vector<16x128xbf16>
    %955 = vector.shape_cast %951 : vector<16x128xbf16> to vector<1x16x128xbf16>
    tpu.vector_store %arg8[%952, %c0_374, %c0_375], %955 {strides = array<i32>} : memref<8x16x128xbf16, #tpu.memory_space<vmem>>, vector<1x16x128xbf16>,
    %c4_i32_376 = arith.constant 4 : i32
    %956 = arith.index_cast %c4_i32_376 : i32 to index
    %c0_377 = arith.constant 0 : index
    %c0_378 = arith.constant 0 : index
    %957 = vector.load %arg9[%956, %c0_377, %c0_378] : memref<8x16x512xf32, #tpu.memory_space<vmem>>, vector<1x16x512xf32>
    %958 = vector.shape_cast %957 : vector<1x16x512xf32> to vector<16x512xf32>
    %959 = arith.truncf %950 : vector<16x128xf32> to vector<16x128xbf16>
    %cst_379 = arith.constant dense<0.000000e+00> : vector<16x512xf32>
    %960 = tpu.matmul %959, %776, %cst_379 {dimension_numbers = #tpu.dot_dimension_numbers<[1], [0], [0], [1], [0, 0, 1, 1], [], []>} : vector<16x128xbf16>, vector<128x512xbf16>, vector<16x512xf32> -> vector<16x512xf32>
    %961 = arith.addf %958, %960 : vector<16x512xf32>
    %962 = vector.extract_strided_slice %961 {offsets = [0, 0], sizes = [16, 128], strides = [1, 1]} : vector<16x512xf32> to vector<16x128xf32>
    %cst_380 = arith.constant 5.000000e-01 : f32
    %963 = vector.broadcast %cst_380 : f32 to vector<16x128xf32>
    %964 = arith.mulf %963, %962 : vector<16x128xf32>
    %965 = math.tanh %964 : vector<16x128xf32>
    %cst_381 = arith.constant 1.000000e+00 : f32
    %966 = vector.broadcast %cst_381 : f32 to vector<16x128xf32>
    %967 = arith.addf %965, %966 : vector<16x128xf32>
    %cst_382 = arith.constant 5.000000e-01 : f32
    %968 = vector.broadcast %cst_382 : f32 to vector<16x128xf32>
    %969 = arith.mulf %968, %967 : vector<16x128xf32>
    %970 = vector.extract_strided_slice %961 {offsets = [0, 128], sizes = [16, 128], strides = [1, 1]} : vector<16x512xf32> to vector<16x128xf32>
    %cst_383 = arith.constant 5.000000e-01 : f32
    %971 = vector.broadcast %cst_383 : f32 to vector<16x128xf32>
    %972 = arith.mulf %971, %970 : vector<16x128xf32>
    %973 = math.tanh %972 : vector<16x128xf32>
    %cst_384 = arith.constant 1.000000e+00 : f32
    %974 = vector.broadcast %cst_384 : f32 to vector<16x128xf32>
    %975 = arith.addf %973, %974 : vector<16x128xf32>
    %cst_385 = arith.constant 5.000000e-01 : f32
    %976 = vector.broadcast %cst_385 : f32 to vector<16x128xf32>
    %977 = arith.mulf %976, %975 : vector<16x128xf32>
    %978 = vector.extract_strided_slice %961 {offsets = [0, 256], sizes = [16, 128], strides = [1, 1]} : vector<16x512xf32> to vector<16x128xf32>
    %979 = math.tanh %978 : vector<16x128xf32>
    %980 = vector.extract_strided_slice %961 {offsets = [0, 384], sizes = [16, 128], strides = [1, 1]} : vector<16x512xf32> to vector<16x128xf32>
    %cst_386 = arith.constant 5.000000e-01 : f32
    %981 = vector.broadcast %cst_386 : f32 to vector<16x128xf32>
    %982 = arith.mulf %981, %980 : vector<16x128xf32>
    %983 = math.tanh %982 : vector<16x128xf32>
    %cst_387 = arith.constant 1.000000e+00 : f32
    %984 = vector.broadcast %cst_387 : f32 to vector<16x128xf32>
    %985 = arith.addf %983, %984 : vector<16x128xf32>
    %cst_388 = arith.constant 5.000000e-01 : f32
    %986 = vector.broadcast %cst_388 : f32 to vector<16x128xf32>
    %987 = arith.mulf %986, %985 : vector<16x128xf32>
    %988 = arith.mulf %977, %948 : vector<16x128xf32>
    %989 = arith.mulf %969, %979 : vector<16x128xf32>
    %990 = arith.addf %988, %989 : vector<16x128xf32>
    %991 = math.tanh %990 : vector<16x128xf32>
    %992 = arith.mulf %987, %991 : vector<16x128xf32>
    %993 = arith.truncf %992 : vector<16x128xf32> to vector<16x128xbf16>
    %994 = arith.index_cast %c4_i32_376 : i32 to index
    %c0_389 = arith.constant 0 : index
    %c0_390 = arith.constant 0 : index
    %995 = vector.load %arg8[%994, %c0_389, %c0_390] : memref<8x16x128xbf16, #tpu.memory_space<vmem>>, vector<1x16x128xbf16>
    %996 = vector.shape_cast %995 : vector<1x16x128xbf16> to vector<16x128xbf16>
    %997 = vector.shape_cast %993 : vector<16x128xbf16> to vector<1x16x128xbf16>
    tpu.vector_store %arg8[%994, %c0_389, %c0_390], %997 {strides = array<i32>} : memref<8x16x128xbf16, #tpu.memory_space<vmem>>, vector<1x16x128xbf16>,
    %c5_i32_391 = arith.constant 5 : i32
    %998 = arith.index_cast %c5_i32_391 : i32 to index
    %c0_392 = arith.constant 0 : index
    %c0_393 = arith.constant 0 : index
    %999 = vector.load %arg9[%998, %c0_392, %c0_393] : memref<8x16x512xf32, #tpu.memory_space<vmem>>, vector<1x16x512xf32>
    %1000 = vector.shape_cast %999 : vector<1x16x512xf32> to vector<16x512xf32>
    %1001 = arith.truncf %992 : vector<16x128xf32> to vector<16x128xbf16>
    %cst_394 = arith.constant dense<0.000000e+00> : vector<16x512xf32>
    %1002 = tpu.matmul %1001, %776, %cst_394 {dimension_numbers = #tpu.dot_dimension_numbers<[1], [0], [0], [1], [0, 0, 1, 1], [], []>} : vector<16x128xbf16>, vector<128x512xbf16>, vector<16x512xf32> -> vector<16x512xf32>
    %1003 = arith.addf %1000, %1002 : vector<16x512xf32>
    %1004 = vector.extract_strided_slice %1003 {offsets = [0, 0], sizes = [16, 128], strides = [1, 1]} : vector<16x512xf32> to vector<16x128xf32>
    %cst_395 = arith.constant 5.000000e-01 : f32
    %1005 = vector.broadcast %cst_395 : f32 to vector<16x128xf32>
    %1006 = arith.mulf %1005, %1004 : vector<16x128xf32>
    %1007 = math.tanh %1006 : vector<16x128xf32>
    %cst_396 = arith.constant 1.000000e+00 : f32
    %1008 = vector.broadcast %cst_396 : f32 to vector<16x128xf32>
    %1009 = arith.addf %1007, %1008 : vector<16x128xf32>
    %cst_397 = arith.constant 5.000000e-01 : f32
    %1010 = vector.broadcast %cst_397 : f32 to vector<16x128xf32>
    %1011 = arith.mulf %1010, %1009 : vector<16x128xf32>
    %1012 = vector.extract_strided_slice %1003 {offsets = [0, 128], sizes = [16, 128], strides = [1, 1]} : vector<16x512xf32> to vector<16x128xf32>
    %cst_398 = arith.constant 5.000000e-01 : f32
    %1013 = vector.broadcast %cst_398 : f32 to vector<16x128xf32>
    %1014 = arith.mulf %1013, %1012 : vector<16x128xf32>
    %1015 = math.tanh %1014 : vector<16x128xf32>
    %cst_399 = arith.constant 1.000000e+00 : f32
    %1016 = vector.broadcast %cst_399 : f32 to vector<16x128xf32>
    %1017 = arith.addf %1015, %1016 : vector<16x128xf32>
    %cst_400 = arith.constant 5.000000e-01 : f32
    %1018 = vector.broadcast %cst_400 : f32 to vector<16x128xf32>
    %1019 = arith.mulf %1018, %1017 : vector<16x128xf32>
    %1020 = vector.extract_strided_slice %1003 {offsets = [0, 256], sizes = [16, 128], strides = [1, 1]} : vector<16x512xf32> to vector<16x128xf32>
    %1021 = math.tanh %1020 : vector<16x128xf32>
    %1022 = vector.extract_strided_slice %1003 {offsets = [0, 384], sizes = [16, 128], strides = [1, 1]} : vector<16x512xf32> to vector<16x128xf32>
    %cst_401 = arith.constant 5.000000e-01 : f32
    %1023 = vector.broadcast %cst_401 : f32 to vector<16x128xf32>
    %1024 = arith.mulf %1023, %1022 : vector<16x128xf32>
    %1025 = math.tanh %1024 : vector<16x128xf32>
    %cst_402 = arith.constant 1.000000e+00 : f32
    %1026 = vector.broadcast %cst_402 : f32 to vector<16x128xf32>
    %1027 = arith.addf %1025, %1026 : vector<16x128xf32>
    %cst_403 = arith.constant 5.000000e-01 : f32
    %1028 = vector.broadcast %cst_403 : f32 to vector<16x128xf32>
    %1029 = arith.mulf %1028, %1027 : vector<16x128xf32>
    %1030 = arith.mulf %1019, %990 : vector<16x128xf32>
    %1031 = arith.mulf %1011, %1021 : vector<16x128xf32>
    %1032 = arith.addf %1030, %1031 : vector<16x128xf32>
    %1033 = math.tanh %1032 : vector<16x128xf32>
    %1034 = arith.mulf %1029, %1033 : vector<16x128xf32>
    %1035 = arith.truncf %1034 : vector<16x128xf32> to vector<16x128xbf16>
    %1036 = arith.index_cast %c5_i32_391 : i32 to index
    %c0_404 = arith.constant 0 : index
    %c0_405 = arith.constant 0 : index
    %1037 = vector.load %arg8[%1036, %c0_404, %c0_405] : memref<8x16x128xbf16, #tpu.memory_space<vmem>>, vector<1x16x128xbf16>
    %1038 = vector.shape_cast %1037 : vector<1x16x128xbf16> to vector<16x128xbf16>
    %1039 = vector.shape_cast %1035 : vector<16x128xbf16> to vector<1x16x128xbf16>
    tpu.vector_store %arg8[%1036, %c0_404, %c0_405], %1039 {strides = array<i32>} : memref<8x16x128xbf16, #tpu.memory_space<vmem>>, vector<1x16x128xbf16>,
    %c6_i32_406 = arith.constant 6 : i32
    %1040 = arith.index_cast %c6_i32_406 : i32 to index
    %c0_407 = arith.constant 0 : index
    %c0_408 = arith.constant 0 : index
    %1041 = vector.load %arg9[%1040, %c0_407, %c0_408] : memref<8x16x512xf32, #tpu.memory_space<vmem>>, vector<1x16x512xf32>
    %1042 = vector.shape_cast %1041 : vector<1x16x512xf32> to vector<16x512xf32>
    %1043 = arith.truncf %1034 : vector<16x128xf32> to vector<16x128xbf16>
    %cst_409 = arith.constant dense<0.000000e+00> : vector<16x512xf32>
    %1044 = tpu.matmul %1043, %776, %cst_409 {dimension_numbers = #tpu.dot_dimension_numbers<[1], [0], [0], [1], [0, 0, 1, 1], [], []>} : vector<16x128xbf16>, vector<128x512xbf16>, vector<16x512xf32> -> vector<16x512xf32>
    %1045 = arith.addf %1042, %1044 : vector<16x512xf32>
    %1046 = vector.extract_strided_slice %1045 {offsets = [0, 0], sizes = [16, 128], strides = [1, 1]} : vector<16x512xf32> to vector<16x128xf32>
    %cst_410 = arith.constant 5.000000e-01 : f32
    %1047 = vector.broadcast %cst_410 : f32 to vector<16x128xf32>
    %1048 = arith.mulf %1047, %1046 : vector<16x128xf32>
    %1049 = math.tanh %1048 : vector<16x128xf32>
    %cst_411 = arith.constant 1.000000e+00 : f32
    %1050 = vector.broadcast %cst_411 : f32 to vector<16x128xf32>
    %1051 = arith.addf %1049, %1050 : vector<16x128xf32>
    %cst_412 = arith.constant 5.000000e-01 : f32
    %1052 = vector.broadcast %cst_412 : f32 to vector<16x128xf32>
    %1053 = arith.mulf %1052, %1051 : vector<16x128xf32>
    %1054 = vector.extract_strided_slice %1045 {offsets = [0, 128], sizes = [16, 128], strides = [1, 1]} : vector<16x512xf32> to vector<16x128xf32>
    %cst_413 = arith.constant 5.000000e-01 : f32
    %1055 = vector.broadcast %cst_413 : f32 to vector<16x128xf32>
    %1056 = arith.mulf %1055, %1054 : vector<16x128xf32>
    %1057 = math.tanh %1056 : vector<16x128xf32>
    %cst_414 = arith.constant 1.000000e+00 : f32
    %1058 = vector.broadcast %cst_414 : f32 to vector<16x128xf32>
    %1059 = arith.addf %1057, %1058 : vector<16x128xf32>
    %cst_415 = arith.constant 5.000000e-01 : f32
    %1060 = vector.broadcast %cst_415 : f32 to vector<16x128xf32>
    %1061 = arith.mulf %1060, %1059 : vector<16x128xf32>
    %1062 = vector.extract_strided_slice %1045 {offsets = [0, 256], sizes = [16, 128], strides = [1, 1]} : vector<16x512xf32> to vector<16x128xf32>
    %1063 = math.tanh %1062 : vector<16x128xf32>
    %1064 = vector.extract_strided_slice %1045 {offsets = [0, 384], sizes = [16, 128], strides = [1, 1]} : vector<16x512xf32> to vector<16x128xf32>
    %cst_416 = arith.constant 5.000000e-01 : f32
    %1065 = vector.broadcast %cst_416 : f32 to vector<16x128xf32>
    %1066 = arith.mulf %1065, %1064 : vector<16x128xf32>
    %1067 = math.tanh %1066 : vector<16x128xf32>
    %cst_417 = arith.constant 1.000000e+00 : f32
    %1068 = vector.broadcast %cst_417 : f32 to vector<16x128xf32>
    %1069 = arith.addf %1067, %1068 : vector<16x128xf32>
    %cst_418 = arith.constant 5.000000e-01 : f32
    %1070 = vector.broadcast %cst_418 : f32 to vector<16x128xf32>
    %1071 = arith.mulf %1070, %1069 : vector<16x128xf32>
    %1072 = arith.mulf %1061, %1032 : vector<16x128xf32>
    %1073 = arith.mulf %1053, %1063 : vector<16x128xf32>
    %1074 = arith.addf %1072, %1073 : vector<16x128xf32>
    %1075 = math.tanh %1074 : vector<16x128xf32>
    %1076 = arith.mulf %1071, %1075 : vector<16x128xf32>
    %1077 = arith.truncf %1076 : vector<16x128xf32> to vector<16x128xbf16>
    %1078 = arith.index_cast %c6_i32_406 : i32 to index
    %c0_419 = arith.constant 0 : index
    %c0_420 = arith.constant 0 : index
    %1079 = vector.load %arg8[%1078, %c0_419, %c0_420] : memref<8x16x128xbf16, #tpu.memory_space<vmem>>, vector<1x16x128xbf16>
    %1080 = vector.shape_cast %1079 : vector<1x16x128xbf16> to vector<16x128xbf16>
    %1081 = vector.shape_cast %1077 : vector<16x128xbf16> to vector<1x16x128xbf16>
    tpu.vector_store %arg8[%1078, %c0_419, %c0_420], %1081 {strides = array<i32>} : memref<8x16x128xbf16, #tpu.memory_space<vmem>>, vector<1x16x128xbf16>,
    %c7_i32_421 = arith.constant 7 : i32
    %1082 = arith.index_cast %c7_i32_421 : i32 to index
    %c0_422 = arith.constant 0 : index
    %c0_423 = arith.constant 0 : index
    %1083 = vector.load %arg9[%1082, %c0_422, %c0_423] : memref<8x16x512xf32, #tpu.memory_space<vmem>>, vector<1x16x512xf32>
    %1084 = vector.shape_cast %1083 : vector<1x16x512xf32> to vector<16x512xf32>
    %1085 = arith.truncf %1076 : vector<16x128xf32> to vector<16x128xbf16>
    %cst_424 = arith.constant dense<0.000000e+00> : vector<16x512xf32>
    %1086 = tpu.matmul %1085, %776, %cst_424 {dimension_numbers = #tpu.dot_dimension_numbers<[1], [0], [0], [1], [0, 0, 1, 1], [], []>} : vector<16x128xbf16>, vector<128x512xbf16>, vector<16x512xf32> -> vector<16x512xf32>
    %1087 = arith.addf %1084, %1086 : vector<16x512xf32>
    %1088 = vector.extract_strided_slice %1087 {offsets = [0, 0], sizes = [16, 128], strides = [1, 1]} : vector<16x512xf32> to vector<16x128xf32>
    %cst_425 = arith.constant 5.000000e-01 : f32
    %1089 = vector.broadcast %cst_425 : f32 to vector<16x128xf32>
    %1090 = arith.mulf %1089, %1088 : vector<16x128xf32>
    %1091 = math.tanh %1090 : vector<16x128xf32>
    %cst_426 = arith.constant 1.000000e+00 : f32
    %1092 = vector.broadcast %cst_426 : f32 to vector<16x128xf32>
    %1093 = arith.addf %1091, %1092 : vector<16x128xf32>
    %cst_427 = arith.constant 5.000000e-01 : f32
    %1094 = vector.broadcast %cst_427 : f32 to vector<16x128xf32>
    %1095 = arith.mulf %1094, %1093 : vector<16x128xf32>
    %1096 = vector.extract_strided_slice %1087 {offsets = [0, 128], sizes = [16, 128], strides = [1, 1]} : vector<16x512xf32> to vector<16x128xf32>
    %cst_428 = arith.constant 5.000000e-01 : f32
    %1097 = vector.broadcast %cst_428 : f32 to vector<16x128xf32>
    %1098 = arith.mulf %1097, %1096 : vector<16x128xf32>
    %1099 = math.tanh %1098 : vector<16x128xf32>
    %cst_429 = arith.constant 1.000000e+00 : f32
    %1100 = vector.broadcast %cst_429 : f32 to vector<16x128xf32>
    %1101 = arith.addf %1099, %1100 : vector<16x128xf32>
    %cst_430 = arith.constant 5.000000e-01 : f32
    %1102 = vector.broadcast %cst_430 : f32 to vector<16x128xf32>
    %1103 = arith.mulf %1102, %1101 : vector<16x128xf32>
    %1104 = vector.extract_strided_slice %1087 {offsets = [0, 256], sizes = [16, 128], strides = [1, 1]} : vector<16x512xf32> to vector<16x128xf32>
    %1105 = math.tanh %1104 : vector<16x128xf32>
    %1106 = vector.extract_strided_slice %1087 {offsets = [0, 384], sizes = [16, 128], strides = [1, 1]} : vector<16x512xf32> to vector<16x128xf32>
    %cst_431 = arith.constant 5.000000e-01 : f32
    %1107 = vector.broadcast %cst_431 : f32 to vector<16x128xf32>
    %1108 = arith.mulf %1107, %1106 : vector<16x128xf32>
    %1109 = math.tanh %1108 : vector<16x128xf32>
    %cst_432 = arith.constant 1.000000e+00 : f32
    %1110 = vector.broadcast %cst_432 : f32 to vector<16x128xf32>
    %1111 = arith.addf %1109, %1110 : vector<16x128xf32>
    %cst_433 = arith.constant 5.000000e-01 : f32
    %1112 = vector.broadcast %cst_433 : f32 to vector<16x128xf32>
    %1113 = arith.mulf %1112, %1111 : vector<16x128xf32>
    %1114 = arith.mulf %1103, %1074 : vector<16x128xf32>
    %1115 = arith.mulf %1095, %1105 : vector<16x128xf32>
    %1116 = arith.addf %1114, %1115 : vector<16x128xf32>
    %1117 = math.tanh %1116 : vector<16x128xf32>
    %1118 = arith.mulf %1113, %1117 : vector<16x128xf32>
    %1119 = arith.truncf %1118 : vector<16x128xf32> to vector<16x128xbf16>
    %1120 = arith.index_cast %c7_i32_421 : i32 to index
    %c0_434 = arith.constant 0 : index
    %c0_435 = arith.constant 0 : index
    %1121 = vector.load %arg8[%1120, %c0_434, %c0_435] : memref<8x16x128xbf16, #tpu.memory_space<vmem>>, vector<1x16x128xbf16>
    %1122 = vector.shape_cast %1121 : vector<1x16x128xbf16> to vector<16x128xbf16>
    %1123 = vector.shape_cast %1119 : vector<16x128xbf16> to vector<1x16x128xbf16>
    tpu.vector_store %arg8[%1120, %c0_434, %c0_435], %1123 {strides = array<i32>} : memref<8x16x128xbf16, #tpu.memory_space<vmem>>, vector<1x16x128xbf16>,
    %c8_i32_436 = arith.constant 8 : i32
    %c0_437 = arith.constant 0 : index
    %c0_438 = arith.constant 0 : index
    %c0_439 = arith.constant 0 : index
    %1124 = vector.load %arg1[%c0_437, %c0_438, %c0_439] : memref<16x8x128xf32, #tpu.memory_space<vmem>>, vector<16x1x128xf32>
    %1125 = vector.shape_cast %1124 : vector<16x1x128xf32> to vector<16x128xf32>
    %c0_440 = arith.constant 0 : index
    %c0_441 = arith.constant 0 : index
    %c0_442 = arith.constant 0 : index
    %1126 = vector.load %arg8[%c0_440, %c0_441, %c0_442] : memref<8x16x128xbf16, #tpu.memory_space<vmem>>, vector<1x16x128xbf16>
    %1127 = vector.shape_cast %1126 : vector<1x16x128xbf16> to vector<16x128xbf16>
    %1128 = arith.extf %1127 : vector<16x128xbf16> to vector<16x128xf32>
    %1129 = arith.addf %1125, %1128 : vector<16x128xf32>
    %c0_443 = arith.constant 0 : index
    %c0_444 = arith.constant 0 : index
    %c0_445 = arith.constant 0 : index
    %1130 = vector.load %arg7[%c0_443, %c0_444, %c0_445] : memref<16x8x128xf32, #tpu.memory_space<vmem>>, vector<16x1x128xf32>
    %1131 = vector.shape_cast %1130 : vector<16x1x128xf32> to vector<16x128xf32>
    %1132 = vector.shape_cast %1129 : vector<16x128xf32> to vector<16x1x128xf32>
    tpu.vector_store %arg7[%c0_443, %c0_444, %c0_445], %1132 {strides = array<i32>} : memref<16x8x128xf32, #tpu.memory_space<vmem>>, vector<16x1x128xf32>,
    %c0_446 = arith.constant 0 : index
    %c1_447 = arith.constant 1 : index
    %c0_448 = arith.constant 0 : index
    %1133 = vector.load %arg1[%c0_446, %c1_447, %c0_448] : memref<16x8x128xf32, #tpu.memory_space<vmem>>, vector<16x1x128xf32>
    %1134 = vector.shape_cast %1133 : vector<16x1x128xf32> to vector<16x128xf32>
    %c1_449 = arith.constant 1 : index
    %c0_450 = arith.constant 0 : index
    %c0_451 = arith.constant 0 : index
    %1135 = vector.load %arg8[%c1_449, %c0_450, %c0_451] : memref<8x16x128xbf16, #tpu.memory_space<vmem>>, vector<1x16x128xbf16>
    %1136 = vector.shape_cast %1135 : vector<1x16x128xbf16> to vector<16x128xbf16>
    %1137 = arith.extf %1136 : vector<16x128xbf16> to vector<16x128xf32>
    %1138 = arith.addf %1134, %1137 : vector<16x128xf32>
    %c0_452 = arith.constant 0 : index
    %c1_453 = arith.constant 1 : index
    %c0_454 = arith.constant 0 : index
    %1139 = vector.load %arg7[%c0_452, %c1_453, %c0_454] : memref<16x8x128xf32, #tpu.memory_space<vmem>>, vector<16x1x128xf32>
    %1140 = vector.shape_cast %1139 : vector<16x1x128xf32> to vector<16x128xf32>
    %1141 = vector.shape_cast %1138 : vector<16x128xf32> to vector<16x1x128xf32>
    tpu.vector_store %arg7[%c0_452, %c1_453, %c0_454], %1141 {strides = array<i32>} : memref<16x8x128xf32, #tpu.memory_space<vmem>>, vector<16x1x128xf32>,
    %c0_455 = arith.constant 0 : index
    %c2_456 = arith.constant 2 : index
    %c0_457 = arith.constant 0 : index
    %1142 = vector.load %arg1[%c0_455, %c2_456, %c0_457] : memref<16x8x128xf32, #tpu.memory_space<vmem>>, vector<16x1x128xf32>
    %1143 = vector.shape_cast %1142 : vector<16x1x128xf32> to vector<16x128xf32>
    %c2_458 = arith.constant 2 : index
    %c0_459 = arith.constant 0 : index
    %c0_460 = arith.constant 0 : index
    %1144 = vector.load %arg8[%c2_458, %c0_459, %c0_460] : memref<8x16x128xbf16, #tpu.memory_space<vmem>>, vector<1x16x128xbf16>
    %1145 = vector.shape_cast %1144 : vector<1x16x128xbf16> to vector<16x128xbf16>
    %1146 = arith.extf %1145 : vector<16x128xbf16> to vector<16x128xf32>
    %1147 = arith.addf %1143, %1146 : vector<16x128xf32>
    %c0_461 = arith.constant 0 : index
    %c2_462 = arith.constant 2 : index
    %c0_463 = arith.constant 0 : index
    %1148 = vector.load %arg7[%c0_461, %c2_462, %c0_463] : memref<16x8x128xf32, #tpu.memory_space<vmem>>, vector<16x1x128xf32>
    %1149 = vector.shape_cast %1148 : vector<16x1x128xf32> to vector<16x128xf32>
    %1150 = vector.shape_cast %1147 : vector<16x128xf32> to vector<16x1x128xf32>
    tpu.vector_store %arg7[%c0_461, %c2_462, %c0_463], %1150 {strides = array<i32>} : memref<16x8x128xf32, #tpu.memory_space<vmem>>, vector<16x1x128xf32>,
    %c0_464 = arith.constant 0 : index
    %c3_465 = arith.constant 3 : index
    %c0_466 = arith.constant 0 : index
    %1151 = vector.load %arg1[%c0_464, %c3_465, %c0_466] : memref<16x8x128xf32, #tpu.memory_space<vmem>>, vector<16x1x128xf32>
    %1152 = vector.shape_cast %1151 : vector<16x1x128xf32> to vector<16x128xf32>
    %c3_467 = arith.constant 3 : index
    %c0_468 = arith.constant 0 : index
    %c0_469 = arith.constant 0 : index
    %1153 = vector.load %arg8[%c3_467, %c0_468, %c0_469] : memref<8x16x128xbf16, #tpu.memory_space<vmem>>, vector<1x16x128xbf16>
    %1154 = vector.shape_cast %1153 : vector<1x16x128xbf16> to vector<16x128xbf16>
    %1155 = arith.extf %1154 : vector<16x128xbf16> to vector<16x128xf32>
    %1156 = arith.addf %1152, %1155 : vector<16x128xf32>
    %c0_470 = arith.constant 0 : index
    %c3_471 = arith.constant 3 : index
    %c0_472 = arith.constant 0 : index
    %1157 = vector.load %arg7[%c0_470, %c3_471, %c0_472] : memref<16x8x128xf32, #tpu.memory_space<vmem>>, vector<16x1x128xf32>
    %1158 = vector.shape_cast %1157 : vector<16x1x128xf32> to vector<16x128xf32>
    %1159 = vector.shape_cast %1156 : vector<16x128xf32> to vector<16x1x128xf32>
    tpu.vector_store %arg7[%c0_470, %c3_471, %c0_472], %1159 {strides = array<i32>} : memref<16x8x128xf32, #tpu.memory_space<vmem>>, vector<16x1x128xf32>,
    %c0_473 = arith.constant 0 : index
    %c4_474 = arith.constant 4 : index
    %c0_475 = arith.constant 0 : index
    %1160 = vector.load %arg1[%c0_473, %c4_474, %c0_475] : memref<16x8x128xf32, #tpu.memory_space<vmem>>, vector<16x1x128xf32>
    %1161 = vector.shape_cast %1160 : vector<16x1x128xf32> to vector<16x128xf32>
    %c4_476 = arith.constant 4 : index
    %c0_477 = arith.constant 0 : index
    %c0_478 = arith.constant 0 : index
    %1162 = vector.load %arg8[%c4_476, %c0_477, %c0_478] : memref<8x16x128xbf16, #tpu.memory_space<vmem>>, vector<1x16x128xbf16>
    %1163 = vector.shape_cast %1162 : vector<1x16x128xbf16> to vector<16x128xbf16>
    %1164 = arith.extf %1163 : vector<16x128xbf16> to vector<16x128xf32>
    %1165 = arith.addf %1161, %1164 : vector<16x128xf32>
    %c0_479 = arith.constant 0 : index
    %c4_480 = arith.constant 4 : index
    %c0_481 = arith.constant 0 : index
    %1166 = vector.load %arg7[%c0_479, %c4_480, %c0_481] : memref<16x8x128xf32, #tpu.memory_space<vmem>>, vector<16x1x128xf32>
    %1167 = vector.shape_cast %1166 : vector<16x1x128xf32> to vector<16x128xf32>
    %1168 = vector.shape_cast %1165 : vector<16x128xf32> to vector<16x1x128xf32>
    tpu.vector_store %arg7[%c0_479, %c4_480, %c0_481], %1168 {strides = array<i32>} : memref<16x8x128xf32, #tpu.memory_space<vmem>>, vector<16x1x128xf32>,
    %c0_482 = arith.constant 0 : index
    %c5_483 = arith.constant 5 : index
    %c0_484 = arith.constant 0 : index
    %1169 = vector.load %arg1[%c0_482, %c5_483, %c0_484] : memref<16x8x128xf32, #tpu.memory_space<vmem>>, vector<16x1x128xf32>
    %1170 = vector.shape_cast %1169 : vector<16x1x128xf32> to vector<16x128xf32>
    %c5_485 = arith.constant 5 : index
    %c0_486 = arith.constant 0 : index
    %c0_487 = arith.constant 0 : index
    %1171 = vector.load %arg8[%c5_485, %c0_486, %c0_487] : memref<8x16x128xbf16, #tpu.memory_space<vmem>>, vector<1x16x128xbf16>
    %1172 = vector.shape_cast %1171 : vector<1x16x128xbf16> to vector<16x128xbf16>
    %1173 = arith.extf %1172 : vector<16x128xbf16> to vector<16x128xf32>
    %1174 = arith.addf %1170, %1173 : vector<16x128xf32>
    %c0_488 = arith.constant 0 : index
    %c5_489 = arith.constant 5 : index
    %c0_490 = arith.constant 0 : index
    %1175 = vector.load %arg7[%c0_488, %c5_489, %c0_490] : memref<16x8x128xf32, #tpu.memory_space<vmem>>, vector<16x1x128xf32>
    %1176 = vector.shape_cast %1175 : vector<16x1x128xf32> to vector<16x128xf32>
    %1177 = vector.shape_cast %1174 : vector<16x128xf32> to vector<16x1x128xf32>
    tpu.vector_store %arg7[%c0_488, %c5_489, %c0_490], %1177 {strides = array<i32>} : memref<16x8x128xf32, #tpu.memory_space<vmem>>, vector<16x1x128xf32>,
    %c0_491 = arith.constant 0 : index
    %c6_492 = arith.constant 6 : index
    %c0_493 = arith.constant 0 : index
    %1178 = vector.load %arg1[%c0_491, %c6_492, %c0_493] : memref<16x8x128xf32, #tpu.memory_space<vmem>>, vector<16x1x128xf32>
    %1179 = vector.shape_cast %1178 : vector<16x1x128xf32> to vector<16x128xf32>
    %c6_494 = arith.constant 6 : index
    %c0_495 = arith.constant 0 : index
    %c0_496 = arith.constant 0 : index
    %1180 = vector.load %arg8[%c6_494, %c0_495, %c0_496] : memref<8x16x128xbf16, #tpu.memory_space<vmem>>, vector<1x16x128xbf16>
    %1181 = vector.shape_cast %1180 : vector<1x16x128xbf16> to vector<16x128xbf16>
    %1182 = arith.extf %1181 : vector<16x128xbf16> to vector<16x128xf32>
    %1183 = arith.addf %1179, %1182 : vector<16x128xf32>
    %c0_497 = arith.constant 0 : index
    %c6_498 = arith.constant 6 : index
    %c0_499 = arith.constant 0 : index
    %1184 = vector.load %arg7[%c0_497, %c6_498, %c0_499] : memref<16x8x128xf32, #tpu.memory_space<vmem>>, vector<16x1x128xf32>
    %1185 = vector.shape_cast %1184 : vector<16x1x128xf32> to vector<16x128xf32>
    %1186 = vector.shape_cast %1183 : vector<16x128xf32> to vector<16x1x128xf32>
    tpu.vector_store %arg7[%c0_497, %c6_498, %c0_499], %1186 {strides = array<i32>} : memref<16x8x128xf32, #tpu.memory_space<vmem>>, vector<16x1x128xf32>,
    %c0_500 = arith.constant 0 : index
    %c7_501 = arith.constant 7 : index
    %c0_502 = arith.constant 0 : index
    %1187 = vector.load %arg1[%c0_500, %c7_501, %c0_502] : memref<16x8x128xf32, #tpu.memory_space<vmem>>, vector<16x1x128xf32>
    %1188 = vector.shape_cast %1187 : vector<16x1x128xf32> to vector<16x128xf32>
    %c7_503 = arith.constant 7 : index
    %c0_504 = arith.constant 0 : index
    %c0_505 = arith.constant 0 : index
    %1189 = vector.load %arg8[%c7_503, %c0_504, %c0_505] : memref<8x16x128xbf16, #tpu.memory_space<vmem>>, vector<1x16x128xbf16>
    %1190 = vector.shape_cast %1189 : vector<1x16x128xbf16> to vector<16x128xbf16>
    %1191 = arith.extf %1190 : vector<16x128xbf16> to vector<16x128xf32>
    %1192 = arith.addf %1188, %1191 : vector<16x128xf32>
    %c0_506 = arith.constant 0 : index
    %c7_507 = arith.constant 7 : index
    %c0_508 = arith.constant 0 : index
    %1193 = vector.load %arg7[%c0_506, %c7_507, %c0_508] : memref<16x8x128xf32, #tpu.memory_space<vmem>>, vector<16x1x128xf32>
    %1194 = vector.shape_cast %1193 : vector<16x1x128xf32> to vector<16x128xf32>
    %1195 = vector.shape_cast %1192 : vector<16x128xf32> to vector<16x1x128xf32>
    tpu.vector_store %arg7[%c0_506, %c7_507, %c0_508], %1195 {strides = array<i32>} : memref<16x8x128xf32, #tpu.memory_space<vmem>>, vector<16x1x128xf32>,
    return
  }
  func.func @transform_0(%arg0: i32) -> (i32, i32, i32) {
    %c0_i32 = arith.constant 0 : i32
    %c0_i32_0 = arith.constant 0 : i32
    %c0_i32_1 = arith.constant 0 : i32
    return %arg0, %c0_i32, %c0_i32_0 : i32, i32, i32
  }
  func.func @transform_1(%arg0: i32) -> (i32, i32, i32) {
    %c0_i32 = arith.constant 0 : i32
    %c0_i32_0 = arith.constant 0 : i32
    %c0_i32_1 = arith.constant 0 : i32
    %c0_i32_2 = arith.constant 0 : i32
    return %c0_i32, %c0_i32_0, %c0_i32_1 : i32, i32, i32
  }
  func.func @transform_2(%arg0: i32) -> (i32, i32, i32) {
    %c0_i32 = arith.constant 0 : i32
    %c0_i32_0 = arith.constant 0 : i32
    %c0_i32_1 = arith.constant 0 : i32
    %c0_i32_2 = arith.constant 0 : i32
    return %c0_i32, %c0_i32_0, %c0_i32_1 : i32, i32, i32
  }
  func.func @transform_3(%arg0: i32) -> (i32, i32, i32) {
    %c0_i32 = arith.constant 0 : i32
    %c0_i32_0 = arith.constant 0 : i32
    %c0_i32_1 = arith.constant 0 : i32
    %c0_i32_2 = arith.constant 0 : i32
    return %c0_i32, %c0_i32_0, %c0_i32_1 : i32, i32, i32
  }
  func.func @transform_4(%arg0: i32) -> (i32, i32, i32) {
    %c0_i32 = arith.constant 0 : i32
    %c0_i32_0 = arith.constant 0 : i32
    %c0_i32_1 = arith.constant 0 : i32
    %c0_i32_2 = arith.constant 0 : i32
    return %c0_i32, %c0_i32_0, %c0_i32_1 : i32, i32, i32
  }
  func.func @transform_5(%arg0: i32) -> (i32, i32, i32) {
    %c0_i32 = arith.constant 0 : i32
    %c0_i32_0 = arith.constant 0 : i32
    %c0_i32_1 = arith.constant 0 : i32
    %c0_i32_2 = arith.constant 0 : i32
    return %c0_i32, %c0_i32_0, %c0_i32_1 : i32, i32, i32
  }
  func.func @transform_6(%arg0: i32) -> (i32, i32, i32) {
    %c0_i32 = arith.constant 0 : i32
    %c0_i32_0 = arith.constant 0 : i32
    %c0_i32_1 = arith.constant 0 : i32
    return %arg0, %c0_i32, %c0_i32_0 : i32, i32, i32
  }
}

</mosaic_0001>

<bundles_post_ra>
// kernel: lstm_module_forward.1
= control target key start
LH: loop header
LB: loop body
LE: loop exit
PB: predicated region body
PF: predicated region fallthrough
CT: control target
= control target key end

     0   :  { %vm312_vm0 = vcmask 1041409   ;;  %vm315_vm1 = vcmask 1042434   ;;  %vm318_vm2 = vcmask 1043459   ;;  %vm321_vm3 = vcmask 1044484   ;;  %s12235_s0 = inlined_call_operand.vmem [shape: f32[16,8,128], index: 0, kind: input, shape index: {}]   ;;  %s12236_s3 = inlined_call_operand.vmem [shape: bf16[3,128,512], index: 3, kind: input, shape index: {}]   ;;  %s12237_s4 = inlined_call_operand.vmem [shape: bf16[3,128,512], index: 4, kind: input, shape index: {}]   ;;  %s12238_s1 = inlined_call_operand.vmem [shape: f32[1,1,128], index: 1, kind: input, shape index: {}]   ;;  %s12239_s2 = inlined_call_operand.vmem [shape: f32[1,1,128], index: 2, kind: input, shape index: {}]   ;;  %s12240_s5 = inlined_call_operand.vmem [shape: f32[3,1,512], index: 5, kind: input, shape index: {}]   ;;  %s12241_s6 = inlined_call_operand.vmem [shape: f32[16,8,128], index: 6, kind: output, shape index: {}]  }
   0x1   :  { %v25_v0 = vld [vmem:[%s12235_s0 + $0x8] sm:$0xff]  ;;  %v26_v1 = vld [vmem:[%s12235_s0 + $0x10] sm:$0xff]  ;;  %v24_v4 = vld [vmem:[%s12235_s0] sm:$0xff]  ;;  %vm324_vm4 = vcmask 1045509   ;;  %vm327_vm5 = vcmask 1046534   ;;  %vm330_vm6 = vcmask 1047559  }
   0x2   :  { %42 = vadd.xlane.f32.xlu0 %v25_v0  ;;  %44 = vadd.xlane.f32.xlu1 %v26_v1  ;;  %v33_v2 = vld [vmem:[%s12235_s0 + $0x48] sm:$0xff]  ;;  %v34_v3 = vld [vmem:[%s12235_s0 + $0x50] sm:$0xff]  ;;  %v27_v5 = vld [vmem:[%s12235_s0 + $0x18] sm:$0xff] }
   0x3   :  { %v32_v6 = vld [vmem:[%s12235_s0 + $0x40] sm:$0xff]  ;;  %v35_v7 = vld [vmem:[%s12235_s0 + $0x58] sm:$0xff]  ;;  %v29_v10 = vld [vmem:[%s12235_s0 + $0x28] sm:$0xff] }
   0x4   :  { %v28_v8 = vld [vmem:[%s12235_s0 + $0x20] sm:$0xff]  ;;  %v8405_v11 = vld [vmem:[%s12235_s0 + $0x68] sm:$0xff]  ;;  %v8411_v12 = vld [vmem:[%s12235_s0 + $0x30] sm:$0xff] }
   0x5   :  { %v36_v9 = vld [vmem:[%s12235_s0 + $0x60] sm:$0xff]  ;;  %v8416_v13 = vld [vmem:[%s12235_s0 + $0x70] sm:$0xff]  ;;  %v8423_v14 = vld [vmem:[%s12235_s0 + $0x38] sm:$0xff] }
   0x6   :  { %58 = vadd.xlane.f32.xlu0 %v33_v2  ;;  %60 = vadd.xlane.f32.xlu1 %v34_v3  ;;  %v8428_v15 = vld [vmem:[%s12235_s0 + $0x78] sm:$0xff] }
   0xa   :  { %40 = vadd.xlane.f32.xlu0 %v24_v4  ;;  %46 = vadd.xlane.f32.xlu1 %v27_v5 }
   0xe   :  { %56 = vadd.xlane.f32.xlu0 %v32_v6  ;;  %62 = vadd.xlane.f32.xlu1 %v35_v7 }
  0x12   :  { %48 = vadd.xlane.f32.xlu0 %v28_v8  ;;  %64 = vadd.xlane.f32.xlu1 %v36_v9 }
  0x16   :  { %50 = vadd.xlane.f32.xlu0 %v29_v10  ;;  %66 = vadd.xlane.f32.xlu1 %v8405_v11 }
  0x1a   :  { %52 = vadd.xlane.f32.xlu0 %v8411_v12  ;;  %68 = vadd.xlane.f32.xlu1 %v8416_v13 }
  0x1e   :  { %54 = vadd.xlane.f32.xlu0 %v8423_v14  ;;  %70 = vadd.xlane.f32.xlu1 %v8428_v15 }
  0x8f   :  { %v43_v16 = vpop.xlane.xlu0 %42  ;;  %v45_v17 = vpop.xlane.xlu1 %44 }
  0x90   :  { %v74_v18 = vmul.f32 0.0078125, %v43_v16  ;;  %v75_v19 = vmul.f32 0.0078125, %v45_v17 }
  0x92   :  { %v8432_v20 = vsub.f32 %v25_v0, %v74_v18  ;;  %v8434_v21 = vsub.f32 %v26_v1, %v75_v19  ;;  %v7438_v18 = vld [vmem:[%s12236_s3 + $0xc] ss:$16 sps:$4 sm:$0xff]   ;;  %v7440_v19 = vld [vmem:[%s12236_s3 + $0x8] ss:$16 sps:$4 sm:$0xff]  }
  0x93   :  { %v59_v22 = vpop.xlane.xlu0 %58  ;;  %v61_v23 = vpop.xlane.xlu1 %60  ;;  %940 = vmatprep.subr.bf16.mxu1 %v7438_v18 }
  0x94   :  { %v82_v24 = vmul.f32 0.0078125, %v59_v22  ;;  %v106_v25 = vmul.f32 %v8432_v20, %v8432_v20  ;;  %v83_v26 = vmul.f32 0.0078125, %v61_v23  ;;  %v107_v29 = vmul.f32 %v8434_v21, %v8434_v21  ;;  %v7441_v22 = vld [vmem:[%s12236_s3 + $0x24] ss:$16 sps:$4 sm:$0xff]   ;;  %v7444_v23 = vld [vmem:[%s12236_s3 + $0x2c] ss:$16 sps:$4 sm:$0xff]   ;;  %941 = vmatpush1.bf16.msra.mxu1 %v7440_v19 }
  0x95   :  { %942 = vmatprep.subr.bf16.mxu1 %v7444_v23 }
  0x96   :  { %v8438_v27 = vsub.f32 %v33_v2, %v82_v24  ;;  %123 = vadd.xlane.f32.xlu0 %v106_v25  ;;  %v8440_v28 = vsub.f32 %v34_v3, %v83_v26  ;;  %v7443_v24 = vld [vmem:[%s12236_s3 + $0x20] ss:$16 sps:$4 sm:$0xff]   ;;  %v7446_v25 = vld [vmem:[%s12236_s3 + $0x28] ss:$16 sps:$4 sm:$0xff]   ;;  %v7447_v26 = vld [vmem:[%s12236_s3 + $0x44] ss:$16 sps:$4 sm:$0xff]  }
  0x97   :  { %v41_v30 = vpop.xlane.xlu0 %40  ;;  %v47_v31 = vpop.xlane.xlu1 %46 }
  0x98   :  { %v73_v32 = vmul.f32 0.0078125, %v41_v30  ;;  %v114_v33 = vmul.f32 %v8438_v27, %v8438_v27  ;;  %v76_v34 = vmul.f32 0.0078125, %v47_v31  ;;  %v115_v37 = vmul.f32 %v8440_v28, %v8440_v28  ;;  %943 = vmatpush1.bf16.msra.mxu1 %v7446_v25  ;;  %v7449_v30 = vld [vmem:[%s12236_s3 + $0x40] ss:$16 sps:$4 sm:$0xff]   ;;  %v7452_v31 = vld [vmem:[%s12236_s3 + $0x48] ss:$16 sps:$4 sm:$0xff]  }
  0x9a   :  { %v8446_v35 = vsub.f32 %v24_v4, %v73_v32  ;;  %139 = vadd.xlane.f32.xlu1 %v114_v33  ;;  %125 = vadd.xlane.f32.xlu0 %v107_v29  ;;  %v8448_v36 = vsub.f32 %v27_v5, %v76_v34  ;;  %v7450_v29 = vld [vmem:[%s12236_s3 + $0x4c] ss:$16 sps:$4 sm:$0xff]   ;;  %v7453_v32 = vld [vmem:[%s12236_s3 + $0x64] ss:$16 sps:$4 sm:$0xff]   ;;  %v7455_v34 = vld [vmem:[%s12236_s3 + $0x60] ss:$16 sps:$4 sm:$0xff]  }
  0x9b   :  { %v57_v38 = vpop.xlane.xlu0 %56  ;;  %v63_v39 = vpop.xlane.xlu1 %62  ;;  %944 = vmatprep.subr.bf16.mxu1 %v7450_v29  ;;  %v7456_v33 = vld [vmem:[%s12236_s3 + $0x6c] ss:$16 sps:$4 sm:$0xff]  }
  0x9c   :  { %v81_v40 = vmul.f32 0.0078125, %v57_v38  ;;  %v105_v41 = vmul.f32 %v8446_v35, %v8446_v35  ;;  %v84_v42 = vmul.f32 0.0078125, %v63_v39  ;;  %v108_v45 = vmul.f32 %v8448_v36, %v8448_v36  ;;  %945 = vmatpush1.bf16.msra.mxu1 %v7452_v31  ;;  %v7459_v38 = vld [vmem:[%s12236_s3 + $0x84] ss:$16 sps:$4 sm:$0xff]   ;;  %v7462_v39 = vld [vmem:[%s12236_s3 + $0x8c] ss:$16 sps:$4 sm:$0xff]  }
  0x9d   :  { %946 = vmatprep.subr.bf16.mxu1 %v7456_v33 }
  0x9e   :  { %v8454_v43 = vsub.f32 %v32_v6, %v81_v40  ;;  %141 = vadd.xlane.f32.xlu1 %v115_v37  ;;  %121 = vadd.xlane.f32.xlu0 %v105_v41  ;;  %v8456_v44 = vsub.f32 %v35_v7, %v84_v42  ;;  %v7458_v37 = vld [vmem:[%s12236_s3 + $0x68] ss:$16 sps:$4 sm:$0xff]   ;;  %v7461_v40 = vld [vmem:[%s12236_s3 + $0x80] ss:$16 sps:$4 sm:$0xff]   ;;  %v7465_v42 = vld [vmem:[%s12236_s3 + $0xa4] ss:$16 sps:$4 sm:$0xff]  }
  0x9f   :  { %v49_v46 = vpop.xlane.xlu0 %48  ;;  %v65_v47 = vpop.xlane.xlu1 %64  ;;  %v7464_v41 = vld [vmem:[%s12236_s3 + $0x88] ss:$16 sps:$4 sm:$0xff]  }
  0xa0   :  { %v77_v48 = vmul.f32 0.0078125, %v49_v46  ;;  %v113_v49 = vmul.f32 %v8454_v43, %v8454_v43  ;;  %v85_v50 = vmul.f32 0.0078125, %v65_v47  ;;  %v116_v53 = vmul.f32 %v8456_v44, %v8456_v44  ;;  %947 = vmatpush1.bf16.msra.mxu1 %v7458_v37  ;;  %v7467_v46 = vld [vmem:[%s12236_s3 + $0xa0] ss:$16 sps:$4 sm:$0xff]   ;;  %v7470_v47 = vld [vmem:[%s12236_s3 + $0xa8] ss:$16 sps:$4 sm:$0xff]  }
  0xa1   :  { %948 = vmatprep.subr.bf16.mxu1 %v7462_v39 }
  0xa2   :  { %v8462_v51 = vsub.f32 %v28_v8, %v77_v48  ;;  %127 = vadd.xlane.f32.xlu1 %v108_v45  ;;  %137 = vadd.xlane.f32.xlu0 %v113_v49  ;;  %v8464_v52 = vsub.f32 %v36_v9, %v85_v50  ;;  %v7468_v45 = vld [vmem:[%s12236_s3 + $0xac] ss:$16 sps:$4 sm:$0xff]   ;;  %v7471_v48 = vld [vmem:[%s12236_s3 + $0xc4] ss:$16 sps:$4 sm:$0xff]   ;;  %v7473_v50 = vld [vmem:[%s12236_s3 + $0xc0] ss:$16 sps:$4 sm:$0xff]  }
  0xa3   :  { %v51_v54 = vpop.xlane.xlu0 %50  ;;  %v67_v55 = vpop.xlane.xlu1 %66  ;;  %v7474_v49 = vld [vmem:[%s12236_s3 + $0xcc] ss:$16 sps:$4 sm:$0xff]  }
  0xa4   :  { %v78_v56 = vmul.f32 0.0078125, %v51_v54  ;;  %v109_v57 = vmul.f32 %v8462_v51, %v8462_v51  ;;  %v86_v58 = vmul.f32 0.0078125, %v67_v55  ;;  %v117_v61 = vmul.f32 %v8464_v52, %v8464_v52  ;;  %949 = vmatpush1.bf16.msra.mxu1 %v7464_v41  ;;  %v7477_v54 = vld [vmem:[%s12236_s3 + $0xe4] ss:$16 sps:$4 sm:$0xff]   ;;  %v7479_v55 = vld [vmem:[%s12236_s3 + $0xe0] ss:$16 sps:$4 sm:$0xff]  }
  0xa5   :  { %950 = vmatprep.subr.bf16.mxu1 %v7468_v45  ;;  %v8609_v45 = vld [vmem:[%s12238_s1] ss:$0 sm:$0xff] }
  0xa6   :  { %v8470_v59 = vsub.f32 %v29_v10, %v78_v56  ;;  %143 = vadd.xlane.f32.xlu1 %v116_v53  ;;  %129 = vadd.xlane.f32.xlu0 %v109_v57  ;;  %v8473_v60 = vsub.f32 %v8405_v11, %v86_v58  ;;  %v7476_v53 = vld [vmem:[%s12236_s3 + $0xc8] ss:$16 sps:$4 sm:$0xff]   ;;  %v7480_v56 = vld [vmem:[%s12236_s3 + $0xec] ss:$16 sps:$4 sm:$0xff]   ;;  %v12244_v58 = vmov 0  }
  0xa7   :  { %v53_v62 = vpop.xlane.xlu0 %52  ;;  %v69_v63 = vpop.xlane.xlu1 %68  ;;  %v7482_v57 = vld [vmem:[%s12236_s3 + $0xe8] ss:$16 sps:$4 sm:$0xff]   ;;  %859 = vmatprep.mubr.bf16.mxu0 %v12244_v58  ;;  %972 = vmatprep.mubr.bf16.mxu1 %v12244_v58 }
  0xa8   :  { %v79_v0 = vmul.f32 0.0078125, %v53_v62  ;;  %v110_v1 = vmul.f32 %v8470_v59, %v8470_v59  ;;  %v87_v2 = vmul.f32 0.0078125, %v69_v63  ;;  %v118_v5 = vmul.f32 %v8473_v60, %v8473_v60  ;;  %951 = vmatpush1.bf16.msra.mxu1 %v7470_v47  ;;  %v7486_v62 = vld [vmem:[%s12237_s4 + $0xc] ss:$16 sps:$4 sm:$0xff]  }
  0xa9   :  { %952 = vmatprep.subr.bf16.mxu1 %v7474_v49 }
  0xaa   :  { %v8480_v3 = vsub.f32 %v8411_v12, %v79_v0  ;;  %145 = vadd.xlane.f32.xlu1 %v117_v61  ;;  %131 = vadd.xlane.f32.xlu0 %v110_v1  ;;  %v8483_v4 = vsub.f32 %v8416_v13, %v87_v2  ;;  %v7483_v61 = vld [vmem:[%s12237_s4 + $0x4] ss:$16 sps:$4 sm:$0xff]  }
  0xab   :  { %v55_v6 = vpop.xlane.xlu0 %54  ;;  %v71_v7 = vpop.xlane.xlu1 %70 }
  0xac   :  { %v80_v8 = vmul.f32 0.0078125, %v55_v6  ;;  %v111_v9 = vmul.f32 %v8480_v3, %v8480_v3  ;;  %v88_v10 = vmul.f32 0.0078125, %v71_v7  ;;  %v119_v13 = vmul.f32 %v8483_v4, %v8483_v4  ;;  %953 = vmatpush1.bf16.msra.mxu1 %v7476_v53 }
  0xad   :  { %954 = vmatprep.subr.bf16.mxu1 %v7480_v56 }
  0xae   :  { %v8490_v11 = vsub.f32 %v8423_v14, %v80_v8  ;;  %147 = vadd.xlane.f32.xlu1 %v118_v5  ;;  %133 = vadd.xlane.f32.xlu0 %v111_v9  ;;  %v8493_v12 = vsub.f32 %v8428_v15, %v88_v10  ;;  %v7435_v14 = vld [vmem:[%s12236_s3 + $0x4] ss:$16 sps:$4 sm:$0xff]   ;;  %v7437_v15 = vld [vmem:[%s12236_s3] ss:$16 sps:$4 sm:$0xff]  }
  0xaf   :  { %827 = vmatprep.subr.bf16.mxu0 %v7435_v14 }
  0xb0   :  { %v112_v16 = vmul.f32 %v8490_v11, %v8490_v11  ;;  %v120_v17 = vmul.f32 %v8493_v12, %v8493_v12  ;;  %828 = vmatpush1.bf16.msra.mxu0 %v7437_v15  ;;  %955 = vmatpush1.bf16.msra.mxu1 %v7482_v57 }
  0xb1   :  { %829 = vmatprep.subr.bf16.mxu0 %v7441_v22  ;;  %1328 = vmatprep.subr.bf16.mxu1 %v7486_v62 }
  0xb2   :  { %149 = vadd.xlane.f32.xlu1 %v119_v13  ;;  %135 = vadd.xlane.f32.xlu0 %v112_v16 }
  0xb4   :  { %830 = vmatpush1.bf16.msra.mxu0 %v7443_v24 }
  0xb5   :  { %831 = vmatprep.subr.bf16.mxu0 %v7447_v26 }
  0xb6   :  { %151 = vadd.xlane.f32.xlu1 %v120_v17 }
  0xb8   :  { %832 = vmatpush1.bf16.msra.mxu0 %v7449_v30 }
  0xb9   :  { %833 = vmatprep.subr.bf16.mxu0 %v7453_v32 }
  0xbc   :  { %834 = vmatpush1.bf16.msra.mxu0 %v7455_v34 }
  0xbd   :  { %835 = vmatprep.subr.bf16.mxu0 %v7459_v38 }
  0xc0   :  { %836 = vmatpush1.bf16.msra.mxu0 %v7461_v40 }
  0xc1   :  { %837 = vmatprep.subr.bf16.mxu0 %v7465_v42 }
  0xc4   :  { %838 = vmatpush1.bf16.msra.mxu0 %v7467_v46 }
  0xc5   :  { %839 = vmatprep.subr.bf16.mxu0 %v7471_v48 }
  0xc8   :  { %840 = vmatpush1.bf16.msra.mxu0 %v7473_v50 }
  0xc9   :  { %841 = vmatprep.subr.bf16.mxu0 %v7477_v54 }
  0xcc   :  { %842 = vmatpush1.bf16.msra.mxu0 %v7479_v55 }
  0xcd   :  { %1285 = vmatprep.subr.bf16.mxu0 %v7483_v61  ;;  %v8617_v61 = vld [vmem:[%s12239_s2] ss:$0 sm:$0xff] }
 0x123   :  { %v124_v63 = vpop.xlane.xlu0 %123 }
 0x124   :  { %v154_v0 = vmul.f32 0.0078125, %v124_v63 }
 0x126   :  { %v170_v1 = vadd.f32 1e-05, %v154_v0 }
 0x127   :  { %v140_v2 = vpop.xlane.xlu1 %139  ;;  %v126_v5 = vpop.xlane.xlu0 %125 }
 0x128   :  { %v162_v6 = vmul.f32 0.0078125, %v140_v2  ;;  %v155_v7 = vmul.f32 0.0078125, %v126_v5  ;;  %7723 = vrsqrt.f32 %v170_v1 }
 0x12a   :  { %v171_v8 = vadd.f32 1e-05, %v155_v7  ;;  %v178_v13 = vadd.f32 1e-05, %v162_v6 }
 0x12b   :  { %v142_v9 = vpop.xlane.xlu1 %141  ;;  %v122_v10 = vpop.xlane.xlu0 %121 }
 0x12c   :  { %v163_v16 = vmul.f32 0.0078125, %v142_v9  ;;  %v153_v17 = vmul.f32 0.0078125, %v122_v10  ;;  %7725 = vrsqrt.f32 %v171_v8 }
 0x12d   :  { %7727 = vrsqrt.f32 %v178_v13 }
 0x12e   :  { %v169_v14 = vadd.f32 1e-05, %v153_v17  ;;  %v179_v15 = vadd.f32 1e-05, %v163_v16 }
 0x12f   :  { %v128_v18 = vpop.xlane.xlu1 %127  ;;  %v138_v19 = vpop.xlane.xlu0 %137 }
 0x130   :  { %v156_v22 = vmul.f32 0.0078125, %v128_v18  ;;  %v161_v23 = vmul.f32 0.0078125, %v138_v19  ;;  %7729 = vrsqrt.f32 %v169_v14 }
 0x131   :  { %7731 = vrsqrt.f32 %v179_v15 }
 0x132   :  { %v172_v24 = vadd.f32 1e-05, %v156_v22  ;;  %v177_v25 = vadd.f32 1e-05, %v161_v23  ;;  %v7724_v32 = vpop.eup %7723 }
 0x133   :  { %v144_v26 = vpop.xlane.xlu1 %143  ;;  %v130_v29 = vpop.xlane.xlu0 %129  ;;  %v202_v40 = vmul.f32 %v7724_v32, %v8432_v20 }
 0x134   :  { %7733 = vrsqrt.f32 %v172_v24  ;;  %v164_v30 = vmul.f32 0.0078125, %v144_v26  ;;  %v157_v31 = vmul.f32 0.0078125, %v130_v29 }
 0x135   :  { %7735 = vrsqrt.f32 %v177_v25  ;;  %v225_v55 = vmul.f32 %v8609_v45, %v202_v40 }
 0x136   :  { %v180_v33 = vadd.f32 1e-05, %v164_v30  ;;  %v173_v34 = vadd.f32 1e-05, %v157_v31  ;;  %v7726_v37 = vpop.eup %7725 }
 0x137   :  { %v146_v38 = vpop.xlane.xlu1 %145  ;;  %v132_v39 = vpop.xlane.xlu0 %131  ;;  %v203_v47 = vmul.f32 %v7726_v37, %v8434_v21  ;;  %v248_v9 = vadd.f32 %v8617_v61, %v225_v55 }
 0x138   :  { %7737 = vrsqrt.f32 %v180_v33  ;;  %v165_v41 = vmul.f32 0.0078125, %v146_v38  ;;  %v158_v42 = vmul.f32 0.0078125, %v132_v39  ;;  %v7728_v46 = vpop.eup %7727 }
 0x139   :  { %7739 = vrsqrt.f32 %v173_v34  ;;  %v210_v62 = vmul.f32 %v7728_v46, %v8438_v27  ;;  %v226_v0 = vmul.f32 %v8609_v45, %v203_v47  ;;  %v264_v24 = vpack.c.bf16 %v248_v9, %v248_v9 }
 0x13a   :  { %v181_v48 = vadd.f32 1e-05, %v165_v41  ;;  %v174_v49 = vadd.f32 1e-05, %v158_v42  ;;  %v7730_v50 = vpop.eup %7729 }
 0x13b   :  { %v148_v53 = vpop.xlane.xlu1 %147  ;;  %v134_v54 = vpop.xlane.xlu0 %133  ;;  %v201_v20 = vmul.f32 %v7730_v50, %v8446_v35  ;;  %v233_v27 = vmul.f32 %v8609_v45, %v210_v62  ;;  %v249_v14 = vadd.f32 %v8617_v61, %v226_v0  ;;  %v8639_v41 = vunpack.c.l.b16 %v264_v24 }
 0x13c   :  { %7741 = vrsqrt.f32 %v181_v48  ;;  %v166_v56 = vmul.f32 0.0078125, %v148_v53  ;;  %v7732_v57 = vpop.eup %7731  ;;  %v159_v21 = vmul.f32 0.0078125, %v134_v54 }
 0x13d   :  { %7743 = vrsqrt.f32 %v174_v49  ;;  %v224_v1 = vmul.f32 %v8609_v45, %v201_v20  ;;  %v211_v10 = vmul.f32 %v7732_v57, %v8440_v28  ;;  %v256_v29 = vadd.f32 %v8617_v61, %v233_v27 }
 0x13e   :  { %v7734_v63 = vpop.eup %7733  ;;  %v182_v2 = vadd.f32 1e-05, %v166_v56  ;;  %v175_v6 = vadd.f32 1e-05, %v159_v21  ;;  %v265_v33 = vpack.c.bf16 %v249_v14, %v249_v14  ;;  %v311_v0 = vrot.slane %v8639_v41, 7 }
 0x13f   :  { %v7736_v5 = vpop.eup %7735  ;;  %v204_v35 = vmul.f32 %v7734_v63, %v8448_v36  ;;  %v150_v7 = vpop.xlane.xlu1 %149  ;;  %v247_v15 = vadd.f32 %v8617_v61, %v224_v1  ;;  %v234_v25 = vmul.f32 %v8609_v45, %v211_v10  ;;  %v272_v50 = vpack.c.bf16 %v256_v29, %v256_v29 }
 0x140   :  { %v136_v8 = vpop.xlane.xlu0 %135  ;;  %7745 = vrsqrt.f32 %v182_v2  ;;  %v209_v13 = vmul.f32 %v7736_v5, %v8454_v43  ;;  %v167_v16 = vmul.f32 0.0078125, %v150_v7  ;;  %v8648_v20 = vunpack.c.l.b16 %v265_v33 }
 0x141   :  { %7747 = vrsqrt.f32 %v175_v6  ;;  %v227_v36 = vmul.f32 %v8609_v45, %v204_v35  ;;  %v160_v18 = vmul.f32 0.0078125, %v136_v8  ;;  %v263_v34 = vpack.c.bf16 %v247_v15, %v247_v15 }
 0x142   :  { %v7738_v17 = vpop.eup %7737  ;;  %v183_v23 = vadd.f32 1e-05, %v167_v16  ;;  %v232_v30 = vmul.f32 %v8609_v45, %v209_v13  ;;  %v257_v42 = vadd.f32 %v8617_v61, %v234_v25  ;;  %v8658_v35 = vunpack.c.l.b16 %v272_v50 }
 0x143   :  { %v7740_v19 = vpop.eup %7739  ;;  %v212_v22 = vmul.f32 %v7738_v17, %v8456_v44  ;;  %v152_v28 = vpop.xlane.xlu1 %151  ;;  %v176_v26 = vadd.f32 1e-05, %v160_v18  ;;  %v250_v37 = vadd.f32 %v8617_v61, %v227_v36  ;;  %v8645_v53 = vunpack.c.l.b16 %v263_v34 }
 0x144   :  { %v205_v43 = vmul.f32 %v7740_v19, %v8462_v51  ;;  %7749 = vrsqrt.f32 %v183_v23  ;;  %v168_v31 = vmul.f32 0.0078125, %v152_v28  ;;  %v255_v47 = vadd.f32 %v8617_v61, %v232_v30 }
 0x145   :  { %7751 = vrsqrt.f32 %v176_v26  ;;  %v235_v38 = vmul.f32 %v8609_v45, %v212_v22  ;;  %v266_v54 = vpack.c.bf16 %v250_v37, %v250_v37  ;;  %v273_v62 = vpack.c.bf16 %v257_v42, %v257_v42 }
 0x146   :  { %v7742_v32 = vpop.eup %7741  ;;  %v228_v39 = vmul.f32 %v8609_v45, %v205_v43  ;;  %v184_v40 = vadd.f32 1e-05, %v168_v31  ;;  %v271_v1 = vpack.c.bf16 %v255_v47, %v255_v47  ;;  %v314_v27 = vrot.slane %v8648_v20, 6 }
 0x147   :  { %v7744_v44 = vpop.eup %7743  ;;  %v213_v51 = vmul.f32 %v7742_v32, %v8464_v52  ;;  %v258_v56 = vadd.f32 %v8617_v61, %v235_v38  ;;  %v8660_v6 = vunpack.c.l.b16 %v266_v54  ;;  %v8667_v16 = vunpack.c.l.b16 %v273_v62 }
 0x148   :  { %v206_v46 = vmul.f32 %v7744_v44, %v8470_v59  ;;  %7753 = vrsqrt.f32 %v184_v40  ;;  %v251_v59 = vadd.f32 %v8617_v61, %v228_v39  ;;  %v8671_v36 = vunpack.c.l.b16 %v271_v1 }
 0x149   :  { %v236_v48 = vmul.f32 %v8609_v45, %v213_v51  ;;  %v274_v9 = vpack.c.bf16 %v258_v56, %v258_v56  ;;  %v317_v24 = vrot.slane %v8660_v6, 5  ;;  %v332_v25 = vrot.slane %v8658_v35, 7 }
 0x14a   :  { %v7746_v49 = vpop.eup %7745  ;;  %v229_v52 = vmul.f32 %v8609_v45, %v206_v46  ;;  %v334_v33 = vrot.slane %v8667_v16, 6  ;;  %v349_v38 = vrot.slane %v8645_v53, 1 }
 0x14b   :  { %v7748_v55 = vpop.eup %7747  ;;  %v214_v57 = vmul.f32 %v7746_v49, %v8473_v60  ;;  %v259_v21 = vadd.f32 %v8617_v61, %v236_v48  ;;  %v313_v60 = vsel %vm312_vm0, %v311_v0, %v8645_v53  ;;  %v8678_v26 = vunpack.c.l.b16 %v274_v9 }
 0x14c   :  { %v207_v63 = vmul.f32 %v7748_v55, %v8480_v3  ;;  %v252_v2 = vadd.f32 %v8617_v61, %v229_v52  ;;  %v267_v3 = vpack.c.bf16 %v251_v59, %v251_v59  ;;  %v316_v22 = vsel %vm315_vm1, %v314_v27, %v313_v60 }
 0x14d   :  { %v237_v5 = vmul.f32 %v8609_v45, %v214_v57  ;;  %v275_v17 = vpack.c.bf16 %v259_v21, %v259_v21  ;;  %v333_v44 = vsel %vm312_vm0, %v332_v25, %v8671_v36  ;;  %v319_v42 = vsel %vm318_vm2, %v317_v24, %v316_v22  ;;  %v8743_v25 = vld [vmem:[%s12237_s4] ss:$16 sps:$4 sm:$0xff]  }
 0x14e   :  { %v230_v7 = vmul.f32 %v8609_v45, %v207_v63  ;;  %v7750_v8 = vpop.eup %7749  ;;  %v268_v18 = vpack.c.bf16 %v252_v2, %v252_v2  ;;  %v8680_v29 = vunpack.c.l.b16 %v267_v3  ;;  %v336_v48 = vrot.slane %v8678_v26, 5 }
 0x14f   :  { %v260_v10 = vadd.f32 %v8617_v61, %v237_v5  ;;  %v7752_v13 = vpop.eup %7751  ;;  %v215_v15 = vmul.f32 %v7750_v8, %v8483_v4  ;;  %v8683_v31 = vunpack.c.l.b16 %v275_v17  ;;  %v335_v54 = vsel %vm315_vm1, %v334_v33, %v333_v44  ;;  %v8758_v44 = vld [vmem:[%s12237_s4 + $0x8] ss:$16 sps:$4 sm:$0xff]  }
 0x150   :  { %v253_v14 = vadd.f32 %v8617_v61, %v230_v7  ;;  %v208_v19 = vmul.f32 %v7752_v13, %v8490_v11  ;;  %v8688_v34 = vunpack.c.l.b16 %v268_v18  ;;  %v320_v47 = vrot.slane %v8680_v29, 4 }
 0x151   :  { %v276_v23 = vpack.c.bf16 %v260_v10, %v260_v10  ;;  %v238_v28 = vmul.f32 %v8609_v45, %v215_v15  ;;  %v338_v52 = vrot.slane %v8683_v31, 4  ;;  %v350_v56 = vsel %vm312_vm0, %v8639_v41, %v349_v38 }
 0x152   :  { %v7754_v43 = vpop.eup %7753  ;;  %v269_v4 = vpack.c.bf16 %v253_v14, %v253_v14  ;;  %v231_v30 = vmul.f32 %v8609_v45, %v208_v19  ;;  %v323_v55 = vrot.slane %v8688_v34, 3  ;;  %v353_v59 = vrot.slane %v8660_v6, 6 }
 0x153   :  { %v261_v11 = vadd.f32 %v8617_v61, %v238_v28  ;;  %v216_v32 = vmul.f32 %v7754_v43, %v8493_v12  ;;  %v8694_v39 = vunpack.c.l.b16 %v276_v23  ;;  %v351_v21 = vrot.slane %v8648_v20, 7 }
 0x154   :  { %v254_v37 = vadd.f32 %v8617_v61, %v231_v30  ;;  %v8698_v12 = vunpack.c.l.b16 %v269_v4  ;;  %v322_v63 = vsel %vm321_vm3, %v320_v47, %v319_v42  ;;  %v337_v1 = vsel %vm318_vm2, %v336_v48, %v335_v54  ;;  %v8769_v48 = vld [vmem:[%s12237_s4 + $0x2c] ss:$16 sps:$4 sm:$0xff]  }
 0x155   :  { %v277_v51 = vpack.c.bf16 %v261_v11, %v261_v11  ;;  %v239_v40 = vmul.f32 %v8609_v45, %v216_v32  ;;  %v340_v62 = vrot.slane %v8694_v39, 3  ;;  %v339_v60 = vsel %vm321_vm3, %v338_v52, %v337_v1  ;;  %v8750_v11 = vld [vmem:[%s12237_s4 + $0x24] ss:$16 sps:$4 sm:$0xff]  }
 0x156   :  { %v270_v46 = vpack.c.bf16 %v254_v37, %v254_v37  ;;  %v326_v0 = vrot.slane %v8698_v12, 2  ;;  %v352_v8 = vsel %vm315_vm1, %v351_v21, %v350_v56  ;;  %v325_v9 = vsel %vm324_vm4, %v323_v55, %v322_v63  ;;  %v8779_v55 = vld [vmem:[%s12237_s4 + $0x20] ss:$16 sps:$4 sm:$0xff]   ;;  %v8797_v63 = vld [vmem:[%s12237_s4 + $0x28] ss:$16 sps:$4 sm:$0xff]  }
 0x157   :  { %v8702_v49 = vunpack.c.l.b16 %v277_v51  ;;  %v262_v50 = vadd.f32 %v8617_v61, %v239_v40  ;;  %v363_v61 = vrot.slane %v8671_v36, 1  ;;  %v354_v3 = vsel %vm318_vm2, %v353_v59, %v352_v8 }
 0x158   :  { %v8707_v45 = vunpack.c.l.b16 %v270_v46  ;;  %v355_v10 = vrot.slane %v8680_v29, 5  ;;  %v357_v27 = vrot.slane %v8688_v34, 4  ;;  %v341_v13 = vsel %vm324_vm4, %v340_v62, %v339_v60  ;;  %v8789_v62 = vld [vmem:[%s12237_s4 + $0x44] ss:$16 sps:$4 sm:$0xff]  }
 0x159   :  { %v278_v57 = vpack.c.bf16 %v262_v50, %v262_v50  ;;  %v342_v2 = vrot.slane %v8702_v49, 2  ;;  %v364_v14 = vsel %vm312_vm0, %v8658_v35, %v363_v61  ;;  %v367_v15 = vrot.slane %v8678_v26, 6 }
 0x15a   :  { %v329_v7 = vrot.slane %v8707_v45, 1  ;;  %v328_v18 = vsel %vm327_vm5, %v326_v0, %v325_v9  ;;  %v365_v22 = vrot.slane %v8667_v16, 7  ;;  %v369_v23 = vrot.slane %v8683_v31, 5 }
 0x15b   :  { %v8720_v5 = vunpack.c.l.b16 %v278_v57  ;;  %v343_v19 = vsel %vm327_vm5, %v342_v2, %v341_v13  ;;  %v359_v43 = vrot.slane %v8698_v12, 3  ;;  %v371_v4 = vrot.slane %v8694_v39, 4 }
 0x15c   :  { %v331_v28 = vsel %vm330_vm6, %v329_v7, %v328_v18  ;;  %v361_v32 = vrot.slane %v8707_v45, 2  ;;  %v366_v33 = vsel %vm315_vm1, %v365_v22, %v364_v14  ;;  %v373_v37 = vrot.slane %v8702_v49, 3  ;;  %v8819_v18 = vld [vmem:[%s12237_s4 + $0x40] ss:$16 sps:$4 sm:$0xff]  }
 0x15d   :  { %v344_v17 = vrot.slane %v8720_v5, 1  ;;  %v356_v38 = vsel %vm321_vm3, %v355_v10, %v354_v3  ;;  %v368_v51 = vsel %vm318_vm2, %v367_v15, %v366_v33  ;;  %v375_v40 = vrot.slane %v8720_v5, 2 }
 0x15e   :  { %v395_v42 = vrot.slane %v8671_v36, 2  ;;  %v358_v46 = vsel %vm324_vm4, %v357_v27, %v356_v38  ;;  %v370_v47 = vsel %vm321_vm3, %v369_v23, %v368_v51  ;;  %v381_v50 = vrot.slane %v8645_v53, 2  ;;  %v8850_v51 = vld [vmem:[%s12237_s4 + $0x6c] ss:$16 sps:$4 sm:$0xff]  }
 0x15f   :  { %v345_v24 = vsel %vm330_vm6, %v344_v17, %v343_v19  ;;  %v360_v54 = vsel %vm327_vm5, %v359_v43, %v358_v46  ;;  %v372_v52 = vsel %vm324_vm4, %v371_v4, %v370_v47  ;;  %v396_v56 = vrot.slane %v8658_v35, 1  ;;  %v8824_v19 = vld [vmem:[%s12237_s4 + $0x4c] ss:$16 sps:$4 sm:$0xff]   ;;  %v8835_v43 = vld [vmem:[%s12237_s4 + $0x64] ss:$16 sps:$4 sm:$0xff]  }
 0x160   :  { %v346_v30 = vpack.c.b16 %v345_v24, %v331_v28  ;;  %v362_v59 = vsel %vm330_vm6, %v361_v32, %v360_v54  ;;  %v374_v57 = vsel %vm327_vm5, %v373_v37, %v372_v52  ;;  %v382_v21 = vrot.slane %v8639_v41, 1  ;;  %v8840_v4 = vld [vmem:[%s12237_s4 + $0x48] ss:$16 sps:$4 sm:$0xff]  }
 0x161   :  { %v376_v61 = vsel %vm330_vm6, %v375_v40, %v374_v57  ;;  %v385_v0 = vrot.slane %v8660_v6, 7  ;;  %v397_v1 = vsel %vm312_vm0, %v396_v56, %v395_v42  ;;  %v399_v2 = vrot.slane %v8678_v26, 7  ;;  %v8866_v56 = vld [vmem:[%s12237_s4 + $0x60] ss:$16 sps:$4 sm:$0xff]  }
 0x162   :  { %860 = vmatmul.mubr.bf16.vlgmr.msra.gmra.mrb[0].mxu0 %v346_v30  ;;  %973 = vmatmul.mubr.bf16.vlgmr.msra.gmra.mrb[0].mxu1 %v346_v30  ;;  %v383_v7 = vsel %vm312_vm0, %v382_v21, %v381_v50  ;;  %v387_v60 = vrot.slane %v8680_v29, 6  ;;  %v401_v8 = vrot.slane %v8683_v31, 6  ;;  %v413_v9 = vrot.slane %v8645_v53, 3 }
 0x163   :  { %1286 = vmatpush1.bf16.msra.mxu0 %v8743_v25  ;;  %869 = vmatprep.mubr.bf16.mxu0 %v12244_v58  ;;  %v389_v3 = vrot.slane %v8688_v34, 5  ;;  %v391_v10 = vrot.slane %v8698_v12, 4  ;;  %v403_v27 = vrot.slane %v8694_v39, 5  ;;  %v427_v13 = vrot.slane %v8671_v36, 3 }
 0x164   :  { %982 = vmatprep.mubr.bf16.mxu1 %v12244_v58  ;;  %1287 = vmatprep.subr.bf16.mxu0 %v8750_v11  ;;  %v377_v17 = vpack.c.b16 %v376_v61, %v362_v59  ;;  %v398_v14 = vsel %vm315_vm1, %v8667_v16, %v397_v1  ;;  %v405_v15 = vrot.slane %v8702_v49, 4  ;;  %v414_v22 = vrot.slane %v8639_v41, 2  ;;  %v8876_v61 = vld [vmem:[%s12237_s4 + $0x84] ss:$16 sps:$4 sm:$0xff]  }
 0x165   :  { %1329 = vmatpush1.bf16.msra.mxu1 %v8758_v44  ;;  %v384_v23 = vsel %vm315_vm1, %v8648_v20, %v383_v7  ;;  %v400_v28 = vsel %vm318_vm2, %v399_v2, %v398_v14  ;;  %v407_v24 = vrot.slane %v8720_v5, 3  ;;  %v428_v30 = vrot.slane %v8658_v35, 2 }
 0x166   :  { %1330 = vmatprep.subr.bf16.mxu1 %v8769_v48  ;;  %v386_v32 = vsel %vm318_vm2, %v385_v0, %v384_v23  ;;  %v393_v33 = vrot.slane %v8707_v45, 3  ;;  %v402_v37 = vsel %vm321_vm3, %v401_v8, %v400_v28  ;;  %v415_v38 = vsel %vm312_vm0, %v414_v22, %v413_v9  ;;  %v8881_v0 = vld [vmem:[%s12237_s4 + $0x68] ss:$16 sps:$4 sm:$0xff]   ;;  %v8905_v22 = vld [vmem:[%s12237_s4 + $0x8c] ss:$16 sps:$4 sm:$0xff]  }
 0x167   :  { %1288 = vmatpush1.bf16.msra.mxu0 %v8779_v55  ;;  %v388_v40 = vsel %vm321_vm3, %v387_v60, %v386_v32  ;;  %v404_v42 = vsel %vm324_vm4, %v403_v27, %v402_v37  ;;  %v416_v46 = vrot.slane %v8648_v20, 1  ;;  %v429_v47 = vsel %vm312_vm0, %v428_v30, %v427_v13  ;;  %v8895_v27 = vld [vmem:[%s12237_s4 + $0x80] ss:$16 sps:$4 sm:$0xff]   ;;  %v8910_v23 = vld [vmem:[%s12237_s4 + $0xa4] ss:$16 sps:$4 sm:$0xff]  }
 0x168   :  { %1289 = vmatprep.subr.bf16.mxu0 %v8789_v62  ;;  %v390_v50 = vsel %vm324_vm4, %v389_v3, %v388_v40  ;;  %v406_v54 = vsel %vm327_vm5, %v405_v15, %v404_v42  ;;  %v430_v52 = vrot.slane %v8667_v16, 1  ;;  %v419_v2 = vrot.slane %v8680_v29, 7 }
 0x169   :  { %1331 = vmatpush1.bf16.msra.mxu1 %v8797_v63  ;;  %v392_v59 = vsel %vm327_vm5, %v391_v10, %v390_v50  ;;  %v408_v57 = vsel %vm330_vm6, %v407_v24, %v406_v54  ;;  %v417_v21 = vsel %vm315_vm1, %v416_v46, %v415_v38  ;;  %v433_v60 = vrot.slane %v8683_v31, 7  ;;  %v8931_v46 = vld [vmem:[%s12237_s4 + $0xac] ss:$16 sps:$4 sm:$0xff]  }
 0x16a   :  { %870 = vmatmul.mubr.bf16.gmra.mrb[4].mxu0 %v377_v17  ;;  %983 = vmatmul.mubr.bf16.gmra.mrb[4].mxu1 %v377_v17  ;;  %v394_v1 = vsel %vm330_vm6, %v393_v33, %v392_v59  ;;  %v431_v7 = vsel %vm315_vm1, %v430_v52, %v429_v47  ;;  %v421_v8 = vrot.slane %v8688_v34, 6  ;;  %v435_v9 = vrot.slane %v8694_v39, 6  ;;  %v8922_v33 = vld [vmem:[%s12237_s4 + $0x88] ss:$16 sps:$4 sm:$0xff]  }
 0x16b   :  { %879 = vmatprep.mubr.bf16.mxu0 %v12244_v58  ;;  %992 = vmatprep.mubr.bf16.mxu1 %v12244_v58  ;;  %v445_v3 = vrot.slane %v8645_v53, 4  ;;  %v459_v10 = vrot.slane %v8671_v36, 4  ;;  %v409_v13 = vpack.c.b16 %v408_v57, %v394_v1  ;;  %v418_v17 = vsel %vm318_vm2, %v8660_v6, %v417_v21 }
 0x16c   :  { %1290 = vmatpush1.bf16.msra.mxu0 %v8819_v18  ;;  %1332 = vmatprep.subr.bf16.mxu1 %v8824_v19  ;;  %v423_v14 = vrot.slane %v8698_v12, 5  ;;  %v437_v15 = vrot.slane %v8702_v49, 5  ;;  %v432_v28 = vsel %vm318_vm2, %v8678_v26, %v431_v7  ;;  %v439_v24 = vrot.slane %v8720_v5, 4 }
 0x16d   :  { %1291 = vmatprep.subr.bf16.mxu0 %v8835_v43  ;;  %1333 = vmatpush1.bf16.msra.mxu1 %v8840_v4  ;;  %v446_v30 = vrot.slane %v8639_v41, 3  ;;  %v460_v32 = vrot.slane %v8658_v35, 3  ;;  %v420_v37 = vsel %vm321_vm3, %v419_v2, %v418_v17  ;;  %v425_v38 = vrot.slane %v8707_v45, 4  ;;  %v8948_v2 = vld [vmem:[%s12237_s4 + $0xa0] ss:$16 sps:$4 sm:$0xff]  }
 0x16e   :  { %1334 = vmatprep.subr.bf16.mxu1 %v8850_v51  ;;  %v434_v40 = vsel %vm321_vm3, %v433_v60, %v432_v28  ;;  %v450_v42 = vrot.slane %v8660_v6, 1  ;;  %v464_v52 = vrot.slane %v8678_v26, 1  ;;  %v422_v59 = vsel %vm324_vm4, %v421_v8, %v420_v37  ;;  %v8957_v8 = vld [vmem:[%s12237_s4 + $0xc4] ss:$16 sps:$4 sm:$0xff]  }
 0x16f   :  { %v436_v47 = vsel %vm324_vm4, %v435_v9, %v434_v40  ;;  %v447_v50 = vsel %vm312_vm0, %v446_v30, %v445_v3  ;;  %v461_v54 = vsel %vm312_vm0, %v460_v32, %v459_v10  ;;  %v448_v21 = vrot.slane %v8648_v20, 2  ;;  %12324 = vst [vmem:[#allocation4_spill] sm:$0xff] %v8957_v8  ;;  %v8962_v9 = vld [vmem:[%s12237_s4 + $0xa8] ss:$16 sps:$4 sm:$0xff]   ;;  %v8976_v30 = vld [vmem:[%s12237_s4 + $0xc0] ss:$16 sps:$4 sm:$0xff]  }
 0x170   :  { %1292 = vmatpush1.bf16.msra.mxu0 %v8866_v56  ;;  %v438_v57 = vsel %vm327_vm5, %v437_v15, %v436_v47  ;;  %v462_v1 = vrot.slane %v8667_v16, 2  ;;  %v424_v7 = vsel %vm327_vm5, %v423_v14, %v422_v59  ;;  %v467_v28 = vrot.slane %v8694_v39, 7  ;;  %12325 = vst [vmem:[#allocation5_spill] sm:$0xff] %v8976_v30  ;;  %v8984_v40 = vld [vmem:[%s12237_s4 + $0xcc] ss:$16 sps:$4 sm:$0xff]  }
 0x171   :  { %1293 = vmatprep.subr.bf16.mxu0 %v8876_v61  ;;  %1335 = vmatpush1.bf16.msra.mxu1 %v8881_v0  ;;  %v440_v60 = vsel %vm330_vm6, %v439_v24, %v438_v57  ;;  %v426_v3 = vsel %vm330_vm6, %v425_v38, %v424_v7  ;;  %v449_v10 = vsel %vm315_vm1, %v448_v21, %v447_v50  ;;  %v491_v24 = vrot.slane %v8671_v36, 5  ;;  %v9010_v7 = vld [vmem:[%s12237_s4 + $0xec] ss:$16 sps:$4 sm:$0xff]  }
 0x172   :  { %880 = vmatmul.mubr.bf16.gmra.mrb[8].mxu0 %v409_v13  ;;  %993 = vmatmul.mubr.bf16.gmra.mrb[8].mxu1 %v409_v13  ;;  %v453_v13 = vrot.slane %v8688_v34, 7  ;;  %v463_v17 = vsel %vm315_vm1, %v462_v1, %v461_v54  ;;  %v451_v14 = vsel %vm318_vm2, %v450_v42, %v449_v10  ;;  %v441_v32 = vpack.c.b16 %v440_v60, %v426_v3  ;;  %v8989_v42 = vld [vmem:[%s12237_s4 + $0xe4] ss:$16 sps:$4 sm:$0xff]  }
 0x173   :  { %889 = vmatprep.mubr.bf16.mxu0 %v12244_v58  ;;  %1002 = vmatprep.mubr.bf16.mxu1 %v12244_v58  ;;  %v465_v15 = vsel %vm318_vm2, %v464_v52, %v463_v17  ;;  %v469_v37 = vrot.slane %v8702_v49, 6  ;;  %v477_v38 = vrot.slane %v8645_v53, 5  ;;  %12326 = vst [vmem:[#allocation6_spill] sm:$0xff] %v8984_v40  ;;  %12327 = vst [vmem:[#allocation7_spill] sm:$0xff] %v8989_v42  ;;  %v455_v47 = vrot.slane %v8698_v12, 6 }
 0x174   :  { %1294 = vmatpush1.bf16.msra.mxu0 %v8895_v27  ;;  %1336 = vmatprep.subr.bf16.mxu1 %v8905_v22  ;;  %v471_v50 = vrot.slane %v8720_v5, 5  ;;  %v492_v54 = vrot.slane %v8658_v35, 4  ;;  %v8999_v52 = vld [vmem:[%s12237_s4 + $0xc8] ss:$16 sps:$4 sm:$0xff]   ;;  %v452_v59 = vsel %vm321_vm3, %v8680_v29, %v451_v14  ;;  %v457_v57 = vrot.slane %v8707_v45, 5  ;;  %12329 = vst [vmem:[#allocation9_spill] sm:$0xff] %v9010_v7 }
 0x175   :  { %1295 = vmatprep.subr.bf16.mxu0 %v8910_v23  ;;  %1337 = vmatpush1.bf16.msra.mxu1 %v8922_v33  ;;  %12328 = vst [vmem:[#allocation8_spill] sm:$0xff] %v8999_v52  ;;  %v466_v21 = vsel %vm321_vm3, %v8683_v31, %v465_v15  ;;  %v478_v1 = vrot.slane %v8639_v41, 4  ;;  %v454_v60 = vsel %vm324_vm4, %v453_v13, %v452_v59  ;;  %v496_v17 = vrot.slane %v8678_v26, 2  ;;  %v9027_v13 = vld [vmem:[%s12237_s4 + $0xe0] ss:$16 sps:$4 sm:$0xff]  }
 0x176   :  { %1338 = vmatprep.subr.bf16.mxu1 %v8931_v46  ;;  %v468_v3 = vsel %vm324_vm4, %v467_v28, %v466_v21  ;;  %v493_v10 = vsel %vm312_vm0, %v492_v54, %v491_v24  ;;  %12330 = vst [vmem:[#allocation10_spill] sm:$0xff] %v9027_v13  ;;  %v456_v28 = vsel %vm327_vm5, %v455_v47, %v454_v60  ;;  %v9038_v54 = vld [vmem:[%s12237_s4 + $0xe8] ss:$16 sps:$4 sm:$0xff]   ;;  %v484_v21 = vrot.slane %v8680_v29, 1 }
 0x177   :  { %v470_v14 = vsel %vm327_vm5, %v469_v37, %v468_v3  ;;  %v479_v15 = vsel %vm312_vm0, %v478_v1, %v477_v38  ;;  %v480_v37 = vrot.slane %v8648_v20, 3  ;;  %v482_v38 = vrot.slane %v8660_v6, 2  ;;  %12331 = vst [vmem:[#allocation11_spill] sm:$0xff] %v9038_v54 }
 0x178   :  { %1296 = vmatpush1.bf16.msra.mxu0 %v8948_v2  ;;  %v472_v24 = vsel %vm330_vm6, %v471_v50, %v470_v14  ;;  %v458_v59 = vsel %vm330_vm6, %v457_v57, %v456_v28  ;;  %v509_v50 = vrot.slane %v8645_v53, 6  ;;  %v487_v60 = vrot.slane %v8698_v12, 7 }
 0x179   :  { %1297 = vmatprep.subr.bf16.mxu0 %v8957_v8  ;;  %1339 = vmatpush1.bf16.msra.mxu1 %v8962_v9  ;;  %v498_v8 = vrot.slane %v8683_v31, 1  ;;  %v481_v1 = vsel %vm315_vm1, %v480_v37, %v479_v15  ;;  %v523_v14 = vrot.slane %v8671_v36, 6  ;;  %v501_v57 = vrot.slane %v8702_v49, 7 }
 0x17a   :  { %890 = vmatmul.mubr.bf16.gmra.mrb[12].mxu0 %v441_v32  ;;  %1003 = vmatmul.mubr.bf16.gmra.mrb[12].mxu1 %v441_v32  ;;  %v494_v32 = vrot.slane %v8667_v16, 3  ;;  %v510_v28 = vrot.slane %v8639_v41, 5  ;;  %v503_v15 = vrot.slane %v8720_v5, 6  ;;  %v524_v37 = vrot.slane %v8658_v35, 5 }
 0x17b   :  { %899 = vmatprep.mubr.bf16.mxu0 %v12244_v58  ;;  %1012 = vmatprep.mubr.bf16.mxu1 %v12244_v58  ;;  %v473_v58 = vpack.c.b16 %v472_v24, %v458_v59  ;;  %v514_v59 = vrot.slane %v8660_v6, 3 }
 0x17c   :  { %1298 = vmatpush1.bf16.msra.mxu0 %v8976_v30  ;;  %1340 = vmatprep.subr.bf16.mxu1 %v8984_v40  ;;  %v495_v47 = vsel %vm315_vm1, %v494_v32, %v493_v10  ;;  %v483_v10 = vsel %vm318_vm2, %v482_v38, %v481_v1  ;;  %v489_v32 = vrot.slane %v8707_v45, 6  ;;  %v511_v24 = vsel %vm312_vm0, %v510_v28, %v509_v50 }
 0x17d   :  { %1299 = vmatprep.subr.bf16.mxu0 %v8989_v42  ;;  %1341 = vmatpush1.bf16.msra.mxu1 %v8999_v52  ;;  %v497_v3 = vsel %vm318_vm2, %v496_v17, %v495_v47  ;;  %v485_v17 = vsel %vm321_vm3, %v484_v21, %v483_v10  ;;  %v512_v38 = vrot.slane %v8648_v20, 4  ;;  %v12333_v47 = vmov 0  }
 0x17e   :  { %1342 = vmatprep.subr.bf16.mxu1 %v9010_v7  ;;  %v499_v42 = vsel %vm321_vm3, %v498_v8, %v497_v3  ;;  %v9061_v8 = vld [vmem:[%s12237_s4 + $0x4] ss:$16 sps:$4 sm:$0xff]   ;;  %v516_v3 = vrot.slane %v8680_v29, 2  ;;  %v518_v50 = vrot.slane %v8688_v34, 1  ;;  %v526_v28 = vrot.slane %v8667_v16, 4 }
 0x17f   :  { %12332 = vst [vmem:[#allocation12_spill] sm:$0xff] %v9061_v8  ;;  %v500_v1 = vsel %vm324_vm4, %v8694_v39, %v499_v42  ;;  %v530_v10 = vrot.slane %v8683_v31, 2  ;;  %v486_v42 = vsel %vm324_vm4, %v8688_v34, %v485_v17  ;;  %v555_v17 = vrot.slane %v8671_v36, 7 }
 0x180   :  { %1300 = vmatpush1.bf16.msra.mxu0 %v9027_v13  ;;  %v502_v21 = vsel %vm327_vm5, %v501_v57, %v500_v1  ;;  %v513_v57 = vsel %vm315_vm1, %v512_v38, %v511_v24  ;;  %v488_v1 = vsel %vm327_vm5, %v487_v60, %v486_v42  ;;  %v535_v60 = vrot.slane %v8720_v5, 7 }
 0x181   :  { %1343 = vmatpush1.bf16.msra.mxu1 %v9038_v54  ;;  %1426 = vmatprep.subr.bf16.mxu0 %v9061_v8  ;;  %v525_v8 = vsel %vm312_vm0, %v524_v37, %v523_v14  ;;  %v9082_v54 = vld [vmem:[%s12237_s4 + $0xc] ss:$16 sps:$4 sm:$0xff]   ;;  %v504_v14 = vsel %vm330_vm6, %v503_v15, %v502_v21  ;;  %v532_v37 = vrot.slane %v8694_v39, 1  ;;  %v515_v13 = vsel %vm318_vm2, %v514_v59, %v513_v57 }
 0x182   :  { %900 = vmatmul.mubr.bf16.gmra.mrb[16].mxu0 %v473_v58  ;;  %1013 = vmatmul.mubr.bf16.gmra.mrb[16].mxu1 %v473_v58  ;;  %v528_v58 = vrot.slane %v8678_v26, 3  ;;  %12334 = vst [vmem:[#allocation13_spill] sm:$0xff] %v9082_v54  ;;  %v527_v7 = vsel %vm315_vm1, %v526_v28, %v525_v8  ;;  %v490_v52 = vsel %vm330_vm6, %v489_v32, %v488_v1  ;;  %v541_v59 = vrot.slane %v8645_v53, 7 }
 0x183   :  { %909 = vmatprep.mubr.bf16.mxu0 %v12333_v47  ;;  %1022 = vmatprep.mubr.bf16.mxu1 %v12333_v47  ;;  %v517_v30 = vsel %vm321_vm3, %v516_v3, %v515_v13  ;;  %v505_v40 = vpack.c.b16 %v504_v14, %v490_v52  ;;  %v556_v8 = vrot.slane %v8658_v35, 6  ;;  %v521_v36 = vrot.slane %v8707_v45, 7 }
 0x184   :  { %1469 = vmatprep.subr.bf16.mxu1 %v9082_v54  ;;  %v529_v54 = vsel %vm318_vm2, %v528_v58, %v527_v7  ;;  %v519_v15 = vsel %vm324_vm4, %v518_v50, %v517_v30  ;;  %v542_v30 = vrot.slane %v8639_v41, 6  ;;  %v560_v7 = vrot.slane %v8678_v26, 4 }
 0x185   :  { %v531_v24 = vsel %vm321_vm3, %v530_v10, %v529_v54  ;;  %v557_v52 = vsel %vm312_vm0, %v556_v8, %v555_v17  ;;  %v520_v13 = vsel %vm327_vm5, %v8698_v12, %v519_v15  ;;  %v558_v35 = vrot.slane %v8667_v16, 5  ;;  %v12337_v17 = vld [vmem:[#allocation5_spill] sm:$0xff]  ;;  %v12338_v15 = vld [vmem:[#allocation8_spill] sm:$0xff] }
 0x186   :  { %v533_v38 = vsel %vm324_vm4, %v532_v37, %v531_v24  ;;  %v543_v32 = vsel %vm312_vm0, %v542_v30, %v541_v59  ;;  %v546_v41 = vrot.slane %v8660_v6, 4  ;;  %v564_v3 = vrot.slane %v8694_v39, 2  ;;  %v12339_v24 = vld [vmem:[#allocation7_spill] sm:$0xff]  ;;  %v12343_v8 = vld [vmem:[#allocation12_spill] sm:$0xff] }
 0x187   :  { %v534_v53 = vsel %vm327_vm5, %v8702_v49, %v533_v38  ;;  %v544_v26 = vrot.slane %v8648_v20, 5  ;;  %v548_v58 = vrot.slane %v8680_v29, 3  ;;  %v559_v21 = vsel %vm315_vm1, %v558_v35, %v557_v52  ;;  %v12340_v38 = vld [vmem:[#allocation9_spill] sm:$0xff]  ;;  %v12342_v59 = vld [vmem:[#allocation11_spill] sm:$0xff] }
 0x188   :  { %v536_v54 = vsel %vm330_vm6, %v535_v60, %v534_v53  ;;  %v566_v50 = vrot.slane %v8702_v49, 1  ;;  %v522_v16 = vsel %vm330_vm6, %v521_v36, %v520_v13  ;;  %v561_v28 = vsel %vm318_vm2, %v560_v7, %v559_v21  ;;  %v12341_v60 = vld [vmem:[#allocation10_spill] sm:$0xff]  ;;  %v637_v13 = vld [vmem:[%s12240_s5] sm:$0xf] }
 0x189   :  { %v537_v10 = vpack.c.b16 %v536_v54, %v522_v16  ;;  %v545_v42 = vsel %vm315_vm1, %v544_v26, %v543_v32  ;;  %v552_v6 = vrot.slane %v8698_v12, 1  ;;  %v12344_v36 = vld [vmem:[#allocation13_spill] sm:$0xff]  ;;  %v647_v30 = vlaneseq }
 0x18a   :  { %910 = vmatmul.mubr.bf16.gmra.mrb[20].mxu0 %v505_v40  ;;  %1023 = vmatmul.mubr.bf16.gmra.mrb[20].mxu1 %v505_v40  ;;  %v562_v40 = vrot.slane %v8683_v31, 3  ;;  %v550_v31 = vrot.slane %v8688_v34, 2  ;;  %v547_v20 = vsel %vm318_vm2, %v546_v41, %v545_v42 }
 0x18b   :  { %919 = vmatprep.mubr.bf16.mxu0 %v12333_v47  ;;  %1032 = vmatprep.mubr.bf16.mxu1 %v12333_v47  ;;  %v549_v49 = vsel %vm321_vm3, %v548_v58, %v547_v20  ;;  %v648_v52 = vshrl.u32 %v647_v30, 7 }
 0x18c   :  { %v563_v39 = vsel %vm321_vm3, %v562_v40, %v561_v28  ;;  %v551_v34 = vsel %vm324_vm4, %v550_v31, %v549_v49 }
 0x18d   :  { %v565_v29 = vsel %vm324_vm4, %v564_v3, %v563_v39  ;;  %v553_v12 = vsel %vm327_vm5, %v552_v6, %v551_v34  ;;  %v9179_v7 = vsub.s32 0, %v648_v52  ;;  %v9184_v53 = vsub.s32 1, %v648_v52 }
 0x18e   :  { %v567_v14 = vsel %vm327_vm5, %v566_v50, %v565_v29  ;;  %v554_v37 = vsel %vm330_vm6, %v8707_v45, %v553_v12  ;;  %v12335_v45 = vld [vmem:[#allocation4_spill] sm:$0xff]  ;;  %v9189_v40 = vsub.s32 2, %v648_v52  ;;  %v9200_v20 = vsub.s32 3, %v648_v52 }
 0x18f   :  { %v568_v57 = vsel %vm330_vm6, %v8720_v5, %v567_v14  ;;  %v12336_v5 = vld [vmem:[#allocation6_spill] sm:$0xff]  ;;  %v9187_v35 = vrot.slane %v637_v13, %v9179_v7  ;;  %v9192_v54 = vrot.slane %v637_v13, %v9184_v53 }
 0x190   :  { %v569_v1 = vpack.c.b16 %v568_v57, %v554_v37  ;;  %12345 = vst [vmem:[#allocation4_spill] sm:$0xff] %v9189_v40  ;;  %v9196_v26 = vrot.slane %v637_v13, %v9189_v40  ;;  %12346 = vst [vmem:[#allocation6_spill] sm:$0xff] %v9200_v20  ;;  %v9205_v12 = vrot.slane %v637_v13, %v9200_v20 }
 0x192   :  { %920 = vmatmul.mubr.bf16.gmra.mrb[24].mxu0 %v537_v10  ;;  %1033 = vmatmul.mubr.bf16.gmra.mrb[24].mxu1 %v537_v10 }
 0x193   :  { %929 = vmatprep.mubr.bf16.mxu0 %v12333_v47  ;;  %1042 = vmatprep.mubr.bf16.mxu1 %v12333_v47 }
 0x19a   :  { %930 = vmatmul.mubr.bf16.gmra.mrb[28].mxu0 %v569_v1  ;;  %1043 = vmatmul.mubr.bf16.gmra.mrb[28].mxu1 %v569_v1 }
 0x19b   :  { %1317 = vmatprep.mubr.bf16.mxu0 %v12333_v47  ;;  %1360 = vmatprep.mubr.bf16.mxu1 %v12333_v47 }
 0x1a2   :  { %1318 = vmatmul.mubr.bf16.vlgmr.msra.gmra.mrb[0].mxu0 %v12333_v47  ;;  %1361 = vmatmul.mubr.bf16.vlgmr.msra.gmra.mrb[0].mxu1 %v12333_v47 }
 0x1a3   :  { %1427 = vmatpush1.bf16.msra.mxu0 %v8743_v25  ;;  %1470 = vmatpush1.bf16.msra.mxu1 %v8758_v44 }
 0x1a4   :  { %1428 = vmatprep.subr.bf16.mxu0 %v8750_v11  ;;  %1471 = vmatprep.subr.bf16.mxu1 %v8769_v48 }
 0x1a5   :  { %1458 = vmatprep.mubr.bf16.mxu0 %v12333_v47  ;;  %1501 = vmatprep.mubr.bf16.mxu1 %v12333_v47 }
 0x1a7   :  { %1429 = vmatpush1.bf16.msra.mxu0 %v8779_v55  ;;  %1472 = vmatpush1.bf16.msra.mxu1 %v8797_v63 }
 0x1a8   :  { %1430 = vmatprep.subr.bf16.mxu0 %v8789_v62  ;;  %1473 = vmatprep.subr.bf16.mxu1 %v8824_v19 }
 0x1ab   :  { %1431 = vmatpush1.bf16.msra.mxu0 %v8819_v18  ;;  %1474 = vmatpush1.bf16.msra.mxu1 %v8840_v4 }
 0x1ac   :  { %1432 = vmatprep.subr.bf16.mxu0 %v8835_v43  ;;  %1475 = vmatprep.subr.bf16.mxu1 %v8850_v51 }
 0x1af   :  { %1433 = vmatpush1.bf16.msra.mxu0 %v8866_v56  ;;  %1476 = vmatpush1.bf16.msra.mxu1 %v8881_v0 }
 0x1b0   :  { %1434 = vmatprep.subr.bf16.mxu0 %v8876_v61  ;;  %1477 = vmatprep.subr.bf16.mxu1 %v8905_v22 }
 0x1b3   :  { %1435 = vmatpush1.bf16.msra.mxu0 %v8895_v27  ;;  %1478 = vmatpush1.bf16.msra.mxu1 %v8922_v33 }
 0x1b4   :  { %1436 = vmatprep.subr.bf16.mxu0 %v8910_v23  ;;  %1479 = vmatprep.subr.bf16.mxu1 %v8931_v46 }
 0x1b7   :  { %1437 = vmatpush1.bf16.msra.mxu0 %v8948_v2  ;;  %1480 = vmatpush1.bf16.msra.mxu1 %v8962_v9 }
 0x1b8   :  { %1438 = vmatprep.subr.bf16.mxu0 %v12335_v45  ;;  %1481 = vmatprep.subr.bf16.mxu1 %v12336_v5 }
 0x1bb   :  { %1439 = vmatpush1.bf16.msra.mxu0 %v12337_v17  ;;  %1482 = vmatpush1.bf16.msra.mxu1 %v12338_v15 }
 0x1bc   :  { %1440 = vmatprep.subr.bf16.mxu0 %v12339_v24  ;;  %1483 = vmatprep.subr.bf16.mxu1 %v12340_v38 }
 0x1bf   :  { %1441 = vmatpush1.bf16.msra.mxu0 %v12341_v60  ;;  %1484 = vmatpush1.bf16.msra.mxu1 %v12342_v59 }
 0x1c0   :  { %1567 = vmatprep.subr.bf16.mxu0 %v12343_v8  ;;  %1610 = vmatprep.subr.bf16.mxu1 %v12344_v36 }
 0x275   :  { %v1319_v32 = vpop.f32.mrb[0].mxu0  ;;  %v1362_v41 = vpop.f32.mrb[0].mxu1 }
 0x276   :  { %v7050_v3 = vadd.f32 %v1319_v32, %v9187_v35  ;;  %v1321_v58 = vpop.f32.mrb[1].mxu0  ;;  %v1364_v21 = vpop.f32.mrb[1].mxu1  ;;  %v7082_v49 = vadd.f32 %v1362_v41, %v9196_v26 }
 0x277   :  { %v7051_v50 = vadd.f32 %v1321_v58, %v9192_v54  ;;  %v1323_v16 = vpop.f32.mrb[2].mxu0  ;;  %v1366_v31 = vpop.f32.mrb[2].mxu1  ;;  %v7083_v37 = vadd.f32 %v1364_v21, %v9205_v12 }
 0x278   :  { %v1379_v28 = vmul.f32 0.5, %v7050_v3  ;;  %v7052_v10 = vadd.f32 %v1323_v16, %v9187_v35  ;;  %v1325_v42 = vpop.f32.mrb[3].mxu0  ;;  %v1368_v6 = vpop.f32.mrb[3].mxu1  ;;  %v7084_v57 = vadd.f32 %v1366_v31, %v9196_v26 }
 0x279   :  { %v1387_v39 = vmul.f32 0.5, %v7051_v50  ;;  %v7053_v29 = vadd.f32 %v1325_v42, %v9192_v54  ;;  %v7085_v1 = vadd.f32 %v1368_v6, %v9205_v12  ;;  %v1397_v41 = vmul.f32 0.5, %v7083_v37 }
 0x27a   :  { %7755 = vtanh.f32 %v1379_v28  ;;  %v1380_v14 = vmul.f32 0.5, %v7052_v10 }
 0x27b   :  { %7757 = vtanh.f32 %v1387_v39  ;;  %v1388_v34 = vmul.f32 0.5, %v7053_v29  ;;  %v1398_v58 = vmul.f32 0.5, %v7085_v1 }
 0x27c   :  { %7759 = vtanh.f32 %v1380_v14 }
 0x27d   :  { %7761 = vtanh.f32 %v7082_v49 }
 0x27e   :  { %7763 = vtanh.f32 %v1388_v34 }
 0x27f   :  { %7765 = vtanh.f32 %v7084_v57 }
 0x280   :  { %7767 = vtanh.f32 %v1397_v41 }
 0x281   :  { %7769 = vtanh.f32 %v1398_v58 }
 0x284   :  { %v7756_v30 = vpop.eup %7755 }
 0x285   :  { %v7758_v52 = vpop.eup %7757  ;;  %v1383_v32 = vadd.f32 1.0, %v7756_v30 }
 0x286   :  { %v1391_v3 = vadd.f32 1.0, %v7758_v52  ;;  %v7760_v50 = vpop.eup %7759 }
 0x287   :  { %v1385_v16 = vmul.f32 0.5, %v1383_v32  ;;  %v7762_v13 = vpop.eup %7761  ;;  %v1384_v10 = vadd.f32 1.0, %v7760_v50 }
 0x288   :  { %v1393_v28 = vmul.f32 0.5, %v1391_v3  ;;  %v7764_v42 = vpop.eup %7763 }
 0x289   :  { %v1407_v31 = vmul.f32 %v7762_v13, %v1385_v16  ;;  %v1386_v29 = vmul.f32 0.5, %v1384_v10  ;;  %v1392_v21 = vadd.f32 1.0, %v7764_v42  ;;  %v7766_v49 = vpop.eup %7765 }
 0x28a   :  { %v1405_v39 = vmul.f32 0.0, %v1393_v28  ;;  %v7768_v1 = vpop.eup %7767 }
 0x28b   :  { %v1394_v14 = vmul.f32 0.5, %v1392_v21  ;;  %v1408_v34 = vmul.f32 %v7766_v49, %v1386_v29  ;;  %v7770_v30 = vpop.eup %7769  ;;  %v1401_v52 = vadd.f32 1.0, %v7768_v1 }
 0x28c   :  { %v9210_v6 = vadd.f32 %v1407_v31, %v1405_v39  ;;  %v1402_v32 = vadd.f32 1.0, %v7770_v30 }
 0x28d   :  { %v1406_v57 = vmul.f32 0.0, %v1394_v14  ;;  %v1403_v3 = vmul.f32 0.5, %v1401_v52 }
 0x28e   :  { %7771 = vtanh.f32 %v9210_v6  ;;  %v1404_v50 = vmul.f32 0.5, %v1402_v32 }
 0x28f   :  { %v9213_v37 = vadd.f32 %v1408_v34, %v1406_v57 }
 0x291   :  { %7773 = vtanh.f32 %v9213_v37 }
 0x298   :  { %v7772_v41 = vpop.eup %7771 }
 0x299   :  { %v1413_v16 = vmul.f32 %v7772_v41, %v1403_v3 }
 0x29b   :  { %v7774_v58 = vpop.eup %7773 }
 0x29c   :  { %v1414_v13 = vmul.f32 %v7774_v58, %v1404_v50 }
 0x29e   :  { %v9216_v28 = vpack.c.bf16 %v1414_v13, %v1413_v16 }
 0x2a0   :  { %1459 = vmatmul.mubr.bf16.vlgmr.msra.gmra.mrb[4].mxu0 %v9216_v28  ;;  %1502 = vmatmul.mubr.bf16.vlgmr.msra.gmra.mrb[4].mxu1 %v9216_v28 }
 0x2a1   :  { %1568 = vmatpush1.bf16.msra.mxu0 %v8743_v25  ;;  %1611 = vmatpush1.bf16.msra.mxu1 %v8758_v44 }
 0x2a2   :  { %1569 = vmatprep.subr.bf16.mxu0 %v8750_v11  ;;  %1612 = vmatprep.subr.bf16.mxu1 %v8769_v48 }
 0x2a3   :  { %1599 = vmatprep.mubr.bf16.mxu0 %v12333_v47  ;;  %1642 = vmatprep.mubr.bf16.mxu1 %v12333_v47 }
 0x2a5   :  { %1570 = vmatpush1.bf16.msra.mxu0 %v8779_v55  ;;  %1613 = vmatpush1.bf16.msra.mxu1 %v8797_v63 }
 0x2a6   :  { %1571 = vmatprep.subr.bf16.mxu0 %v8789_v62  ;;  %1614 = vmatprep.subr.bf16.mxu1 %v8824_v19 }
 0x2a9   :  { %1572 = vmatpush1.bf16.msra.mxu0 %v8819_v18  ;;  %1615 = vmatpush1.bf16.msra.mxu1 %v8840_v4 }
 0x2aa   :  { %1573 = vmatprep.subr.bf16.mxu0 %v8835_v43  ;;  %1616 = vmatprep.subr.bf16.mxu1 %v8850_v51 }
 0x2ad   :  { %1574 = vmatpush1.bf16.msra.mxu0 %v8866_v56  ;;  %1617 = vmatpush1.bf16.msra.mxu1 %v8881_v0 }
 0x2ae   :  { %1575 = vmatprep.subr.bf16.mxu0 %v8876_v61  ;;  %1618 = vmatprep.subr.bf16.mxu1 %v8905_v22 }
 0x2b1   :  { %1576 = vmatpush1.bf16.msra.mxu0 %v8895_v27  ;;  %1619 = vmatpush1.bf16.msra.mxu1 %v8922_v33 }
 0x2b2   :  { %1577 = vmatprep.subr.bf16.mxu0 %v8910_v23  ;;  %1620 = vmatprep.subr.bf16.mxu1 %v8931_v46 }
 0x2b5   :  { %1578 = vmatpush1.bf16.msra.mxu0 %v8948_v2  ;;  %1621 = vmatpush1.bf16.msra.mxu1 %v8962_v9 }
 0x2b6   :  { %1579 = vmatprep.subr.bf16.mxu0 %v12335_v45  ;;  %1622 = vmatprep.subr.bf16.mxu1 %v12336_v5 }
 0x2b9   :  { %1580 = vmatpush1.bf16.msra.mxu0 %v12337_v17  ;;  %1623 = vmatpush1.bf16.msra.mxu1 %v12338_v15 }
 0x2ba   :  { %1581 = vmatprep.subr.bf16.mxu0 %v12339_v24  ;;  %1624 = vmatprep.subr.bf16.mxu1 %v12340_v38 }
 0x2bd   :  { %1582 = vmatpush1.bf16.msra.mxu0 %v12341_v60  ;;  %1625 = vmatpush1.bf16.msra.mxu1 %v12342_v59 }
 0x2be   :  { %1708 = vmatprep.subr.bf16.mxu0 %v12343_v8  ;;  %1751 = vmatprep.subr.bf16.mxu1 %v12344_v36 }
 0x373   :  { %v1460_v10 = vpop.f32.mrb[4].mxu0  ;;  %v1503_v42 = vpop.f32.mrb[4].mxu1 }
 0x374   :  { %v7054_v31 = vadd.f32 %v1460_v10, %v9187_v35  ;;  %v1462_v39 = vpop.f32.mrb[5].mxu0  ;;  %v1505_v29 = vpop.f32.mrb[5].mxu1  ;;  %v7086_v41 = vadd.f32 %v1503_v42, %v9196_v26 }
 0x375   :  { %v7055_v21 = vadd.f32 %v1462_v39, %v9192_v54  ;;  %v1464_v49 = vpop.f32.mrb[6].mxu0  ;;  %v1507_v14 = vpop.f32.mrb[6].mxu1  ;;  %v7087_v16 = vadd.f32 %v1505_v29, %v9205_v12 }
 0x376   :  { %v1520_v34 = vmul.f32 0.5, %v7054_v31  ;;  %v7056_v57 = vadd.f32 %v1464_v49, %v9187_v35  ;;  %v1466_v1 = vpop.f32.mrb[7].mxu0  ;;  %v1509_v30 = vpop.f32.mrb[7].mxu1  ;;  %v7088_v58 = vadd.f32 %v1507_v14, %v9196_v26 }
 0x377   :  { %v1528_v52 = vmul.f32 0.5, %v7055_v21  ;;  %v7057_v32 = vadd.f32 %v1466_v1, %v9192_v54  ;;  %v7089_v13 = vadd.f32 %v1509_v30, %v9205_v12  ;;  %v1538_v21 = vmul.f32 0.5, %v7087_v16 }
 0x378   :  { %7775 = vtanh.f32 %v1520_v34  ;;  %v1521_v3 = vmul.f32 0.5, %v7056_v57 }
 0x379   :  { %7777 = vtanh.f32 %v1528_v52  ;;  %v1529_v50 = vmul.f32 0.5, %v7057_v32  ;;  %v1539_v34 = vmul.f32 0.5, %v7089_v13 }
 0x37a   :  { %7779 = vtanh.f32 %v1521_v3 }
 0x37b   :  { %7781 = vtanh.f32 %v7086_v41 }
 0x37c   :  { %7783 = vtanh.f32 %v1529_v50 }
 0x37d   :  { %7785 = vtanh.f32 %v7088_v58 }
 0x37e   :  { %7787 = vtanh.f32 %v1538_v21 }
 0x37f   :  { %7789 = vtanh.f32 %v1539_v34 }
 0x382   :  { %v7776_v10 = vpop.eup %7775 }
 0x383   :  { %v7778_v31 = vpop.eup %7777  ;;  %v1524_v39 = vadd.f32 1.0, %v7776_v10 }
 0x384   :  { %v1532_v49 = vadd.f32 1.0, %v7778_v31  ;;  %v7780_v42 = vpop.eup %7779 }
 0x385   :  { %v1526_v57 = vmul.f32 0.5, %v1524_v39  ;;  %v7782_v1 = vpop.eup %7781  ;;  %v1525_v32 = vadd.f32 1.0, %v7780_v42 }
 0x386   :  { %v1534_v52 = vmul.f32 0.5, %v1532_v49  ;;  %v7784_v3 = vpop.eup %7783 }
 0x387   :  { %v1548_v14 = vmul.f32 %v7782_v1, %v1526_v57  ;;  %v1527_v29 = vmul.f32 0.5, %v1525_v32  ;;  %v1533_v50 = vadd.f32 1.0, %v7784_v3  ;;  %v7786_v30 = vpop.eup %7785 }
 0x388   :  { %v1546_v41 = vmul.f32 %v1534_v52, %v9210_v6  ;;  %v7788_v39 = vpop.eup %7787 }
 0x389   :  { %v1535_v10 = vmul.f32 0.5, %v1533_v50  ;;  %v1549_v16 = vmul.f32 %v7786_v30, %v1527_v29  ;;  %v7790_v21 = vpop.eup %7789  ;;  %v1542_v49 = vadd.f32 1.0, %v7788_v39 }
 0x38a   :  { %v9263_v58 = vadd.f32 %v1548_v14, %v1546_v41  ;;  %v1543_v6 = vadd.f32 1.0, %v7790_v21 }
 0x38b   :  { %v1547_v13 = vmul.f32 %v1535_v10, %v9213_v37  ;;  %v1544_v57 = vmul.f32 0.5, %v1542_v49 }
 0x38c   :  { %7791 = vtanh.f32 %v9263_v58  ;;  %v1545_v34 = vmul.f32 0.5, %v1543_v6 }
 0x38d   :  { %v9267_v31 = vadd.f32 %v1549_v16, %v1547_v13 }
 0x38f   :  { %7793 = vtanh.f32 %v9267_v31 }
 0x396   :  { %v7792_v42 = vpop.eup %7791 }
 0x397   :  { %v1554_v52 = vmul.f32 %v7792_v42, %v1544_v57 }
 0x399   :  { %v7794_v1 = vpop.eup %7793 }
 0x39a   :  { %v1555_v32 = vmul.f32 %v7794_v1, %v1545_v34 }
 0x39c   :  { %v9270_v3 = vpack.c.bf16 %v1555_v32, %v1554_v52 }
 0x39e   :  { %1600 = vmatmul.mubr.bf16.vlgmr.msra.gmra.mrb[8].mxu0 %v9270_v3  ;;  %1643 = vmatmul.mubr.bf16.vlgmr.msra.gmra.mrb[8].mxu1 %v9270_v3 }
 0x39f   :  { %1709 = vmatpush1.bf16.msra.mxu0 %v8743_v25  ;;  %1752 = vmatpush1.bf16.msra.mxu1 %v8758_v44 }
 0x3a0   :  { %1710 = vmatprep.subr.bf16.mxu0 %v8750_v11  ;;  %1753 = vmatprep.subr.bf16.mxu1 %v8769_v48 }
 0x3a1   :  { %1740 = vmatprep.mubr.bf16.mxu0 %v12333_v47  ;;  %1783 = vmatprep.mubr.bf16.mxu1 %v12333_v47 }
 0x3a3   :  { %1711 = vmatpush1.bf16.msra.mxu0 %v8779_v55  ;;  %1754 = vmatpush1.bf16.msra.mxu1 %v8797_v63 }
 0x3a4   :  { %1712 = vmatprep.subr.bf16.mxu0 %v8789_v62  ;;  %1755 = vmatprep.subr.bf16.mxu1 %v8824_v19 }
 0x3a7   :  { %1713 = vmatpush1.bf16.msra.mxu0 %v8819_v18  ;;  %1756 = vmatpush1.bf16.msra.mxu1 %v8840_v4 }
 0x3a8   :  { %1714 = vmatprep.subr.bf16.mxu0 %v8835_v43  ;;  %1757 = vmatprep.subr.bf16.mxu1 %v8850_v51 }
 0x3ab   :  { %1715 = vmatpush1.bf16.msra.mxu0 %v8866_v56  ;;  %1758 = vmatpush1.bf16.msra.mxu1 %v8881_v0 }
 0x3ac   :  { %1716 = vmatprep.subr.bf16.mxu0 %v8876_v61  ;;  %1759 = vmatprep.subr.bf16.mxu1 %v8905_v22 }
 0x3af   :  { %1717 = vmatpush1.bf16.msra.mxu0 %v8895_v27  ;;  %1760 = vmatpush1.bf16.msra.mxu1 %v8922_v33 }
 0x3b0   :  { %1718 = vmatprep.subr.bf16.mxu0 %v8910_v23  ;;  %1761 = vmatprep.subr.bf16.mxu1 %v8931_v46 }
 0x3b3   :  { %1719 = vmatpush1.bf16.msra.mxu0 %v8948_v2  ;;  %1762 = vmatpush1.bf16.msra.mxu1 %v8962_v9 }
 0x3b4   :  { %1720 = vmatprep.subr.bf16.mxu0 %v12335_v45  ;;  %1763 = vmatprep.subr.bf16.mxu1 %v12336_v5 }
 0x3b7   :  { %1721 = vmatpush1.bf16.msra.mxu0 %v12337_v17  ;;  %1764 = vmatpush1.bf16.msra.mxu1 %v12338_v15 }
 0x3b8   :  { %1722 = vmatprep.subr.bf16.mxu0 %v12339_v24  ;;  %1765 = vmatprep.subr.bf16.mxu1 %v12340_v38 }
 0x3bb   :  { %1723 = vmatpush1.bf16.msra.mxu0 %v12341_v60  ;;  %1766 = vmatpush1.bf16.msra.mxu1 %v12342_v59 }
 0x3bc   :  { %1849 = vmatprep.subr.bf16.mxu0 %v12343_v8  ;;  %1892 = vmatprep.subr.bf16.mxu1 %v12344_v36 }
 0x471   :  { %v1601_v25 = vpop.f32.mrb[8].mxu0  ;;  %v1644_v11 = vpop.f32.mrb[8].mxu1 }
 0x472   :  { %v7058_v44 = vadd.f32 %v1601_v25, %v9187_v35  ;;  %v1603_v48 = vpop.f32.mrb[9].mxu0  ;;  %v1646_v55 = vpop.f32.mrb[9].mxu1  ;;  %v7090_v0 = vadd.f32 %v1644_v11, %v9196_v26 }
 0x473   :  { %v7059_v62 = vadd.f32 %v1603_v48, %v9192_v54  ;;  %v1605_v63 = vpop.f32.mrb[10].mxu0  ;;  %v1648_v18 = vpop.f32.mrb[10].mxu1  ;;  %v7091_v14 = vadd.f32 %v1646_v55, %v9205_v12 }
 0x474   :  { %v1661_v19 = vmul.f32 0.5, %v7058_v44  ;;  %v7060_v43 = vadd.f32 %v1605_v63, %v9187_v35  ;;  %v1607_v4 = vpop.f32.mrb[11].mxu0  ;;  %v1650_v51 = vpop.f32.mrb[11].mxu1  ;;  %v7092_v37 = vadd.f32 %v1648_v18, %v9196_v26 }
 0x475   :  { %v1669_v56 = vmul.f32 0.5, %v7059_v62  ;;  %v7061_v61 = vadd.f32 %v1607_v4, %v9192_v54  ;;  %v7093_v41 = vadd.f32 %v1650_v51, %v9205_v12  ;;  %v1679_v10 = vmul.f32 0.5, %v7091_v14  ;;  %v9349_v14 = vld [vmem:[%s12237_s4 + $0x2c] ss:$16 sps:$4 sm:$0xff]  }
 0x476   :  { %7795 = vtanh.f32 %v1661_v19  ;;  %v1662_v27 = vmul.f32 0.5, %v7060_v43 }
 0x477   :  { %7797 = vtanh.f32 %v1669_v56  ;;  %v1670_v23 = vmul.f32 0.5, %v7061_v61  ;;  %v1680_v13 = vmul.f32 0.5, %v7093_v41  ;;  %v9357_v41 = vld [vmem:[%s12237_s4 + $0x20] ss:$16 sps:$4 sm:$0xff]  }
 0x478   :  { %7799 = vtanh.f32 %v1662_v27 }
 0x479   :  { %7801 = vtanh.f32 %v7090_v0 }
 0x47a   :  { %7803 = vtanh.f32 %v1670_v23  ;;  %v9337_v23 = vld [vmem:[%s12237_s4 + $0x8] ss:$16 sps:$4 sm:$0xff]  }
 0x47b   :  { %7805 = vtanh.f32 %v7092_v37  ;;  %v9343_v37 = vld [vmem:[%s12237_s4 + $0x24] ss:$16 sps:$4 sm:$0xff]  }
 0x47c   :  { %7807 = vtanh.f32 %v1679_v10  ;;  %v9381_v10 = vld [vmem:[%s12237_s4 + $0x40] ss:$16 sps:$4 sm:$0xff]  }
 0x47d   :  { %7809 = vtanh.f32 %v1680_v13  ;;  %v9393_v13 = vld [vmem:[%s12237_s4 + $0x64] ss:$16 sps:$4 sm:$0xff]  }
 0x480   :  { %v7796_v29 = vpop.eup %7795 }
 0x481   :  { %v7798_v50 = vpop.eup %7797  ;;  %v1665_v30 = vadd.f32 1.0, %v7796_v29  ;;  %v9363_v29 = vld [vmem:[%s12237_s4 + $0x28] ss:$16 sps:$4 sm:$0xff]  }
 0x482   :  { %v1673_v16 = vadd.f32 1.0, %v7798_v50  ;;  %v7800_v39 = vpop.eup %7799  ;;  %v9369_v50 = vld [vmem:[%s12237_s4 + $0x44] ss:$16 sps:$4 sm:$0xff]  }
 0x483   :  { %v1667_v21 = vmul.f32 0.5, %v1665_v30  ;;  %v7802_v49 = vpop.eup %7801  ;;  %v1666_v42 = vadd.f32 1.0, %v7800_v39  ;;  %v9375_v30 = vld [vmem:[%s12237_s4 + $0x4c] ss:$16 sps:$4 sm:$0xff]  }
 0x484   :  { %v1675_v6 = vmul.f32 0.5, %v1673_v16  ;;  %v7804_v57 = vpop.eup %7803  ;;  %v9387_v16 = vld [vmem:[%s12237_s4 + $0x48] ss:$16 sps:$4 sm:$0xff]   ;;  %v9399_v39 = vld [vmem:[%s12237_s4 + $0x6c] ss:$16 sps:$4 sm:$0xff]  }
 0x485   :  { %v1689_v34 = vmul.f32 %v7802_v49, %v1667_v21  ;;  %v1668_v52 = vmul.f32 0.5, %v1666_v42  ;;  %v1674_v32 = vadd.f32 1.0, %v7804_v57  ;;  %v7806_v25 = vpop.eup %7805  ;;  %v9405_v21 = vld [vmem:[%s12237_s4 + $0x60] ss:$16 sps:$4 sm:$0xff]   ;;  %v9411_v49 = vld [vmem:[%s12237_s4 + $0x68] ss:$16 sps:$4 sm:$0xff]  }
 0x486   :  { %v1687_v1 = vmul.f32 %v1675_v6, %v9263_v58  ;;  %v7808_v63 = vpop.eup %7807  ;;  %v9417_v6 = vld [vmem:[%s12237_s4 + $0x84] ss:$16 sps:$4 sm:$0xff]   ;;  %v9424_v42 = vld [vmem:[%s12237_s4 + $0x80] ss:$16 sps:$4 sm:$0xff]  }
 0x487   :  { %v1676_v44 = vmul.f32 0.5, %v1674_v32  ;;  %v1690_v48 = vmul.f32 %v7806_v25, %v1668_v52  ;;  %v7810_v18 = vpop.eup %7809  ;;  %v1683_v19 = vadd.f32 1.0, %v7808_v63  ;;  %v9431_v57 = vld [vmem:[%s12237_s4 + $0xa4] ss:$16 sps:$4 sm:$0xff]  }
 0x488   :  { %v9317_v11 = vadd.f32 %v1689_v34, %v1687_v1  ;;  %v1684_v58 = vadd.f32 1.0, %v7810_v18 }
 0x489   :  { %v1688_v55 = vmul.f32 %v1676_v44, %v9267_v31  ;;  %v1685_v4 = vmul.f32 0.5, %v1683_v19  ;;  %v9331_v31 = vld [vmem:[%s12237_s4] ss:$16 sps:$4 sm:$0xff]  }
 0x48a   :  { %7811 = vtanh.f32 %v9317_v11  ;;  %v1686_v51 = vmul.f32 0.5, %v1684_v58 }
 0x48b   :  { %v9321_v62 = vadd.f32 %v1690_v48, %v1688_v55 }
 0x48d   :  { %7813 = vtanh.f32 %v9321_v62 }
 0x494   :  { %v7812_v43 = vpop.eup %7811 }
 0x495   :  { %v1695_v61 = vmul.f32 %v7812_v43, %v1685_v4 }
 0x497   :  { %v7814_v56 = vpop.eup %7813 }
 0x498   :  { %v1696_v0 = vmul.f32 %v7814_v56, %v1686_v51 }
 0x49a   :  { %v9324_v27 = vpack.c.bf16 %v1696_v0, %v1695_v61 }
 0x49c   :  { %1741 = vmatmul.mubr.bf16.vlgmr.msra.gmra.mrb[12].mxu0 %v9324_v27  ;;  %1784 = vmatmul.mubr.bf16.vlgmr.msra.gmra.mrb[12].mxu1 %v9324_v27 }
 0x49d   :  { %1850 = vmatpush1.bf16.msra.mxu0 %v9331_v31  ;;  %1893 = vmatpush1.bf16.msra.mxu1 %v9337_v23 }
 0x49e   :  { %1851 = vmatprep.subr.bf16.mxu0 %v9343_v37  ;;  %1894 = vmatprep.subr.bf16.mxu1 %v9349_v14 }
 0x49f   :  { %1881 = vmatprep.mubr.bf16.mxu0 %v12333_v47  ;;  %1924 = vmatprep.mubr.bf16.mxu1 %v12333_v47 }
 0x4a1   :  { %1852 = vmatpush1.bf16.msra.mxu0 %v9357_v41  ;;  %1895 = vmatpush1.bf16.msra.mxu1 %v9363_v29 }
 0x4a2   :  { %1853 = vmatprep.subr.bf16.mxu0 %v9369_v50  ;;  %1896 = vmatprep.subr.bf16.mxu1 %v9375_v30 }
 0x4a5   :  { %1854 = vmatpush1.bf16.msra.mxu0 %v9381_v10  ;;  %1897 = vmatpush1.bf16.msra.mxu1 %v9387_v16 }
 0x4a6   :  { %1855 = vmatprep.subr.bf16.mxu0 %v9393_v13  ;;  %1898 = vmatprep.subr.bf16.mxu1 %v9399_v39 }
 0x4a9   :  { %1856 = vmatpush1.bf16.msra.mxu0 %v9405_v21  ;;  %1899 = vmatpush1.bf16.msra.mxu1 %v9411_v49 }
 0x4aa   :  { %1857 = vmatprep.subr.bf16.mxu0 %v9417_v6  ;;  %1900 = vmatprep.subr.bf16.mxu1 %v8905_v22 }
 0x4ad   :  { %1858 = vmatpush1.bf16.msra.mxu0 %v9424_v42  ;;  %1901 = vmatpush1.bf16.msra.mxu1 %v8922_v33 }
 0x4ae   :  { %1859 = vmatprep.subr.bf16.mxu0 %v9431_v57  ;;  %1902 = vmatprep.subr.bf16.mxu1 %v8931_v46 }
 0x4b1   :  { %1860 = vmatpush1.bf16.msra.mxu0 %v8948_v2  ;;  %1903 = vmatpush1.bf16.msra.mxu1 %v8962_v9 }
 0x4b2   :  { %1861 = vmatprep.subr.bf16.mxu0 %v12335_v45  ;;  %1904 = vmatprep.subr.bf16.mxu1 %v12336_v5 }
 0x4b5   :  { %1862 = vmatpush1.bf16.msra.mxu0 %v12337_v17  ;;  %1905 = vmatpush1.bf16.msra.mxu1 %v12338_v15 }
 0x4b6   :  { %1863 = vmatprep.subr.bf16.mxu0 %v12339_v24  ;;  %1906 = vmatprep.subr.bf16.mxu1 %v12340_v38 }
 0x4b9   :  { %1864 = vmatpush1.bf16.msra.mxu0 %v12341_v60  ;;  %1907 = vmatpush1.bf16.msra.mxu1 %v12342_v59 }
 0x4ba   :  { %1990 = vmatprep.subr.bf16.mxu0 %v12343_v8  ;;  %2033 = vmatprep.subr.bf16.mxu1 %v12344_v36 }
 0x56f   :  { %v1742_v22 = vpop.f32.mrb[12].mxu0  ;;  %v1785_v33 = vpop.f32.mrb[12].mxu1 }
 0x570   :  { %v7062_v46 = vadd.f32 %v1742_v22, %v9187_v35  ;;  %v1744_v2 = vpop.f32.mrb[13].mxu0  ;;  %v1787_v9 = vpop.f32.mrb[13].mxu1  ;;  %v7094_v34 = vadd.f32 %v1785_v33, %v9196_v26 }
 0x571   :  { %v7063_v45 = vadd.f32 %v1744_v2, %v9192_v54  ;;  %v1746_v5 = vpop.f32.mrb[14].mxu0  ;;  %v1789_v17 = vpop.f32.mrb[14].mxu1  ;;  %v7095_v25 = vadd.f32 %v1787_v9, %v9205_v12 }
 0x572   :  { %v1802_v15 = vmul.f32 0.5, %v7062_v46  ;;  %v7064_v24 = vadd.f32 %v1746_v5, %v9187_v35  ;;  %v1748_v38 = vpop.f32.mrb[15].mxu0  ;;  %v1791_v60 = vpop.f32.mrb[15].mxu1  ;;  %v7096_v32 = vadd.f32 %v1789_v17, %v9196_v26 }
 0x573   :  { %v1810_v59 = vmul.f32 0.5, %v7063_v45  ;;  %v7065_v8 = vadd.f32 %v1748_v38, %v9192_v54  ;;  %v7097_v44 = vadd.f32 %v1791_v60, %v9205_v12  ;;  %v1820_v18 = vmul.f32 0.5, %v7095_v25 }
 0x574   :  { %7815 = vtanh.f32 %v1802_v15  ;;  %v1803_v1 = vmul.f32 0.5, %v7064_v24 }
 0x575   :  { %7817 = vtanh.f32 %v1810_v59  ;;  %v1811_v52 = vmul.f32 0.5, %v7065_v8  ;;  %v1821_v58 = vmul.f32 0.5, %v7097_v44 }
 0x576   :  { %7819 = vtanh.f32 %v1803_v1 }
 0x577   :  { %7821 = vtanh.f32 %v7094_v34 }
 0x578   :  { %7823 = vtanh.f32 %v1811_v52 }
 0x579   :  { %7825 = vtanh.f32 %v7096_v32 }
 0x57a   :  { %7827 = vtanh.f32 %v1820_v18  ;;  %v9513_v18 = vld [vmem:[%s12237_s4 + $0xa8] ss:$16 sps:$4 sm:$0xff]  }
 0x57b   :  { %7829 = vtanh.f32 %v1821_v58  ;;  %v9525_v58 = vld [vmem:[%s12237_s4 + $0xcc] ss:$16 sps:$4 sm:$0xff]  }
 0x57e   :  { %v7816_v48 = vpop.eup %7815 }
 0x57f   :  { %v7818_v55 = vpop.eup %7817  ;;  %v1806_v63 = vadd.f32 1.0, %v7816_v48  ;;  %v9494_v48 = vld [vmem:[%s12237_s4 + $0x88] ss:$16 sps:$4 sm:$0xff]  }
 0x580   :  { %v1814_v19 = vadd.f32 1.0, %v7818_v55  ;;  %v7820_v43 = vpop.eup %7819  ;;  %v9501_v55 = vld [vmem:[%s12237_s4 + $0xac] ss:$16 sps:$4 sm:$0xff]  }
 0x581   :  { %v1808_v4 = vmul.f32 0.5, %v1806_v63  ;;  %v7822_v51 = vpop.eup %7821  ;;  %v1807_v61 = vadd.f32 1.0, %v7820_v43  ;;  %v9507_v63 = vld [vmem:[%s12237_s4 + $0xa0] ss:$16 sps:$4 sm:$0xff]  }
 0x582   :  { %v1816_v56 = vmul.f32 0.5, %v1814_v19  ;;  %v7824_v0 = vpop.eup %7823  ;;  %v9519_v19 = vld [vmem:[%s12237_s4 + $0xc4] ss:$16 sps:$4 sm:$0xff]   ;;  %v9531_v43 = vld [vmem:[%s12237_s4 + $0xc0] ss:$16 sps:$4 sm:$0xff]  }
 0x583   :  { %v1830_v22 = vmul.f32 %v7822_v51, %v1808_v4  ;;  %v1809_v46 = vmul.f32 0.5, %v1807_v61  ;;  %v1815_v2 = vadd.f32 1.0, %v7824_v0  ;;  %v7826_v9 = vpop.eup %7825  ;;  %v9537_v4 = vld [vmem:[%s12237_s4 + $0xc8] ss:$16 sps:$4 sm:$0xff]   ;;  %v9543_v51 = vld [vmem:[%s12237_s4 + $0xe4] ss:$16 sps:$4 sm:$0xff]  }
 0x584   :  { %v1828_v33 = vmul.f32 %v1816_v56, %v9317_v11  ;;  %v7828_v38 = vpop.eup %7827  ;;  %v9549_v56 = vld [vmem:[%s12237_s4 + $0xec] ss:$16 sps:$4 sm:$0xff]   ;;  %v9555_v61 = vld [vmem:[%s12237_s4 + $0xe0] ss:$16 sps:$4 sm:$0xff]   ;;  %v9561_v0 = vld [vmem:[%s12237_s4 + $0xe8] ss:$16 sps:$4 sm:$0xff]  }
 0x585   :  { %v1817_v5 = vmul.f32 0.5, %v1815_v2  ;;  %v1831_v17 = vmul.f32 %v7826_v9, %v1809_v46  ;;  %v7830_v60 = vpop.eup %7829  ;;  %v1824_v59 = vadd.f32 1.0, %v7828_v38 }
 0x586   :  { %v9456_v45 = vadd.f32 %v1830_v22, %v1828_v33  ;;  %v1825_v11 = vadd.f32 1.0, %v7830_v60  ;;  %v9567_v22 = vld [vmem:[%s12237_s4 + $0x4] ss:$16 sps:$4 sm:$0xff]  }
 0x587   :  { %v1829_v15 = vmul.f32 %v1817_v5, %v9321_v62  ;;  %v1826_v34 = vmul.f32 0.5, %v1824_v59  ;;  %v9487_v62 = vld [vmem:[%s12237_s4 + $0x8c] ss:$16 sps:$4 sm:$0xff]  }
 0x588   :  { %7831 = vtanh.f32 %v9456_v45  ;;  %v1827_v1 = vmul.f32 0.5, %v1825_v11 }
 0x589   :  { %v9460_v24 = vadd.f32 %v1831_v17, %v1829_v15 }
 0x58b   :  { %7833 = vtanh.f32 %v9460_v24 }
 0x592   :  { %v7832_v8 = vpop.eup %7831 }
 0x593   :  { %v1836_v32 = vmul.f32 %v7832_v8, %v1826_v34 }
 0x595   :  { %v7834_v52 = vpop.eup %7833 }
 0x596   :  { %v1837_v25 = vmul.f32 %v7834_v52, %v1827_v1 }
 0x598   :  { %v9463_v44 = vpack.c.bf16 %v1837_v25, %v1836_v32 }
 0x59a   :  { %1882 = vmatmul.mubr.bf16.vlgmr.msra.gmra.mrb[16].mxu0 %v9463_v44  ;;  %1925 = vmatmul.mubr.bf16.vlgmr.msra.gmra.mrb[16].mxu1 %v9463_v44 }
 0x59b   :  { %1991 = vmatpush1.bf16.msra.mxu0 %v9331_v31  ;;  %2034 = vmatpush1.bf16.msra.mxu1 %v9337_v23 }
 0x59c   :  { %1992 = vmatprep.subr.bf16.mxu0 %v9343_v37  ;;  %2035 = vmatprep.subr.bf16.mxu1 %v9349_v14 }
 0x59d   :  { %2022 = vmatprep.mubr.bf16.mxu0 %v12333_v47  ;;  %2065 = vmatprep.mubr.bf16.mxu1 %v12333_v47 }
 0x59f   :  { %1993 = vmatpush1.bf16.msra.mxu0 %v9357_v41  ;;  %2036 = vmatpush1.bf16.msra.mxu1 %v9363_v29 }
 0x5a0   :  { %1994 = vmatprep.subr.bf16.mxu0 %v9369_v50  ;;  %2037 = vmatprep.subr.bf16.mxu1 %v9375_v30 }
 0x5a3   :  { %1995 = vmatpush1.bf16.msra.mxu0 %v9381_v10  ;;  %2038 = vmatpush1.bf16.msra.mxu1 %v9387_v16 }
 0x5a4   :  { %1996 = vmatprep.subr.bf16.mxu0 %v9393_v13  ;;  %2039 = vmatprep.subr.bf16.mxu1 %v9399_v39 }
 0x5a7   :  { %1997 = vmatpush1.bf16.msra.mxu0 %v9405_v21  ;;  %2040 = vmatpush1.bf16.msra.mxu1 %v9411_v49 }
 0x5a8   :  { %1998 = vmatprep.subr.bf16.mxu0 %v9417_v6  ;;  %2041 = vmatprep.subr.bf16.mxu1 %v9487_v62 }
 0x5ab   :  { %1999 = vmatpush1.bf16.msra.mxu0 %v9424_v42  ;;  %2042 = vmatpush1.bf16.msra.mxu1 %v9494_v48 }
 0x5ac   :  { %2000 = vmatprep.subr.bf16.mxu0 %v9431_v57  ;;  %2043 = vmatprep.subr.bf16.mxu1 %v9501_v55 }
 0x5af   :  { %2001 = vmatpush1.bf16.msra.mxu0 %v9507_v63  ;;  %2044 = vmatpush1.bf16.msra.mxu1 %v9513_v18 }
 0x5b0   :  { %2002 = vmatprep.subr.bf16.mxu0 %v9519_v19  ;;  %2045 = vmatprep.subr.bf16.mxu1 %v9525_v58 }
 0x5b3   :  { %2003 = vmatpush1.bf16.msra.mxu0 %v9531_v43  ;;  %2046 = vmatpush1.bf16.msra.mxu1 %v9537_v4 }
 0x5b4   :  { %2004 = vmatprep.subr.bf16.mxu0 %v9543_v51  ;;  %2047 = vmatprep.subr.bf16.mxu1 %v9549_v56 }
 0x5b7   :  { %2005 = vmatpush1.bf16.msra.mxu0 %v9555_v61  ;;  %2048 = vmatpush1.bf16.msra.mxu1 %v9561_v0 }
 0x5b8   :  { %2131 = vmatprep.subr.bf16.mxu0 %v9567_v22  ;;  %2174 = vmatprep.subr.bf16.mxu1 %v12344_v36 }
 0x66d   :  { %v1883_v33 = vpop.f32.mrb[16].mxu0  ;;  %v1926_v46 = vpop.f32.mrb[16].mxu1 }
 0x66e   :  { %v7066_v2 = vadd.f32 %v1883_v33, %v9187_v35  ;;  %v1885_v9 = vpop.f32.mrb[17].mxu0  ;;  %v1928_v5 = vpop.f32.mrb[17].mxu1  ;;  %v7098_v36 = vadd.f32 %v1926_v46, %v9196_v26 }
 0x66f   :  { %v7067_v17 = vadd.f32 %v1885_v9, %v9192_v54  ;;  %v1887_v15 = vpop.f32.mrb[18].mxu0  ;;  %v1930_v38 = vpop.f32.mrb[18].mxu1  ;;  %v7099_v33 = vadd.f32 %v1928_v5, %v9205_v12 }
 0x670   :  { %v1943_v60 = vmul.f32 0.5, %v7066_v2  ;;  %v7068_v59 = vadd.f32 %v1887_v15, %v9187_v35  ;;  %v1889_v11 = vpop.f32.mrb[19].mxu0  ;;  %v1932_v8 = vpop.f32.mrb[19].mxu1  ;;  %v7100_v25 = vadd.f32 %v1930_v38, %v9196_v26 }
 0x671   :  { %v1951_v34 = vmul.f32 0.5, %v7067_v17  ;;  %v7069_v1 = vadd.f32 %v1889_v11, %v9192_v54  ;;  %v7101_v2 = vadd.f32 %v1932_v8, %v9205_v12  ;;  %v1961_v11 = vmul.f32 0.5, %v7099_v33 }
 0x672   :  { %7835 = vtanh.f32 %v1943_v60  ;;  %v1944_v52 = vmul.f32 0.5, %v7068_v59 }
 0x673   :  { %7837 = vtanh.f32 %v1951_v34  ;;  %v1952_v32 = vmul.f32 0.5, %v7069_v1  ;;  %v1962_v20 = vmul.f32 0.5, %v7101_v2 }
 0x674   :  { %7839 = vtanh.f32 %v1944_v52 }
 0x675   :  { %7841 = vtanh.f32 %v7098_v36 }
 0x676   :  { %7843 = vtanh.f32 %v1952_v32 }
 0x677   :  { %7845 = vtanh.f32 %v7100_v25 }
 0x678   :  { %7847 = vtanh.f32 %v1961_v11 }
 0x679   :  { %7849 = vtanh.f32 %v1962_v20 }
 0x67c   :  { %v7836_v9 = vpop.eup %7835 }
 0x67d   :  { %v7838_v17 = vpop.eup %7837  ;;  %v1947_v15 = vadd.f32 1.0, %v7836_v9 }
 0x67e   :  { %v1955_v60 = vadd.f32 1.0, %v7838_v17  ;;  %v7840_v46 = vpop.eup %7839 }
 0x67f   :  { %v1949_v59 = vmul.f32 0.5, %v1947_v15  ;;  %v7842_v34 = vpop.eup %7841  ;;  %v1948_v52 = vadd.f32 1.0, %v7840_v46 }
 0x680   :  { %v1957_v1 = vmul.f32 0.5, %v1955_v60  ;;  %v7844_v40 = vpop.eup %7843 }
 0x681   :  { %v1971_v38 = vmul.f32 %v7842_v34, %v1949_v59  ;;  %v1950_v5 = vmul.f32 0.5, %v1948_v52  ;;  %v1956_v32 = vadd.f32 1.0, %v7844_v40  ;;  %v7846_v8 = vpop.eup %7845 }
 0x682   :  { %v1969_v36 = vmul.f32 %v1957_v1, %v9456_v45  ;;  %v7848_v15 = vpop.eup %7847 }
 0x683   :  { %v1958_v9 = vmul.f32 0.5, %v1956_v32  ;;  %v1972_v33 = vmul.f32 %v7846_v8, %v1950_v5  ;;  %v7850_v11 = vpop.eup %7849  ;;  %v1965_v60 = vadd.f32 1.0, %v7848_v15 }
 0x684   :  { %v9580_v25 = vadd.f32 %v1971_v38, %v1969_v36  ;;  %v1966_v45 = vadd.f32 1.0, %v7850_v11 }
 0x685   :  { %v1970_v2 = vmul.f32 %v1958_v9, %v9460_v24  ;;  %v1967_v40 = vmul.f32 0.5, %v1965_v60  ;;  %v8268_v24 = vld [vmem:[%s12237_s4 + $0xc] ss:$16 sps:$4 sm:$0xff]  }
 0x686   :  { %7851 = vtanh.f32 %v9580_v25  ;;  %v1968_v20 = vmul.f32 0.5, %v1966_v45 }
 0x687   :  { %v9584_v17 = vadd.f32 %v1972_v33, %v1970_v2 }
 0x689   :  { %7853 = vtanh.f32 %v9584_v17 }
 0x690   :  { %v7852_v46 = vpop.eup %7851 }
 0x691   :  { %v1977_v34 = vmul.f32 %v7852_v46, %v1967_v40 }
 0x693   :  { %v7854_v59 = vpop.eup %7853 }
 0x694   :  { %v1978_v1 = vmul.f32 %v7854_v59, %v1968_v20 }
 0x696   :  { %v9587_v52 = vpack.c.bf16 %v1978_v1, %v1977_v34 }
 0x698   :  { %2023 = vmatmul.mubr.bf16.vlgmr.msra.gmra.mrb[20].mxu0 %v9587_v52  ;;  %2066 = vmatmul.mubr.bf16.vlgmr.msra.gmra.mrb[20].mxu1 %v9587_v52 }
 0x699   :  { %2132 = vmatpush1.bf16.msra.mxu0 %v9331_v31  ;;  %2175 = vmatpush1.bf16.msra.mxu1 %v9337_v23 }
 0x69a   :  { %2133 = vmatprep.subr.bf16.mxu0 %v9343_v37  ;;  %2176 = vmatprep.subr.bf16.mxu1 %v9349_v14 }
 0x69b   :  { %2163 = vmatprep.mubr.bf16.mxu0 %v12333_v47  ;;  %2206 = vmatprep.mubr.bf16.mxu1 %v12333_v47 }
 0x69d   :  { %2134 = vmatpush1.bf16.msra.mxu0 %v9357_v41  ;;  %2177 = vmatpush1.bf16.msra.mxu1 %v9363_v29 }
 0x69e   :  { %2135 = vmatprep.subr.bf16.mxu0 %v9369_v50  ;;  %2178 = vmatprep.subr.bf16.mxu1 %v9375_v30 }
 0x6a1   :  { %2136 = vmatpush1.bf16.msra.mxu0 %v9381_v10  ;;  %2179 = vmatpush1.bf16.msra.mxu1 %v9387_v16 }
 0x6a2   :  { %2137 = vmatprep.subr.bf16.mxu0 %v9393_v13  ;;  %2180 = vmatprep.subr.bf16.mxu1 %v9399_v39 }
 0x6a5   :  { %2138 = vmatpush1.bf16.msra.mxu0 %v9405_v21  ;;  %2181 = vmatpush1.bf16.msra.mxu1 %v9411_v49 }
 0x6a6   :  { %2139 = vmatprep.subr.bf16.mxu0 %v9417_v6  ;;  %2182 = vmatprep.subr.bf16.mxu1 %v9487_v62 }
 0x6a9   :  { %2140 = vmatpush1.bf16.msra.mxu0 %v9424_v42  ;;  %2183 = vmatpush1.bf16.msra.mxu1 %v9494_v48 }
 0x6aa   :  { %2141 = vmatprep.subr.bf16.mxu0 %v9431_v57  ;;  %2184 = vmatprep.subr.bf16.mxu1 %v9501_v55 }
 0x6ad   :  { %2142 = vmatpush1.bf16.msra.mxu0 %v9507_v63  ;;  %2185 = vmatpush1.bf16.msra.mxu1 %v9513_v18 }
 0x6ae   :  { %2143 = vmatprep.subr.bf16.mxu0 %v9519_v19  ;;  %2186 = vmatprep.subr.bf16.mxu1 %v9525_v58 }
 0x6b1   :  { %2144 = vmatpush1.bf16.msra.mxu0 %v9531_v43  ;;  %2187 = vmatpush1.bf16.msra.mxu1 %v9537_v4 }
 0x6b2   :  { %2145 = vmatprep.subr.bf16.mxu0 %v9543_v51  ;;  %2188 = vmatprep.subr.bf16.mxu1 %v9549_v56 }
 0x6b5   :  { %2146 = vmatpush1.bf16.msra.mxu0 %v9555_v61  ;;  %2189 = vmatpush1.bf16.msra.mxu1 %v9561_v0 }
 0x6b6   :  { %2272 = vmatprep.subr.bf16.mxu0 %v9567_v22  ;;  %2315 = vmatprep.subr.bf16.mxu1 %v8268_v24 }
 0x76b   :  { %v2024_v38 = vpop.f32.mrb[20].mxu0  ;;  %v2067_v36 = vpop.f32.mrb[20].mxu1 }
 0x76c   :  { %v7070_v5 = vadd.f32 %v2024_v38, %v9187_v35  ;;  %v2026_v32 = vpop.f32.mrb[21].mxu0  ;;  %v2069_v8 = vpop.f32.mrb[21].mxu1  ;;  %v7102_v40 = vadd.f32 %v2067_v36, %v9196_v26 }
 0x76d   :  { %v7071_v9 = vadd.f32 %v2026_v32, %v9192_v54  ;;  %v2028_v33 = vpop.f32.mrb[22].mxu0  ;;  %v2071_v2 = vpop.f32.mrb[22].mxu1  ;;  %v7103_v1 = vadd.f32 %v2069_v8, %v9205_v12 }
 0x76e   :  { %v2084_v15 = vmul.f32 0.5, %v7070_v5  ;;  %v7072_v11 = vadd.f32 %v2028_v33, %v9187_v35  ;;  %v2030_v60 = vpop.f32.mrb[23].mxu0  ;;  %v2073_v22 = vpop.f32.mrb[23].mxu1  ;;  %v7104_v34 = vadd.f32 %v2071_v2, %v9196_v26 }
 0x76f   :  { %v2092_v45 = vmul.f32 0.5, %v7071_v9  ;;  %v7073_v46 = vadd.f32 %v2030_v60, %v9192_v54  ;;  %v7105_v24 = vadd.f32 %v2073_v22, %v9205_v12  ;;  %v2102_v9 = vmul.f32 0.5, %v7103_v1 }
 0x770   :  { %7855 = vtanh.f32 %v2084_v15  ;;  %v2085_v20 = vmul.f32 0.5, %v7072_v11 }
 0x771   :  { %7857 = vtanh.f32 %v2092_v45  ;;  %v2093_v59 = vmul.f32 0.5, %v7073_v46  ;;  %v2103_v15 = vmul.f32 0.5, %v7105_v24 }
 0x772   :  { %7859 = vtanh.f32 %v2085_v20 }
 0x773   :  { %7861 = vtanh.f32 %v7102_v40 }
 0x774   :  { %7863 = vtanh.f32 %v2093_v59 }
 0x775   :  { %7865 = vtanh.f32 %v7104_v34 }
 0x776   :  { %7867 = vtanh.f32 %v2102_v9 }
 0x777   :  { %7869 = vtanh.f32 %v2103_v15 }
 0x77a   :  { %v7856_v38 = vpop.eup %7855 }
 0x77b   :  { %v7858_v5 = vpop.eup %7857  ;;  %v2088_v32 = vadd.f32 1.0, %v7856_v38 }
 0x77c   :  { %v2096_v33 = vadd.f32 1.0, %v7858_v5  ;;  %v7860_v36 = vpop.eup %7859 }
 0x77d   :  { %v2090_v11 = vmul.f32 0.5, %v2088_v32  ;;  %v7862_v60 = vpop.eup %7861  ;;  %v2089_v46 = vadd.f32 1.0, %v7860_v36 }
 0x77e   :  { %v2098_v45 = vmul.f32 0.5, %v2096_v33  ;;  %v7864_v20 = vpop.eup %7863 }
 0x77f   :  { %v2112_v2 = vmul.f32 %v7862_v60, %v2090_v11  ;;  %v2091_v8 = vmul.f32 0.5, %v2089_v46  ;;  %v2097_v59 = vadd.f32 1.0, %v7864_v20  ;;  %v7866_v22 = vpop.eup %7865 }
 0x780   :  { %v2110_v40 = vmul.f32 %v2098_v45, %v9580_v25  ;;  %v7868_v32 = vpop.eup %7867 }
 0x781   :  { %v2099_v38 = vmul.f32 0.5, %v2097_v59  ;;  %v2113_v1 = vmul.f32 %v7866_v22, %v2091_v8  ;;  %v7870_v9 = vpop.eup %7869  ;;  %v2106_v33 = vadd.f32 1.0, %v7868_v32 }
 0x782   :  { %v9636_v34 = vadd.f32 %v2112_v2, %v2110_v40  ;;  %v2107_v25 = vadd.f32 1.0, %v7870_v9 }
 0x783   :  { %v2111_v24 = vmul.f32 %v2099_v38, %v9584_v17  ;;  %v2108_v11 = vmul.f32 0.5, %v2106_v33 }
 0x784   :  { %7871 = vtanh.f32 %v9636_v34  ;;  %v2109_v15 = vmul.f32 0.5, %v2107_v25 }
 0x785   :  { %v9640_v5 = vadd.f32 %v2113_v1, %v2111_v24 }
 0x787   :  { %7873 = vtanh.f32 %v9640_v5 }
 0x78e   :  { %v7872_v36 = vpop.eup %7871 }
 0x78f   :  { %v2118_v45 = vmul.f32 %v7872_v36, %v2108_v11 }
 0x791   :  { %v7874_v60 = vpop.eup %7873 }
 0x792   :  { %v2119_v46 = vmul.f32 %v7874_v60, %v2109_v15 }
 0x794   :  { %v9643_v20 = vpack.c.bf16 %v2119_v46, %v2118_v45 }
 0x796   :  { %2164 = vmatmul.mubr.bf16.vlgmr.msra.gmra.mrb[24].mxu0 %v9643_v20  ;;  %2207 = vmatmul.mubr.bf16.vlgmr.msra.gmra.mrb[24].mxu1 %v9643_v20 }
 0x797   :  { %2273 = vmatpush1.bf16.msra.mxu0 %v9331_v31  ;;  %2316 = vmatpush1.bf16.msra.mxu1 %v9337_v23  ;;  %v7533_v31 = vld [vmem:[%s12236_s3 + $0x104] ss:$16 sps:$4 sm:$0xff]   ;;  %v7536_v23 = vld [vmem:[%s12236_s3 + $0x10c] ss:$16 sps:$4 sm:$0xff]  }
 0x798   :  { %2274 = vmatprep.subr.bf16.mxu0 %v9343_v37  ;;  %2317 = vmatprep.subr.bf16.mxu1 %v9349_v14 }
 0x799   :  { %2304 = vmatprep.mubr.bf16.mxu0 %v12333_v47  ;;  %2347 = vmatprep.mubr.bf16.mxu1 %v12333_v47 }
 0x79b   :  { %2275 = vmatpush1.bf16.msra.mxu0 %v9357_v41  ;;  %2318 = vmatpush1.bf16.msra.mxu1 %v9363_v29 }
 0x79c   :  { %2276 = vmatprep.subr.bf16.mxu0 %v9369_v50  ;;  %2319 = vmatprep.subr.bf16.mxu1 %v9375_v30 }
 0x79f   :  { %2277 = vmatpush1.bf16.msra.mxu0 %v9381_v10  ;;  %2320 = vmatpush1.bf16.msra.mxu1 %v9387_v16 }
 0x7a0   :  { %2278 = vmatprep.subr.bf16.mxu0 %v9393_v13  ;;  %2321 = vmatprep.subr.bf16.mxu1 %v9399_v39 }
 0x7a3   :  { %2279 = vmatpush1.bf16.msra.mxu0 %v9405_v21  ;;  %2322 = vmatpush1.bf16.msra.mxu1 %v9411_v49 }
 0x7a4   :  { %2280 = vmatprep.subr.bf16.mxu0 %v9417_v6  ;;  %2323 = vmatprep.subr.bf16.mxu1 %v9487_v62 }
 0x7a7   :  { %2281 = vmatpush1.bf16.msra.mxu0 %v9424_v42  ;;  %2324 = vmatpush1.bf16.msra.mxu1 %v9494_v48 }
 0x7a8   :  { %2282 = vmatprep.subr.bf16.mxu0 %v9431_v57  ;;  %2325 = vmatprep.subr.bf16.mxu1 %v9501_v55 }
 0x7ab   :  { %2283 = vmatpush1.bf16.msra.mxu0 %v9507_v63  ;;  %2326 = vmatpush1.bf16.msra.mxu1 %v9513_v18 }
 0x7ac   :  { %2284 = vmatprep.subr.bf16.mxu0 %v9519_v19  ;;  %2327 = vmatprep.subr.bf16.mxu1 %v9525_v58 }
 0x7af   :  { %2285 = vmatpush1.bf16.msra.mxu0 %v9531_v43  ;;  %2328 = vmatpush1.bf16.msra.mxu1 %v9537_v4 }
 0x7b0   :  { %2286 = vmatprep.subr.bf16.mxu0 %v9543_v51  ;;  %2329 = vmatprep.subr.bf16.mxu1 %v9549_v56 }
 0x7b3   :  { %2287 = vmatpush1.bf16.msra.mxu0 %v9555_v61  ;;  %2330 = vmatpush1.bf16.msra.mxu1 %v9561_v0 }
 0x7b4   :  { %2661 = vmatprep.subr.bf16.mxu0 %v7533_v31  ;;  %2774 = vmatprep.subr.bf16.mxu1 %v7536_v23 }
 0x869   :  { %v2165_v37 = vpop.f32.mrb[24].mxu0  ;;  %v2208_v14 = vpop.f32.mrb[24].mxu1 }
 0x86a   :  { %v7074_v41 = vadd.f32 %v2165_v37, %v9187_v35  ;;  %v2167_v29 = vpop.f32.mrb[25].mxu0  ;;  %v2210_v50 = vpop.f32.mrb[25].mxu1  ;;  %v7106_v57 = vadd.f32 %v2208_v14, %v9196_v26 }
 0x86b   :  { %v7075_v30 = vadd.f32 %v2167_v29, %v9192_v54  ;;  %v2169_v10 = vpop.f32.mrb[26].mxu0  ;;  %v2212_v16 = vpop.f32.mrb[26].mxu1  ;;  %v7107_v63 = vadd.f32 %v2210_v50, %v9205_v12  ;;  %v7539_v50 = vld [vmem:[%s12236_s3 + $0x124] ss:$16 sps:$4 sm:$0xff]  }
 0x86c   :  { %v2225_v13 = vmul.f32 0.5, %v7074_v41  ;;  %v7076_v39 = vadd.f32 %v2169_v10, %v9187_v35  ;;  %v2171_v21 = vpop.f32.mrb[27].mxu0  ;;  %v2214_v49 = vpop.f32.mrb[27].mxu1  ;;  %v7108_v55 = vadd.f32 %v2212_v16, %v9196_v26  ;;  %v7534_v41 = vld [vmem:[%s12236_s3 + $0x108] ss:$16 sps:$4 sm:$0xff]  }
 0x86d   :  { %v2233_v6 = vmul.f32 0.5, %v7075_v30  ;;  %v7077_v42 = vadd.f32 %v2171_v21, %v9192_v54  ;;  %v7109_v18 = vadd.f32 %v2214_v49, %v9205_v12  ;;  %v2243_v4 = vmul.f32 0.5, %v7107_v63  ;;  %v7542_v30 = vld [vmem:[%s12236_s3 + $0x12c] ss:$16 sps:$4 sm:$0xff]   ;;  %v7537_v10 = vld [vmem:[%s12236_s3 + $0x120] ss:$16 sps:$4 sm:$0xff]  }
 0x86e   :  { %7875 = vtanh.f32 %v2225_v13  ;;  %v2226_v62 = vmul.f32 0.5, %v7076_v39  ;;  %v7540_v16 = vld [vmem:[%s12236_s3 + $0x128] ss:$16 sps:$4 sm:$0xff]   ;;  %v7545_v13 = vld [vmem:[%s12236_s3 + $0x144] ss:$16 sps:$4 sm:$0xff]  }
 0x86f   :  { %7877 = vtanh.f32 %v2233_v6  ;;  %v2234_v48 = vmul.f32 0.5, %v7077_v42  ;;  %v2244_v56 = vmul.f32 0.5, %v7109_v18  ;;  %v7548_v39 = vld [vmem:[%s12236_s3 + $0x14c] ss:$16 sps:$4 sm:$0xff]   ;;  %v7543_v21 = vld [vmem:[%s12236_s3 + $0x140] ss:$16 sps:$4 sm:$0xff]  }
 0x870   :  { %7879 = vtanh.f32 %v2226_v62  ;;  %v7546_v49 = vld [vmem:[%s12236_s3 + $0x148] ss:$16 sps:$4 sm:$0xff]   ;;  %v7551_v6 = vld [vmem:[%s12236_s3 + $0x164] ss:$16 sps:$4 sm:$0xff]   ;;  %v7554_v42 = vld [vmem:[%s12236_s3 + $0x16c] ss:$16 sps:$4 sm:$0xff]  }
 0x871   :  { %7881 = vtanh.f32 %v7106_v57  ;;  %v7549_v57 = vld [vmem:[%s12236_s3 + $0x160] ss:$16 sps:$4 sm:$0xff]   ;;  %v7552_v62 = vld [vmem:[%s12236_s3 + $0x168] ss:$16 sps:$4 sm:$0xff]  }
 0x872   :  { %7883 = vtanh.f32 %v2234_v48  ;;  %v7557_v48 = vld [vmem:[%s12236_s3 + $0x184] ss:$16 sps:$4 sm:$0xff]   ;;  %v7555_v63 = vld [vmem:[%s12236_s3 + $0x180] ss:$16 sps:$4 sm:$0xff]   ;;  %v7558_v18 = vld [vmem:[%s12236_s3 + $0x188] ss:$16 sps:$4 sm:$0xff]  }
 0x873   :  { %7885 = vtanh.f32 %v7108_v55  ;;  %v7560_v55 = vld [vmem:[%s12236_s3 + $0x18c] ss:$16 sps:$4 sm:$0xff]  }
 0x874   :  { %7887 = vtanh.f32 %v2243_v4  ;;  %v7564_v4 = vld [vmem:[%s12236_s3 + $0x1a8] ss:$16 sps:$4 sm:$0xff]  }
 0x875   :  { %7889 = vtanh.f32 %v2244_v56  ;;  %v7572_v56 = vld [vmem:[%s12236_s3 + $0x1cc] ss:$16 sps:$4 sm:$0xff]  }
 0x878   :  { %v7876_v19 = vpop.eup %7875 }
 0x879   :  { %v7878_v58 = vpop.eup %7877  ;;  %v2229_v43 = vadd.f32 1.0, %v7876_v19  ;;  %v7563_v19 = vld [vmem:[%s12236_s3 + $0x1a4] ss:$16 sps:$4 sm:$0xff]  }
 0x87a   :  { %v2237_v51 = vadd.f32 1.0, %v7878_v58  ;;  %v7880_v61 = vpop.eup %7879  ;;  %v7566_v58 = vld [vmem:[%s12236_s3 + $0x1ac] ss:$16 sps:$4 sm:$0xff]  }
 0x87b   :  { %v2231_v0 = vmul.f32 0.5, %v2229_v43  ;;  %v7882_v17 = vpop.eup %7881  ;;  %v2230_v40 = vadd.f32 1.0, %v7880_v61  ;;  %v7561_v43 = vld [vmem:[%s12236_s3 + $0x1a0] ss:$16 sps:$4 sm:$0xff]  }
 0x87c   :  { %v2239_v2 = vmul.f32 0.5, %v2237_v51  ;;  %v7884_v8 = vpop.eup %7883  ;;  %v7569_v51 = vld [vmem:[%s12236_s3 + $0x1c4] ss:$16 sps:$4 sm:$0xff]   ;;  %v7567_v61 = vld [vmem:[%s12236_s3 + $0x1c0] ss:$16 sps:$4 sm:$0xff]  }
 0x87d   :  { %v2253_v59 = vmul.f32 %v7882_v17, %v2231_v0  ;;  %v2232_v38 = vmul.f32 0.5, %v2230_v40  ;;  %v2238_v1 = vadd.f32 1.0, %v7884_v8  ;;  %v7886_v24 = vpop.eup %7885  ;;  %v7570_v0 = vld [vmem:[%s12236_s3 + $0x1c8] ss:$16 sps:$4 sm:$0xff]   ;;  %v7575_v17 = vld [vmem:[%s12236_s3 + $0x1e4] ss:$16 sps:$4 sm:$0xff]  }
 0x87e   :  { %v2251_v22 = vmul.f32 %v2239_v2, %v9636_v34  ;;  %v7888_v11 = vpop.eup %7887  ;;  %v7578_v2 = vld [vmem:[%s12236_s3 + $0x1ec] ss:$16 sps:$4 sm:$0xff]   ;;  %v7573_v40 = vld [vmem:[%s12236_s3 + $0x1e0] ss:$16 sps:$4 sm:$0xff]   ;;  %v7576_v8 = vld [vmem:[%s12236_s3 + $0x1e8] ss:$16 sps:$4 sm:$0xff]  }
 0x87f   :  { %v2240_v9 = vmul.f32 0.5, %v2238_v1  ;;  %v2254_v33 = vmul.f32 %v7886_v24, %v2232_v38  ;;  %v7890_v15 = vpop.eup %7889  ;;  %v2247_v60 = vadd.f32 1.0, %v7888_v11  ;;  %v9811_v38 = vld [vmem:[%s12237_s4 + $0x100] ss:$16 sps:$4 sm:$0xff]   ;;  %v9817_v1 = vld [vmem:[%s12237_s4 + $0x108] ss:$16 sps:$4 sm:$0xff]  }
 0x880   :  { %v9694_v32 = vadd.f32 %v2253_v59, %v2251_v22  ;;  %v2248_v34 = vadd.f32 1.0, %v7890_v15  ;;  %v9800_v59 = vld [vmem:[%s12237_s4 + $0x104] ss:$16 sps:$4 sm:$0xff]   ;;  %v9805_v22 = vld [vmem:[%s12237_s4 + $0x10c] ss:$16 sps:$4 sm:$0xff]  }
 0x881   :  { %v2252_v25 = vmul.f32 %v2240_v9, %v9640_v5  ;;  %v2249_v46 = vmul.f32 0.5, %v2247_v60  ;;  %v7531_v5 = vld [vmem:[%s12236_s3 + $0x100] ss:$16 sps:$4 sm:$0xff]   ;;  %v9822_v24 = vld [vmem:[%s12237_s4 + $0x124] ss:$16 sps:$4 sm:$0xff]  }
 0x882   :  { %7891 = vtanh.f32 %v9694_v32  ;;  %v2250_v31 = vmul.f32 0.5, %v2248_v34  ;;  %v9833_v9 = vld [vmem:[%s12237_s4 + $0x120] ss:$16 sps:$4 sm:$0xff]   ;;  %v9908_v11 = vld [vmem:[%s12237_s4 + $0x16c] ss:$16 sps:$4 sm:$0xff]  }
 0x883   :  { %v9698_v36 = vadd.f32 %v2254_v33, %v2252_v25  ;;  %v9898_v33 = vld [vmem:[%s12237_s4 + $0x148] ss:$16 sps:$4 sm:$0xff]   ;;  %v9903_v25 = vld [vmem:[%s12237_s4 + $0x160] ss:$16 sps:$4 sm:$0xff]   ;;  %v9913_v15 = vld [vmem:[%s12237_s4 + $0x184] ss:$16 sps:$4 sm:$0xff]  }
 0x884   :  { %v9922_v60 = vld [vmem:[%s12237_s4 + $0x168] ss:$16 sps:$4 sm:$0xff]   ;;  %v9927_v34 = vld [vmem:[%s12237_s4 + $0x180] ss:$16 sps:$4 sm:$0xff]  }
 0x885   :  { %7893 = vtanh.f32 %v9698_v36 }
 0x88c   :  { %v7892_v45 = vpop.eup %7891 }
 0x88d   :  { %v2259_v37 = vmul.f32 %v7892_v45, %v2249_v46  ;;  %v9934_v45 = vld [vmem:[%s12237_s4 + $0x18c] ss:$16 sps:$4 sm:$0xff]   ;;  %v9939_v46 = vld [vmem:[%s12237_s4 + $0x1a4] ss:$16 sps:$4 sm:$0xff]  }
 0x88f   :  { %v7894_v23 = vpop.eup %7893 }
 0x890   :  { %v2260_v14 = vmul.f32 %v7894_v23, %v2250_v31  ;;  %v9946_v31 = vld [vmem:[%s12237_s4 + $0x188] ss:$16 sps:$4 sm:$0xff]   ;;  %v9951_v23 = vld [vmem:[%s12237_s4 + $0x1a0] ss:$16 sps:$4 sm:$0xff]  }
 0x892   :  { %v9707_v29 = vpack.c.bf16 %v2260_v14, %v2259_v37  ;;  %v9958_v37 = vld [vmem:[%s12237_s4 + $0x1ac] ss:$16 sps:$4 sm:$0xff]   ;;  %v9963_v14 = vld [vmem:[%s12237_s4 + $0x1c4] ss:$16 sps:$4 sm:$0xff]  }
 0x894   :  { %2305 = vmatmul.mubr.bf16.vlgmr.msra.gmra.mrb[28].mxu0 %v9707_v29  ;;  %2348 = vmatmul.mubr.bf16.vlgmr.msra.gmra.mrb[28].mxu1 %v9707_v29 }
 0x895   :  { %2662 = vmatpush1.bf16.msra.mxu0 %v7531_v5  ;;  %2775 = vmatpush1.bf16.msra.mxu1 %v7534_v41  ;;  %v9970_v5 = vld [vmem:[%s12237_s4 + $0x1a8] ss:$16 sps:$4 sm:$0xff]   ;;  %v9975_v41 = vld [vmem:[%s12237_s4 + $0x1c0] ss:$16 sps:$4 sm:$0xff]  }
 0x896   :  { %2663 = vmatprep.subr.bf16.mxu0 %v7539_v50  ;;  %2776 = vmatprep.subr.bf16.mxu1 %v7542_v30  ;;  %v9987_v50 = vld [vmem:[%s12237_s4 + $0x1e4] ss:$16 sps:$4 sm:$0xff]   ;;  %v9994_v30 = vld [vmem:[%s12237_s4 + $0x1c8] ss:$16 sps:$4 sm:$0xff]  }
 0x897   :  { %2693 = vmatprep.mubr.bf16.mxu0 %v12333_v47  ;;  %2806 = vmatprep.mubr.bf16.mxu1 %v12333_v47 }
 0x899   :  { %2664 = vmatpush1.bf16.msra.mxu0 %v7537_v10  ;;  %2777 = vmatpush1.bf16.msra.mxu1 %v7540_v16  ;;  %v9999_v10 = vld [vmem:[%s12237_s4 + $0x1e0] ss:$16 sps:$4 sm:$0xff]   ;;  %v10006_v16 = vld [vmem:[%s12237_s4 + $0x1ec] ss:$16 sps:$4 sm:$0xff]  }
 0x89a   :  { %2665 = vmatprep.subr.bf16.mxu0 %v7545_v13  ;;  %2778 = vmatprep.subr.bf16.mxu1 %v7548_v39  ;;  %v10013_v13 = vld [vmem:[%s12237_s4 + $0x1e8] ss:$16 sps:$4 sm:$0xff]  }
 0x89d   :  { %2666 = vmatpush1.bf16.msra.mxu0 %v7543_v21  ;;  %2779 = vmatpush1.bf16.msra.mxu1 %v7546_v49 }
 0x89e   :  { %2667 = vmatprep.subr.bf16.mxu0 %v7551_v6  ;;  %2780 = vmatprep.subr.bf16.mxu1 %v7554_v42 }
 0x8a1   :  { %2668 = vmatpush1.bf16.msra.mxu0 %v7549_v57  ;;  %2781 = vmatpush1.bf16.msra.mxu1 %v7552_v62 }
 0x8a2   :  { %2669 = vmatprep.subr.bf16.mxu0 %v7557_v48  ;;  %2782 = vmatprep.subr.bf16.mxu1 %v7560_v55 }
 0x8a5   :  { %2670 = vmatpush1.bf16.msra.mxu0 %v7555_v63  ;;  %2783 = vmatpush1.bf16.msra.mxu1 %v7558_v18 }
 0x8a6   :  { %2671 = vmatprep.subr.bf16.mxu0 %v7563_v19  ;;  %2784 = vmatprep.subr.bf16.mxu1 %v7566_v58 }
 0x8a9   :  { %2672 = vmatpush1.bf16.msra.mxu0 %v7561_v43  ;;  %2785 = vmatpush1.bf16.msra.mxu1 %v7564_v4 }
 0x8aa   :  { %2673 = vmatprep.subr.bf16.mxu0 %v7569_v51  ;;  %2786 = vmatprep.subr.bf16.mxu1 %v7572_v56 }
 0x8ad   :  { %2674 = vmatpush1.bf16.msra.mxu0 %v7567_v61  ;;  %2787 = vmatpush1.bf16.msra.mxu1 %v7570_v0 }
 0x8ae   :  { %2675 = vmatprep.subr.bf16.mxu0 %v7575_v17  ;;  %2788 = vmatprep.subr.bf16.mxu1 %v7578_v2 }
 0x8b1   :  { %2676 = vmatpush1.bf16.msra.mxu0 %v7573_v40  ;;  %2789 = vmatpush1.bf16.msra.mxu1 %v7576_v8 }
 0x8b2   :  { %3119 = vmatprep.subr.bf16.mxu0 %v9800_v59  ;;  %3162 = vmatprep.subr.bf16.mxu1 %v9805_v22 }
 0x8b4   :  { %2694 = vmatmul.mubr.bf16.vlgmr.msra.gmra.mrb[32].mxu0 %v9216_v28  ;;  %2807 = vmatmul.mubr.bf16.vlgmr.msra.gmra.mrb[32].mxu1 %v9216_v28  ;;  %v9864_v28 = vld [vmem:[%s12237_s4 + $0x12c] ss:$16 sps:$4 sm:$0xff]  }
 0x8b5   :  { %2703 = vmatprep.mubr.bf16.mxu0 %v12333_v47  ;;  %2816 = vmatprep.mubr.bf16.mxu1 %v12333_v47 }
 0x8b6   :  { %3120 = vmatpush1.bf16.msra.mxu0 %v9811_v38  ;;  %3163 = vmatpush1.bf16.msra.mxu1 %v9817_v1 }
 0x8b7   :  { %3121 = vmatprep.subr.bf16.mxu0 %v9822_v24  ;;  %3164 = vmatprep.subr.bf16.mxu1 %v9864_v28 }
 0x8ba   :  { %3122 = vmatpush1.bf16.msra.mxu0 %v9833_v9 }
 0x8bc   :  { %2704 = vmatmul.mubr.bf16.gmra.mrb[36].mxu0 %v9270_v3  ;;  %2817 = vmatmul.mubr.bf16.gmra.mrb[36].mxu1 %v9270_v3  ;;  %v9870_v3 = vld [vmem:[%s12237_s4 + $0x144] ss:$16 sps:$4 sm:$0xff]  }
 0x8bd   :  { %2713 = vmatprep.mubr.bf16.mxu0 %v12333_v47  ;;  %2826 = vmatprep.mubr.bf16.mxu1 %v12333_v47 }
 0x8be   :  { %3123 = vmatprep.subr.bf16.mxu0 %v9870_v3 }
 0x8c4   :  { %2714 = vmatmul.mubr.bf16.gmra.mrb[40].mxu0 %v9324_v27  ;;  %2827 = vmatmul.mubr.bf16.gmra.mrb[40].mxu1 %v9324_v27  ;;  %v9875_v27 = vld [vmem:[%s12237_s4 + $0x128] ss:$16 sps:$4 sm:$0xff]  }
 0x8c5   :  { %2723 = vmatprep.mubr.bf16.mxu0 %v12333_v47  ;;  %2836 = vmatprep.mubr.bf16.mxu1 %v12333_v47 }
 0x8c6   :  { %3165 = vmatpush1.bf16.msra.mxu1 %v9875_v27 }
 0x8cc   :  { %2724 = vmatmul.mubr.bf16.gmra.mrb[44].mxu0 %v9463_v44  ;;  %2837 = vmatmul.mubr.bf16.gmra.mrb[44].mxu1 %v9463_v44  ;;  %v9880_v44 = vld [vmem:[%s12237_s4 + $0x140] ss:$16 sps:$4 sm:$0xff]  }
 0x8cd   :  { %2733 = vmatprep.mubr.bf16.mxu0 %v12333_v47  ;;  %2846 = vmatprep.mubr.bf16.mxu1 %v12333_v47 }
 0x8ce   :  { %3124 = vmatpush1.bf16.msra.mxu0 %v9880_v44 }
 0x8d4   :  { %2734 = vmatmul.mubr.bf16.gmra.mrb[48].mxu0 %v9587_v52  ;;  %2847 = vmatmul.mubr.bf16.gmra.mrb[48].mxu1 %v9587_v52  ;;  %v9888_v52 = vld [vmem:[%s12237_s4 + $0x14c] ss:$16 sps:$4 sm:$0xff]  }
 0x8d5   :  { %2743 = vmatprep.mubr.bf16.mxu0 %v12333_v47  ;;  %2856 = vmatprep.mubr.bf16.mxu1 %v12333_v47 }
 0x8d6   :  { %3166 = vmatprep.subr.bf16.mxu1 %v9888_v52 }
 0x8d7   :  { %3167 = vmatpush1.bf16.msra.mxu1 %v9898_v33 }
 0x8d8   :  { %3168 = vmatprep.subr.bf16.mxu1 %v9908_v11 }
 0x8db   :  { %3169 = vmatpush1.bf16.msra.mxu1 %v9922_v60 }
 0x8dc   :  { %2744 = vmatmul.mubr.bf16.gmra.mrb[52].mxu0 %v9643_v20  ;;  %2857 = vmatmul.mubr.bf16.gmra.mrb[52].mxu1 %v9643_v20  ;;  %v9893_v20 = vld [vmem:[%s12237_s4 + $0x164] ss:$16 sps:$4 sm:$0xff]  }
 0x8dd   :  { %2753 = vmatprep.mubr.bf16.mxu0 %v12333_v47  ;;  %2866 = vmatprep.mubr.bf16.mxu1 %v12333_v47 }
 0x8de   :  { %3125 = vmatprep.subr.bf16.mxu0 %v9893_v20  ;;  %3170 = vmatprep.subr.bf16.mxu1 %v9934_v45 }
 0x8df   :  { %3126 = vmatpush1.bf16.msra.mxu0 %v9903_v25  ;;  %3171 = vmatpush1.bf16.msra.mxu1 %v9946_v31 }
 0x8e0   :  { %3127 = vmatprep.subr.bf16.mxu0 %v9913_v15  ;;  %3172 = vmatprep.subr.bf16.mxu1 %v9958_v37 }
 0x8e3   :  { %3128 = vmatpush1.bf16.msra.mxu0 %v9927_v34  ;;  %3173 = vmatpush1.bf16.msra.mxu1 %v9970_v5 }
 0x8e4   :  { %2754 = vmatmul.mubr.bf16.gmra.mrb[56].mxu0 %v9707_v29  ;;  %2867 = vmatmul.mubr.bf16.gmra.mrb[56].mxu1 %v9707_v29  ;;  %v9982_v29 = vld [vmem:[%s12237_s4 + $0x1cc] ss:$16 sps:$4 sm:$0xff]  }
 0x8e5   :  { %2763 = vmatprep.mubr.bf16.mxu0 %v12333_v47  ;;  %2876 = vmatprep.mubr.bf16.mxu1 %v12333_v47 }
 0x8e6   :  { %3129 = vmatprep.subr.bf16.mxu0 %v9939_v46  ;;  %3174 = vmatprep.subr.bf16.mxu1 %v9982_v29 }
 0x8e7   :  { %3130 = vmatpush1.bf16.msra.mxu0 %v9951_v23  ;;  %3175 = vmatpush1.bf16.msra.mxu1 %v9994_v30 }
 0x8e8   :  { %3131 = vmatprep.subr.bf16.mxu0 %v9963_v14  ;;  %3176 = vmatprep.subr.bf16.mxu1 %v10006_v16 }
 0x8eb   :  { %3132 = vmatpush1.bf16.msra.mxu0 %v9975_v41  ;;  %3177 = vmatpush1.bf16.msra.mxu1 %v10013_v13 }
 0x8ec   :  { %3133 = vmatprep.subr.bf16.mxu0 %v9987_v50  ;;  %3302 = vmatprep.subr.bf16.mxu1 %v9805_v22 }
 0x8ef   :  { %3134 = vmatpush1.bf16.msra.mxu0 %v9999_v10 }
 0x8f0   :  { %3259 = vmatprep.subr.bf16.mxu0 %v9800_v59 }
 0x967   :  { %v2306_v39 = vpop.f32.mrb[28].mxu0  ;;  %v2349_v21 = vpop.f32.mrb[28].mxu1 }
 0x968   :  { %v7078_v49 = vadd.f32 %v2306_v39, %v9187_v35  ;;  %v2308_v6 = vpop.f32.mrb[29].mxu0  ;;  %v2351_v42 = vpop.f32.mrb[29].mxu1  ;;  %v7110_v4 = vadd.f32 %v2349_v21, %v9196_v26 }
 0x969   :  { %v7079_v57 = vadd.f32 %v2308_v6, %v9192_v54  ;;  %v2310_v62 = vpop.f32.mrb[30].mxu0  ;;  %v2353_v48 = vpop.f32.mrb[30].mxu1  ;;  %v7111_v0 = vadd.f32 %v2351_v42, %v9205_v12 }
 0x96a   :  { %v2366_v55 = vmul.f32 0.5, %v7078_v49  ;;  %v7080_v63 = vadd.f32 %v2310_v62, %v9187_v35  ;;  %v2312_v18 = vpop.f32.mrb[31].mxu0  ;;  %v2355_v19 = vpop.f32.mrb[31].mxu1  ;;  %v7112_v61 = vadd.f32 %v2353_v48, %v9196_v26 }
 0x96b   :  { %v2374_v58 = vmul.f32 0.5, %v7079_v57  ;;  %v7081_v43 = vadd.f32 %v2312_v18, %v9192_v54  ;;  %v2384_v35 = vmul.f32 0.5, %v7111_v0  ;;  %v7113_v17 = vadd.f32 %v2355_v19, %v9205_v12 }
 0x96c   :  { %7895 = vtanh.f32 %v2366_v55  ;;  %v2367_v51 = vmul.f32 0.5, %v7080_v63 }
 0x96d   :  { %7897 = vtanh.f32 %v2374_v58  ;;  %v2375_v56 = vmul.f32 0.5, %v7081_v43  ;;  %v2385_v39 = vmul.f32 0.5, %v7113_v17 }
 0x96e   :  { %7899 = vtanh.f32 %v2367_v51 }
 0x96f   :  { %7901 = vtanh.f32 %v7110_v4 }
 0x970   :  { %7903 = vtanh.f32 %v2375_v56 }
 0x971   :  { %7905 = vtanh.f32 %v7112_v61 }
 0x972   :  { %7907 = vtanh.f32 %v2384_v35 }
 0x973   :  { %7909 = vtanh.f32 %v2385_v39 }
 0x976   :  { %v7896_v2 = vpop.eup %7895 }
 0x977   :  { %v7898_v40 = vpop.eup %7897  ;;  %v2370_v54 = vadd.f32 1.0, %v7896_v2 }
 0x978   :  { %v2378_v8 = vadd.f32 1.0, %v7898_v40  ;;  %v7900_v21 = vpop.eup %7899 }
 0x979   :  { %v2372_v49 = vmul.f32 0.5, %v2370_v54  ;;  %v7902_v6 = vpop.eup %7901  ;;  %v2371_v62 = vadd.f32 1.0, %v7900_v21 }
 0x97a   :  { %v2380_v57 = vmul.f32 0.5, %v2378_v8  ;;  %v7904_v26 = vpop.eup %7903 }
 0x97b   :  { %v2394_v48 = vmul.f32 %v7902_v6, %v2372_v49  ;;  %v2373_v55 = vmul.f32 0.5, %v2371_v62  ;;  %v2379_v63 = vadd.f32 1.0, %v7904_v26  ;;  %v7906_v18 = vpop.eup %7905  ;;  %v12347_v62 = vld [vmem:[#allocation4_spill] sm:$0xff] }
 0x97c   :  { %v2392_v42 = vmul.f32 %v2380_v57, %v9694_v32  ;;  %v7908_v4 = vpop.eup %7907 }
 0x97d   :  { %v2381_v19 = vmul.f32 0.5, %v2379_v63  ;;  %v2395_v58 = vmul.f32 %v7906_v18, %v2373_v55  ;;  %v2388_v56 = vadd.f32 1.0, %v7908_v4  ;;  %v7910_v61 = vpop.eup %7909 }
 0x97e   :  { %v2396_v12 = vadd.f32 %v2394_v48, %v2392_v42  ;;  %v2389_v35 = vadd.f32 1.0, %v7910_v61 }
 0x97f   :  { %v2393_v43 = vmul.f32 %v2381_v19, %v9698_v36  ;;  %v2390_v0 = vmul.f32 0.5, %v2388_v56  ;;  %v6856_v36 = vld [vmem:[%s12240_s5 + $0x4] sm:$0xf] }
 0x980   :  { %7911 = vtanh.f32 %v2396_v12  ;;  %v2391_v32 = vmul.f32 0.5, %v2389_v35  ;;  %v10071_v39 = vrot.slane %v6856_v36, %v9179_v7  ;;  %v10074_v21 = vrot.slane %v6856_v36, %v9184_v53  ;;  %v12348_v35 = vld [vmem:[#allocation6_spill] sm:$0xff] }
 0x981   :  { %v2397_v51 = vadd.f32 %v2395_v58, %v2393_v43  ;;  %v10078_v26 = vrot.slane %v6856_v36, %v12347_v62 }
 0x983   :  { %7913 = vtanh.f32 %v2397_v51 }
 0x98a   :  { %v7912_v17 = vpop.eup %7911 }
 0x98b   :  { %v2400_v2 = vmul.f32 %v7912_v17, %v2390_v0  ;;  %v10085_v17 = vrot.slane %v6856_v36, %v12348_v35 }
 0x98d   :  { %v7914_v40 = vpop.eup %7913 }
 0x98e   :  { %v2401_v54 = vmul.f32 %v7914_v40, %v2391_v32 }
 0x990   :  { %v2402_v8 = vpack.c.bf16 %v2401_v54, %v2400_v2 }
 0x992   :  { %2764 = vmatmul.mubr.bf16.gmra.mrb[60].mxu0 %v2402_v8  ;;  %2877 = vmatmul.mubr.bf16.gmra.mrb[60].mxu1 %v2402_v8 }
 0x993   :  { %3151 = vmatprep.mubr.bf16.mxu0 %v12333_v47  ;;  %3194 = vmatprep.mubr.bf16.mxu1 %v12333_v47 }
 0x99a   :  { %3152 = vmatmul.mubr.bf16.vlgmr.msra.gmra.mrb[32].mxu0 %v12333_v47  ;;  %3195 = vmatmul.mubr.bf16.vlgmr.msra.gmra.mrb[32].mxu1 %v12333_v47 }
 0x99b   :  { %3260 = vmatpush1.bf16.msra.mxu0 %v9811_v38  ;;  %3303 = vmatpush1.bf16.msra.mxu1 %v9817_v1 }
 0x99c   :  { %3261 = vmatprep.subr.bf16.mxu0 %v9822_v24  ;;  %3304 = vmatprep.subr.bf16.mxu1 %v9864_v28 }
 0x99d   :  { %3291 = vmatprep.mubr.bf16.mxu0 %v12333_v47  ;;  %3334 = vmatprep.mubr.bf16.mxu1 %v12333_v47 }
 0x99f   :  { %3262 = vmatpush1.bf16.msra.mxu0 %v9833_v9  ;;  %3305 = vmatpush1.bf16.msra.mxu1 %v9875_v27 }
 0x9a0   :  { %3263 = vmatprep.subr.bf16.mxu0 %v9870_v3  ;;  %3306 = vmatprep.subr.bf16.mxu1 %v9888_v52 }
 0x9a3   :  { %3264 = vmatpush1.bf16.msra.mxu0 %v9880_v44  ;;  %3307 = vmatpush1.bf16.msra.mxu1 %v9898_v33 }
 0x9a4   :  { %3265 = vmatprep.subr.bf16.mxu0 %v9893_v20  ;;  %3308 = vmatprep.subr.bf16.mxu1 %v9908_v11 }
 0x9a7   :  { %3266 = vmatpush1.bf16.msra.mxu0 %v9903_v25  ;;  %3309 = vmatpush1.bf16.msra.mxu1 %v9922_v60 }
 0x9a8   :  { %3267 = vmatprep.subr.bf16.mxu0 %v9913_v15  ;;  %3310 = vmatprep.subr.bf16.mxu1 %v9934_v45 }
 0x9ab   :  { %3268 = vmatpush1.bf16.msra.mxu0 %v9927_v34  ;;  %3311 = vmatpush1.bf16.msra.mxu1 %v9946_v31 }
 0x9ac   :  { %3269 = vmatprep.subr.bf16.mxu0 %v9939_v46  ;;  %3312 = vmatprep.subr.bf16.mxu1 %v9958_v37 }
 0x9af   :  { %3270 = vmatpush1.bf16.msra.mxu0 %v9951_v23  ;;  %3313 = vmatpush1.bf16.msra.mxu1 %v9970_v5 }
 0x9b0   :  { %3271 = vmatprep.subr.bf16.mxu0 %v9963_v14  ;;  %3314 = vmatprep.subr.bf16.mxu1 %v9982_v29 }
 0x9b3   :  { %3272 = vmatpush1.bf16.msra.mxu0 %v9975_v41  ;;  %3315 = vmatpush1.bf16.msra.mxu1 %v9994_v30 }
 0x9b4   :  { %3273 = vmatprep.subr.bf16.mxu0 %v9987_v50  ;;  %3316 = vmatprep.subr.bf16.mxu1 %v10006_v16 }
 0x9b7   :  { %3274 = vmatpush1.bf16.msra.mxu0 %v9999_v10  ;;  %3317 = vmatpush1.bf16.msra.mxu1 %v10013_v13 }
 0x9b8   :  { %3399 = vmatprep.subr.bf16.mxu0 %v9800_v59  ;;  %3442 = vmatprep.subr.bf16.mxu1 %v9805_v22 }
 0xa6d   :  { %v3153_v49 = vpop.f32.mrb[32].mxu0  ;;  %v3196_v6 = vpop.f32.mrb[32].mxu1 }
 0xa6e   :  { %v7114_v57 = vadd.f32 %v3153_v49, %v10071_v39  ;;  %v3155_v48 = vpop.f32.mrb[33].mxu0  ;;  %v3198_v42 = vpop.f32.mrb[33].mxu1  ;;  %v7146_v56 = vadd.f32 %v3196_v6, %v10078_v26 }
 0xa6f   :  { %v7115_v55 = vadd.f32 %v3155_v48, %v10074_v21  ;;  %v3157_v63 = vpop.f32.mrb[34].mxu0  ;;  %v3200_v18 = vpop.f32.mrb[34].mxu1  ;;  %v7147_v32 = vadd.f32 %v3198_v42, %v10085_v17 }
 0xa70   :  { %v3213_v12 = vmul.f32 0.5, %v7114_v57  ;;  %v7116_v19 = vadd.f32 %v3157_v63, %v10071_v39  ;;  %v3159_v58 = vpop.f32.mrb[35].mxu0  ;;  %v3202_v43 = vpop.f32.mrb[35].mxu1  ;;  %v7148_v2 = vadd.f32 %v3200_v18, %v10078_v26 }
 0xa71   :  { %v3221_v4 = vmul.f32 0.5, %v7115_v55  ;;  %v7117_v51 = vadd.f32 %v3159_v58, %v10074_v21  ;;  %v7149_v40 = vadd.f32 %v3202_v43, %v10085_v17  ;;  %v3231_v6 = vmul.f32 0.5, %v7147_v32 }
 0xa72   :  { %7915 = vtanh.f32 %v3213_v12  ;;  %v3214_v61 = vmul.f32 0.5, %v7116_v19 }
 0xa73   :  { %7917 = vtanh.f32 %v3221_v4  ;;  %v3222_v0 = vmul.f32 0.5, %v7117_v51  ;;  %v3232_v48 = vmul.f32 0.5, %v7149_v40 }
 0xa74   :  { %7919 = vtanh.f32 %v3214_v61 }
 0xa75   :  { %7921 = vtanh.f32 %v7146_v56 }
 0xa76   :  { %7923 = vtanh.f32 %v3222_v0 }
 0xa77   :  { %7925 = vtanh.f32 %v7148_v2 }
 0xa78   :  { %7927 = vtanh.f32 %v3231_v6 }
 0xa79   :  { %7929 = vtanh.f32 %v3232_v48 }
 0xa7c   :  { %v7916_v54 = vpop.eup %7915 }
 0xa7d   :  { %v7918_v8 = vpop.eup %7917  ;;  %v3217_v49 = vadd.f32 1.0, %v7916_v54 }
 0xa7e   :  { %v3225_v57 = vadd.f32 1.0, %v7918_v8  ;;  %v7920_v55 = vpop.eup %7919 }
 0xa7f   :  { %v3219_v63 = vmul.f32 0.5, %v3217_v49  ;;  %v7922_v36 = vpop.eup %7921  ;;  %v3218_v19 = vadd.f32 1.0, %v7920_v55 }
 0xa80   :  { %v3227_v12 = vmul.f32 0.5, %v3225_v57  ;;  %v7924_v58 = vpop.eup %7923 }
 0xa81   :  { %v3241_v18 = vmul.f32 %v7922_v36, %v3219_v63  ;;  %v3220_v51 = vmul.f32 0.5, %v3218_v19  ;;  %v3226_v42 = vadd.f32 1.0, %v7924_v58  ;;  %v7926_v56 = vpop.eup %7925 }
 0xa82   :  { %v3239_v4 = vmul.f32 0.0, %v3227_v12  ;;  %v7928_v40 = vpop.eup %7927 }
 0xa83   :  { %v3228_v61 = vmul.f32 0.5, %v3226_v42  ;;  %v3242_v0 = vmul.f32 %v7926_v56, %v3220_v51  ;;  %v7930_v54 = vpop.eup %7929  ;;  %v3235_v8 = vadd.f32 1.0, %v7928_v40 }
 0xa84   :  { %v10090_v43 = vadd.f32 %v3241_v18, %v3239_v4  ;;  %v3236_v49 = vadd.f32 1.0, %v7930_v54 }
 0xa85   :  { %v3240_v2 = vmul.f32 0.0, %v3228_v61  ;;  %v3237_v57 = vmul.f32 0.5, %v3235_v8 }
 0xa86   :  { %7931 = vtanh.f32 %v10090_v43  ;;  %v3238_v55 = vmul.f32 0.5, %v3236_v49 }
 0xa87   :  { %v10093_v32 = vadd.f32 %v3242_v0, %v3240_v2 }
 0xa89   :  { %7933 = vtanh.f32 %v10093_v32 }
 0xa90   :  { %v7932_v6 = vpop.eup %7931 }
 0xa91   :  { %v3247_v63 = vmul.f32 %v7932_v6, %v3237_v57 }
 0xa93   :  { %v7934_v48 = vpop.eup %7933 }
 0xa94   :  { %v3248_v36 = vmul.f32 %v7934_v48, %v3238_v55 }
 0xa96   :  { %v10096_v12 = vpack.c.bf16 %v3248_v36, %v3247_v63 }
 0xa98   :  { %3292 = vmatmul.mubr.bf16.vlgmr.msra.gmra.mrb[36].mxu0 %v10096_v12  ;;  %3335 = vmatmul.mubr.bf16.vlgmr.msra.gmra.mrb[36].mxu1 %v10096_v12 }
 0xa99   :  { %3400 = vmatpush1.bf16.msra.mxu0 %v9811_v38  ;;  %3443 = vmatpush1.bf16.msra.mxu1 %v9817_v1 }
 0xa9a   :  { %3401 = vmatprep.subr.bf16.mxu0 %v9822_v24  ;;  %3444 = vmatprep.subr.bf16.mxu1 %v9864_v28 }
 0xa9b   :  { %3431 = vmatprep.mubr.bf16.mxu0 %v12333_v47  ;;  %3474 = vmatprep.mubr.bf16.mxu1 %v12333_v47 }
 0xa9d   :  { %3402 = vmatpush1.bf16.msra.mxu0 %v9833_v9  ;;  %3445 = vmatpush1.bf16.msra.mxu1 %v9875_v27 }
 0xa9e   :  { %3403 = vmatprep.subr.bf16.mxu0 %v9870_v3  ;;  %3446 = vmatprep.subr.bf16.mxu1 %v9888_v52 }
 0xaa1   :  { %3404 = vmatpush1.bf16.msra.mxu0 %v9880_v44  ;;  %3447 = vmatpush1.bf16.msra.mxu1 %v9898_v33 }
 0xaa2   :  { %3405 = vmatprep.subr.bf16.mxu0 %v9893_v20  ;;  %3448 = vmatprep.subr.bf16.mxu1 %v9908_v11 }
 0xaa5   :  { %3406 = vmatpush1.bf16.msra.mxu0 %v9903_v25  ;;  %3449 = vmatpush1.bf16.msra.mxu1 %v9922_v60 }
 0xaa6   :  { %3407 = vmatprep.subr.bf16.mxu0 %v9913_v15  ;;  %3450 = vmatprep.subr.bf16.mxu1 %v9934_v45 }
 0xaa9   :  { %3408 = vmatpush1.bf16.msra.mxu0 %v9927_v34  ;;  %3451 = vmatpush1.bf16.msra.mxu1 %v9946_v31 }
 0xaaa   :  { %3409 = vmatprep.subr.bf16.mxu0 %v9939_v46  ;;  %3452 = vmatprep.subr.bf16.mxu1 %v9958_v37 }
 0xaad   :  { %3410 = vmatpush1.bf16.msra.mxu0 %v9951_v23  ;;  %3453 = vmatpush1.bf16.msra.mxu1 %v9970_v5 }
 0xaae   :  { %3411 = vmatprep.subr.bf16.mxu0 %v9963_v14  ;;  %3454 = vmatprep.subr.bf16.mxu1 %v9982_v29 }
 0xab1   :  { %3412 = vmatpush1.bf16.msra.mxu0 %v9975_v41  ;;  %3455 = vmatpush1.bf16.msra.mxu1 %v9994_v30 }
 0xab2   :  { %3413 = vmatprep.subr.bf16.mxu0 %v9987_v50  ;;  %3456 = vmatprep.subr.bf16.mxu1 %v10006_v16 }
 0xab5   :  { %3414 = vmatpush1.bf16.msra.mxu0 %v9999_v10  ;;  %3457 = vmatpush1.bf16.msra.mxu1 %v10013_v13 }
 0xab6   :  { %3539 = vmatprep.subr.bf16.mxu0 %v9800_v59  ;;  %3582 = vmatprep.subr.bf16.mxu1 %v9805_v22 }
 0xb6b   :  { %v3293_v19 = vpop.f32.mrb[36].mxu0  ;;  %v3336_v58 = vpop.f32.mrb[36].mxu1 }
 0xb6c   :  { %v7118_v18 = vadd.f32 %v3293_v19, %v10071_v39  ;;  %v3295_v4 = vpop.f32.mrb[37].mxu0  ;;  %v3338_v51 = vpop.f32.mrb[37].mxu1  ;;  %v7150_v6 = vadd.f32 %v3336_v58, %v10078_v26 }
 0xb6d   :  { %v7119_v42 = vadd.f32 %v3295_v4, %v10074_v21  ;;  %v3297_v56 = vpop.f32.mrb[38].mxu0  ;;  %v3340_v61 = vpop.f32.mrb[38].mxu1  ;;  %v7151_v63 = vadd.f32 %v3338_v51, %v10085_v17 }
 0xb6e   :  { %v3353_v0 = vmul.f32 0.5, %v7118_v18  ;;  %v7120_v2 = vadd.f32 %v3297_v56, %v10071_v39  ;;  %v3299_v40 = vpop.f32.mrb[39].mxu0  ;;  %v3342_v54 = vpop.f32.mrb[39].mxu1  ;;  %v7152_v48 = vadd.f32 %v3340_v61, %v10078_v26 }
 0xb6f   :  { %v3361_v8 = vmul.f32 0.5, %v7119_v42  ;;  %v7121_v49 = vadd.f32 %v3299_v40, %v10074_v21  ;;  %v7153_v36 = vadd.f32 %v3342_v54, %v10085_v17  ;;  %v3371_v42 = vmul.f32 0.5, %v7151_v63 }
 0xb70   :  { %7935 = vtanh.f32 %v3353_v0  ;;  %v3354_v57 = vmul.f32 0.5, %v7120_v2 }
 0xb71   :  { %7937 = vtanh.f32 %v3361_v8  ;;  %v3362_v55 = vmul.f32 0.5, %v7121_v49  ;;  %v3372_v0 = vmul.f32 0.5, %v7153_v36 }
 0xb72   :  { %7939 = vtanh.f32 %v3354_v57 }
 0xb73   :  { %7941 = vtanh.f32 %v7150_v6 }
 0xb74   :  { %7943 = vtanh.f32 %v3362_v55 }
 0xb75   :  { %7945 = vtanh.f32 %v7152_v48 }
 0xb76   :  { %7947 = vtanh.f32 %v3371_v42 }
 0xb77   :  { %7949 = vtanh.f32 %v3372_v0 }
 0xb7a   :  { %v7936_v19 = vpop.eup %7935 }
 0xb7b   :  { %v7938_v18 = vpop.eup %7937  ;;  %v3357_v4 = vadd.f32 1.0, %v7936_v19 }
 0xb7c   :  { %v3365_v56 = vadd.f32 1.0, %v7938_v18  ;;  %v7940_v58 = vpop.eup %7939 }
 0xb7d   :  { %v3359_v2 = vmul.f32 0.5, %v3357_v4  ;;  %v7942_v40 = vpop.eup %7941  ;;  %v3358_v49 = vadd.f32 1.0, %v7940_v58 }
 0xb7e   :  { %v3367_v8 = vmul.f32 0.5, %v3365_v56  ;;  %v7944_v57 = vpop.eup %7943 }
 0xb7f   :  { %v3381_v61 = vmul.f32 %v7942_v40, %v3359_v2  ;;  %v3360_v51 = vmul.f32 0.5, %v3358_v49  ;;  %v3366_v55 = vadd.f32 1.0, %v7944_v57  ;;  %v7946_v54 = vpop.eup %7945 }
 0xb80   :  { %v3379_v6 = vmul.f32 %v3367_v8, %v10090_v43  ;;  %v7948_v4 = vpop.eup %7947 }
 0xb81   :  { %v3368_v19 = vmul.f32 0.5, %v3366_v55  ;;  %v3382_v63 = vmul.f32 %v7946_v54, %v3360_v51  ;;  %v7950_v42 = vpop.eup %7949  ;;  %v3375_v56 = vadd.f32 1.0, %v7948_v4 }
 0xb82   :  { %v10143_v48 = vadd.f32 %v3381_v61, %v3379_v6  ;;  %v3376_v43 = vadd.f32 1.0, %v7950_v42 }
 0xb83   :  { %v3380_v36 = vmul.f32 %v3368_v19, %v10093_v32  ;;  %v3377_v2 = vmul.f32 0.5, %v3375_v56 }
 0xb84   :  { %7951 = vtanh.f32 %v10143_v48  ;;  %v3378_v0 = vmul.f32 0.5, %v3376_v43 }
 0xb85   :  { %v10147_v18 = vadd.f32 %v3382_v63, %v3380_v36 }
 0xb87   :  { %7953 = vtanh.f32 %v10147_v18 }
 0xb8e   :  { %v7952_v58 = vpop.eup %7951 }
 0xb8f   :  { %v3387_v8 = vmul.f32 %v7952_v58, %v3377_v2 }
 0xb91   :  { %v7954_v40 = vpop.eup %7953 }
 0xb92   :  { %v3388_v49 = vmul.f32 %v7954_v40, %v3378_v0 }
 0xb94   :  { %v10150_v57 = vpack.c.bf16 %v3388_v49, %v3387_v8 }
 0xb96   :  { %3432 = vmatmul.mubr.bf16.vlgmr.msra.gmra.mrb[40].mxu0 %v10150_v57  ;;  %3475 = vmatmul.mubr.bf16.vlgmr.msra.gmra.mrb[40].mxu1 %v10150_v57 }
 0xb97   :  { %3540 = vmatpush1.bf16.msra.mxu0 %v9811_v38  ;;  %3583 = vmatpush1.bf16.msra.mxu1 %v9817_v1 }
 0xb98   :  { %3541 = vmatprep.subr.bf16.mxu0 %v9822_v24  ;;  %3584 = vmatprep.subr.bf16.mxu1 %v9864_v28 }
 0xb99   :  { %3571 = vmatprep.mubr.bf16.mxu0 %v12333_v47  ;;  %3614 = vmatprep.mubr.bf16.mxu1 %v12333_v47 }
 0xb9b   :  { %3542 = vmatpush1.bf16.msra.mxu0 %v9833_v9  ;;  %3585 = vmatpush1.bf16.msra.mxu1 %v9875_v27 }
 0xb9c   :  { %3543 = vmatprep.subr.bf16.mxu0 %v9870_v3  ;;  %3586 = vmatprep.subr.bf16.mxu1 %v9888_v52 }
 0xb9f   :  { %3544 = vmatpush1.bf16.msra.mxu0 %v9880_v44  ;;  %3587 = vmatpush1.bf16.msra.mxu1 %v9898_v33 }
 0xba0   :  { %3545 = vmatprep.subr.bf16.mxu0 %v9893_v20  ;;  %3588 = vmatprep.subr.bf16.mxu1 %v9908_v11 }
 0xba3   :  { %3546 = vmatpush1.bf16.msra.mxu0 %v9903_v25  ;;  %3589 = vmatpush1.bf16.msra.mxu1 %v9922_v60 }
 0xba4   :  { %3547 = vmatprep.subr.bf16.mxu0 %v9913_v15  ;;  %3590 = vmatprep.subr.bf16.mxu1 %v9934_v45 }
 0xba7   :  { %3548 = vmatpush1.bf16.msra.mxu0 %v9927_v34  ;;  %3591 = vmatpush1.bf16.msra.mxu1 %v9946_v31 }
 0xba8   :  { %3549 = vmatprep.subr.bf16.mxu0 %v9939_v46  ;;  %3592 = vmatprep.subr.bf16.mxu1 %v9958_v37 }
 0xbab   :  { %3550 = vmatpush1.bf16.msra.mxu0 %v9951_v23  ;;  %3593 = vmatpush1.bf16.msra.mxu1 %v9970_v5 }
 0xbac   :  { %3551 = vmatprep.subr.bf16.mxu0 %v9963_v14  ;;  %3594 = vmatprep.subr.bf16.mxu1 %v9982_v29 }
 0xbaf   :  { %3552 = vmatpush1.bf16.msra.mxu0 %v9975_v41  ;;  %3595 = vmatpush1.bf16.msra.mxu1 %v9994_v30 }
 0xbb0   :  { %3553 = vmatprep.subr.bf16.mxu0 %v9987_v50  ;;  %3596 = vmatprep.subr.bf16.mxu1 %v10006_v16 }
 0xbb3   :  { %3554 = vmatpush1.bf16.msra.mxu0 %v9999_v10  ;;  %3597 = vmatpush1.bf16.msra.mxu1 %v10013_v13 }
 0xbb4   :  { %3679 = vmatprep.subr.bf16.mxu0 %v9800_v59  ;;  %3722 = vmatprep.subr.bf16.mxu1 %v9805_v22 }
 0xc69   :  { %v3433_v32 = vpop.f32.mrb[40].mxu0  ;;  %v3476_v61 = vpop.f32.mrb[40].mxu1 }
 0xc6a   :  { %v7122_v6 = vadd.f32 %v3433_v32, %v10071_v39  ;;  %v3435_v51 = vpop.f32.mrb[41].mxu0  ;;  %v3478_v55 = vpop.f32.mrb[41].mxu1  ;;  %v7154_v2 = vadd.f32 %v3476_v61, %v10078_v26 }
 0xc6b   :  { %v7123_v54 = vadd.f32 %v3435_v51, %v10074_v21  ;;  %v3437_v19 = vpop.f32.mrb[42].mxu0  ;;  %v3480_v63 = vpop.f32.mrb[42].mxu1  ;;  %v7155_v49 = vadd.f32 %v3478_v55, %v10085_v17 }
 0xc6c   :  { %v3493_v36 = vmul.f32 0.5, %v7122_v6  ;;  %v7124_v4 = vadd.f32 %v3437_v19, %v10071_v39  ;;  %v3439_v42 = vpop.f32.mrb[43].mxu0  ;;  %v3482_v56 = vpop.f32.mrb[43].mxu1  ;;  %v7156_v8 = vadd.f32 %v3480_v63, %v10078_v26 }
 0xc6d   :  { %v3501_v43 = vmul.f32 0.5, %v7123_v54  ;;  %v7125_v58 = vadd.f32 %v3439_v42, %v10074_v21  ;;  %v7157_v32 = vadd.f32 %v3482_v56, %v10085_v17  ;;  %v3511_v19 = vmul.f32 0.5, %v7155_v49 }
 0xc6e   :  { %7955 = vtanh.f32 %v3493_v36  ;;  %v3494_v0 = vmul.f32 0.5, %v7124_v4 }
 0xc6f   :  { %7957 = vtanh.f32 %v3501_v43  ;;  %v3502_v40 = vmul.f32 0.5, %v7125_v58  ;;  %v3512_v42 = vmul.f32 0.5, %v7157_v32 }
 0xc70   :  { %7959 = vtanh.f32 %v3494_v0 }
 0xc71   :  { %7961 = vtanh.f32 %v7154_v2 }
 0xc72   :  { %7963 = vtanh.f32 %v3502_v40 }
 0xc73   :  { %7965 = vtanh.f32 %v7156_v8 }
 0xc74   :  { %7967 = vtanh.f32 %v3511_v19 }
 0xc75   :  { %7969 = vtanh.f32 %v3512_v42 }
 0xc78   :  { %v7956_v6 = vpop.eup %7955 }
 0xc79   :  { %v7958_v51 = vpop.eup %7957  ;;  %v3497_v54 = vadd.f32 1.0, %v7956_v6 }
 0xc7a   :  { %v3505_v36 = vadd.f32 1.0, %v7958_v51  ;;  %v7960_v61 = vpop.eup %7959 }
 0xc7b   :  { %v3499_v4 = vmul.f32 0.5, %v3497_v54  ;;  %v7962_v43 = vpop.eup %7961  ;;  %v3498_v0 = vadd.f32 1.0, %v7960_v61 }
 0xc7c   :  { %v3507_v58 = vmul.f32 0.5, %v3505_v36  ;;  %v7964_v35 = vpop.eup %7963 }
 0xc7d   :  { %v3521_v63 = vmul.f32 %v7962_v43, %v3499_v4  ;;  %v3500_v55 = vmul.f32 0.5, %v3498_v0  ;;  %v3506_v40 = vadd.f32 1.0, %v7964_v35  ;;  %v7966_v56 = vpop.eup %7965 }
 0xc7e   :  { %v3519_v2 = vmul.f32 %v3507_v58, %v10143_v48  ;;  %v7968_v54 = vpop.eup %7967 }
 0xc7f   :  { %v3508_v6 = vmul.f32 0.5, %v3506_v40  ;;  %v3522_v49 = vmul.f32 %v7966_v56, %v3500_v55  ;;  %v7970_v19 = vpop.eup %7969  ;;  %v3515_v36 = vadd.f32 1.0, %v7968_v54 }
 0xc80   :  { %v10197_v8 = vadd.f32 %v3521_v63, %v3519_v2  ;;  %v3516_v48 = vadd.f32 1.0, %v7970_v19 }
 0xc81   :  { %v3520_v32 = vmul.f32 %v3508_v6, %v10147_v18  ;;  %v3517_v35 = vmul.f32 0.5, %v3515_v36 }
 0xc82   :  { %7971 = vtanh.f32 %v10197_v8  ;;  %v3518_v42 = vmul.f32 0.5, %v3516_v48 }
 0xc83   :  { %v10201_v51 = vadd.f32 %v3522_v49, %v3520_v32 }
 0xc85   :  { %7973 = vtanh.f32 %v10201_v51 }
 0xc8c   :  { %v7972_v61 = vpop.eup %7971 }
 0xc8d   :  { %v3527_v43 = vmul.f32 %v7972_v61, %v3517_v35 }
 0xc8f   :  { %v7974_v4 = vpop.eup %7973 }
 0xc90   :  { %v3528_v58 = vmul.f32 %v7974_v4, %v3518_v42 }
 0xc92   :  { %v10204_v0 = vpack.c.bf16 %v3528_v58, %v3527_v43 }
 0xc94   :  { %3572 = vmatmul.mubr.bf16.vlgmr.msra.gmra.mrb[44].mxu0 %v10204_v0  ;;  %3615 = vmatmul.mubr.bf16.vlgmr.msra.gmra.mrb[44].mxu1 %v10204_v0 }
 0xc95   :  { %3680 = vmatpush1.bf16.msra.mxu0 %v9811_v38  ;;  %3723 = vmatpush1.bf16.msra.mxu1 %v9817_v1 }
 0xc96   :  { %3681 = vmatprep.subr.bf16.mxu0 %v9822_v24  ;;  %3724 = vmatprep.subr.bf16.mxu1 %v9864_v28 }
 0xc97   :  { %3711 = vmatprep.mubr.bf16.mxu0 %v12333_v47  ;;  %3754 = vmatprep.mubr.bf16.mxu1 %v12333_v47 }
 0xc99   :  { %3682 = vmatpush1.bf16.msra.mxu0 %v9833_v9  ;;  %3725 = vmatpush1.bf16.msra.mxu1 %v9875_v27 }
 0xc9a   :  { %3683 = vmatprep.subr.bf16.mxu0 %v9870_v3  ;;  %3726 = vmatprep.subr.bf16.mxu1 %v9888_v52 }
 0xc9d   :  { %3684 = vmatpush1.bf16.msra.mxu0 %v9880_v44  ;;  %3727 = vmatpush1.bf16.msra.mxu1 %v9898_v33 }
 0xc9e   :  { %3685 = vmatprep.subr.bf16.mxu0 %v9893_v20  ;;  %3728 = vmatprep.subr.bf16.mxu1 %v9908_v11 }
 0xca1   :  { %3686 = vmatpush1.bf16.msra.mxu0 %v9903_v25  ;;  %3729 = vmatpush1.bf16.msra.mxu1 %v9922_v60 }
 0xca2   :  { %3687 = vmatprep.subr.bf16.mxu0 %v9913_v15  ;;  %3730 = vmatprep.subr.bf16.mxu1 %v9934_v45 }
 0xca5   :  { %3688 = vmatpush1.bf16.msra.mxu0 %v9927_v34  ;;  %3731 = vmatpush1.bf16.msra.mxu1 %v9946_v31 }
 0xca6   :  { %3689 = vmatprep.subr.bf16.mxu0 %v9939_v46  ;;  %3732 = vmatprep.subr.bf16.mxu1 %v9958_v37 }
 0xca9   :  { %3690 = vmatpush1.bf16.msra.mxu0 %v9951_v23  ;;  %3733 = vmatpush1.bf16.msra.mxu1 %v9970_v5 }
 0xcaa   :  { %3691 = vmatprep.subr.bf16.mxu0 %v9963_v14  ;;  %3734 = vmatprep.subr.bf16.mxu1 %v9982_v29 }
 0xcad   :  { %3692 = vmatpush1.bf16.msra.mxu0 %v9975_v41  ;;  %3735 = vmatpush1.bf16.msra.mxu1 %v9994_v30 }
 0xcae   :  { %3693 = vmatprep.subr.bf16.mxu0 %v9987_v50  ;;  %3736 = vmatprep.subr.bf16.mxu1 %v10006_v16 }
 0xcb1   :  { %3694 = vmatpush1.bf16.msra.mxu0 %v9999_v10  ;;  %3737 = vmatpush1.bf16.msra.mxu1 %v10013_v13 }
 0xcb2   :  { %3819 = vmatprep.subr.bf16.mxu0 %v9800_v59  ;;  %3862 = vmatprep.subr.bf16.mxu1 %v9805_v22 }
 0xd67   :  { %v3573_v38 = vpop.f32.mrb[44].mxu0  ;;  %v3616_v1 = vpop.f32.mrb[44].mxu1 }
 0xd68   :  { %v7126_v24 = vadd.f32 %v3573_v38, %v10071_v39  ;;  %v3575_v9 = vpop.f32.mrb[45].mxu0  ;;  %v3618_v28 = vpop.f32.mrb[45].mxu1  ;;  %v7158_v22 = vadd.f32 %v3616_v1, %v10078_v26 }
 0xd69   :  { %v7127_v3 = vadd.f32 %v3575_v9, %v10074_v21  ;;  %v3577_v27 = vpop.f32.mrb[46].mxu0  ;;  %v3620_v44 = vpop.f32.mrb[46].mxu1  ;;  %v7159_v45 = vadd.f32 %v3618_v28, %v10085_v17 }
 0xd6a   :  { %v3633_v52 = vmul.f32 0.5, %v7126_v24  ;;  %v7128_v20 = vadd.f32 %v3577_v27, %v10071_v39  ;;  %v3579_v33 = vpop.f32.mrb[47].mxu0  ;;  %v3622_v25 = vpop.f32.mrb[47].mxu1  ;;  %v7160_v34 = vadd.f32 %v3620_v44, %v10078_v26  ;;  %v10271_v27 = vld [vmem:[%s12237_s4 + $0x108] ss:$16 sps:$4 sm:$0xff]  }
 0xd6b   :  { %v3641_v11 = vmul.f32 0.5, %v7127_v3  ;;  %v7129_v59 = vadd.f32 %v3579_v33, %v10074_v21  ;;  %v7161_v46 = vadd.f32 %v3622_v25, %v10085_v17  ;;  %v3651_v14 = vmul.f32 0.5, %v7159_v45  ;;  %v10277_v44 = vld [vmem:[%s12237_s4 + $0x124] ss:$16 sps:$4 sm:$0xff]   ;;  %v10297_v33 = vld [vmem:[%s12237_s4 + $0x128] ss:$16 sps:$4 sm:$0xff]  }
 0xd6c   :  { %7975 = vtanh.f32 %v3633_v52  ;;  %v3634_v15 = vmul.f32 0.5, %v7128_v20  ;;  %v10283_v52 = vld [vmem:[%s12237_s4 + $0x12c] ss:$16 sps:$4 sm:$0xff]   ;;  %v10291_v20 = vld [vmem:[%s12237_s4 + $0x120] ss:$16 sps:$4 sm:$0xff]  }
 0xd6d   :  { %7977 = vtanh.f32 %v3641_v11  ;;  %v3642_v60 = vmul.f32 0.5, %v7129_v59  ;;  %v3652_v41 = vmul.f32 0.5, %v7161_v46  ;;  %v10303_v25 = vld [vmem:[%s12237_s4 + $0x144] ss:$16 sps:$4 sm:$0xff]   ;;  %v10309_v11 = vld [vmem:[%s12237_s4 + $0x14c] ss:$16 sps:$4 sm:$0xff]  }
 0xd6e   :  { %7979 = vtanh.f32 %v3634_v15  ;;  %v10315_v59 = vld [vmem:[%s12237_s4 + $0x140] ss:$16 sps:$4 sm:$0xff]   ;;  %v10327_v15 = vld [vmem:[%s12237_s4 + $0x164] ss:$16 sps:$4 sm:$0xff]   ;;  %v10345_v45 = vld [vmem:[%s12237_s4 + $0x168] ss:$16 sps:$4 sm:$0xff]  }
 0xd6f   :  { %7981 = vtanh.f32 %v7158_v22  ;;  %v10321_v22 = vld [vmem:[%s12237_s4 + $0x148] ss:$16 sps:$4 sm:$0xff]   ;;  %v10351_v46 = vld [vmem:[%s12237_s4 + $0x184] ss:$16 sps:$4 sm:$0xff]  }
 0xd70   :  { %7983 = vtanh.f32 %v3642_v60  ;;  %v10333_v60 = vld [vmem:[%s12237_s4 + $0x16c] ss:$16 sps:$4 sm:$0xff]  }
 0xd71   :  { %7985 = vtanh.f32 %v7160_v34  ;;  %v10339_v34 = vld [vmem:[%s12237_s4 + $0x160] ss:$16 sps:$4 sm:$0xff]  }
 0xd72   :  { %7987 = vtanh.f32 %v3651_v14  ;;  %v10375_v14 = vld [vmem:[%s12237_s4 + $0x1a4] ss:$16 sps:$4 sm:$0xff]  }
 0xd73   :  { %7989 = vtanh.f32 %v3652_v41  ;;  %v10387_v41 = vld [vmem:[%s12237_s4 + $0x1a0] ss:$16 sps:$4 sm:$0xff]  }
 0xd76   :  { %v7976_v31 = vpop.eup %7975 }
 0xd77   :  { %v7978_v23 = vpop.eup %7977  ;;  %v3637_v37 = vadd.f32 1.0, %v7976_v31  ;;  %v10357_v31 = vld [vmem:[%s12237_s4 + $0x18c] ss:$16 sps:$4 sm:$0xff]  }
 0xd78   :  { %v3645_v5 = vadd.f32 1.0, %v7978_v23  ;;  %v7980_v50 = vpop.eup %7979  ;;  %v10363_v23 = vld [vmem:[%s12237_s4 + $0x180] ss:$16 sps:$4 sm:$0xff]  }
 0xd79   :  { %v3639_v18 = vmul.f32 0.5, %v3637_v37  ;;  %v7982_v63 = vpop.eup %7981  ;;  %v3638_v55 = vadd.f32 1.0, %v7980_v50  ;;  %v10369_v37 = vld [vmem:[%s12237_s4 + $0x188] ss:$16 sps:$4 sm:$0xff]  }
 0xd7a   :  { %v3647_v2 = vmul.f32 0.5, %v3645_v5  ;;  %v7984_v40 = vpop.eup %7983  ;;  %v10381_v5 = vld [vmem:[%s12237_s4 + $0x1ac] ss:$16 sps:$4 sm:$0xff]   ;;  %v10393_v50 = vld [vmem:[%s12237_s4 + $0x1a8] ss:$16 sps:$4 sm:$0xff]  }
 0xd7b   :  { %v3661_v56 = vmul.f32 %v7982_v63, %v3639_v18  ;;  %v3640_v49 = vmul.f32 0.5, %v3638_v55  ;;  %v3646_v32 = vadd.f32 1.0, %v7984_v40  ;;  %v7986_v54 = vpop.eup %7985  ;;  %v10399_v18 = vld [vmem:[%s12237_s4 + $0x1c4] ss:$16 sps:$4 sm:$0xff]   ;;  %v10406_v63 = vld [vmem:[%s12237_s4 + $0x1c0] ss:$16 sps:$4 sm:$0xff]  }
 0xd7c   :  { %v3659_v6 = vmul.f32 %v3647_v2, %v10197_v8  ;;  %v7988_v42 = vpop.eup %7987  ;;  %v10413_v2 = vld [vmem:[%s12237_s4 + $0x1e4] ss:$16 sps:$4 sm:$0xff]  }
 0xd7d   :  { %v3648_v36 = vmul.f32 0.5, %v3646_v32  ;;  %v3662_v48 = vmul.f32 %v7986_v54, %v3640_v49  ;;  %v7990_v4 = vpop.eup %7989  ;;  %v3655_v43 = vadd.f32 1.0, %v7988_v42 }
 0xd7e   :  { %v10251_v19 = vadd.f32 %v3661_v56, %v3659_v6  ;;  %v3656_v8 = vadd.f32 1.0, %v7990_v4 }
 0xd7f   :  { %v3660_v61 = vmul.f32 %v3648_v36, %v10201_v51  ;;  %v3657_v38 = vmul.f32 0.5, %v3655_v43  ;;  %v10265_v51 = vld [vmem:[%s12237_s4 + $0x100] ss:$16 sps:$4 sm:$0xff]  }
 0xd80   :  { %7991 = vtanh.f32 %v10251_v19  ;;  %v3658_v1 = vmul.f32 0.5, %v3656_v8 }
 0xd81   :  { %v10255_v35 = vadd.f32 %v3662_v48, %v3660_v61 }
 0xd83   :  { %7993 = vtanh.f32 %v10255_v35 }
 0xd8a   :  { %v7992_v58 = vpop.eup %7991 }
 0xd8b   :  { %v3667_v9 = vmul.f32 %v7992_v58, %v3657_v38 }
 0xd8d   :  { %v7994_v24 = vpop.eup %7993 }
 0xd8e   :  { %v3668_v28 = vmul.f32 %v7994_v24, %v3658_v1 }
 0xd90   :  { %v10258_v3 = vpack.c.bf16 %v3668_v28, %v3667_v9 }
 0xd92   :  { %3712 = vmatmul.mubr.bf16.vlgmr.msra.gmra.mrb[48].mxu0 %v10258_v3  ;;  %3755 = vmatmul.mubr.bf16.vlgmr.msra.gmra.mrb[48].mxu1 %v10258_v3 }
 0xd93   :  { %3820 = vmatpush1.bf16.msra.mxu0 %v10265_v51  ;;  %3863 = vmatpush1.bf16.msra.mxu1 %v10271_v27 }
 0xd94   :  { %3821 = vmatprep.subr.bf16.mxu0 %v10277_v44  ;;  %3864 = vmatprep.subr.bf16.mxu1 %v10283_v52 }
 0xd95   :  { %3851 = vmatprep.mubr.bf16.mxu0 %v12333_v47  ;;  %3894 = vmatprep.mubr.bf16.mxu1 %v12333_v47 }
 0xd97   :  { %3822 = vmatpush1.bf16.msra.mxu0 %v10291_v20  ;;  %3865 = vmatpush1.bf16.msra.mxu1 %v10297_v33 }
 0xd98   :  { %3823 = vmatprep.subr.bf16.mxu0 %v10303_v25  ;;  %3866 = vmatprep.subr.bf16.mxu1 %v10309_v11 }
 0xd9b   :  { %3824 = vmatpush1.bf16.msra.mxu0 %v10315_v59  ;;  %3867 = vmatpush1.bf16.msra.mxu1 %v10321_v22 }
 0xd9c   :  { %3825 = vmatprep.subr.bf16.mxu0 %v10327_v15  ;;  %3868 = vmatprep.subr.bf16.mxu1 %v10333_v60 }
 0xd9f   :  { %3826 = vmatpush1.bf16.msra.mxu0 %v10339_v34  ;;  %3869 = vmatpush1.bf16.msra.mxu1 %v10345_v45 }
 0xda0   :  { %3827 = vmatprep.subr.bf16.mxu0 %v10351_v46  ;;  %3870 = vmatprep.subr.bf16.mxu1 %v10357_v31 }
 0xda3   :  { %3828 = vmatpush1.bf16.msra.mxu0 %v10363_v23  ;;  %3871 = vmatpush1.bf16.msra.mxu1 %v10369_v37 }
 0xda4   :  { %3829 = vmatprep.subr.bf16.mxu0 %v10375_v14  ;;  %3872 = vmatprep.subr.bf16.mxu1 %v10381_v5 }
 0xda7   :  { %3830 = vmatpush1.bf16.msra.mxu0 %v10387_v41  ;;  %3873 = vmatpush1.bf16.msra.mxu1 %v10393_v50 }
 0xda8   :  { %3831 = vmatprep.subr.bf16.mxu0 %v10399_v18  ;;  %3874 = vmatprep.subr.bf16.mxu1 %v9982_v29  ;;  %v10422_v29 = vld [vmem:[%s12237_s4 + $0x104] ss:$16 sps:$4 sm:$0xff]  }
 0xdab   :  { %3832 = vmatpush1.bf16.msra.mxu0 %v10406_v63  ;;  %3875 = vmatpush1.bf16.msra.mxu1 %v9994_v30  ;;  %v10428_v30 = vld [vmem:[%s12237_s4 + $0x10c] ss:$16 sps:$4 sm:$0xff]  }
 0xdac   :  { %3833 = vmatprep.subr.bf16.mxu0 %v10413_v2  ;;  %3876 = vmatprep.subr.bf16.mxu1 %v10006_v16 }
 0xdaf   :  { %3834 = vmatpush1.bf16.msra.mxu0 %v9999_v10  ;;  %3877 = vmatpush1.bf16.msra.mxu1 %v10013_v13 }
 0xdb0   :  { %3959 = vmatprep.subr.bf16.mxu0 %v10422_v29  ;;  %4002 = vmatprep.subr.bf16.mxu1 %v10428_v30 }
 0xe65   :  { %v3713_v55 = vpop.f32.mrb[48].mxu0  ;;  %v3756_v16 = vpop.f32.mrb[48].mxu1 }
 0xe66   :  { %v7130_v10 = vadd.f32 %v3713_v55, %v10071_v39  ;;  %v3715_v40 = vpop.f32.mrb[49].mxu0  ;;  %v3758_v13 = vpop.f32.mrb[49].mxu1  ;;  %v7162_v4 = vadd.f32 %v3756_v16, %v10078_v26 }
 0xe67   :  { %v7131_v56 = vadd.f32 %v3715_v40, %v10074_v21  ;;  %v3717_v6 = vpop.f32.mrb[50].mxu0  ;;  %v3760_v49 = vpop.f32.mrb[50].mxu1  ;;  %v7163_v38 = vadd.f32 %v3758_v13, %v10085_v17 }
 0xe68   :  { %v3773_v32 = vmul.f32 0.5, %v7130_v10  ;;  %v7132_v54 = vadd.f32 %v3717_v6, %v10071_v39  ;;  %v3719_v36 = vpop.f32.mrb[51].mxu0  ;;  %v3762_v48 = vpop.f32.mrb[51].mxu1  ;;  %v7164_v58 = vadd.f32 %v3760_v49, %v10078_v26 }
 0xe69   :  { %v3781_v61 = vmul.f32 0.5, %v7131_v56  ;;  %v7133_v42 = vadd.f32 %v3719_v36, %v10074_v21  ;;  %v7165_v1 = vadd.f32 %v3762_v48, %v10085_v17  ;;  %v3791_v55 = vmul.f32 0.5, %v7163_v38 }
 0xe6a   :  { %7995 = vtanh.f32 %v3773_v32  ;;  %v3774_v43 = vmul.f32 0.5, %v7132_v54 }
 0xe6b   :  { %7997 = vtanh.f32 %v3781_v61  ;;  %v3782_v8 = vmul.f32 0.5, %v7133_v42  ;;  %v3792_v40 = vmul.f32 0.5, %v7165_v1 }
 0xe6c   :  { %7999 = vtanh.f32 %v3774_v43 }
 0xe6d   :  { %8001 = vtanh.f32 %v7162_v4 }
 0xe6e   :  { %8003 = vtanh.f32 %v3782_v8 }
 0xe6f   :  { %8005 = vtanh.f32 %v7164_v58 }
 0xe70   :  { %8007 = vtanh.f32 %v3791_v55 }
 0xe71   :  { %8009 = vtanh.f32 %v3792_v40 }
 0xe74   :  { %v7996_v24 = vpop.eup %7995 }
 0xe75   :  { %v7998_v9 = vpop.eup %7997  ;;  %v3777_v28 = vadd.f32 1.0, %v7996_v24 }
 0xe76   :  { %v3785_v10 = vadd.f32 1.0, %v7998_v9  ;;  %v8000_v16 = vpop.eup %7999 }
 0xe77   :  { %v3779_v56 = vmul.f32 0.5, %v3777_v28  ;;  %v8002_v6 = vpop.eup %8001  ;;  %v3778_v54 = vadd.f32 1.0, %v8000_v16 }
 0xe78   :  { %v3787_v32 = vmul.f32 0.5, %v3785_v10  ;;  %v8004_v36 = vpop.eup %8003 }
 0xe79   :  { %v3801_v49 = vmul.f32 %v8002_v6, %v3779_v56  ;;  %v3780_v13 = vmul.f32 0.5, %v3778_v54  ;;  %v3786_v42 = vadd.f32 1.0, %v8004_v36  ;;  %v8006_v48 = vpop.eup %8005  ;;  %v10493_v54 = vld [vmem:[%s12237_s4 + $0x1ec] ss:$16 sps:$4 sm:$0xff]   ;;  %v10499_v36 = vld [vmem:[%s12237_s4 + $0x1e0] ss:$16 sps:$4 sm:$0xff]  }
 0xe7a   :  { %v3799_v61 = vmul.f32 %v3787_v32, %v10251_v19  ;;  %v8008_v1 = vpop.eup %8007  ;;  %v10486_v32 = vld [vmem:[%s12237_s4 + $0x1c8] ss:$16 sps:$4 sm:$0xff]  }
 0xe7b   :  { %v3788_v43 = vmul.f32 0.5, %v3786_v42  ;;  %v3802_v8 = vmul.f32 %v8006_v48, %v3780_v13  ;;  %v8010_v24 = vpop.eup %8009  ;;  %v3795_v9 = vadd.f32 1.0, %v8008_v1 }
 0xe7c   :  { %v10440_v4 = vadd.f32 %v3801_v49, %v3799_v61  ;;  %v3796_v19 = vadd.f32 1.0, %v8010_v24  ;;  %v10505_v49 = vld [vmem:[%s12237_s4 + $0x1e8] ss:$16 sps:$4 sm:$0xff]  }
 0xe7d   :  { %v3800_v58 = vmul.f32 %v3788_v43, %v10255_v35  ;;  %v3797_v55 = vmul.f32 0.5, %v3795_v9  ;;  %v10479_v35 = vld [vmem:[%s12237_s4 + $0x1cc] ss:$16 sps:$4 sm:$0xff]  }
 0xe7e   :  { %8011 = vtanh.f32 %v10440_v4  ;;  %v3798_v10 = vmul.f32 0.5, %v3796_v19 }
 0xe7f   :  { %v10444_v38 = vadd.f32 %v3802_v8, %v3800_v58 }
 0xe81   :  { %8013 = vtanh.f32 %v10444_v38 }
 0xe88   :  { %v8012_v28 = vpop.eup %8011 }
 0xe89   :  { %v3807_v16 = vmul.f32 %v8012_v28, %v3797_v55 }
 0xe8b   :  { %v8014_v40 = vpop.eup %8013 }
 0xe8c   :  { %v3808_v56 = vmul.f32 %v8014_v40, %v3798_v10 }
 0xe8e   :  { %v10447_v6 = vpack.c.bf16 %v3808_v56, %v3807_v16 }
 0xe90   :  { %3852 = vmatmul.mubr.bf16.vlgmr.msra.gmra.mrb[52].mxu0 %v10447_v6  ;;  %3895 = vmatmul.mubr.bf16.vlgmr.msra.gmra.mrb[52].mxu1 %v10447_v6 }
 0xe91   :  { %3960 = vmatpush1.bf16.msra.mxu0 %v10265_v51  ;;  %4003 = vmatpush1.bf16.msra.mxu1 %v10271_v27 }
 0xe92   :  { %3961 = vmatprep.subr.bf16.mxu0 %v10277_v44  ;;  %4004 = vmatprep.subr.bf16.mxu1 %v10283_v52 }
 0xe93   :  { %3991 = vmatprep.mubr.bf16.mxu0 %v12333_v47  ;;  %4034 = vmatprep.mubr.bf16.mxu1 %v12333_v47 }
 0xe95   :  { %3962 = vmatpush1.bf16.msra.mxu0 %v10291_v20  ;;  %4005 = vmatpush1.bf16.msra.mxu1 %v10297_v33 }
 0xe96   :  { %3963 = vmatprep.subr.bf16.mxu0 %v10303_v25  ;;  %4006 = vmatprep.subr.bf16.mxu1 %v10309_v11 }
 0xe99   :  { %3964 = vmatpush1.bf16.msra.mxu0 %v10315_v59  ;;  %4007 = vmatpush1.bf16.msra.mxu1 %v10321_v22 }
 0xe9a   :  { %3965 = vmatprep.subr.bf16.mxu0 %v10327_v15  ;;  %4008 = vmatprep.subr.bf16.mxu1 %v10333_v60 }
 0xe9d   :  { %3966 = vmatpush1.bf16.msra.mxu0 %v10339_v34  ;;  %4009 = vmatpush1.bf16.msra.mxu1 %v10345_v45 }
 0xe9e   :  { %3967 = vmatprep.subr.bf16.mxu0 %v10351_v46  ;;  %4010 = vmatprep.subr.bf16.mxu1 %v10357_v31 }
 0xea1   :  { %3968 = vmatpush1.bf16.msra.mxu0 %v10363_v23  ;;  %4011 = vmatpush1.bf16.msra.mxu1 %v10369_v37 }
 0xea2   :  { %3969 = vmatprep.subr.bf16.mxu0 %v10375_v14  ;;  %4012 = vmatprep.subr.bf16.mxu1 %v10381_v5 }
 0xea5   :  { %3970 = vmatpush1.bf16.msra.mxu0 %v10387_v41  ;;  %4013 = vmatpush1.bf16.msra.mxu1 %v10393_v50 }
 0xea6   :  { %3971 = vmatprep.subr.bf16.mxu0 %v10399_v18  ;;  %4014 = vmatprep.subr.bf16.mxu1 %v10479_v35 }
 0xea9   :  { %3972 = vmatpush1.bf16.msra.mxu0 %v10406_v63  ;;  %4015 = vmatpush1.bf16.msra.mxu1 %v10486_v32 }
 0xeaa   :  { %3973 = vmatprep.subr.bf16.mxu0 %v10413_v2  ;;  %4016 = vmatprep.subr.bf16.mxu1 %v10493_v54 }
 0xead   :  { %3974 = vmatpush1.bf16.msra.mxu0 %v10499_v36  ;;  %4017 = vmatpush1.bf16.msra.mxu1 %v10505_v49 }
 0xeae   :  { %4099 = vmatprep.subr.bf16.mxu0 %v10422_v29  ;;  %4142 = vmatprep.subr.bf16.mxu1 %v10428_v30 }
 0xf63   :  { %v3853_v61 = vpop.f32.mrb[52].mxu0  ;;  %v3896_v13 = vpop.f32.mrb[52].mxu1 }
 0xf64   :  { %v7134_v42 = vadd.f32 %v3853_v61, %v10071_v39  ;;  %v3855_v48 = vpop.f32.mrb[53].mxu0  ;;  %v3898_v43 = vpop.f32.mrb[53].mxu1  ;;  %v7166_v30 = vadd.f32 %v3896_v13, %v10078_v26 }
 0xf65   :  { %v7135_v8 = vadd.f32 %v3855_v48, %v10074_v21  ;;  %v3857_v58 = vpop.f32.mrb[54].mxu0  ;;  %v3900_v1 = vpop.f32.mrb[54].mxu1  ;;  %v7167_v56 = vadd.f32 %v3898_v43, %v10085_v17 }
 0xf66   :  { %v3913_v24 = vmul.f32 0.5, %v7134_v42  ;;  %v7136_v9 = vadd.f32 %v3857_v58, %v10071_v39  ;;  %v3859_v19 = vpop.f32.mrb[55].mxu0  ;;  %v3902_v28 = vpop.f32.mrb[55].mxu1  ;;  %v7168_v16 = vadd.f32 %v3900_v1, %v10078_v26 }
 0xf67   :  { %v3921_v55 = vmul.f32 0.5, %v7135_v8  ;;  %v7137_v29 = vadd.f32 %v3859_v19, %v10074_v21  ;;  %v7169_v61 = vadd.f32 %v3902_v28, %v10085_v17  ;;  %v3931_v58 = vmul.f32 0.5, %v7167_v56 }
 0xf68   :  { %8015 = vtanh.f32 %v3913_v24  ;;  %v3914_v10 = vmul.f32 0.5, %v7136_v9 }
 0xf69   :  { %8017 = vtanh.f32 %v3921_v55  ;;  %v3922_v40 = vmul.f32 0.5, %v7137_v29  ;;  %v3932_v19 = vmul.f32 0.5, %v7169_v61 }
 0xf6a   :  { %8019 = vtanh.f32 %v3914_v10 }
 0xf6b   :  { %8021 = vtanh.f32 %v7166_v30 }
 0xf6c   :  { %8023 = vtanh.f32 %v3922_v40 }
 0xf6d   :  { %8025 = vtanh.f32 %v7168_v16 }
 0xf6e   :  { %8027 = vtanh.f32 %v3931_v58 }
 0xf6f   :  { %8029 = vtanh.f32 %v3932_v19 }
 0xf72   :  { %v8016_v42 = vpop.eup %8015 }
 0xf73   :  { %v8018_v48 = vpop.eup %8017  ;;  %v3917_v8 = vadd.f32 1.0, %v8016_v42 }
 0xf74   :  { %v3925_v24 = vadd.f32 1.0, %v8018_v48  ;;  %v8020_v13 = vpop.eup %8019 }
 0xf75   :  { %v3919_v9 = vmul.f32 0.5, %v3917_v8  ;;  %v8022_v55 = vpop.eup %8021  ;;  %v3918_v10 = vadd.f32 1.0, %v8020_v13 }
 0xf76   :  { %v3927_v29 = vmul.f32 0.5, %v3925_v24  ;;  %v8024_v62 = vpop.eup %8023 }
 0xf77   :  { %v3941_v1 = vmul.f32 %v8022_v55, %v3919_v9  ;;  %v3920_v43 = vmul.f32 0.5, %v3918_v10  ;;  %v3926_v40 = vadd.f32 1.0, %v8024_v62  ;;  %v8026_v28 = vpop.eup %8025 }
 0xf78   :  { %v3939_v30 = vmul.f32 %v3927_v29, %v10440_v4  ;;  %v8028_v8 = vpop.eup %8027 }
 0xf79   :  { %v3928_v42 = vmul.f32 0.5, %v3926_v40  ;;  %v3942_v56 = vmul.f32 %v8026_v28, %v3920_v43  ;;  %v8030_v58 = vpop.eup %8029  ;;  %v3935_v24 = vadd.f32 1.0, %v8028_v8 }
 0xf7a   :  { %v10519_v16 = vadd.f32 %v3941_v1, %v3939_v30  ;;  %v3936_v4 = vadd.f32 1.0, %v8030_v58 }
 0xf7b   :  { %v3940_v61 = vmul.f32 %v3928_v42, %v10444_v38  ;;  %v3937_v62 = vmul.f32 0.5, %v3935_v24 }
 0xf7c   :  { %8031 = vtanh.f32 %v10519_v16  ;;  %v3938_v19 = vmul.f32 0.5, %v3936_v4 }
 0xf7d   :  { %v10523_v48 = vadd.f32 %v3942_v56, %v3940_v61 }
 0xf7f   :  { %8033 = vtanh.f32 %v10523_v48 }
 0xf86   :  { %v8032_v13 = vpop.eup %8031 }
 0xf87   :  { %v3947_v55 = vmul.f32 %v8032_v13, %v3937_v62 }
 0xf89   :  { %v8034_v9 = vpop.eup %8033 }
 0xf8a   :  { %v3948_v29 = vmul.f32 %v8034_v9, %v3938_v19 }
 0xf8c   :  { %v10526_v10 = vpack.c.bf16 %v3948_v29, %v3947_v55 }
 0xf8e   :  { %3992 = vmatmul.mubr.bf16.vlgmr.msra.gmra.mrb[56].mxu0 %v10526_v10  ;;  %4035 = vmatmul.mubr.bf16.vlgmr.msra.gmra.mrb[56].mxu1 %v10526_v10 }
 0xf8f   :  { %4100 = vmatpush1.bf16.msra.mxu0 %v10265_v51  ;;  %4143 = vmatpush1.bf16.msra.mxu1 %v10271_v27  ;;  %v7629_v51 = vld [vmem:[%s12236_s3 + $0x204] ss:$16 sps:$4 sm:$0xff]   ;;  %v7632_v27 = vld [vmem:[%s12236_s3 + $0x20c] ss:$16 sps:$4 sm:$0xff]  }
 0xf90   :  { %4101 = vmatprep.subr.bf16.mxu0 %v10277_v44  ;;  %4144 = vmatprep.subr.bf16.mxu1 %v10283_v52 }
 0xf91   :  { %4131 = vmatprep.mubr.bf16.mxu0 %v12333_v47  ;;  %4174 = vmatprep.mubr.bf16.mxu1 %v12333_v47 }
 0xf93   :  { %4102 = vmatpush1.bf16.msra.mxu0 %v10291_v20  ;;  %4145 = vmatpush1.bf16.msra.mxu1 %v10297_v33 }
 0xf94   :  { %4103 = vmatprep.subr.bf16.mxu0 %v10303_v25  ;;  %4146 = vmatprep.subr.bf16.mxu1 %v10309_v11 }
 0xf97   :  { %4104 = vmatpush1.bf16.msra.mxu0 %v10315_v59  ;;  %4147 = vmatpush1.bf16.msra.mxu1 %v10321_v22 }
 0xf98   :  { %4105 = vmatprep.subr.bf16.mxu0 %v10327_v15  ;;  %4148 = vmatprep.subr.bf16.mxu1 %v10333_v60 }
 0xf9b   :  { %4106 = vmatpush1.bf16.msra.mxu0 %v10339_v34  ;;  %4149 = vmatpush1.bf16.msra.mxu1 %v10345_v45 }
 0xf9c   :  { %4107 = vmatprep.subr.bf16.mxu0 %v10351_v46  ;;  %4150 = vmatprep.subr.bf16.mxu1 %v10357_v31 }
 0xf9f   :  { %4108 = vmatpush1.bf16.msra.mxu0 %v10363_v23  ;;  %4151 = vmatpush1.bf16.msra.mxu1 %v10369_v37 }
 0xfa0   :  { %4109 = vmatprep.subr.bf16.mxu0 %v10375_v14  ;;  %4152 = vmatprep.subr.bf16.mxu1 %v10381_v5 }
 0xfa3   :  { %4110 = vmatpush1.bf16.msra.mxu0 %v10387_v41  ;;  %4153 = vmatpush1.bf16.msra.mxu1 %v10393_v50 }
 0xfa4   :  { %4111 = vmatprep.subr.bf16.mxu0 %v10399_v18  ;;  %4154 = vmatprep.subr.bf16.mxu1 %v10479_v35 }
 0xfa7   :  { %4112 = vmatpush1.bf16.msra.mxu0 %v10406_v63  ;;  %4155 = vmatpush1.bf16.msra.mxu1 %v10486_v32 }
 0xfa8   :  { %4113 = vmatprep.subr.bf16.mxu0 %v10413_v2  ;;  %4156 = vmatprep.subr.bf16.mxu1 %v10493_v54 }
 0xfab   :  { %4114 = vmatpush1.bf16.msra.mxu0 %v10499_v36  ;;  %4157 = vmatpush1.bf16.msra.mxu1 %v10505_v49 }
 0xfac   :  { %4488 = vmatprep.subr.bf16.mxu0 %v7629_v51  ;;  %4601 = vmatprep.subr.bf16.mxu1 %v7632_v27 }
0x1061   :  { %v3993_v44 = vpop.f32.mrb[56].mxu0  ;;  %v4036_v52 = vpop.f32.mrb[56].mxu1 }
0x1062   :  { %v7138_v20 = vadd.f32 %v3993_v44, %v10071_v39  ;;  %v3995_v33 = vpop.f32.mrb[57].mxu0  ;;  %v4038_v25 = vpop.f32.mrb[57].mxu1  ;;  %v7170_v23 = vadd.f32 %v4036_v52, %v10078_v26 }
0x1063   :  { %v7139_v11 = vadd.f32 %v3995_v33, %v10074_v21  ;;  %v3997_v59 = vpop.f32.mrb[58].mxu0  ;;  %v4040_v22 = vpop.f32.mrb[58].mxu1  ;;  %v7171_v41 = vadd.f32 %v4038_v25, %v10085_v17  ;;  %v7635_v25 = vld [vmem:[%s12236_s3 + $0x224] ss:$16 sps:$4 sm:$0xff]  }
0x1064   :  { %v4053_v15 = vmul.f32 0.5, %v7138_v20  ;;  %v7140_v60 = vadd.f32 %v3997_v59, %v10071_v39  ;;  %v3999_v34 = vpop.f32.mrb[59].mxu0  ;;  %v4042_v45 = vpop.f32.mrb[59].mxu1  ;;  %v7172_v5 = vadd.f32 %v4040_v22, %v10078_v26  ;;  %v7630_v20 = vld [vmem:[%s12236_s3 + $0x208] ss:$16 sps:$4 sm:$0xff]  }
0x1065   :  { %v4061_v46 = vmul.f32 0.5, %v7139_v11  ;;  %v7141_v31 = vadd.f32 %v3999_v34, %v10074_v21  ;;  %v7173_v50 = vadd.f32 %v4042_v45, %v10085_v17  ;;  %v4071_v38 = vmul.f32 0.5, %v7171_v41  ;;  %v7638_v11 = vld [vmem:[%s12236_s3 + $0x22c] ss:$16 sps:$4 sm:$0xff]   ;;  %v7633_v59 = vld [vmem:[%s12236_s3 + $0x220] ss:$16 sps:$4 sm:$0xff]  }
0x1066   :  { %8035 = vtanh.f32 %v4053_v15  ;;  %v4054_v37 = vmul.f32 0.5, %v7140_v60  ;;  %v7636_v22 = vld [vmem:[%s12236_s3 + $0x228] ss:$16 sps:$4 sm:$0xff]   ;;  %v7641_v15 = vld [vmem:[%s12236_s3 + $0x244] ss:$16 sps:$4 sm:$0xff]  }
0x1067   :  { %8037 = vtanh.f32 %v4061_v46  ;;  %v4062_v14 = vmul.f32 0.5, %v7141_v31  ;;  %v4072_v32 = vmul.f32 0.5, %v7173_v50  ;;  %v7644_v60 = vld [vmem:[%s12236_s3 + $0x24c] ss:$16 sps:$4 sm:$0xff]   ;;  %v7639_v34 = vld [vmem:[%s12236_s3 + $0x240] ss:$16 sps:$4 sm:$0xff]  }
0x1068   :  { %8039 = vtanh.f32 %v4054_v37  ;;  %v7642_v45 = vld [vmem:[%s12236_s3 + $0x248] ss:$16 sps:$4 sm:$0xff]   ;;  %v7647_v46 = vld [vmem:[%s12236_s3 + $0x264] ss:$16 sps:$4 sm:$0xff]   ;;  %v7650_v31 = vld [vmem:[%s12236_s3 + $0x26c] ss:$16 sps:$4 sm:$0xff]  }
0x1069   :  { %8041 = vtanh.f32 %v7170_v23  ;;  %v7645_v23 = vld [vmem:[%s12236_s3 + $0x260] ss:$16 sps:$4 sm:$0xff]   ;;  %v7648_v37 = vld [vmem:[%s12236_s3 + $0x268] ss:$16 sps:$4 sm:$0xff]  }
0x106a   :  { %8043 = vtanh.f32 %v4062_v14  ;;  %v7653_v14 = vld [vmem:[%s12236_s3 + $0x284] ss:$16 sps:$4 sm:$0xff]   ;;  %v7651_v41 = vld [vmem:[%s12236_s3 + $0x280] ss:$16 sps:$4 sm:$0xff]   ;;  %v7654_v50 = vld [vmem:[%s12236_s3 + $0x288] ss:$16 sps:$4 sm:$0xff]  }
0x106b   :  { %8045 = vtanh.f32 %v7172_v5  ;;  %v7656_v5 = vld [vmem:[%s12236_s3 + $0x28c] ss:$16 sps:$4 sm:$0xff]  }
0x106c   :  { %8047 = vtanh.f32 %v4071_v38  ;;  %v7660_v38 = vld [vmem:[%s12236_s3 + $0x2a8] ss:$16 sps:$4 sm:$0xff]  }
0x106d   :  { %8049 = vtanh.f32 %v4072_v32  ;;  %v7668_v32 = vld [vmem:[%s12236_s3 + $0x2cc] ss:$16 sps:$4 sm:$0xff]  }
0x1070   :  { %v8036_v18 = vpop.eup %8035 }
0x1071   :  { %v8038_v63 = vpop.eup %8037  ;;  %v4057_v2 = vadd.f32 1.0, %v8036_v18  ;;  %v7659_v18 = vld [vmem:[%s12236_s3 + $0x2a4] ss:$16 sps:$4 sm:$0xff]  }
0x1072   :  { %v4065_v35 = vadd.f32 1.0, %v8038_v63  ;;  %v8040_v54 = vpop.eup %8039  ;;  %v7662_v63 = vld [vmem:[%s12236_s3 + $0x2ac] ss:$16 sps:$4 sm:$0xff]  }
0x1073   :  { %v4059_v36 = vmul.f32 0.5, %v4057_v2  ;;  %v8042_v49 = vpop.eup %8041  ;;  %v4058_v30 = vadd.f32 1.0, %v8040_v54  ;;  %v7657_v2 = vld [vmem:[%s12236_s3 + $0x2a0] ss:$16 sps:$4 sm:$0xff]  }
0x1074   :  { %v4067_v1 = vmul.f32 0.5, %v4065_v35  ;;  %v8044_v43 = vpop.eup %8043  ;;  %v7665_v35 = vld [vmem:[%s12236_s3 + $0x2c4] ss:$16 sps:$4 sm:$0xff]   ;;  %v7663_v54 = vld [vmem:[%s12236_s3 + $0x2c0] ss:$16 sps:$4 sm:$0xff]  }
0x1075   :  { %v4081_v40 = vmul.f32 %v8042_v49, %v4059_v36  ;;  %v4060_v42 = vmul.f32 0.5, %v4058_v30  ;;  %v4066_v56 = vadd.f32 1.0, %v8044_v43  ;;  %v8046_v61 = vpop.eup %8045  ;;  %v7666_v36 = vld [vmem:[%s12236_s3 + $0x2c8] ss:$16 sps:$4 sm:$0xff]   ;;  %v7671_v49 = vld [vmem:[%s12236_s3 + $0x2e4] ss:$16 sps:$4 sm:$0xff]  }
0x1076   :  { %v4079_v28 = vmul.f32 %v4067_v1, %v10519_v16  ;;  %v8048_v62 = vpop.eup %8047  ;;  %v7674_v1 = vld [vmem:[%s12236_s3 + $0x2ec] ss:$16 sps:$4 sm:$0xff]   ;;  %v7669_v30 = vld [vmem:[%s12236_s3 + $0x2e0] ss:$16 sps:$4 sm:$0xff]   ;;  %v7672_v43 = vld [vmem:[%s12236_s3 + $0x2e8] ss:$16 sps:$4 sm:$0xff]  }
0x1077   :  { %v4068_v58 = vmul.f32 0.5, %v4066_v56  ;;  %v4082_v24 = vmul.f32 %v8046_v61, %v4060_v42  ;;  %v8050_v19 = vpop.eup %8049  ;;  %v4075_v9 = vadd.f32 1.0, %v8048_v62  ;;  %v10694_v42 = vld [vmem:[%s12237_s4 + $0x200] ss:$16 sps:$4 sm:$0xff]   ;;  %v10700_v56 = vld [vmem:[%s12237_s4 + $0x208] ss:$16 sps:$4 sm:$0xff]  }
0x1078   :  { %v10577_v8 = vadd.f32 %v4081_v40, %v4079_v28  ;;  %v4076_v16 = vadd.f32 1.0, %v8050_v19  ;;  %v10683_v40 = vld [vmem:[%s12237_s4 + $0x204] ss:$16 sps:$4 sm:$0xff]   ;;  %v10688_v28 = vld [vmem:[%s12237_s4 + $0x20c] ss:$16 sps:$4 sm:$0xff]   ;;  %12351 = vst [vmem:[#allocation7_spill] sm:$0xff] %v10694_v42 }
0x1079   :  { %v4080_v4 = vmul.f32 %v4068_v58, %v10523_v48  ;;  %v4077_v29 = vmul.f32 0.5, %v4075_v9  ;;  %v7627_v48 = vld [vmem:[%s12236_s3 + $0x200] ss:$16 sps:$4 sm:$0xff]   ;;  %12349 = vst [vmem:[#allocation5_spill] sm:$0xff] %v10683_v40  ;;  %12350 = vst [vmem:[#allocation8_spill] sm:$0xff] %v10688_v28 }
0x107a   :  { %8051 = vtanh.f32 %v10577_v8  ;;  %v4078_v51 = vmul.f32 0.5, %v4076_v16  ;;  %12352 = vst [vmem:[#allocation9_spill] sm:$0xff] %v10700_v56  ;;  %v10705_v61 = vld [vmem:[%s12237_s4 + $0x224] ss:$16 sps:$4 sm:$0xff]   ;;  %v10716_v58 = vld [vmem:[%s12237_s4 + $0x220] ss:$16 sps:$4 sm:$0xff]  }
0x107b   :  { %v10581_v13 = vadd.f32 %v4082_v24, %v4080_v4  ;;  %12353 = vst [vmem:[#allocation10_spill] sm:$0xff] %v10705_v61  ;;  %v10781_v24 = vld [vmem:[%s12237_s4 + $0x248] ss:$16 sps:$4 sm:$0xff]   ;;  %v10786_v4 = vld [vmem:[%s12237_s4 + $0x260] ss:$16 sps:$4 sm:$0xff]  }
0x107c   :  { %v10791_v62 = vld [vmem:[%s12237_s4 + $0x26c] ss:$16 sps:$4 sm:$0xff]   ;;  %v10796_v19 = vld [vmem:[%s12237_s4 + $0x284] ss:$16 sps:$4 sm:$0xff]   ;;  %v10805_v9 = vld [vmem:[%s12237_s4 + $0x268] ss:$16 sps:$4 sm:$0xff]  }
0x107d   :  { %8053 = vtanh.f32 %v10581_v13  ;;  %v10810_v16 = vld [vmem:[%s12237_s4 + $0x280] ss:$16 sps:$4 sm:$0xff]  }
0x1084   :  { %v8052_v55 = vpop.eup %8051 }
0x1085   :  { %v4087_v44 = vmul.f32 %v8052_v55, %v4077_v29  ;;  %v10817_v55 = vld [vmem:[%s12237_s4 + $0x28c] ss:$16 sps:$4 sm:$0xff]   ;;  %v10822_v29 = vld [vmem:[%s12237_s4 + $0x2a4] ss:$16 sps:$4 sm:$0xff]  }
0x1087   :  { %v8054_v27 = vpop.eup %8053 }
0x1088   :  { %v4088_v52 = vmul.f32 %v8054_v27, %v4078_v51  ;;  %v10829_v51 = vld [vmem:[%s12237_s4 + $0x288] ss:$16 sps:$4 sm:$0xff]   ;;  %v10834_v27 = vld [vmem:[%s12237_s4 + $0x2a0] ss:$16 sps:$4 sm:$0xff]  }
0x108a   :  { %v10590_v33 = vpack.c.bf16 %v4088_v52, %v4087_v44  ;;  %v10841_v44 = vld [vmem:[%s12237_s4 + $0x2ac] ss:$16 sps:$4 sm:$0xff]   ;;  %v10846_v52 = vld [vmem:[%s12237_s4 + $0x2c4] ss:$16 sps:$4 sm:$0xff]  }
0x108c   :  { %4132 = vmatmul.mubr.bf16.vlgmr.msra.gmra.mrb[60].mxu0 %v10590_v33  ;;  %4175 = vmatmul.mubr.bf16.vlgmr.msra.gmra.mrb[60].mxu1 %v10590_v33 }
0x108d   :  { %4489 = vmatpush1.bf16.msra.mxu0 %v7627_v48  ;;  %4602 = vmatpush1.bf16.msra.mxu1 %v7630_v20  ;;  %v10853_v48 = vld [vmem:[%s12237_s4 + $0x2a8] ss:$16 sps:$4 sm:$0xff]   ;;  %v10858_v20 = vld [vmem:[%s12237_s4 + $0x2c0] ss:$16 sps:$4 sm:$0xff]  }
0x108e   :  { %4490 = vmatprep.subr.bf16.mxu0 %v7635_v25  ;;  %4603 = vmatprep.subr.bf16.mxu1 %v7638_v11  ;;  %v10870_v25 = vld [vmem:[%s12237_s4 + $0x2e4] ss:$16 sps:$4 sm:$0xff]   ;;  %v10877_v11 = vld [vmem:[%s12237_s4 + $0x2c8] ss:$16 sps:$4 sm:$0xff]  }
0x108f   :  { %4520 = vmatprep.mubr.bf16.mxu0 %v12333_v47  ;;  %4633 = vmatprep.mubr.bf16.mxu1 %v12333_v47 }
0x1091   :  { %4491 = vmatpush1.bf16.msra.mxu0 %v7633_v59  ;;  %4604 = vmatpush1.bf16.msra.mxu1 %v7636_v22  ;;  %v10882_v59 = vld [vmem:[%s12237_s4 + $0x2e0] ss:$16 sps:$4 sm:$0xff]   ;;  %v10889_v22 = vld [vmem:[%s12237_s4 + $0x2ec] ss:$16 sps:$4 sm:$0xff]  }
0x1092   :  { %4492 = vmatprep.subr.bf16.mxu0 %v7641_v15  ;;  %4605 = vmatprep.subr.bf16.mxu1 %v7644_v60  ;;  %v10896_v15 = vld [vmem:[%s12237_s4 + $0x2e8] ss:$16 sps:$4 sm:$0xff]  }
0x1095   :  { %4493 = vmatpush1.bf16.msra.mxu0 %v7639_v34  ;;  %4606 = vmatpush1.bf16.msra.mxu1 %v7642_v45 }
0x1096   :  { %4494 = vmatprep.subr.bf16.mxu0 %v7647_v46  ;;  %4607 = vmatprep.subr.bf16.mxu1 %v7650_v31 }
0x1099   :  { %4495 = vmatpush1.bf16.msra.mxu0 %v7645_v23  ;;  %4608 = vmatpush1.bf16.msra.mxu1 %v7648_v37 }
0x109a   :  { %4496 = vmatprep.subr.bf16.mxu0 %v7653_v14  ;;  %4609 = vmatprep.subr.bf16.mxu1 %v7656_v5 }
0x109d   :  { %4497 = vmatpush1.bf16.msra.mxu0 %v7651_v41  ;;  %4610 = vmatpush1.bf16.msra.mxu1 %v7654_v50 }
0x109e   :  { %4498 = vmatprep.subr.bf16.mxu0 %v7659_v18  ;;  %4611 = vmatprep.subr.bf16.mxu1 %v7662_v63 }
0x10a1   :  { %4499 = vmatpush1.bf16.msra.mxu0 %v7657_v2  ;;  %4612 = vmatpush1.bf16.msra.mxu1 %v7660_v38 }
0x10a2   :  { %4500 = vmatprep.subr.bf16.mxu0 %v7665_v35  ;;  %4613 = vmatprep.subr.bf16.mxu1 %v7668_v32 }
0x10a5   :  { %4501 = vmatpush1.bf16.msra.mxu0 %v7663_v54  ;;  %4614 = vmatpush1.bf16.msra.mxu1 %v7666_v36 }
0x10a6   :  { %4502 = vmatprep.subr.bf16.mxu0 %v7671_v49  ;;  %4615 = vmatprep.subr.bf16.mxu1 %v7674_v1 }
0x10a9   :  { %4503 = vmatpush1.bf16.msra.mxu0 %v7669_v30  ;;  %4616 = vmatpush1.bf16.msra.mxu1 %v7672_v43 }
0x10aa   :  { %4946 = vmatprep.subr.bf16.mxu0 %v10683_v40  ;;  %4989 = vmatprep.subr.bf16.mxu1 %v10688_v28 }
0x10ac   :  { %4521 = vmatmul.mubr.bf16.vlgmr.msra.gmra.mrb[64].mxu0 %v10096_v12  ;;  %4634 = vmatmul.mubr.bf16.vlgmr.msra.gmra.mrb[64].mxu1 %v10096_v12  ;;  %v10747_v12 = vld [vmem:[%s12237_s4 + $0x22c] ss:$16 sps:$4 sm:$0xff]  }
0x10ad   :  { %4530 = vmatprep.mubr.bf16.mxu0 %v12333_v47  ;;  %4643 = vmatprep.mubr.bf16.mxu1 %v12333_v47  ;;  %12354 = vst [vmem:[#allocation11_spill] sm:$0xff] %v10747_v12 }
0x10ae   :  { %4947 = vmatpush1.bf16.msra.mxu0 %v10694_v42  ;;  %4990 = vmatpush1.bf16.msra.mxu1 %v10700_v56 }
0x10af   :  { %4948 = vmatprep.subr.bf16.mxu0 %v10705_v61  ;;  %4991 = vmatprep.subr.bf16.mxu1 %v10747_v12 }
0x10b2   :  { %4949 = vmatpush1.bf16.msra.mxu0 %v10716_v58 }
0x10b4   :  { %4531 = vmatmul.mubr.bf16.gmra.mrb[68].mxu0 %v10150_v57  ;;  %4644 = vmatmul.mubr.bf16.gmra.mrb[68].mxu1 %v10150_v57  ;;  %v10753_v57 = vld [vmem:[%s12237_s4 + $0x244] ss:$16 sps:$4 sm:$0xff]  }
0x10b5   :  { %4540 = vmatprep.mubr.bf16.mxu0 %v12333_v47  ;;  %4653 = vmatprep.mubr.bf16.mxu1 %v12333_v47 }
0x10b6   :  { %4950 = vmatprep.subr.bf16.mxu0 %v10753_v57 }
0x10bc   :  { %4541 = vmatmul.mubr.bf16.gmra.mrb[72].mxu0 %v10204_v0  ;;  %4654 = vmatmul.mubr.bf16.gmra.mrb[72].mxu1 %v10204_v0  ;;  %v10758_v0 = vld [vmem:[%s12237_s4 + $0x228] ss:$16 sps:$4 sm:$0xff]  }
0x10bd   :  { %4550 = vmatprep.mubr.bf16.mxu0 %v12333_v47  ;;  %4663 = vmatprep.mubr.bf16.mxu1 %v12333_v47 }
0x10be   :  { %4992 = vmatpush1.bf16.msra.mxu1 %v10758_v0 }
0x10c4   :  { %4551 = vmatmul.mubr.bf16.gmra.mrb[76].mxu0 %v10258_v3  ;;  %4664 = vmatmul.mubr.bf16.gmra.mrb[76].mxu1 %v10258_v3  ;;  %v10763_v3 = vld [vmem:[%s12237_s4 + $0x240] ss:$16 sps:$4 sm:$0xff]  }
0x10c5   :  { %4560 = vmatprep.mubr.bf16.mxu0 %v12333_v47  ;;  %4673 = vmatprep.mubr.bf16.mxu1 %v12333_v47 }
0x10c6   :  { %4951 = vmatpush1.bf16.msra.mxu0 %v10763_v3 }
0x10cc   :  { %4561 = vmatmul.mubr.bf16.gmra.mrb[80].mxu0 %v10447_v6  ;;  %4674 = vmatmul.mubr.bf16.gmra.mrb[80].mxu1 %v10447_v6  ;;  %v10771_v6 = vld [vmem:[%s12237_s4 + $0x24c] ss:$16 sps:$4 sm:$0xff]  }
0x10cd   :  { %4570 = vmatprep.mubr.bf16.mxu0 %v12333_v47  ;;  %4683 = vmatprep.mubr.bf16.mxu1 %v12333_v47 }
0x10ce   :  { %4993 = vmatprep.subr.bf16.mxu1 %v10771_v6 }
0x10cf   :  { %4994 = vmatpush1.bf16.msra.mxu1 %v10781_v24 }
0x10d0   :  { %4995 = vmatprep.subr.bf16.mxu1 %v10791_v62 }
0x10d3   :  { %4996 = vmatpush1.bf16.msra.mxu1 %v10805_v9 }
0x10d4   :  { %4571 = vmatmul.mubr.bf16.gmra.mrb[84].mxu0 %v10526_v10  ;;  %4684 = vmatmul.mubr.bf16.gmra.mrb[84].mxu1 %v10526_v10  ;;  %v10776_v10 = vld [vmem:[%s12237_s4 + $0x264] ss:$16 sps:$4 sm:$0xff]  }
0x10d5   :  { %4580 = vmatprep.mubr.bf16.mxu0 %v12333_v47  ;;  %4693 = vmatprep.mubr.bf16.mxu1 %v12333_v47 }
0x10d6   :  { %4952 = vmatprep.subr.bf16.mxu0 %v10776_v10  ;;  %4997 = vmatprep.subr.bf16.mxu1 %v10817_v55 }
0x10d7   :  { %4953 = vmatpush1.bf16.msra.mxu0 %v10786_v4  ;;  %4998 = vmatpush1.bf16.msra.mxu1 %v10829_v51 }
0x10d8   :  { %4954 = vmatprep.subr.bf16.mxu0 %v10796_v19  ;;  %4999 = vmatprep.subr.bf16.mxu1 %v10841_v44 }
0x10db   :  { %4955 = vmatpush1.bf16.msra.mxu0 %v10810_v16  ;;  %5000 = vmatpush1.bf16.msra.mxu1 %v10853_v48 }
0x10dc   :  { %4581 = vmatmul.mubr.bf16.gmra.mrb[88].mxu0 %v10590_v33  ;;  %4694 = vmatmul.mubr.bf16.gmra.mrb[88].mxu1 %v10590_v33  ;;  %v10865_v33 = vld [vmem:[%s12237_s4 + $0x2cc] ss:$16 sps:$4 sm:$0xff]  }
0x10dd   :  { %4590 = vmatprep.mubr.bf16.mxu0 %v12333_v47  ;;  %4703 = vmatprep.mubr.bf16.mxu1 %v12333_v47 }
0x10de   :  { %4956 = vmatprep.subr.bf16.mxu0 %v10822_v29  ;;  %5001 = vmatprep.subr.bf16.mxu1 %v10865_v33 }
0x10df   :  { %4957 = vmatpush1.bf16.msra.mxu0 %v10834_v27  ;;  %5002 = vmatpush1.bf16.msra.mxu1 %v10877_v11 }
0x10e0   :  { %4958 = vmatprep.subr.bf16.mxu0 %v10846_v52  ;;  %5003 = vmatprep.subr.bf16.mxu1 %v10889_v22 }
0x10e3   :  { %4959 = vmatpush1.bf16.msra.mxu0 %v10858_v20  ;;  %5004 = vmatpush1.bf16.msra.mxu1 %v10896_v15 }
0x10e4   :  { %4960 = vmatprep.subr.bf16.mxu0 %v10870_v25  ;;  %5129 = vmatprep.subr.bf16.mxu1 %v10688_v28 }
0x10e7   :  { %4961 = vmatpush1.bf16.msra.mxu0 %v10882_v59 }
0x10e8   :  { %5086 = vmatprep.subr.bf16.mxu0 %v10683_v40 }
0x115f   :  { %v4133_v60 = vpop.f32.mrb[60].mxu0  ;;  %v4176_v34 = vpop.f32.mrb[60].mxu1 }
0x1160   :  { %v7142_v45 = vadd.f32 %v4133_v60, %v10071_v39  ;;  %v4135_v46 = vpop.f32.mrb[61].mxu0  ;;  %v4178_v31 = vpop.f32.mrb[61].mxu1  ;;  %v7174_v38 = vadd.f32 %v4176_v34, %v10078_v26 }
0x1161   :  { %v7143_v23 = vadd.f32 %v4135_v46, %v10074_v21  ;;  %v4137_v37 = vpop.f32.mrb[62].mxu0  ;;  %v4180_v14 = vpop.f32.mrb[62].mxu1  ;;  %v7175_v36 = vadd.f32 %v4178_v31, %v10085_v17 }
0x1162   :  { %v4193_v5 = vmul.f32 0.5, %v7142_v45  ;;  %v7144_v41 = vadd.f32 %v4137_v37, %v10071_v39  ;;  %v4139_v50 = vpop.f32.mrb[63].mxu0  ;;  %v4182_v18 = vpop.f32.mrb[63].mxu1  ;;  %v7176_v54 = vadd.f32 %v4180_v14, %v10078_v26 }
0x1163   :  { %v4201_v63 = vmul.f32 0.5, %v7143_v23  ;;  %v7145_v2 = vadd.f32 %v4139_v50, %v10074_v21  ;;  %v4211_v39 = vmul.f32 0.5, %v7175_v36  ;;  %v7177_v49 = vadd.f32 %v4182_v18, %v10085_v17 }
0x1164   :  { %8055 = vtanh.f32 %v4193_v5  ;;  %v4194_v35 = vmul.f32 0.5, %v7144_v41 }
0x1165   :  { %8057 = vtanh.f32 %v4201_v63  ;;  %v4202_v32 = vmul.f32 0.5, %v7145_v2  ;;  %v4212_v60 = vmul.f32 0.5, %v7177_v49 }
0x1166   :  { %8059 = vtanh.f32 %v4194_v35 }
0x1167   :  { %8061 = vtanh.f32 %v7174_v38 }
0x1168   :  { %8063 = vtanh.f32 %v4202_v32 }
0x1169   :  { %8065 = vtanh.f32 %v7176_v54 }
0x116a   :  { %8067 = vtanh.f32 %v4211_v39 }
0x116b   :  { %8069 = vtanh.f32 %v4212_v60 }
0x116e   :  { %v8056_v1 = vpop.eup %8055 }
0x116f   :  { %v8058_v30 = vpop.eup %8057  ;;  %v4197_v21 = vadd.f32 1.0, %v8056_v1 }
0x1170   :  { %v4205_v43 = vadd.f32 1.0, %v8058_v30  ;;  %v8060_v34 = vpop.eup %8059 }
0x1171   :  { %v4199_v45 = vmul.f32 0.5, %v4197_v21  ;;  %v8062_v46 = vpop.eup %8061  ;;  %v4198_v37 = vadd.f32 1.0, %v8060_v34 }
0x1172   :  { %v4207_v23 = vmul.f32 0.5, %v4205_v43  ;;  %v8064_v26 = vpop.eup %8063 }
0x1173   :  { %v4221_v14 = vmul.f32 %v8062_v46, %v4199_v45  ;;  %v4200_v5 = vmul.f32 0.5, %v4198_v37  ;;  %v4206_v41 = vadd.f32 1.0, %v8064_v26  ;;  %v8066_v50 = vpop.eup %8065  ;;  %v12357_v37 = vld [vmem:[#allocation4_spill] sm:$0xff] }
0x1174   :  { %v4219_v31 = vmul.f32 %v4207_v23, %v10577_v8  ;;  %v8068_v38 = vpop.eup %8067 }
0x1175   :  { %v4208_v18 = vmul.f32 0.5, %v4206_v41  ;;  %v4222_v63 = vmul.f32 %v8066_v50, %v4200_v5  ;;  %v4215_v32 = vadd.f32 1.0, %v8068_v38  ;;  %v8070_v54 = vpop.eup %8069 }
0x1176   :  { %v4223_v17 = vadd.f32 %v4221_v14, %v4219_v31  ;;  %v4216_v39 = vadd.f32 1.0, %v8070_v54  ;;  %v12359_v54 = vld [vmem:[#allocation6_spill] sm:$0xff] }
0x1177   :  { %v4220_v2 = vmul.f32 %v4208_v18, %v10581_v13  ;;  %v4217_v36 = vmul.f32 0.5, %v4215_v32  ;;  %v6985_v13 = vld [vmem:[%s12240_s5 + $0x8] sm:$0xf] }
0x1178   :  { %8071 = vtanh.f32 %v4223_v17  ;;  %v4218_v8 = vmul.f32 0.5, %v4216_v39  ;;  %v10954_v60 = vrot.slane %v6985_v13, %v9179_v7  ;;  %v10957_v34 = vrot.slane %v6985_v13, %v9184_v53 }
0x1179   :  { %v4224_v35 = vadd.f32 %v4222_v63, %v4220_v2  ;;  %v10961_v26 = vrot.slane %v6985_v13, %v12357_v37 }
0x117a   :  { %12355 = vst [vmem:[#allocation12_spill] sm:$0xff] %v10954_v60  ;;  %12356 = vst [vmem:[#allocation13_spill] sm:$0xff] %v10957_v34 }
0x117b   :  { %8073 = vtanh.f32 %v4224_v35  ;;  %12358 = vst [vmem:[#allocation4_spill] sm:$0xff] %v10961_v26 }
0x1182   :  { %v8072_v49 = vpop.eup %8071 }
0x1183   :  { %v4227_v1 = vmul.f32 %v8072_v49, %v4217_v36  ;;  %v10968_v36 = vrot.slane %v6985_v13, %v12359_v54 }
0x1185   :  { %v8074_v30 = vpop.eup %8073  ;;  %12360 = vst [vmem:[#allocation6_spill] sm:$0xff] %v10968_v36 }
0x1186   :  { %v4228_v21 = vmul.f32 %v8074_v30, %v4218_v8 }
0x1188   :  { %v4229_v43 = vpack.c.bf16 %v4228_v21, %v4227_v1 }
0x118a   :  { %4591 = vmatmul.mubr.bf16.gmra.mrb[92].mxu0 %v4229_v43  ;;  %4704 = vmatmul.mubr.bf16.gmra.mrb[92].mxu1 %v4229_v43 }
0x118b   :  { %4978 = vmatprep.mubr.bf16.mxu0 %v12333_v47  ;;  %5021 = vmatprep.mubr.bf16.mxu1 %v12333_v47 }
0x1192   :  { %4979 = vmatmul.mubr.bf16.vlgmr.msra.gmra.mrb[64].mxu0 %v12333_v47  ;;  %5022 = vmatmul.mubr.bf16.vlgmr.msra.gmra.mrb[64].mxu1 %v12333_v47 }
0x1193   :  { %5087 = vmatpush1.bf16.msra.mxu0 %v10694_v42  ;;  %5130 = vmatpush1.bf16.msra.mxu1 %v10700_v56 }
0x1194   :  { %5088 = vmatprep.subr.bf16.mxu0 %v10705_v61  ;;  %5131 = vmatprep.subr.bf16.mxu1 %v10747_v12 }
0x1195   :  { %5118 = vmatprep.mubr.bf16.mxu0 %v12333_v47  ;;  %5161 = vmatprep.mubr.bf16.mxu1 %v12333_v47 }
0x1197   :  { %5089 = vmatpush1.bf16.msra.mxu0 %v10716_v58  ;;  %5132 = vmatpush1.bf16.msra.mxu1 %v10758_v0 }
0x1198   :  { %5090 = vmatprep.subr.bf16.mxu0 %v10753_v57  ;;  %5133 = vmatprep.subr.bf16.mxu1 %v10771_v6 }
0x119b   :  { %5091 = vmatpush1.bf16.msra.mxu0 %v10763_v3  ;;  %5134 = vmatpush1.bf16.msra.mxu1 %v10781_v24 }
0x119c   :  { %5092 = vmatprep.subr.bf16.mxu0 %v10776_v10  ;;  %5135 = vmatprep.subr.bf16.mxu1 %v10791_v62 }
0x119f   :  { %5093 = vmatpush1.bf16.msra.mxu0 %v10786_v4  ;;  %5136 = vmatpush1.bf16.msra.mxu1 %v10805_v9 }
0x11a0   :  { %5094 = vmatprep.subr.bf16.mxu0 %v10796_v19  ;;  %5137 = vmatprep.subr.bf16.mxu1 %v10817_v55 }
0x11a3   :  { %5095 = vmatpush1.bf16.msra.mxu0 %v10810_v16  ;;  %5138 = vmatpush1.bf16.msra.mxu1 %v10829_v51 }
0x11a4   :  { %5096 = vmatprep.subr.bf16.mxu0 %v10822_v29  ;;  %5139 = vmatprep.subr.bf16.mxu1 %v10841_v44 }
0x11a7   :  { %5097 = vmatpush1.bf16.msra.mxu0 %v10834_v27  ;;  %5140 = vmatpush1.bf16.msra.mxu1 %v10853_v48 }
0x11a8   :  { %5098 = vmatprep.subr.bf16.mxu0 %v10846_v52  ;;  %5141 = vmatprep.subr.bf16.mxu1 %v10865_v33 }
0x11ab   :  { %5099 = vmatpush1.bf16.msra.mxu0 %v10858_v20  ;;  %5142 = vmatpush1.bf16.msra.mxu1 %v10877_v11 }
0x11ac   :  { %5100 = vmatprep.subr.bf16.mxu0 %v10870_v25  ;;  %5143 = vmatprep.subr.bf16.mxu1 %v10889_v22 }
0x11af   :  { %5101 = vmatpush1.bf16.msra.mxu0 %v10882_v59  ;;  %5144 = vmatpush1.bf16.msra.mxu1 %v10896_v15 }
0x11b0   :  { %5226 = vmatprep.subr.bf16.mxu0 %v10683_v40  ;;  %5269 = vmatprep.subr.bf16.mxu1 %v10688_v28 }
0x1265   :  { %v4980_v45 = vpop.f32.mrb[64].mxu0  ;;  %v5023_v46 = vpop.f32.mrb[64].mxu1 }
0x1266   :  { %v7178_v23 = vadd.f32 %v4980_v45, %v10954_v60  ;;  %v4982_v14 = vpop.f32.mrb[65].mxu0  ;;  %v5025_v31 = vpop.f32.mrb[65].mxu1  ;;  %v7210_v38 = vadd.f32 %v5023_v46, %v10961_v26 }
0x1267   :  { %v7179_v5 = vadd.f32 %v4982_v14, %v10957_v34  ;;  %v4984_v41 = vpop.f32.mrb[66].mxu0  ;;  %v5027_v50 = vpop.f32.mrb[66].mxu1  ;;  %v7211_v49 = vadd.f32 %v5025_v31, %v10968_v36 }
0x1268   :  { %v5040_v17 = vmul.f32 0.5, %v7178_v23  ;;  %v7180_v7 = vadd.f32 %v4984_v41, %v10954_v60  ;;  %v4986_v18 = vpop.f32.mrb[67].mxu0  ;;  %v5029_v63 = vpop.f32.mrb[67].mxu1  ;;  %v7212_v39 = vadd.f32 %v5027_v50, %v10961_v26  ;;  %v6073_v26 = vld [vmem:[%s12235_s0 + $0x78] sm:$0x1] }
0x1269   :  { %v5048_v53 = vmul.f32 0.5, %v7179_v5  ;;  %v7181_v2 = vadd.f32 %v4986_v18, %v10957_v34  ;;  %v7213_v1 = vadd.f32 %v5029_v63, %v10968_v36  ;;  %v5058_v43 = vmul.f32 0.5, %v7211_v49  ;;  %v6072_v36 = vld [vmem:[%s12235_s0 + $0x70] sm:$0x1] }
0x126a   :  { %8075 = vtanh.f32 %v5040_v17  ;;  %v5041_v35 = vmul.f32 0.5, %v7180_v7 }
0x126b   :  { %8077 = vtanh.f32 %v5048_v53  ;;  %v5049_v32 = vmul.f32 0.5, %v7181_v2  ;;  %v5059_v46 = vmul.f32 0.5, %v7213_v1 }
0x126c   :  { %8079 = vtanh.f32 %v5041_v35 }
0x126d   :  { %8081 = vtanh.f32 %v7210_v38 }
0x126e   :  { %8083 = vtanh.f32 %v5049_v32 }
0x126f   :  { %8085 = vtanh.f32 %v7212_v39 }
0x1270   :  { %8087 = vtanh.f32 %v5058_v43 }
0x1271   :  { %8089 = vtanh.f32 %v5059_v46 }
0x1274   :  { %v8076_v8 = vpop.eup %8075 }
0x1275   :  { %v8078_v30 = vpop.eup %8077  ;;  %v5044_v21 = vadd.f32 1.0, %v8076_v8 }
0x1276   :  { %v5052_v45 = vadd.f32 1.0, %v8078_v30  ;;  %v8080_v23 = vpop.eup %8079 }
0x1277   :  { %v5046_v37 = vmul.f32 0.5, %v5044_v21  ;;  %v8082_v13 = vpop.eup %8081  ;;  %v5045_v5 = vadd.f32 1.0, %v8080_v23  ;;  %v6058_v23 = vld [vmem:[%s12235_s0] sm:$0x1] }
0x1278   :  { %v5054_v14 = vmul.f32 0.5, %v5052_v45  ;;  %v8084_v41 = vpop.eup %8083 }
0x1279   :  { %v5068_v50 = vmul.f32 %v8082_v13, %v5046_v37  ;;  %v5047_v7 = vmul.f32 0.5, %v5045_v5  ;;  %v5053_v31 = vadd.f32 1.0, %v8084_v41  ;;  %v8086_v18 = vpop.eup %8085  ;;  %v6059_v37 = vld [vmem:[%s12235_s0 + $0x8] sm:$0x1]  ;;  %v6060_v5 = vld [vmem:[%s12235_s0 + $0x10] sm:$0x1] }
0x127a   :  { %v5066_v17 = vmul.f32 0.0, %v5054_v14  ;;  %v8088_v32 = vpop.eup %8087  ;;  %v6061_v41 = vld [vmem:[%s12235_s0 + $0x18] sm:$0x1] }
0x127b   :  { %v5055_v53 = vmul.f32 0.5, %v5053_v31  ;;  %v5069_v2 = vmul.f32 %v8086_v18, %v5047_v7  ;;  %v8090_v54 = vpop.eup %8089  ;;  %v5062_v39 = vadd.f32 1.0, %v8088_v32  ;;  %v6064_v7 = vld [vmem:[%s12235_s0 + $0x30] sm:$0x1]  ;;  %v6065_v31 = vld [vmem:[%s12235_s0 + $0x38] sm:$0x1] }
0x127c   :  { %v10973_v63 = vadd.f32 %v5068_v50, %v5066_v17  ;;  %v5063_v49 = vadd.f32 1.0, %v8090_v54  ;;  %v6062_v50 = vld [vmem:[%s12235_s0 + $0x20] sm:$0x1]  ;;  %v6063_v17 = vld [vmem:[%s12235_s0 + $0x28] sm:$0x1] }
0x127d   :  { %v5067_v38 = vmul.f32 0.0, %v5055_v53  ;;  %v5064_v8 = vmul.f32 0.5, %v5062_v39  ;;  %v6066_v18 = vld [vmem:[%s12235_s0 + $0x40] sm:$0x1]  ;;  %v6067_v53 = vld [vmem:[%s12235_s0 + $0x48] sm:$0x1] }
0x127e   :  { %12361 = vst [vmem:[#allocation14_spill] sm:$0xff] %v10973_v63  ;;  %8091 = vtanh.f32 %v10973_v63  ;;  %v5065_v30 = vmul.f32 0.5, %v5063_v49  ;;  %v6068_v39 = vld [vmem:[%s12235_s0 + $0x50] sm:$0x1] }
0x127f   :  { %v10976_v35 = vadd.f32 %v5069_v2, %v5067_v38 }
0x1281   :  { %12362 = vst [vmem:[#allocation15_spill] sm:$0xff] %v10976_v35  ;;  %8093 = vtanh.f32 %v10976_v35 }
0x1288   :  { %v8092_v1 = vpop.eup %8091 }
0x1289   :  { %v5074_v43 = vmul.f32 %v8092_v1, %v5064_v8 }
0x128b   :  { %v8094_v21 = vpop.eup %8093 }
0x128c   :  { %v5075_v45 = vmul.f32 %v8094_v21, %v5065_v30  ;;  %v6069_v21 = vld [vmem:[%s12235_s0 + $0x58] sm:$0x1] }
0x128e   :  { %v5076_v46 = vpack.c.bf16 %v5075_v45, %v5074_v43 }
0x1290   :  { %5119 = vmatmul.mubr.bf16.vlgmr.msra.gmra.mrb[68].mxu0 %v5076_v46  ;;  %v6075_v13 = vunpack.c.l.bf16 %v5076_v46  ;;  %v10985_v14 = vunpack.c.h.bf16 %v5076_v46  ;;  %5162 = vmatmul.mubr.bf16.vlgmr.msra.gmra.mrb[68].mxu1 %v5076_v46 }
0x1291   :  { %5227 = vmatpush1.bf16.msra.mxu0 %v10694_v42  ;;  %5270 = vmatpush1.bf16.msra.mxu1 %v10700_v56 }
0x1292   :  { %v6079_v2 = vrot.slane %v6075_v13, 1  ;;  %v6080_v38 = vrot.slane %v6075_v13, 2  ;;  %v6081_v32 = vrot.slane %v6075_v13, 3  ;;  %v6082_v54 = vrot.slane %v6075_v13, 4  ;;  %5228 = vmatprep.subr.bf16.mxu0 %v10705_v61  ;;  %5271 = vmatprep.subr.bf16.mxu1 %v10747_v12  ;;  %v6070_v61 = vld [vmem:[%s12235_s0 + $0x60] sm:$0x1] }
0x1293   :  { %v6083_v49 = vrot.slane %v6075_v13, 5  ;;  %v6084_v1 = vrot.slane %v6075_v13, 6  ;;  %v6085_v8 = vrot.slane %v6075_v13, 7  ;;  %v6086_v30 = vrot.slane %v10985_v14, 1  ;;  %5258 = vmatprep.mubr.bf16.mxu0 %v12333_v47  ;;  %5301 = vmatprep.mubr.bf16.mxu1 %v12333_v47  ;;  %v6071_v47 = vld [vmem:[%s12235_s0 + $0x68] sm:$0x1] }
0x1294   :  { %v6087_v43 = vrot.slane %v10985_v14, 2  ;;  %v6088_v45 = vrot.slane %v10985_v14, 3  ;;  %v6089_v46 = vrot.slane %v10985_v14, 4  ;;  %v6090_v12 = vrot.slane %v10985_v14, 5 }
0x1295   :  { %v6091_v56 = vrot.slane %v10985_v14, 6  ;;  %v6092_v42 = vrot.slane %v10985_v14, 7  ;;  %v6109_v35 = vadd.f32 %v6075_v13, %v6058_v23  ;;  %v6110_v63 = vadd.f32 %v6079_v2, %v6059_v37  ;;  %5229 = vmatpush1.bf16.msra.mxu0 %v10716_v58  ;;  %5272 = vmatpush1.bf16.msra.mxu1 %v10758_v0 }
0x1296   :  { %v6111_v34 = vadd.f32 %v6080_v38, %v6060_v5  ;;  %v6112_v60 = vadd.f32 %v6081_v32, %v6061_v41  ;;  %v6113_v28 = vadd.f32 %v6082_v54, %v6062_v50  ;;  %v6114_v40 = vadd.f32 %v6083_v49, %v6063_v17  ;;  %5230 = vmatprep.subr.bf16.mxu0 %v10753_v57  ;;  %v12367_v54 = vld [vmem:[#allocation4_spill] sm:$0xff] }
0x1297   :  { %v6115_v23 = vadd.f32 %v6084_v1, %v6064_v7  ;;  %v6116_v37 = vadd.f32 %v6085_v8, %v6065_v31  ;;  %v6117_v13 = vadd.f32 %v10985_v14, %v6066_v18  ;;  %v6118_v2 = vadd.f32 %v6086_v30, %v6067_v53  ;;  %6125 = vst [vmem:[%s12241_s6] sm:$0x1] %v6109_v35  ;;  %v12368_v30 = vld [vmem:[#allocation6_spill] sm:$0xff] }
0x1298   :  { %6126 = vst [vmem:[%s12241_s6 + $0x8] sm:$0x1] %v6110_v63  ;;  %5273 = vmatprep.subr.bf16.mxu1 %v10771_v6  ;;  %v6119_v5 = vadd.f32 %v6087_v43, %v6068_v39  ;;  %v6120_v41 = vadd.f32 %v6088_v45, %v6069_v21  ;;  %v6121_v50 = vadd.f32 %v6089_v46, %v6070_v61  ;;  %6127 = vst [vmem:[%s12241_s6 + $0x10] sm:$0x1] %v6111_v34  ;;  %v12366_v34 = vld [vmem:[#allocation13_spill] sm:$0xff] }
0x1299   :  { %v6122_v17 = vadd.f32 %v6090_v12, %v6071_v47  ;;  %6128 = vst [vmem:[%s12241_s6 + $0x18] sm:$0x1] %v6112_v60  ;;  %6129 = vst [vmem:[%s12241_s6 + $0x20] sm:$0x1] %v6113_v28  ;;  %v6123_v63 = vadd.f32 %v6091_v56, %v6072_v36  ;;  %v6124_v35 = vadd.f32 %v6092_v42, %v6073_v26  ;;  %5231 = vmatpush1.bf16.msra.mxu0 %v10763_v3  ;;  %v12363_v47 = vld [vmem:[#allocation5_spill] sm:$0xff]  ;;  %v12365_v56 = vld [vmem:[#allocation12_spill] sm:$0xff] }
0x129a   :  { %6130 = vst [vmem:[%s12241_s6 + $0x28] sm:$0x1] %v6114_v40  ;;  %6131 = vst [vmem:[%s12241_s6 + $0x30] sm:$0x1] %v6115_v23  ;;  %5274 = vmatpush1.bf16.msra.mxu1 %v10781_v24  ;;  %5232 = vmatprep.subr.bf16.mxu0 %v10776_v10  ;;  %v12364_v40 = vld [vmem:[#allocation8_spill] sm:$0xff] }
0x129b   :  { %6132 = vst [vmem:[%s12241_s6 + $0x38] sm:$0x1] %v6116_v37  ;;  %6133 = vst [vmem:[%s12241_s6 + $0x40] sm:$0x1] %v6117_v13  ;;  %5275 = vmatprep.subr.bf16.mxu1 %v10791_v62 }
0x129c   :  { %6134 = vst [vmem:[%s12241_s6 + $0x48] sm:$0x1] %v6118_v2  ;;  %6135 = vst [vmem:[%s12241_s6 + $0x50] sm:$0x1] %v6119_v5 }
0x129d   :  { %6136 = vst [vmem:[%s12241_s6 + $0x58] sm:$0x1] %v6120_v41  ;;  %6137 = vst [vmem:[%s12241_s6 + $0x60] sm:$0x1] %v6121_v50  ;;  %5233 = vmatpush1.bf16.msra.mxu0 %v10786_v4 }
0x129e   :  { %6138 = vst [vmem:[%s12241_s6 + $0x68] sm:$0x1] %v6122_v17  ;;  %6139 = vst [vmem:[%s12241_s6 + $0x70] sm:$0x1] %v6123_v63  ;;  %5276 = vmatpush1.bf16.msra.mxu1 %v10805_v9  ;;  %5234 = vmatprep.subr.bf16.mxu0 %v10796_v19 }
0x129f   :  { %6140 = vst [vmem:[%s12241_s6 + $0x78] sm:$0x1] %v6124_v35  ;;  %5277 = vmatprep.subr.bf16.mxu1 %v10817_v55 }
0x12a1   :  { %5235 = vmatpush1.bf16.msra.mxu0 %v10810_v16 }
0x12a2   :  { %5278 = vmatpush1.bf16.msra.mxu1 %v10829_v51  ;;  %5236 = vmatprep.subr.bf16.mxu0 %v10822_v29 }
0x12a3   :  { %5279 = vmatprep.subr.bf16.mxu1 %v10841_v44 }
0x12a5   :  { %5237 = vmatpush1.bf16.msra.mxu0 %v10834_v27 }
0x12a6   :  { %5280 = vmatpush1.bf16.msra.mxu1 %v10853_v48  ;;  %5238 = vmatprep.subr.bf16.mxu0 %v10846_v52 }
0x12a7   :  { %5281 = vmatprep.subr.bf16.mxu1 %v10865_v33 }
0x12a9   :  { %5239 = vmatpush1.bf16.msra.mxu0 %v10858_v20 }
0x12aa   :  { %5282 = vmatpush1.bf16.msra.mxu1 %v10877_v11  ;;  %5240 = vmatprep.subr.bf16.mxu0 %v10870_v25 }
0x12ab   :  { %5283 = vmatprep.subr.bf16.mxu1 %v10889_v22 }
0x12ad   :  { %5241 = vmatpush1.bf16.msra.mxu0 %v10882_v59 }
0x12ae   :  { %5284 = vmatpush1.bf16.msra.mxu1 %v10896_v15  ;;  %5366 = vmatprep.subr.bf16.mxu0 %v12363_v47 }
0x12af   :  { %5409 = vmatprep.subr.bf16.mxu1 %v12364_v40  ;;  %v12369_v40 = vld [vmem:[#allocation14_spill] sm:$0xff] }
0x1363   :  { %v5120_v28 = vpop.f32.mrb[68].mxu0  ;;  %v5163_v42 = vpop.f32.mrb[68].mxu1 }
0x1364   :  { %v7182_v61 = vadd.f32 %v5120_v28, %v12365_v56  ;;  %v5122_v12 = vpop.f32.mrb[69].mxu0  ;;  %v5165_v60 = vpop.f32.mrb[69].mxu1  ;;  %v7214_v39 = vadd.f32 %v5163_v42, %v12367_v54 }
0x1365   :  { %v7183_v26 = vadd.f32 %v5122_v12, %v12366_v34  ;;  %v5124_v36 = vpop.f32.mrb[70].mxu0  ;;  %v5167_v14 = vpop.f32.mrb[70].mxu1  ;;  %v7215_v21 = vadd.f32 %v5165_v60, %v12368_v30 }
0x1366   :  { %v5180_v7 = vmul.f32 0.5, %v7182_v61  ;;  %v7184_v31 = vadd.f32 %v5124_v36, %v12365_v56  ;;  %v5126_v18 = vpop.f32.mrb[71].mxu0  ;;  %v5169_v53 = vpop.f32.mrb[71].mxu1  ;;  %v7216_v8 = vadd.f32 %v5167_v14, %v12367_v54  ;;  %v12371_v14 = vld [vmem:[#allocation15_spill] sm:$0xff] }
0x1367   :  { %v5188_v38 = vmul.f32 0.5, %v7183_v26  ;;  %v7185_v32 = vadd.f32 %v5126_v18, %v12366_v34  ;;  %v7217_v43 = vadd.f32 %v5169_v53, %v12368_v30  ;;  %v5198_v37 = vmul.f32 0.5, %v7215_v21 }
0x1368   :  { %8095 = vtanh.f32 %v5180_v7  ;;  %v5181_v49 = vmul.f32 0.5, %v7184_v31 }
0x1369   :  { %8097 = vtanh.f32 %v5188_v38  ;;  %v5189_v1 = vmul.f32 0.5, %v7185_v32  ;;  %v5199_v2 = vmul.f32 0.5, %v7217_v43 }
0x136a   :  { %8099 = vtanh.f32 %v5181_v49 }
0x136b   :  { %8101 = vtanh.f32 %v7214_v39 }
0x136c   :  { %8103 = vtanh.f32 %v5189_v1 }
0x136d   :  { %8105 = vtanh.f32 %v7216_v8 }
0x136e   :  { %8107 = vtanh.f32 %v5198_v37 }
0x136f   :  { %8109 = vtanh.f32 %v5199_v2  ;;  %v6143_v2 = vld [vmem:[%s12235_s0 + $0x11] sm:$0x1] }
0x1372   :  { %v8096_v45 = vpop.eup %8095 }
0x1373   :  { %v8098_v46 = vpop.eup %8097  ;;  %v5184_v23 = vadd.f32 1.0, %v8096_v45 }
0x1374   :  { %v5192_v13 = vadd.f32 1.0, %v8098_v46  ;;  %v8100_v5 = vpop.eup %8099  ;;  %v6141_v46 = vld [vmem:[%s12235_s0 + $0x1] sm:$0x1] }
0x1375   :  { %v5186_v41 = vmul.f32 0.5, %v5184_v23  ;;  %v8102_v50 = vpop.eup %8101  ;;  %v5185_v63 = vadd.f32 1.0, %v8100_v5  ;;  %v6142_v23 = vld [vmem:[%s12235_s0 + $0x9] sm:$0x1]  ;;  %v6144_v5 = vld [vmem:[%s12235_s0 + $0x19] sm:$0x1] }
0x1376   :  { %v5194_v17 = vmul.f32 0.5, %v5192_v13  ;;  %v8104_v35 = vpop.eup %8103 }
0x1377   :  { %v5208_v47 = vmul.f32 %v8102_v50, %v5186_v41  ;;  %v5187_v42 = vmul.f32 0.5, %v5185_v63  ;;  %v5193_v61 = vadd.f32 1.0, %v8104_v35  ;;  %v8106_v12 = vpop.eup %8105  ;;  %v6145_v41 = vld [vmem:[%s12235_s0 + $0x21] sm:$0x1]  ;;  %v6146_v50 = vld [vmem:[%s12235_s0 + $0x29] sm:$0x1] }
0x1378   :  { %v5206_v28 = vmul.f32 %v5194_v17, %v12369_v40  ;;  %v8108_v18 = vpop.eup %8107  ;;  %v12373_v17 = vld [vmem:[#allocation7_spill] sm:$0xff]  ;;  %v12374_v63 = vld [vmem:[#allocation9_spill] sm:$0xff]  ;;  %v6147_v35 = vld [vmem:[%s12235_s0 + $0x31] sm:$0x1] }
0x1379   :  { %v5195_v26 = vmul.f32 0.5, %v5193_v61  ;;  %v5209_v36 = vmul.f32 %v8106_v12, %v5187_v42  ;;  %v8110_v53 = vpop.eup %8109  ;;  %v5202_v38 = vadd.f32 1.0, %v8108_v18  ;;  %v6149_v40 = vld [vmem:[%s12235_s0 + $0x41] sm:$0x1] }
0x137a   :  { %v11128_v60 = vadd.f32 %v5208_v47, %v5206_v28  ;;  %v5203_v32 = vadd.f32 1.0, %v8110_v53  ;;  %v6148_v47 = vld [vmem:[%s12235_s0 + $0x39] sm:$0x1]  ;;  %v6150_v28 = vld [vmem:[%s12235_s0 + $0x49] sm:$0x1] }
0x137b   :  { %v5207_v7 = vmul.f32 %v5195_v26, %v12371_v14  ;;  %v5204_v49 = vmul.f32 0.5, %v5202_v38  ;;  %v12376_v14 = vld [vmem:[#allocation11_spill] sm:$0xff] }
0x137c   :  { %12370 = vst [vmem:[#allocation5_spill] sm:$0xff] %v11128_v60  ;;  %8111 = vtanh.f32 %v11128_v60  ;;  %v5205_v1 = vmul.f32 0.5, %v5203_v32  ;;  %v6156_v60 = vld [vmem:[%s12235_s0 + $0x79] sm:$0x1] }
0x137d   :  { %v11132_v31 = vadd.f32 %v5209_v36, %v5207_v7  ;;  %v12375_v36 = vld [vmem:[#allocation10_spill] sm:$0xff] }
0x137e   :  { %v6151_v7 = vld [vmem:[%s12235_s0 + $0x51] sm:$0x1] }
0x137f   :  { %12372 = vst [vmem:[#allocation8_spill] sm:$0xff] %v11132_v31  ;;  %8113 = vtanh.f32 %v11132_v31  ;;  %v6155_v31 = vld [vmem:[%s12235_s0 + $0x71] sm:$0x1] }
0x1386   :  { %v8112_v39 = vpop.eup %8111 }
0x1387   :  { %v5214_v21 = vmul.f32 %v8112_v39, %v5204_v49  ;;  %v12377_v39 = vmov 0   ;;  %v6152_v49 = vld [vmem:[%s12235_s0 + $0x59] sm:$0x1] }
0x1389   :  { %v8114_v8 = vpop.eup %8113 }
0x138a   :  { %v5215_v43 = vmul.f32 %v8114_v8, %v5205_v1 }
0x138c   :  { %v5216_v45 = vpack.c.bf16 %v5215_v43, %v5214_v21 }
0x138e   :  { %5259 = vmatmul.mubr.bf16.vlgmr.msra.gmra.mrb[72].mxu0 %v5216_v45  ;;  %v6158_v37 = vunpack.c.l.bf16 %v5216_v45  ;;  %v6159_v13 = vunpack.c.h.bf16 %v5216_v45  ;;  %5302 = vmatmul.mubr.bf16.vlgmr.msra.gmra.mrb[72].mxu1 %v5216_v45  ;;  %v6153_v45 = vld [vmem:[%s12235_s0 + $0x61] sm:$0x1] }
0x138f   :  { %5367 = vmatpush1.bf16.msra.mxu0 %v12373_v17  ;;  %5410 = vmatpush1.bf16.msra.mxu1 %v12374_v63  ;;  %v6154_v17 = vld [vmem:[%s12235_s0 + $0x69] sm:$0x1] }
0x1390   :  { %v6162_v42 = vrot.slane %v6158_v37, 1  ;;  %v6163_v61 = vrot.slane %v6158_v37, 2  ;;  %v6164_v12 = vrot.slane %v6158_v37, 3  ;;  %v6165_v26 = vrot.slane %v6158_v37, 4  ;;  %5368 = vmatprep.subr.bf16.mxu0 %v12375_v36  ;;  %5411 = vmatprep.subr.bf16.mxu1 %v12376_v14 }
0x1391   :  { %v6166_v18 = vrot.slane %v6158_v37, 5  ;;  %v6167_v53 = vrot.slane %v6158_v37, 6  ;;  %v6168_v38 = vrot.slane %v6158_v37, 7  ;;  %v6169_v32 = vrot.slane %v6159_v13, 1  ;;  %5398 = vmatprep.mubr.bf16.mxu0 %v12377_v39  ;;  %5441 = vmatprep.mubr.bf16.mxu1 %v12377_v39 }
0x1392   :  { %v6170_v1 = vrot.slane %v6159_v13, 2  ;;  %v6171_v8 = vrot.slane %v6159_v13, 3  ;;  %v6172_v21 = vrot.slane %v6159_v13, 4  ;;  %v6173_v43 = vrot.slane %v6159_v13, 5 }
0x1393   :  { %v6174_v63 = vrot.slane %v6159_v13, 6  ;;  %v6175_v36 = vrot.slane %v6159_v13, 7  ;;  %v6192_v14 = vadd.f32 %v6158_v37, %v6141_v46  ;;  %v6193_v39 = vadd.f32 %v6162_v42, %v6142_v23  ;;  %5369 = vmatpush1.bf16.msra.mxu0 %v10716_v58  ;;  %5412 = vmatpush1.bf16.msra.mxu1 %v10758_v0 }
0x1394   :  { %v6194_v30 = vadd.f32 %v6163_v61, %v6143_v2  ;;  %v6195_v54 = vadd.f32 %v6164_v12, %v6144_v5  ;;  %v6196_v34 = vadd.f32 %v6165_v26, %v6145_v41  ;;  %v6197_v56 = vadd.f32 %v6166_v18, %v6146_v50  ;;  %5370 = vmatprep.subr.bf16.mxu0 %v10753_v57  ;;  %v12384_v18 = vld [vmem:[#allocation5_spill] sm:$0xff] }
0x1395   :  { %v6198_v46 = vadd.f32 %v6167_v53, %v6147_v35  ;;  %v6199_v23 = vadd.f32 %v6168_v38, %v6148_v47  ;;  %v6200_v37 = vadd.f32 %v6159_v13, %v6149_v40  ;;  %v6201_v58 = vadd.f32 %v6169_v32, %v6150_v28  ;;  %6208 = vst [vmem:[%s12241_s6 + $0x1] sm:$0x1] %v6192_v14 }
0x1396   :  { %6209 = vst [vmem:[%s12241_s6 + $0x9] sm:$0x1] %v6193_v39  ;;  %5413 = vmatprep.subr.bf16.mxu1 %v10771_v6  ;;  %v6202_v0 = vadd.f32 %v6170_v1, %v6151_v7  ;;  %v6203_v2 = vadd.f32 %v6171_v8, %v6152_v49  ;;  %v6204_v5 = vadd.f32 %v6172_v21, %v6153_v45  ;;  %6210 = vst [vmem:[%s12241_s6 + $0x11] sm:$0x1] %v6194_v30  ;;  %v12385_v21 = vld [vmem:[#allocation8_spill] sm:$0xff] }
0x1397   :  { %v6205_v41 = vadd.f32 %v6173_v43, %v6154_v17  ;;  %6211 = vst [vmem:[%s12241_s6 + $0x19] sm:$0x1] %v6195_v54  ;;  %6212 = vst [vmem:[%s12241_s6 + $0x21] sm:$0x1] %v6196_v34  ;;  %v6206_v57 = vadd.f32 %v6174_v63, %v6155_v31  ;;  %v6207_v6 = vadd.f32 %v6175_v36, %v6156_v60  ;;  %5371 = vmatpush1.bf16.msra.mxu0 %v10763_v3  ;;  %v11266_v3 = vld [vmem:[%s12237_s4 + $0x204] ss:$16 sps:$4 sm:$0xff]  }
0x1398   :  { %6213 = vst [vmem:[%s12241_s6 + $0x29] sm:$0x1] %v6197_v56  ;;  %6214 = vst [vmem:[%s12241_s6 + $0x31] sm:$0x1] %v6198_v46  ;;  %5414 = vmatpush1.bf16.msra.mxu1 %v10781_v24  ;;  %5372 = vmatprep.subr.bf16.mxu0 %v10776_v10  ;;  %v11272_v10 = vld [vmem:[%s12237_s4 + $0x20c] ss:$16 sps:$4 sm:$0xff]  }
0x1399   :  { %6215 = vst [vmem:[%s12241_s6 + $0x39] sm:$0x1] %v6199_v23  ;;  %6216 = vst [vmem:[%s12241_s6 + $0x41] sm:$0x1] %v6200_v37  ;;  %5415 = vmatprep.subr.bf16.mxu1 %v10791_v62  ;;  %v12380_v62 = vld [vmem:[#allocation12_spill] sm:$0xff]  ;;  %v12383_v34 = vld [vmem:[#allocation6_spill] sm:$0xff] }
0x139a   :  { %6217 = vst [vmem:[%s12241_s6 + $0x49] sm:$0x1] %v6201_v58  ;;  %6218 = vst [vmem:[%s12241_s6 + $0x51] sm:$0x1] %v6202_v0 }
0x139b   :  { %6219 = vst [vmem:[%s12241_s6 + $0x59] sm:$0x1] %v6203_v2  ;;  %6220 = vst [vmem:[%s12241_s6 + $0x61] sm:$0x1] %v6204_v5  ;;  %5373 = vmatpush1.bf16.msra.mxu0 %v10786_v4 }
0x139c   :  { %6221 = vst [vmem:[%s12241_s6 + $0x69] sm:$0x1] %v6205_v41  ;;  %6222 = vst [vmem:[%s12241_s6 + $0x71] sm:$0x1] %v6206_v57  ;;  %5416 = vmatpush1.bf16.msra.mxu1 %v10805_v9  ;;  %5374 = vmatprep.subr.bf16.mxu0 %v10796_v19  ;;  %v6224_v41 = vld [vmem:[%s12235_s0 + $0x2] sm:$0x1] }
0x139d   :  { %6223 = vst [vmem:[%s12241_s6 + $0x79] sm:$0x1] %v6207_v6  ;;  %5417 = vmatprep.subr.bf16.mxu1 %v10817_v55  ;;  %12378 = vst [vmem:[#allocation14_spill] sm:$0xff] %v11266_v3  ;;  %v12381_v55 = vld [vmem:[#allocation13_spill] sm:$0xff] }
0x139e   :  { %12379 = vst [vmem:[#allocation15_spill] sm:$0xff] %v11272_v10  ;;  %v6225_v57 = vld [vmem:[%s12235_s0 + $0xa] sm:$0x1] }
0x139f   :  { %5375 = vmatpush1.bf16.msra.mxu0 %v10810_v16 }
0x13a0   :  { %5418 = vmatpush1.bf16.msra.mxu1 %v10829_v51  ;;  %5376 = vmatprep.subr.bf16.mxu0 %v10822_v29 }
0x13a1   :  { %5419 = vmatprep.subr.bf16.mxu1 %v10841_v44 }
0x13a3   :  { %5377 = vmatpush1.bf16.msra.mxu0 %v10834_v27 }
0x13a4   :  { %5420 = vmatpush1.bf16.msra.mxu1 %v10853_v48  ;;  %5378 = vmatprep.subr.bf16.mxu0 %v10846_v52 }
0x13a5   :  { %5421 = vmatprep.subr.bf16.mxu1 %v10865_v33 }
0x13a7   :  { %5379 = vmatpush1.bf16.msra.mxu0 %v10858_v20 }
0x13a8   :  { %5422 = vmatpush1.bf16.msra.mxu1 %v10877_v11  ;;  %5380 = vmatprep.subr.bf16.mxu0 %v10870_v25  ;;  %v12382_v11 = vld [vmem:[#allocation4_spill] sm:$0xff] }
0x13a9   :  { %5423 = vmatprep.subr.bf16.mxu1 %v10889_v22 }
0x13ab   :  { %5381 = vmatpush1.bf16.msra.mxu0 %v10882_v59 }
0x13ac   :  { %5424 = vmatpush1.bf16.msra.mxu1 %v10896_v15  ;;  %5506 = vmatprep.subr.bf16.mxu0 %v11266_v3 }
0x13ad   :  { %5549 = vmatprep.subr.bf16.mxu1 %v11272_v10 }
0x1461   :  { %v5260_v24 = vpop.f32.mrb[72].mxu0  ;;  %v5303_v4 = vpop.f32.mrb[72].mxu1 }
0x1462   :  { %v7186_v19 = vadd.f32 %v5260_v24, %v12380_v62  ;;  %v5262_v9 = vpop.f32.mrb[73].mxu0  ;;  %v5305_v16 = vpop.f32.mrb[73].mxu1  ;;  %v7218_v59 = vadd.f32 %v5303_v4, %v12382_v11  ;;  %v6226_v4 = vld [vmem:[%s12235_s0 + $0x12] sm:$0x1] }
0x1463   :  { %v7187_v29 = vadd.f32 %v5262_v9, %v12381_v55  ;;  %v5264_v51 = vpop.f32.mrb[74].mxu0  ;;  %v5307_v27 = vpop.f32.mrb[74].mxu1  ;;  %v7219_v54 = vadd.f32 %v5305_v16, %v12383_v34  ;;  %v6228_v9 = vld [vmem:[%s12235_s0 + $0x22] sm:$0x1]  ;;  %v6229_v16 = vld [vmem:[%s12235_s0 + $0x2a] sm:$0x1] }
0x1464   :  { %v5320_v44 = vmul.f32 0.5, %v7186_v19  ;;  %v7188_v52 = vadd.f32 %v5264_v51, %v12380_v62  ;;  %v5266_v48 = vpop.f32.mrb[75].mxu0  ;;  %v5309_v20 = vpop.f32.mrb[75].mxu1  ;;  %v7220_v56 = vadd.f32 %v5307_v27, %v12382_v11  ;;  %v6227_v19 = vld [vmem:[%s12235_s0 + $0x1a] sm:$0x1] }
0x1465   :  { %v5328_v33 = vmul.f32 0.5, %v7187_v29  ;;  %v7189_v25 = vadd.f32 %v5266_v48, %v12381_v55  ;;  %v7221_v30 = vadd.f32 %v5309_v20, %v12383_v34  ;;  %v5338_v50 = vmul.f32 0.5, %v7219_v54  ;;  %v11314_v29 = vld [vmem:[%s12237_s4 + $0x200] ss:$16 sps:$4 sm:$0xff]   ;;  %v11320_v51 = vld [vmem:[%s12237_s4 + $0x208] ss:$16 sps:$4 sm:$0xff]  }
0x1466   :  { %8115 = vtanh.f32 %v5320_v44  ;;  %v5321_v22 = vmul.f32 0.5, %v7188_v52  ;;  %12386 = vst [vmem:[#allocation7_spill] sm:$0xff] %v11314_v29  ;;  %12387 = vst [vmem:[#allocation9_spill] sm:$0xff] %v11320_v51  ;;  %v6230_v27 = vld [vmem:[%s12235_s0 + $0x32] sm:$0x1] }
0x1467   :  { %8117 = vtanh.f32 %v5328_v33  ;;  %v5329_v15 = vmul.f32 0.5, %v7189_v25  ;;  %v5339_v47 = vmul.f32 0.5, %v7221_v30  ;;  %v6231_v44 = vld [vmem:[%s12235_s0 + $0x3a] sm:$0x1]  ;;  %v6232_v52 = vld [vmem:[%s12235_s0 + $0x42] sm:$0x1] }
0x1468   :  { %8119 = vtanh.f32 %v5321_v22  ;;  %v6233_v48 = vld [vmem:[%s12235_s0 + $0x4a] sm:$0x1]  ;;  %v11338_v22 = vld [vmem:[%s12237_s4 + $0x224] ss:$16 sps:$4 sm:$0xff]  }
0x1469   :  { %8121 = vtanh.f32 %v7218_v59  ;;  %12388 = vst [vmem:[#allocation10_spill] sm:$0xff] %v11338_v22 }
0x146a   :  { %8123 = vtanh.f32 %v5329_v15  ;;  %v11344_v15 = vld [vmem:[%s12237_s4 + $0x22c] ss:$16 sps:$4 sm:$0xff]  }
0x146b   :  { %8125 = vtanh.f32 %v7220_v56  ;;  %12389 = vst [vmem:[#allocation11_spill] sm:$0xff] %v11344_v15  ;;  %v6234_v56 = vld [vmem:[%s12235_s0 + $0x52] sm:$0x1] }
0x146c   :  { %8127 = vtanh.f32 %v5338_v50  ;;  %v6235_v50 = vld [vmem:[%s12235_s0 + $0x5a] sm:$0x1] }
0x146d   :  { %8129 = vtanh.f32 %v5339_v47 }
0x1470   :  { %v8116_v60 = vpop.eup %8115 }
0x1471   :  { %v8118_v31 = vpop.eup %8117  ;;  %v5324_v13 = vadd.f32 1.0, %v8116_v60 }
0x1472   :  { %v5332_v35 = vadd.f32 1.0, %v8118_v31  ;;  %v8120_v40 = vpop.eup %8119 }
0x1473   :  { %v5326_v28 = vmul.f32 0.5, %v5324_v13  ;;  %v8122_v42 = vpop.eup %8121  ;;  %v5325_v12 = vadd.f32 1.0, %v8120_v40  ;;  %v12390_v13 = vmov 0  }
0x1474   :  { %v5334_v61 = vmul.f32 0.5, %v5332_v35  ;;  %v8124_v26 = vpop.eup %8123 }
0x1475   :  { %v5348_v7 = vmul.f32 %v8122_v42, %v5326_v28  ;;  %v5327_v38 = vmul.f32 0.5, %v5325_v12  ;;  %v5333_v32 = vadd.f32 1.0, %v8124_v26  ;;  %v8126_v39 = vpop.eup %8125  ;;  %v6236_v42 = vld [vmem:[%s12235_s0 + $0x62] sm:$0x1] }
0x1476   :  { %v5346_v53 = vmul.f32 %v5334_v61, %v12384_v18  ;;  %v8128_v17 = vpop.eup %8127  ;;  %v6237_v61 = vld [vmem:[%s12235_s0 + $0x6a] sm:$0x1] }
0x1477   :  { %v5335_v1 = vmul.f32 0.5, %v5333_v32  ;;  %v5349_v8 = vmul.f32 %v8126_v39, %v5327_v38  ;;  %v8130_v63 = vpop.eup %8129  ;;  %v5342_v36 = vadd.f32 1.0, %v8128_v17  ;;  %v11377_v38 = vld [vmem:[%s12237_s4 + $0x228] ss:$16 sps:$4 sm:$0xff]   ;;  %v6238_v32 = vld [vmem:[%s12235_s0 + $0x72] sm:$0x1] }
0x1478   :  { %v11284_v49 = vadd.f32 %v5348_v7, %v5346_v53  ;;  %v5343_v14 = vadd.f32 1.0, %v8130_v63  ;;  %v11371_v53 = vld [vmem:[%s12237_s4 + $0x220] ss:$16 sps:$4 sm:$0xff]   ;;  %v6239_v39 = vld [vmem:[%s12235_s0 + $0x7a] sm:$0x1] }
0x1479   :  { %v5347_v43 = vmul.f32 %v5335_v1, %v12385_v21  ;;  %v5344_v23 = vmul.f32 0.5, %v5342_v36  ;;  %v11389_v17 = vld [vmem:[%s12237_s4 + $0x244] ss:$16 sps:$4 sm:$0xff]  }
0x147a   :  { %8131 = vtanh.f32 %v11284_v49  ;;  %v5345_v37 = vmul.f32 0.5, %v5343_v14 }
0x147b   :  { %v11288_v45 = vadd.f32 %v5349_v8, %v5347_v43 }
0x147d   :  { %8133 = vtanh.f32 %v11288_v45 }
0x1484   :  { %v8132_v46 = vpop.eup %8131 }
0x1485   :  { %v5354_v0 = vmul.f32 %v8132_v46, %v5344_v23  ;;  %v11402_v23 = vld [vmem:[%s12237_s4 + $0x24c] ss:$16 sps:$4 sm:$0xff]  }
0x1487   :  { %v8134_v58 = vpop.eup %8133 }
0x1488   :  { %v5355_v2 = vmul.f32 %v8134_v58, %v5345_v37 }
0x148a   :  { %v5356_v5 = vpack.c.bf16 %v5355_v2, %v5354_v0 }
0x148c   :  { %5399 = vmatmul.mubr.bf16.vlgmr.msra.gmra.mrb[76].mxu0 %v5356_v5  ;;  %v6241_v6 = vunpack.c.l.bf16 %v5356_v5  ;;  %v11297_v24 = vunpack.c.h.bf16 %v5356_v5  ;;  %5442 = vmatmul.mubr.bf16.vlgmr.msra.gmra.mrb[76].mxu1 %v5356_v5 }
0x148d   :  { %5507 = vmatpush1.bf16.msra.mxu0 %v11314_v29  ;;  %5550 = vmatpush1.bf16.msra.mxu1 %v11320_v51 }
0x148e   :  { %v6245_v20 = vrot.slane %v6241_v6, 1  ;;  %v6246_v33 = vrot.slane %v6241_v6, 2  ;;  %v6247_v25 = vrot.slane %v6241_v6, 3  ;;  %v6248_v59 = vrot.slane %v6241_v6, 4  ;;  %5508 = vmatprep.subr.bf16.mxu0 %v11338_v22  ;;  %5551 = vmatprep.subr.bf16.mxu1 %v11344_v15 }
0x148f   :  { %v6249_v54 = vrot.slane %v6241_v6, 5  ;;  %v6250_v30 = vrot.slane %v6241_v6, 6  ;;  %v6251_v60 = vrot.slane %v6241_v6, 7  ;;  %v6252_v31 = vrot.slane %v11297_v24, 1  ;;  %5538 = vmatprep.mubr.bf16.mxu0 %v12390_v13  ;;  %5581 = vmatprep.mubr.bf16.mxu1 %v12390_v13 }
0x1490   :  { %v6253_v35 = vrot.slane %v11297_v24, 2  ;;  %v6254_v47 = vrot.slane %v11297_v24, 3  ;;  %v6255_v40 = vrot.slane %v11297_v24, 4  ;;  %v6256_v28 = vrot.slane %v11297_v24, 5 }
0x1491   :  { %v6257_v12 = vrot.slane %v11297_v24, 6  ;;  %v6258_v26 = vrot.slane %v11297_v24, 7  ;;  %v6275_v7 = vadd.f32 %v6241_v6, %v6224_v41  ;;  %v6276_v18 = vadd.f32 %v6245_v20, %v6225_v57  ;;  %5509 = vmatpush1.bf16.msra.mxu0 %v11371_v53  ;;  %5552 = vmatpush1.bf16.msra.mxu1 %v11377_v38  ;;  %v11432_v57 = vld [vmem:[%s12237_s4 + $0x240] ss:$16 sps:$4 sm:$0xff]   ;;  %v11438_v6 = vld [vmem:[%s12237_s4 + $0x248] ss:$16 sps:$4 sm:$0xff]  }
0x1492   :  { %v6277_v1 = vadd.f32 %v6246_v33, %v6226_v4  ;;  %v6278_v8 = vadd.f32 %v6247_v25, %v6227_v19  ;;  %v6279_v21 = vadd.f32 %v6248_v59, %v6228_v9  ;;  %v6280_v43 = vadd.f32 %v6249_v54, %v6229_v16  ;;  %5510 = vmatprep.subr.bf16.mxu0 %v11389_v17  ;;  %v11462_v4 = vld [vmem:[%s12237_s4 + $0x26c] ss:$16 sps:$4 sm:$0xff]   ;;  %v11474_v19 = vld [vmem:[%s12237_s4 + $0x260] ss:$16 sps:$4 sm:$0xff]   ;;  %v11480_v9 = vld [vmem:[%s12237_s4 + $0x268] ss:$16 sps:$4 sm:$0xff]  }
0x1493   :  { %v6281_v63 = vadd.f32 %v6250_v30, %v6230_v27  ;;  %v6282_v36 = vadd.f32 %v6251_v60, %v6231_v44  ;;  %v6283_v14 = vadd.f32 %v11297_v24, %v6232_v52  ;;  %v6284_v46 = vadd.f32 %v6252_v31, %v6233_v48  ;;  %6291 = vst [vmem:[%s12241_s6 + $0x2] sm:$0x1] %v6275_v7  ;;  %v11456_v24 = vld [vmem:[%s12237_s4 + $0x264] ss:$16 sps:$4 sm:$0xff]   ;;  %v11492_v27 = vld [vmem:[%s12237_s4 + $0x28c] ss:$16 sps:$4 sm:$0xff]  }
0x1494   :  { %6292 = vst [vmem:[%s12241_s6 + $0xa] sm:$0x1] %v6276_v18  ;;  %5553 = vmatprep.subr.bf16.mxu1 %v11402_v23  ;;  %v6285_v37 = vadd.f32 %v6253_v35, %v6234_v56  ;;  %v6286_v58 = vadd.f32 %v6254_v47, %v6235_v50  ;;  %v6287_v0 = vadd.f32 %v6255_v40, %v6236_v42  ;;  %6293 = vst [vmem:[%s12241_s6 + $0x12] sm:$0x1] %v6277_v1  ;;  %v11486_v16 = vld [vmem:[%s12237_s4 + $0x284] ss:$16 sps:$4 sm:$0xff]  }
0x1495   :  { %v6288_v2 = vadd.f32 %v6256_v28, %v6237_v61  ;;  %6294 = vst [vmem:[%s12241_s6 + $0x1a] sm:$0x1] %v6278_v8  ;;  %6295 = vst [vmem:[%s12241_s6 + $0x22] sm:$0x1] %v6279_v21  ;;  %v6289_v5 = vadd.f32 %v6257_v12, %v6238_v32  ;;  %v6290_v41 = vadd.f32 %v6258_v26, %v6239_v39  ;;  %5511 = vmatpush1.bf16.msra.mxu0 %v11432_v57  ;;  %v11498_v44 = vld [vmem:[%s12237_s4 + $0x280] ss:$16 sps:$4 sm:$0xff]  }
0x1496   :  { %6296 = vst [vmem:[%s12241_s6 + $0x2a] sm:$0x1] %v6280_v43  ;;  %6297 = vst [vmem:[%s12241_s6 + $0x32] sm:$0x1] %v6281_v63  ;;  %5554 = vmatpush1.bf16.msra.mxu1 %v11438_v6  ;;  %5512 = vmatprep.subr.bf16.mxu0 %v11456_v24  ;;  %v11504_v52 = vld [vmem:[%s12237_s4 + $0x288] ss:$16 sps:$4 sm:$0xff]  }
0x1497   :  { %6298 = vst [vmem:[%s12241_s6 + $0x3a] sm:$0x1] %v6282_v36  ;;  %6299 = vst [vmem:[%s12241_s6 + $0x42] sm:$0x1] %v6283_v14  ;;  %5555 = vmatprep.subr.bf16.mxu1 %v11462_v4  ;;  %v11510_v48 = vld [vmem:[%s12237_s4 + $0x2a4] ss:$16 sps:$4 sm:$0xff]  }
0x1498   :  { %6300 = vst [vmem:[%s12241_s6 + $0x4a] sm:$0x1] %v6284_v46  ;;  %6301 = vst [vmem:[%s12241_s6 + $0x52] sm:$0x1] %v6285_v37  ;;  %v11516_v20 = vld [vmem:[%s12237_s4 + $0x2ac] ss:$16 sps:$4 sm:$0xff]  }
0x1499   :  { %6302 = vst [vmem:[%s12241_s6 + $0x5a] sm:$0x1] %v6286_v58  ;;  %6303 = vst [vmem:[%s12241_s6 + $0x62] sm:$0x1] %v6287_v0  ;;  %5513 = vmatpush1.bf16.msra.mxu0 %v11474_v19  ;;  %v11522_v33 = vld [vmem:[%s12237_s4 + $0x2a0] ss:$16 sps:$4 sm:$0xff]  }
0x149a   :  { %6304 = vst [vmem:[%s12241_s6 + $0x6a] sm:$0x1] %v6288_v2  ;;  %6305 = vst [vmem:[%s12241_s6 + $0x72] sm:$0x1] %v6289_v5  ;;  %5556 = vmatpush1.bf16.msra.mxu1 %v11480_v9  ;;  %5514 = vmatprep.subr.bf16.mxu0 %v11486_v16  ;;  %v11528_v25 = vld [vmem:[%s12237_s4 + $0x2a8] ss:$16 sps:$4 sm:$0xff]  }
0x149b   :  { %6306 = vst [vmem:[%s12241_s6 + $0x7a] sm:$0x1] %v6290_v41  ;;  %5557 = vmatprep.subr.bf16.mxu1 %v11492_v27  ;;  %v11534_v59 = vld [vmem:[%s12237_s4 + $0x2c4] ss:$16 sps:$4 sm:$0xff]   ;;  %v11540_v56 = vld [vmem:[%s12237_s4 + $0x2cc] ss:$16 sps:$4 sm:$0xff]  }
0x149c   :  { %v11546_v54 = vld [vmem:[%s12237_s4 + $0x2c0] ss:$16 sps:$4 sm:$0xff]   ;;  %v11552_v30 = vld [vmem:[%s12237_s4 + $0x2c8] ss:$16 sps:$4 sm:$0xff]   ;;  %v11558_v60 = vld [vmem:[%s12237_s4 + $0x2e4] ss:$16 sps:$4 sm:$0xff]  }
0x149d   :  { %5515 = vmatpush1.bf16.msra.mxu0 %v11498_v44  ;;  %v11564_v31 = vld [vmem:[%s12237_s4 + $0x2ec] ss:$16 sps:$4 sm:$0xff]   ;;  %v11570_v50 = vld [vmem:[%s12237_s4 + $0x2e0] ss:$16 sps:$4 sm:$0xff]   ;;  %v11576_v35 = vld [vmem:[%s12237_s4 + $0x2e8] ss:$16 sps:$4 sm:$0xff]  }
0x149e   :  { %5558 = vmatpush1.bf16.msra.mxu1 %v11504_v52  ;;  %5516 = vmatprep.subr.bf16.mxu0 %v11510_v48 }
0x149f   :  { %5559 = vmatprep.subr.bf16.mxu1 %v11516_v20 }
0x14a1   :  { %5517 = vmatpush1.bf16.msra.mxu0 %v11522_v33 }
0x14a2   :  { %5560 = vmatpush1.bf16.msra.mxu1 %v11528_v25  ;;  %5518 = vmatprep.subr.bf16.mxu0 %v11534_v59 }
0x14a3   :  { %5561 = vmatprep.subr.bf16.mxu1 %v11540_v56 }
0x14a5   :  { %5519 = vmatpush1.bf16.msra.mxu0 %v11546_v54 }
0x14a6   :  { %5562 = vmatpush1.bf16.msra.mxu1 %v11552_v30  ;;  %5520 = vmatprep.subr.bf16.mxu0 %v11558_v60 }
0x14a7   :  { %5563 = vmatprep.subr.bf16.mxu1 %v11564_v31 }
0x14a9   :  { %5521 = vmatpush1.bf16.msra.mxu0 %v11570_v50 }
0x14aa   :  { %5564 = vmatpush1.bf16.msra.mxu1 %v11576_v35  ;;  %5646 = vmatprep.subr.bf16.mxu0 %v11266_v3 }
0x14ab   :  { %5689 = vmatprep.subr.bf16.mxu1 %v11272_v10 }
0x155f   :  { %v5400_v47 = vpop.f32.mrb[76].mxu0  ;;  %v5443_v40 = vpop.f32.mrb[76].mxu1 }
0x1560   :  { %v7190_v28 = vadd.f32 %v5400_v47, %v12380_v62  ;;  %v5402_v42 = vpop.f32.mrb[77].mxu0  ;;  %v5445_v61 = vpop.f32.mrb[77].mxu1  ;;  %v7222_v43 = vadd.f32 %v5443_v40, %v12382_v11 }
0x1561   :  { %v7191_v12 = vadd.f32 %v5402_v42, %v12381_v55  ;;  %v5404_v26 = vpop.f32.mrb[78].mxu0  ;;  %v5447_v7 = vpop.f32.mrb[78].mxu1  ;;  %v7223_v46 = vadd.f32 %v5445_v61, %v12383_v34 }
0x1562   :  { %v5460_v18 = vmul.f32 0.5, %v7190_v28  ;;  %v7192_v32 = vadd.f32 %v5404_v26, %v12380_v62  ;;  %v5406_v39 = vpop.f32.mrb[79].mxu0  ;;  %v5449_v1 = vpop.f32.mrb[79].mxu1  ;;  %v7224_v14 = vadd.f32 %v5447_v7, %v12382_v11  ;;  %v6322_v11 = vld [vmem:[%s12235_s0 + $0x7b] sm:$0x1] }
0x1563   :  { %v5468_v8 = vmul.f32 0.5, %v7191_v12  ;;  %v7193_v21 = vadd.f32 %v5406_v39, %v12381_v55  ;;  %v7225_v37 = vadd.f32 %v5449_v1, %v12383_v34  ;;  %v5478_v5 = vmul.f32 0.5, %v7223_v46  ;;  %v6321_v34 = vld [vmem:[%s12235_s0 + $0x73] sm:$0x1] }
0x1564   :  { %8135 = vtanh.f32 %v5460_v18  ;;  %v5461_v63 = vmul.f32 0.5, %v7192_v32 }
0x1565   :  { %8137 = vtanh.f32 %v5468_v8  ;;  %v5469_v36 = vmul.f32 0.5, %v7193_v21  ;;  %v5479_v47 = vmul.f32 0.5, %v7225_v37 }
0x1566   :  { %8139 = vtanh.f32 %v5461_v63 }
0x1567   :  { %8141 = vtanh.f32 %v7222_v43 }
0x1568   :  { %8143 = vtanh.f32 %v5469_v36 }
0x1569   :  { %8145 = vtanh.f32 %v7224_v14 }
0x156a   :  { %8147 = vtanh.f32 %v5478_v5 }
0x156b   :  { %8149 = vtanh.f32 %v5479_v47 }
0x156e   :  { %v8136_v58 = vpop.eup %8135 }
0x156f   :  { %v8138_v0 = vpop.eup %8137  ;;  %v5464_v2 = vadd.f32 1.0, %v8136_v58 }
0x1570   :  { %v5472_v41 = vadd.f32 1.0, %v8138_v0  ;;  %v8140_v40 = vpop.eup %8139 }
0x1571   :  { %v5466_v28 = vmul.f32 0.5, %v5464_v2  ;;  %v8142_v42 = vpop.eup %8141  ;;  %v5465_v26 = vadd.f32 1.0, %v8140_v40 }
0x1572   :  { %v5474_v12 = vmul.f32 0.5, %v5472_v41  ;;  %v8144_v18 = vpop.eup %8143 }
0x1573   :  { %v5488_v7 = vmul.f32 %v8142_v42, %v5466_v28  ;;  %v5467_v61 = vmul.f32 0.5, %v5465_v26  ;;  %v5473_v39 = vadd.f32 1.0, %v8144_v18  ;;  %v8146_v1 = vpop.eup %8145  ;;  %v6308_v28 = vld [vmem:[%s12235_s0 + $0xb] sm:$0x1]  ;;  %v6309_v26 = vld [vmem:[%s12235_s0 + $0x13] sm:$0x1] }
0x1574   :  { %v5486_v32 = vmul.f32 %v5474_v12, %v11284_v49  ;;  %v8148_v14 = vpop.eup %8147  ;;  %v6310_v18 = vld [vmem:[%s12235_s0 + $0x1b] sm:$0x1] }
0x1575   :  { %v5475_v21 = vmul.f32 0.5, %v5473_v39  ;;  %v5489_v43 = vmul.f32 %v8146_v1, %v5467_v61  ;;  %v8150_v46 = vpop.eup %8149  ;;  %v5482_v37 = vadd.f32 1.0, %v8148_v14  ;;  %v6313_v61 = vld [vmem:[%s12235_s0 + $0x33] sm:$0x1]  ;;  %v6314_v39 = vld [vmem:[%s12235_s0 + $0x3b] sm:$0x1] }
0x1576   :  { %v11590_v8 = vadd.f32 %v5488_v7, %v5486_v32  ;;  %v5483_v49 = vadd.f32 1.0, %v8150_v46  ;;  %v6311_v7 = vld [vmem:[%s12235_s0 + $0x23] sm:$0x1]  ;;  %v6312_v32 = vld [vmem:[%s12235_s0 + $0x2b] sm:$0x1] }
0x1577   :  { %v5487_v63 = vmul.f32 %v5475_v21, %v11288_v45  ;;  %v5484_v0 = vmul.f32 0.5, %v5482_v37  ;;  %v6307_v45 = vld [vmem:[%s12235_s0 + $0x3] sm:$0x1]  ;;  %v6316_v21 = vld [vmem:[%s12235_s0 + $0x4b] sm:$0x1] }
0x1578   :  { %12391 = vst [vmem:[#allocation5_spill] sm:$0xff] %v11590_v8  ;;  %8151 = vtanh.f32 %v11590_v8  ;;  %v5485_v2 = vmul.f32 0.5, %v5483_v49  ;;  %v6315_v1 = vld [vmem:[%s12235_s0 + $0x43] sm:$0x1]  ;;  %v6317_v37 = vld [vmem:[%s12235_s0 + $0x53] sm:$0x1] }
0x1579   :  { %v11594_v36 = vadd.f32 %v5489_v43, %v5487_v63 }
0x157b   :  { %12392 = vst [vmem:[#allocation8_spill] sm:$0xff] %v11594_v36  ;;  %8153 = vtanh.f32 %v11594_v36 }
0x1582   :  { %v8152_v58 = vpop.eup %8151 }
0x1583   :  { %v5494_v41 = vmul.f32 %v8152_v58, %v5484_v0 }
0x1585   :  { %v8154_v5 = vpop.eup %8153 }
0x1586   :  { %v5495_v47 = vmul.f32 %v8154_v5, %v5485_v2  ;;  %v6318_v5 = vld [vmem:[%s12235_s0 + $0x5b] sm:$0x1] }
0x1588   :  { %v5496_v40 = vpack.c.bf16 %v5495_v47, %v5494_v41 }
0x158a   :  { %5539 = vmatmul.mubr.bf16.vlgmr.msra.gmra.mrb[80].mxu0 %v5496_v40  ;;  %v6324_v42 = vunpack.c.l.bf16 %v5496_v40  ;;  %v6325_v12 = vunpack.c.h.bf16 %v5496_v40  ;;  %5582 = vmatmul.mubr.bf16.vlgmr.msra.gmra.mrb[80].mxu1 %v5496_v40 }
0x158b   :  { %5647 = vmatpush1.bf16.msra.mxu0 %v11314_v29  ;;  %5690 = vmatpush1.bf16.msra.mxu1 %v11320_v51  ;;  %v6320_v51 = vld [vmem:[%s12235_s0 + $0x6b] sm:$0x1] }
0x158c   :  { %v6328_v43 = vrot.slane %v6324_v42, 1  ;;  %v6329_v63 = vrot.slane %v6324_v42, 2  ;;  %v6330_v14 = vrot.slane %v6324_v42, 3  ;;  %v6331_v46 = vrot.slane %v6324_v42, 4  ;;  %5648 = vmatprep.subr.bf16.mxu0 %v11338_v22  ;;  %5691 = vmatprep.subr.bf16.mxu1 %v11344_v15  ;;  %v6319_v22 = vld [vmem:[%s12235_s0 + $0x63] sm:$0x1] }
0x158d   :  { %v6332_v49 = vrot.slane %v6324_v42, 5  ;;  %v6333_v58 = vrot.slane %v6324_v42, 6  ;;  %v6334_v0 = vrot.slane %v6324_v42, 7  ;;  %v6335_v2 = vrot.slane %v6325_v12, 1  ;;  %5678 = vmatprep.mubr.bf16.mxu0 %v12390_v13  ;;  %5721 = vmatprep.mubr.bf16.mxu1 %v12390_v13 }
0x158e   :  { %v6336_v41 = vrot.slane %v6325_v12, 2  ;;  %v6337_v47 = vrot.slane %v6325_v12, 3  ;;  %v6338_v40 = vrot.slane %v6325_v12, 4  ;;  %v6339_v15 = vrot.slane %v6325_v12, 5 }
0x158f   :  { %v6340_v29 = vrot.slane %v6325_v12, 6  ;;  %v6341_v36 = vrot.slane %v6325_v12, 7  ;;  %v6358_v8 = vadd.f32 %v6324_v42, %v6307_v45  ;;  %v6359_v13 = vadd.f32 %v6328_v43, %v6308_v28  ;;  %5649 = vmatpush1.bf16.msra.mxu0 %v11371_v53  ;;  %5692 = vmatpush1.bf16.msra.mxu1 %v11377_v38 }
0x1590   :  { %v6360_v55 = vadd.f32 %v6329_v63, %v6309_v26  ;;  %v6361_v62 = vadd.f32 %v6330_v14, %v6310_v18  ;;  %v6362_v10 = vadd.f32 %v6331_v46, %v6311_v7  ;;  %v6363_v3 = vadd.f32 %v6332_v49, %v6312_v32  ;;  %5650 = vmatprep.subr.bf16.mxu0 %v11389_v17  ;;  %v12397_v46 = vld [vmem:[#allocation4_spill] sm:$0xff] }
0x1591   :  { %v6364_v45 = vadd.f32 %v6333_v58, %v6313_v61  ;;  %v6365_v28 = vadd.f32 %v6334_v0, %v6314_v39  ;;  %v6366_v42 = vadd.f32 %v6325_v12, %v6315_v1  ;;  %v6367_v43 = vadd.f32 %v6335_v2, %v6316_v21  ;;  %6374 = vst [vmem:[%s12241_s6 + $0x3] sm:$0x1] %v6358_v8  ;;  %v12398_v2 = vld [vmem:[#allocation6_spill] sm:$0xff] }
0x1592   :  { %6375 = vst [vmem:[%s12241_s6 + $0xb] sm:$0x1] %v6359_v13  ;;  %5693 = vmatprep.subr.bf16.mxu1 %v11402_v23  ;;  %v6368_v26 = vadd.f32 %v6336_v41, %v6317_v37  ;;  %v6369_v18 = vadd.f32 %v6337_v47, %v6318_v5  ;;  %v6370_v7 = vadd.f32 %v6338_v40, %v6319_v22  ;;  %6376 = vst [vmem:[%s12241_s6 + $0x13] sm:$0x1] %v6360_v55  ;;  %v12396_v22 = vld [vmem:[#allocation13_spill] sm:$0xff] }
0x1593   :  { %v6371_v32 = vadd.f32 %v6339_v15, %v6320_v51  ;;  %6377 = vst [vmem:[%s12241_s6 + $0x1b] sm:$0x1] %v6361_v62  ;;  %6378 = vst [vmem:[%s12241_s6 + $0x23] sm:$0x1] %v6362_v10  ;;  %v6372_v13 = vadd.f32 %v6340_v29, %v6321_v34  ;;  %v6373_v8 = vadd.f32 %v6341_v36, %v6322_v11  ;;  %5651 = vmatpush1.bf16.msra.mxu0 %v11432_v57  ;;  %v12394_v10 = vld [vmem:[#allocation15_spill] sm:$0xff]  ;;  %v12395_v11 = vld [vmem:[#allocation12_spill] sm:$0xff] }
0x1594   :  { %6379 = vst [vmem:[%s12241_s6 + $0x2b] sm:$0x1] %v6363_v3  ;;  %6380 = vst [vmem:[%s12241_s6 + $0x33] sm:$0x1] %v6364_v45  ;;  %5694 = vmatpush1.bf16.msra.mxu1 %v11438_v6  ;;  %5652 = vmatprep.subr.bf16.mxu0 %v11456_v24  ;;  %v12393_v3 = vld [vmem:[#allocation14_spill] sm:$0xff] }
0x1595   :  { %6381 = vst [vmem:[%s12241_s6 + $0x3b] sm:$0x1] %v6365_v28  ;;  %6382 = vst [vmem:[%s12241_s6 + $0x43] sm:$0x1] %v6366_v42  ;;  %5695 = vmatprep.subr.bf16.mxu1 %v11462_v4 }
0x1596   :  { %6383 = vst [vmem:[%s12241_s6 + $0x4b] sm:$0x1] %v6367_v43  ;;  %6384 = vst [vmem:[%s12241_s6 + $0x53] sm:$0x1] %v6368_v26 }
0x1597   :  { %6385 = vst [vmem:[%s12241_s6 + $0x5b] sm:$0x1] %v6369_v18  ;;  %6386 = vst [vmem:[%s12241_s6 + $0x63] sm:$0x1] %v6370_v7  ;;  %5653 = vmatpush1.bf16.msra.mxu0 %v11474_v19 }
0x1598   :  { %6387 = vst [vmem:[%s12241_s6 + $0x6b] sm:$0x1] %v6371_v32  ;;  %6388 = vst [vmem:[%s12241_s6 + $0x73] sm:$0x1] %v6372_v13  ;;  %5696 = vmatpush1.bf16.msra.mxu1 %v11480_v9  ;;  %5654 = vmatprep.subr.bf16.mxu0 %v11486_v16 }
0x1599   :  { %6389 = vst [vmem:[%s12241_s6 + $0x7b] sm:$0x1] %v6373_v8  ;;  %5697 = vmatprep.subr.bf16.mxu1 %v11492_v27 }
0x159b   :  { %5655 = vmatpush1.bf16.msra.mxu0 %v11498_v44 }
0x159c   :  { %5698 = vmatpush1.bf16.msra.mxu1 %v11504_v52  ;;  %5656 = vmatprep.subr.bf16.mxu0 %v11510_v48 }
0x159d   :  { %5699 = vmatprep.subr.bf16.mxu1 %v11516_v20 }
0x159f   :  { %5657 = vmatpush1.bf16.msra.mxu0 %v11522_v33 }
0x15a0   :  { %5700 = vmatpush1.bf16.msra.mxu1 %v11528_v25  ;;  %5658 = vmatprep.subr.bf16.mxu0 %v11534_v59 }
0x15a1   :  { %5701 = vmatprep.subr.bf16.mxu1 %v11540_v56 }
0x15a3   :  { %5659 = vmatpush1.bf16.msra.mxu0 %v11546_v54 }
0x15a4   :  { %5702 = vmatpush1.bf16.msra.mxu1 %v11552_v30  ;;  %5660 = vmatprep.subr.bf16.mxu0 %v11558_v60 }
0x15a5   :  { %5703 = vmatprep.subr.bf16.mxu1 %v11564_v31 }
0x15a7   :  { %5661 = vmatpush1.bf16.msra.mxu0 %v11570_v50 }
0x15a8   :  { %5704 = vmatpush1.bf16.msra.mxu1 %v11576_v35  ;;  %5786 = vmatprep.subr.bf16.mxu0 %v12393_v3 }
0x15a9   :  { %5829 = vmatprep.subr.bf16.mxu1 %v12394_v10 }
0x165d   :  { %v5540_v62 = vpop.f32.mrb[80].mxu0  ;;  %v5583_v55 = vpop.f32.mrb[80].mxu1 }
0x165e   :  { %v7194_v34 = vadd.f32 %v5540_v62, %v12395_v11  ;;  %v5542_v29 = vpop.f32.mrb[81].mxu0  ;;  %v5585_v51 = vpop.f32.mrb[81].mxu1  ;;  %v7226_v37 = vadd.f32 %v5583_v55, %v12397_v46  ;;  %v12399_v55 = vld [vmem:[#allocation5_spill] sm:$0xff] }
0x165f   :  { %v7195_v15 = vadd.f32 %v5542_v29, %v12396_v22  ;;  %v5544_v36 = vpop.f32.mrb[82].mxu0  ;;  %v5587_v12 = vpop.f32.mrb[82].mxu1  ;;  %v7227_v5 = vadd.f32 %v5585_v51, %v12398_v2 }
0x1660   :  { %v5600_v61 = vmul.f32 0.5, %v7194_v34  ;;  %v7196_v39 = vadd.f32 %v5544_v36, %v12395_v11  ;;  %v5546_v1 = vpop.f32.mrb[83].mxu0  ;;  %v5589_v21 = vpop.f32.mrb[83].mxu1  ;;  %v7228_v0 = vadd.f32 %v5587_v12, %v12397_v46  ;;  %v6405_v46 = vld [vmem:[%s12235_s0 + $0x7c] sm:$0x1] }
0x1661   :  { %v5608_v63 = vmul.f32 0.5, %v7195_v15  ;;  %v7197_v14 = vadd.f32 %v5546_v1, %v12396_v22  ;;  %v7229_v41 = vadd.f32 %v5589_v21, %v12398_v2  ;;  %v5618_v28 = vmul.f32 0.5, %v7227_v5  ;;  %v6404_v2 = vld [vmem:[%s12235_s0 + $0x74] sm:$0x1] }
0x1662   :  { %8155 = vtanh.f32 %v5600_v61  ;;  %v5601_v49 = vmul.f32 0.5, %v7196_v39  ;;  %v12401_v39 = vld [vmem:[#allocation8_spill] sm:$0xff] }
0x1663   :  { %8157 = vtanh.f32 %v5608_v63  ;;  %v5609_v58 = vmul.f32 0.5, %v7197_v14  ;;  %v5619_v43 = vmul.f32 0.5, %v7229_v41 }
0x1664   :  { %8159 = vtanh.f32 %v5601_v49 }
0x1665   :  { %8161 = vtanh.f32 %v7226_v37 }
0x1666   :  { %8163 = vtanh.f32 %v5609_v58 }
0x1667   :  { %8165 = vtanh.f32 %v7228_v0 }
0x1668   :  { %8167 = vtanh.f32 %v5618_v28  ;;  %v6390_v28 = vld [vmem:[%s12235_s0 + $0x4] sm:$0x1] }
0x1669   :  { %8169 = vtanh.f32 %v5619_v43 }
0x166c   :  { %v8156_v47 = vpop.eup %8155 }
0x166d   :  { %v8158_v40 = vpop.eup %8157  ;;  %v5604_v45 = vadd.f32 1.0, %v8156_v47 }
0x166e   :  { %v5612_v42 = vadd.f32 1.0, %v8158_v40  ;;  %v8160_v26 = vpop.eup %8159 }
0x166f   :  { %v5606_v18 = vmul.f32 0.5, %v5604_v45  ;;  %v8162_v7 = vpop.eup %8161  ;;  %v5605_v13 = vadd.f32 1.0, %v8160_v26 }
0x1670   :  { %v5614_v32 = vmul.f32 0.5, %v5612_v42  ;;  %v8164_v8 = vpop.eup %8163  ;;  %v6391_v42 = vld [vmem:[%s12235_s0 + $0xc] sm:$0x1] }
0x1671   :  { %v5628_v62 = vmul.f32 %v8162_v7, %v5606_v18  ;;  %v5607_v29 = vmul.f32 0.5, %v5605_v13  ;;  %v5613_v51 = vadd.f32 1.0, %v8164_v8  ;;  %v8166_v15 = vpop.eup %8165  ;;  %v6392_v18 = vld [vmem:[%s12235_s0 + $0x14] sm:$0x1]  ;;  %v6393_v7 = vld [vmem:[%s12235_s0 + $0x1c] sm:$0x1] }
0x1672   :  { %v5626_v34 = vmul.f32 %v5614_v32, %v12399_v55  ;;  %v8168_v63 = vpop.eup %8167  ;;  %v6394_v32 = vld [vmem:[%s12235_s0 + $0x24] sm:$0x1]  ;;  %v6395_v13 = vld [vmem:[%s12235_s0 + $0x2c] sm:$0x1]  ;;  %v12403_v8 = vld [vmem:[#allocation7_spill] sm:$0xff] }
0x1673   :  { %v5615_v12 = vmul.f32 0.5, %v5613_v51  ;;  %v5629_v61 = vmul.f32 %v8166_v15, %v5607_v29  ;;  %v8170_v14 = vpop.eup %8169  ;;  %v5622_v37 = vadd.f32 1.0, %v8168_v63  ;;  %v6396_v55 = vld [vmem:[%s12235_s0 + $0x34] sm:$0x1]  ;;  %v6398_v29 = vld [vmem:[%s12235_s0 + $0x44] sm:$0x1] }
0x1674   :  { %v11736_v36 = vadd.f32 %v5628_v62, %v5626_v34  ;;  %v5623_v49 = vadd.f32 1.0, %v8170_v14  ;;  %v12404_v62 = vld [vmem:[#allocation9_spill] sm:$0xff]  ;;  %v6397_v34 = vld [vmem:[%s12235_s0 + $0x3c] sm:$0x1]  ;;  %v6400_v14 = vld [vmem:[%s12235_s0 + $0x54] sm:$0x1] }
0x1675   :  { %v5627_v1 = vmul.f32 %v5615_v12, %v12401_v39  ;;  %v5624_v0 = vmul.f32 0.5, %v5622_v37  ;;  %v6399_v51 = vld [vmem:[%s12235_s0 + $0x4c] sm:$0x1]  ;;  %v12406_v63 = vld [vmem:[#allocation11_spill] sm:$0xff] }
0x1676   :  { %12400 = vst [vmem:[#allocation5_spill] sm:$0xff] %v11736_v36  ;;  %8171 = vtanh.f32 %v11736_v36  ;;  %v5625_v5 = vmul.f32 0.5, %v5623_v49 }
0x1677   :  { %v11740_v21 = vadd.f32 %v5629_v61, %v5627_v1  ;;  %v12405_v1 = vld [vmem:[#allocation10_spill] sm:$0xff] }
0x1679   :  { %12402 = vst [vmem:[#allocation8_spill] sm:$0xff] %v11740_v21  ;;  %8173 = vtanh.f32 %v11740_v21 }
0x1680   :  { %v8172_v58 = vpop.eup %8171 }
0x1681   :  { %v5634_v47 = vmul.f32 %v8172_v58, %v5624_v0 }
0x1683   :  { %v8174_v41 = vpop.eup %8173 }
0x1684   :  { %v5635_v40 = vmul.f32 %v8174_v41, %v5625_v5  ;;  %v12407_v5 = vmov 0   ;;  %v6401_v41 = vld [vmem:[%s12235_s0 + $0x5c] sm:$0x1] }
0x1686   :  { %v5636_v45 = vpack.c.bf16 %v5635_v40, %v5634_v47 }
0x1688   :  { %5679 = vmatmul.mubr.bf16.vlgmr.msra.gmra.mrb[84].mxu0 %v5636_v45  ;;  %v6407_v43 = vunpack.c.l.bf16 %v5636_v45  ;;  %v6408_v26 = vunpack.c.h.bf16 %v5636_v45  ;;  %5722 = vmatmul.mubr.bf16.vlgmr.msra.gmra.mrb[84].mxu1 %v5636_v45 }
0x1689   :  { %5787 = vmatpush1.bf16.msra.mxu0 %v12403_v8  ;;  %5830 = vmatpush1.bf16.msra.mxu1 %v12404_v62  ;;  %v6403_v62 = vld [vmem:[%s12235_s0 + $0x6c] sm:$0x1] }
0x168a   :  { %v6411_v15 = vrot.slane %v6407_v43, 1  ;;  %v6412_v12 = vrot.slane %v6407_v43, 2  ;;  %v6413_v61 = vrot.slane %v6407_v43, 3  ;;  %v6414_v39 = vrot.slane %v6407_v43, 4  ;;  %5788 = vmatprep.subr.bf16.mxu0 %v12405_v1  ;;  %5831 = vmatprep.subr.bf16.mxu1 %v12406_v63  ;;  %v6402_v1 = vld [vmem:[%s12235_s0 + $0x64] sm:$0x1] }
0x168b   :  { %v6415_v37 = vrot.slane %v6407_v43, 5  ;;  %v6416_v49 = vrot.slane %v6407_v43, 6  ;;  %v6417_v58 = vrot.slane %v6407_v43, 7  ;;  %v6418_v0 = vrot.slane %v6408_v26, 1  ;;  %5818 = vmatprep.mubr.bf16.mxu0 %v12407_v5  ;;  %5861 = vmatprep.mubr.bf16.mxu1 %v12407_v5 }
0x168c   :  { %v6419_v47 = vrot.slane %v6408_v26, 2  ;;  %v6420_v40 = vrot.slane %v6408_v26, 3  ;;  %v6421_v45 = vrot.slane %v6408_v26, 4  ;;  %v6422_v63 = vrot.slane %v6408_v26, 5 }
0x168d   :  { %v6423_v8 = vrot.slane %v6408_v26, 6  ;;  %v6424_v21 = vrot.slane %v6408_v26, 7  ;;  %v6441_v36 = vadd.f32 %v6407_v43, %v6390_v28  ;;  %v6442_v5 = vadd.f32 %v6411_v15, %v6391_v42  ;;  %5789 = vmatpush1.bf16.msra.mxu0 %v11371_v53  ;;  %5832 = vmatpush1.bf16.msra.mxu1 %v11377_v38 }
0x168e   :  { %v6443_v22 = vadd.f32 %v6412_v12, %v6392_v18  ;;  %v6444_v11 = vadd.f32 %v6413_v61, %v6393_v7  ;;  %v6445_v10 = vadd.f32 %v6414_v39, %v6394_v32  ;;  %v6446_v3 = vadd.f32 %v6415_v37, %v6395_v13  ;;  %5790 = vmatprep.subr.bf16.mxu0 %v11389_v17 }
0x168f   :  { %v6447_v28 = vadd.f32 %v6416_v49, %v6396_v55  ;;  %v6448_v42 = vadd.f32 %v6417_v58, %v6397_v34  ;;  %v6449_v43 = vadd.f32 %v6408_v26, %v6398_v29  ;;  %v6450_v15 = vadd.f32 %v6418_v0, %v6399_v51  ;;  %6457 = vst [vmem:[%s12241_s6 + $0x4] sm:$0x1] %v6441_v36 }
0x1690   :  { %6458 = vst [vmem:[%s12241_s6 + $0xc] sm:$0x1] %v6442_v5  ;;  %5833 = vmatprep.subr.bf16.mxu1 %v11402_v23  ;;  %v6451_v18 = vadd.f32 %v6419_v47, %v6400_v14  ;;  %v6452_v7 = vadd.f32 %v6420_v40, %v6401_v41  ;;  %v6453_v32 = vadd.f32 %v6421_v45, %v6402_v1  ;;  %6459 = vst [vmem:[%s12241_s6 + $0x14] sm:$0x1] %v6443_v22  ;;  %v12412_v14 = vld [vmem:[#allocation4_spill] sm:$0xff]  ;;  %v12413_v5 = vld [vmem:[#allocation6_spill] sm:$0xff] }
0x1691   :  { %v6454_v13 = vadd.f32 %v6422_v63, %v6403_v62  ;;  %6460 = vst [vmem:[%s12241_s6 + $0x1c] sm:$0x1] %v6444_v11  ;;  %6461 = vst [vmem:[%s12241_s6 + $0x24] sm:$0x1] %v6445_v10  ;;  %v6455_v36 = vadd.f32 %v6423_v8, %v6404_v2  ;;  %v6456_v26 = vadd.f32 %v6424_v21, %v6405_v46  ;;  %5791 = vmatpush1.bf16.msra.mxu0 %v11432_v57  ;;  %v12409_v10 = vld [vmem:[#allocation15_spill] sm:$0xff]  ;;  %v12410_v46 = vld [vmem:[#allocation12_spill] sm:$0xff] }
0x1692   :  { %6462 = vst [vmem:[%s12241_s6 + $0x2c] sm:$0x1] %v6446_v3  ;;  %6463 = vst [vmem:[%s12241_s6 + $0x34] sm:$0x1] %v6447_v28  ;;  %5834 = vmatpush1.bf16.msra.mxu1 %v11438_v6  ;;  %5792 = vmatprep.subr.bf16.mxu0 %v11456_v24  ;;  %v12408_v3 = vld [vmem:[#allocation14_spill] sm:$0xff]  ;;  %v12411_v62 = vld [vmem:[#allocation13_spill] sm:$0xff] }
0x1693   :  { %6464 = vst [vmem:[%s12241_s6 + $0x3c] sm:$0x1] %v6448_v42  ;;  %6465 = vst [vmem:[%s12241_s6 + $0x44] sm:$0x1] %v6449_v43  ;;  %5835 = vmatprep.subr.bf16.mxu1 %v11462_v4 }
0x1694   :  { %6466 = vst [vmem:[%s12241_s6 + $0x4c] sm:$0x1] %v6450_v15  ;;  %6467 = vst [vmem:[%s12241_s6 + $0x54] sm:$0x1] %v6451_v18 }
0x1695   :  { %6468 = vst [vmem:[%s12241_s6 + $0x5c] sm:$0x1] %v6452_v7  ;;  %6469 = vst [vmem:[%s12241_s6 + $0x64] sm:$0x1] %v6453_v32  ;;  %5793 = vmatpush1.bf16.msra.mxu0 %v11474_v19 }
0x1696   :  { %6470 = vst [vmem:[%s12241_s6 + $0x6c] sm:$0x1] %v6454_v13  ;;  %6471 = vst [vmem:[%s12241_s6 + $0x74] sm:$0x1] %v6455_v36  ;;  %5836 = vmatpush1.bf16.msra.mxu1 %v11480_v9  ;;  %5794 = vmatprep.subr.bf16.mxu0 %v11486_v16 }
0x1697   :  { %6472 = vst [vmem:[%s12241_s6 + $0x7c] sm:$0x1] %v6456_v26  ;;  %5837 = vmatprep.subr.bf16.mxu1 %v11492_v27 }
0x1699   :  { %5795 = vmatpush1.bf16.msra.mxu0 %v11498_v44 }
0x169a   :  { %5838 = vmatpush1.bf16.msra.mxu1 %v11504_v52  ;;  %5796 = vmatprep.subr.bf16.mxu0 %v11510_v48 }
0x169b   :  { %5839 = vmatprep.subr.bf16.mxu1 %v11516_v20 }
0x169d   :  { %5797 = vmatpush1.bf16.msra.mxu0 %v11522_v33 }
0x169e   :  { %5840 = vmatpush1.bf16.msra.mxu1 %v11528_v25  ;;  %5798 = vmatprep.subr.bf16.mxu0 %v11534_v59 }
0x169f   :  { %5841 = vmatprep.subr.bf16.mxu1 %v11540_v56 }
0x16a1   :  { %5799 = vmatpush1.bf16.msra.mxu0 %v11546_v54 }
0x16a2   :  { %5842 = vmatpush1.bf16.msra.mxu1 %v11552_v30  ;;  %5800 = vmatprep.subr.bf16.mxu0 %v11558_v60 }
0x16a3   :  { %5843 = vmatprep.subr.bf16.mxu1 %v11564_v31 }
0x16a5   :  { %5801 = vmatpush1.bf16.msra.mxu0 %v11570_v50 }
0x16a6   :  { %5844 = vmatpush1.bf16.msra.mxu1 %v11576_v35  ;;  %5926 = vmatprep.subr.bf16.mxu0 %v12408_v3 }
0x16a7   :  { %5969 = vmatprep.subr.bf16.mxu1 %v12409_v10  ;;  %v12414_v10 = vld [vmem:[#allocation5_spill] sm:$0xff] }
0x175b   :  { %v5680_v11 = vpop.f32.mrb[84].mxu0  ;;  %v5723_v22 = vpop.f32.mrb[84].mxu1 }
0x175c   :  { %v7198_v2 = vadd.f32 %v5680_v11, %v12410_v46  ;;  %v5682_v21 = vpop.f32.mrb[85].mxu0  ;;  %v5725_v8 = vpop.f32.mrb[85].mxu1  ;;  %v7230_v37 = vadd.f32 %v5723_v22, %v12412_v14 }
0x175d   :  { %v7199_v55 = vadd.f32 %v5682_v21, %v12411_v62  ;;  %v5684_v34 = vpop.f32.mrb[86].mxu0  ;;  %v5727_v29 = vpop.f32.mrb[86].mxu1  ;;  %v7231_v41 = vadd.f32 %v5725_v8, %v12413_v5 }
0x175e   :  { %v5740_v51 = vmul.f32 0.5, %v7198_v2  ;;  %v7200_v12 = vadd.f32 %v5684_v34, %v12410_v46  ;;  %v5686_v61 = vpop.f32.mrb[87].mxu0  ;;  %v5729_v39 = vpop.f32.mrb[87].mxu1  ;;  %v7232_v0 = vadd.f32 %v5727_v29, %v12412_v14  ;;  %v12416_v29 = vld [vmem:[#allocation8_spill] sm:$0xff] }
0x175f   :  { %v5748_v1 = vmul.f32 0.5, %v7199_v55  ;;  %v7201_v63 = vadd.f32 %v5686_v61, %v12411_v62  ;;  %v7233_v47 = vadd.f32 %v5729_v39, %v12413_v5  ;;  %v5758_v42 = vmul.f32 0.5, %v7231_v41 }
0x1760   :  { %8175 = vtanh.f32 %v5740_v51  ;;  %v5741_v49 = vmul.f32 0.5, %v7200_v12 }
0x1761   :  { %8177 = vtanh.f32 %v5748_v1  ;;  %v5749_v58 = vmul.f32 0.5, %v7201_v63  ;;  %v5759_v15 = vmul.f32 0.5, %v7233_v47 }
0x1762   :  { %8179 = vtanh.f32 %v5741_v49 }
0x1763   :  { %8181 = vtanh.f32 %v7230_v37 }
0x1764   :  { %8183 = vtanh.f32 %v5749_v58 }
0x1765   :  { %8185 = vtanh.f32 %v7232_v0 }
0x1766   :  { %8187 = vtanh.f32 %v5758_v42 }
0x1767   :  { %8189 = vtanh.f32 %v5759_v15  ;;  %v6475_v15 = vld [vmem:[%s12235_s0 + $0x15] sm:$0x1] }
0x176a   :  { %v8176_v40 = vpop.eup %8175 }
0x176b   :  { %v8178_v45 = vpop.eup %8177  ;;  %v5744_v28 = vadd.f32 1.0, %v8176_v40 }
0x176c   :  { %v5752_v43 = vadd.f32 1.0, %v8178_v45  ;;  %v8180_v18 = vpop.eup %8179  ;;  %v6473_v45 = vld [vmem:[%s12235_s0 + $0x5] sm:$0x1] }
0x176d   :  { %v5746_v7 = vmul.f32 0.5, %v5744_v28  ;;  %v8182_v32 = vpop.eup %8181  ;;  %v5745_v36 = vadd.f32 1.0, %v8180_v18  ;;  %v6474_v28 = vld [vmem:[%s12235_s0 + $0xd] sm:$0x1]  ;;  %v6476_v18 = vld [vmem:[%s12235_s0 + $0x1d] sm:$0x1] }
0x176e   :  { %v5754_v13 = vmul.f32 0.5, %v5752_v43  ;;  %v8184_v26 = vpop.eup %8183 }
0x176f   :  { %v5768_v3 = vmul.f32 %v8182_v32, %v5746_v7  ;;  %v5747_v22 = vmul.f32 0.5, %v5745_v36  ;;  %v5753_v2 = vadd.f32 1.0, %v8184_v26  ;;  %v8186_v21 = vpop.eup %8185  ;;  %v6477_v7 = vld [vmem:[%s12235_s0 + $0x25] sm:$0x1]  ;;  %v6478_v32 = vld [vmem:[%s12235_s0 + $0x2d] sm:$0x1] }
0x1770   :  { %v5766_v11 = vmul.f32 %v5754_v13, %v12414_v10  ;;  %v8188_v61 = vpop.eup %8187  ;;  %v12418_v13 = vld [vmem:[#allocation7_spill] sm:$0xff]  ;;  %v12419_v36 = vld [vmem:[#allocation9_spill] sm:$0xff]  ;;  %v6479_v26 = vld [vmem:[%s12235_s0 + $0x35] sm:$0x1] }
0x1771   :  { %v5755_v55 = vmul.f32 0.5, %v5753_v2  ;;  %v5769_v34 = vmul.f32 %v8186_v21, %v5747_v22  ;;  %v8190_v39 = vpop.eup %8189  ;;  %v5762_v1 = vadd.f32 1.0, %v8188_v61  ;;  %v6481_v10 = vld [vmem:[%s12235_s0 + $0x45] sm:$0x1] }
0x1772   :  { %v11882_v8 = vadd.f32 %v5768_v3, %v5766_v11  ;;  %v5763_v63 = vadd.f32 1.0, %v8190_v39  ;;  %v6480_v3 = vld [vmem:[%s12235_s0 + $0x3d] sm:$0x1]  ;;  %v6482_v11 = vld [vmem:[%s12235_s0 + $0x4d] sm:$0x1] }
0x1773   :  { %v5767_v51 = vmul.f32 %v5755_v55, %v12416_v29  ;;  %v5764_v49 = vmul.f32 0.5, %v5762_v1  ;;  %v12421_v29 = vld [vmem:[#allocation11_spill] sm:$0xff] }
0x1774   :  { %12415 = vst [vmem:[#allocation14_spill] sm:$0xff] %v11882_v8  ;;  %8191 = vtanh.f32 %v11882_v8  ;;  %v5765_v58 = vmul.f32 0.5, %v5763_v63  ;;  %v6488_v8 = vld [vmem:[%s12235_s0 + $0x7d] sm:$0x1] }
0x1775   :  { %v11886_v12 = vadd.f32 %v5769_v34, %v5767_v51  ;;  %v12420_v34 = vld [vmem:[#allocation10_spill] sm:$0xff] }
0x1776   :  { %v6483_v51 = vld [vmem:[%s12235_s0 + $0x55] sm:$0x1] }
0x1777   :  { %12417 = vst [vmem:[#allocation15_spill] sm:$0xff] %v11886_v12  ;;  %8193 = vtanh.f32 %v11886_v12  ;;  %v6487_v12 = vld [vmem:[%s12235_s0 + $0x75] sm:$0x1] }
0x177e   :  { %v8192_v37 = vpop.eup %8191 }
0x177f   :  { %v5774_v41 = vmul.f32 %v8192_v37, %v5764_v49  ;;  %v12422_v37 = vmov 0   ;;  %v6484_v49 = vld [vmem:[%s12235_s0 + $0x5d] sm:$0x1] }
0x1781   :  { %v8194_v0 = vpop.eup %8193 }
0x1782   :  { %v5775_v47 = vmul.f32 %v8194_v0, %v5765_v58 }
0x1784   :  { %v5776_v40 = vpack.c.bf16 %v5775_v47, %v5774_v41 }
0x1786   :  { %5819 = vmatmul.mubr.bf16.vlgmr.msra.gmra.mrb[88].mxu0 %v5776_v40  ;;  %v6490_v42 = vunpack.c.l.bf16 %v5776_v40  ;;  %v6491_v43 = vunpack.c.h.bf16 %v5776_v40  ;;  %5862 = vmatmul.mubr.bf16.vlgmr.msra.gmra.mrb[88].mxu1 %v5776_v40  ;;  %v6485_v40 = vld [vmem:[%s12235_s0 + $0x65] sm:$0x1] }
0x1787   :  { %5927 = vmatpush1.bf16.msra.mxu0 %v12418_v13  ;;  %5970 = vmatpush1.bf16.msra.mxu1 %v12419_v36  ;;  %v6486_v13 = vld [vmem:[%s12235_s0 + $0x6d] sm:$0x1] }
0x1788   :  { %v6494_v22 = vrot.slane %v6490_v42, 1  ;;  %v6495_v2 = vrot.slane %v6490_v42, 2  ;;  %v6496_v21 = vrot.slane %v6490_v42, 3  ;;  %v6497_v55 = vrot.slane %v6490_v42, 4  ;;  %5928 = vmatprep.subr.bf16.mxu0 %v12420_v34  ;;  %5971 = vmatprep.subr.bf16.mxu1 %v12421_v29 }
0x1789   :  { %v6498_v61 = vrot.slane %v6490_v42, 5  ;;  %v6499_v39 = vrot.slane %v6490_v42, 6  ;;  %v6500_v1 = vrot.slane %v6490_v42, 7  ;;  %v6501_v63 = vrot.slane %v6491_v43, 1  ;;  %5958 = vmatprep.mubr.bf16.mxu0 %v12422_v37  ;;  %6001 = vmatprep.mubr.bf16.mxu1 %v12422_v37 }
0x178a   :  { %v6502_v58 = vrot.slane %v6491_v43, 2  ;;  %v6503_v0 = vrot.slane %v6491_v43, 3  ;;  %v6504_v41 = vrot.slane %v6491_v43, 4  ;;  %v6505_v47 = vrot.slane %v6491_v43, 5 }
0x178b   :  { %v6506_v36 = vrot.slane %v6491_v43, 6  ;;  %v6507_v34 = vrot.slane %v6491_v43, 7  ;;  %v6524_v29 = vadd.f32 %v6490_v42, %v6473_v45  ;;  %v6525_v37 = vadd.f32 %v6494_v22, %v6474_v28  ;;  %5929 = vmatpush1.bf16.msra.mxu0 %v11371_v53  ;;  %5972 = vmatpush1.bf16.msra.mxu1 %v11377_v38 }
0x178c   :  { %v6526_v5 = vadd.f32 %v6495_v2, %v6475_v15  ;;  %v6527_v14 = vadd.f32 %v6496_v21, %v6476_v18  ;;  %v6528_v62 = vadd.f32 %v6497_v55, %v6477_v7  ;;  %v6529_v46 = vadd.f32 %v6498_v61, %v6478_v32  ;;  %5930 = vmatprep.subr.bf16.mxu0 %v11389_v17  ;;  %v12427_v55 = vld [vmem:[#allocation14_spill] sm:$0xff] }
0x178d   :  { %v6530_v45 = vadd.f32 %v6499_v39, %v6479_v26  ;;  %v6531_v28 = vadd.f32 %v6500_v1, %v6480_v3  ;;  %v6532_v42 = vadd.f32 %v6491_v43, %v6481_v10  ;;  %v6533_v53 = vadd.f32 %v6501_v63, %v6482_v11  ;;  %6540 = vst [vmem:[%s12241_s6 + $0x5] sm:$0x1] %v6524_v29 }
0x178e   :  { %6541 = vst [vmem:[%s12241_s6 + $0xd] sm:$0x1] %v6525_v37  ;;  %5973 = vmatprep.subr.bf16.mxu1 %v11402_v23  ;;  %v6534_v38 = vadd.f32 %v6502_v58, %v6483_v51  ;;  %v6535_v15 = vadd.f32 %v6503_v0, %v6484_v49  ;;  %v6536_v18 = vadd.f32 %v6504_v41, %v6485_v40  ;;  %6542 = vst [vmem:[%s12241_s6 + $0x15] sm:$0x1] %v6526_v5  ;;  %v12428_v0 = vld [vmem:[#allocation15_spill] sm:$0xff] }
0x178f   :  { %v6537_v7 = vadd.f32 %v6505_v47, %v6486_v13  ;;  %6543 = vst [vmem:[%s12241_s6 + $0x1d] sm:$0x1] %v6527_v14  ;;  %6544 = vst [vmem:[%s12241_s6 + $0x25] sm:$0x1] %v6528_v62  ;;  %v6538_v17 = vadd.f32 %v6506_v36, %v6487_v12  ;;  %v6539_v23 = vadd.f32 %v6507_v34, %v6488_v8  ;;  %5931 = vmatpush1.bf16.msra.mxu0 %v11432_v57 }
0x1790   :  { %6545 = vst [vmem:[%s12241_s6 + $0x2d] sm:$0x1] %v6529_v46  ;;  %6546 = vst [vmem:[%s12241_s6 + $0x35] sm:$0x1] %v6530_v45  ;;  %5974 = vmatpush1.bf16.msra.mxu1 %v11438_v6  ;;  %5932 = vmatprep.subr.bf16.mxu0 %v11456_v24  ;;  %v12423_v24 = vld [vmem:[#allocation12_spill] sm:$0xff] }
0x1791   :  { %6547 = vst [vmem:[%s12241_s6 + $0x3d] sm:$0x1] %v6531_v28  ;;  %6548 = vst [vmem:[%s12241_s6 + $0x45] sm:$0x1] %v6532_v42  ;;  %5975 = vmatprep.subr.bf16.mxu1 %v11462_v4 }
0x1792   :  { %6549 = vst [vmem:[%s12241_s6 + $0x4d] sm:$0x1] %v6533_v53  ;;  %6550 = vst [vmem:[%s12241_s6 + $0x55] sm:$0x1] %v6534_v38 }
0x1793   :  { %6551 = vst [vmem:[%s12241_s6 + $0x5d] sm:$0x1] %v6535_v15  ;;  %6552 = vst [vmem:[%s12241_s6 + $0x65] sm:$0x1] %v6536_v18  ;;  %5933 = vmatpush1.bf16.msra.mxu0 %v11474_v19  ;;  %v6556_v15 = vld [vmem:[%s12235_s0 + $0x6] sm:$0x1] }
0x1794   :  { %6553 = vst [vmem:[%s12241_s6 + $0x6d] sm:$0x1] %v6537_v7  ;;  %6554 = vst [vmem:[%s12241_s6 + $0x75] sm:$0x1] %v6538_v17  ;;  %5976 = vmatpush1.bf16.msra.mxu1 %v11480_v9  ;;  %5934 = vmatprep.subr.bf16.mxu0 %v11486_v16  ;;  %v12424_v16 = vld [vmem:[#allocation13_spill] sm:$0xff] }
0x1795   :  { %6555 = vst [vmem:[%s12241_s6 + $0x7d] sm:$0x1] %v6539_v23  ;;  %5977 = vmatprep.subr.bf16.mxu1 %v11492_v27  ;;  %v6557_v18 = vld [vmem:[%s12235_s0 + $0xe] sm:$0x1]  ;;  %v6558_v23 = vld [vmem:[%s12235_s0 + $0x16] sm:$0x1] }
0x1797   :  { %5935 = vmatpush1.bf16.msra.mxu0 %v11498_v44 }
0x1798   :  { %5978 = vmatpush1.bf16.msra.mxu1 %v11504_v52  ;;  %5936 = vmatprep.subr.bf16.mxu0 %v11510_v48 }
0x1799   :  { %5979 = vmatprep.subr.bf16.mxu1 %v11516_v20 }
0x179b   :  { %5937 = vmatpush1.bf16.msra.mxu0 %v11522_v33 }
0x179c   :  { %5980 = vmatpush1.bf16.msra.mxu1 %v11528_v25  ;;  %5938 = vmatprep.subr.bf16.mxu0 %v11534_v59 }
0x179d   :  { %5981 = vmatprep.subr.bf16.mxu1 %v11540_v56 }
0x179f   :  { %5939 = vmatpush1.bf16.msra.mxu0 %v11546_v54  ;;  %v12425_v54 = vld [vmem:[#allocation4_spill] sm:$0xff] }
0x17a0   :  { %5982 = vmatpush1.bf16.msra.mxu1 %v11552_v30  ;;  %5940 = vmatprep.subr.bf16.mxu0 %v11558_v60 }
0x17a1   :  { %5983 = vmatprep.subr.bf16.mxu1 %v11564_v31 }
0x17a3   :  { %5941 = vmatpush1.bf16.msra.mxu0 %v11570_v50 }
0x17a4   :  { %5984 = vmatpush1.bf16.msra.mxu1 %v11576_v35  ;;  %v12426_v35 = vld [vmem:[#allocation6_spill] sm:$0xff] }
0x1859   :  { %v5820_v57 = vpop.f32.mrb[88].mxu0  ;;  %v5863_v6 = vpop.f32.mrb[88].mxu1 }
0x185a   :  { %v7202_v4 = vadd.f32 %v5820_v57, %v12423_v24  ;;  %v5822_v19 = vpop.f32.mrb[89].mxu0  ;;  %v5865_v9 = vpop.f32.mrb[89].mxu1  ;;  %v7234_v30 = vadd.f32 %v5863_v6, %v12425_v54  ;;  %v6559_v57 = vld [vmem:[%s12235_s0 + $0x1e] sm:$0x1]  ;;  %v6560_v6 = vld [vmem:[%s12235_s0 + $0x26] sm:$0x1] }
0x185b   :  { %v7203_v27 = vadd.f32 %v5822_v19, %v12424_v16  ;;  %v5824_v44 = vpop.f32.mrb[90].mxu0  ;;  %v5867_v52 = vpop.f32.mrb[90].mxu1  ;;  %v7235_v46 = vadd.f32 %v5865_v9, %v12426_v35  ;;  %v6562_v19 = vld [vmem:[%s12235_s0 + $0x36] sm:$0x1]  ;;  %v6563_v9 = vld [vmem:[%s12235_s0 + $0x3e] sm:$0x1] }
0x185c   :  { %v5880_v48 = vmul.f32 0.5, %v7202_v4  ;;  %v7204_v20 = vadd.f32 %v5824_v44, %v12423_v24  ;;  %v5826_v33 = vpop.f32.mrb[91].mxu0  ;;  %v5869_v25 = vpop.f32.mrb[91].mxu1  ;;  %v7236_v50 = vadd.f32 %v5867_v52, %v12425_v54  ;;  %v6561_v4 = vld [vmem:[%s12235_s0 + $0x2e] sm:$0x1] }
0x185d   :  { %v5888_v59 = vmul.f32 0.5, %v7203_v27  ;;  %v7205_v56 = vadd.f32 %v5826_v33, %v12424_v16  ;;  %v7237_v62 = vadd.f32 %v5869_v25, %v12426_v35  ;;  %v5898_v12 = vmul.f32 0.5, %v7235_v46  ;;  %v6564_v27 = vld [vmem:[%s12235_s0 + $0x46] sm:$0x1]  ;;  %v6565_v44 = vld [vmem:[%s12235_s0 + $0x4e] sm:$0x1] }
0x185e   :  { %8195 = vtanh.f32 %v5880_v48  ;;  %v5881_v60 = vmul.f32 0.5, %v7204_v20  ;;  %v6566_v25 = vld [vmem:[%s12235_s0 + $0x56] sm:$0x1] }
0x185f   :  { %8197 = vtanh.f32 %v5888_v59  ;;  %v5889_v31 = vmul.f32 0.5, %v7205_v56  ;;  %v5899_v32 = vmul.f32 0.5, %v7237_v62 }
0x1860   :  { %8199 = vtanh.f32 %v5881_v60 }
0x1861   :  { %8201 = vtanh.f32 %v7234_v30 }
0x1862   :  { %8203 = vtanh.f32 %v5889_v31  ;;  %v6567_v31 = vld [vmem:[%s12235_s0 + $0x5e] sm:$0x1] }
0x1863   :  { %8205 = vtanh.f32 %v7236_v50 }
0x1864   :  { %8207 = vtanh.f32 %v5898_v12 }
0x1865   :  { %8209 = vtanh.f32 %v5899_v32 }
0x1868   :  { %v8196_v14 = vpop.eup %8195 }
0x1869   :  { %v8198_v5 = vpop.eup %8197  ;;  %v5884_v8 = vadd.f32 1.0, %v8196_v14 }
0x186a   :  { %v5892_v43 = vadd.f32 1.0, %v8198_v5  ;;  %v8200_v26 = vpop.eup %8199  ;;  %v6568_v5 = vld [vmem:[%s12235_s0 + $0x66] sm:$0x1] }
0x186b   :  { %v5886_v3 = vmul.f32 0.5, %v5884_v8  ;;  %v8202_v10 = vpop.eup %8201  ;;  %v5885_v22 = vadd.f32 1.0, %v8200_v26  ;;  %v6569_v8 = vld [vmem:[%s12235_s0 + $0x6e] sm:$0x1] }
0x186c   :  { %v5894_v11 = vmul.f32 0.5, %v5892_v43  ;;  %v8204_v2 = vpop.eup %8203 }
0x186d   :  { %v5908_v21 = vmul.f32 %v8202_v10, %v5886_v3  ;;  %v5887_v61 = vmul.f32 0.5, %v5885_v22  ;;  %v5893_v39 = vadd.f32 1.0, %v8204_v2  ;;  %v8206_v1 = vpop.eup %8205  ;;  %v6570_v3 = vld [vmem:[%s12235_s0 + $0x76] sm:$0x1]  ;;  %v6571_v10 = vld [vmem:[%s12235_s0 + $0x7e] sm:$0x1] }
0x186e   :  { %v5906_v51 = vmul.f32 %v5894_v11, %v12427_v55  ;;  %v8208_v40 = vpop.eup %8207 }
0x186f   :  { %v5895_v49 = vmul.f32 0.5, %v5893_v39  ;;  %v5909_v58 = vmul.f32 %v8206_v1, %v5887_v61  ;;  %v8210_v13 = vpop.eup %8209  ;;  %v5902_v36 = vadd.f32 1.0, %v8208_v40 }
0x1870   :  { %v12026_v63 = vadd.f32 %v5908_v21, %v5906_v51  ;;  %v5903_v34 = vadd.f32 1.0, %v8210_v13 }
0x1871   :  { %v5907_v41 = vmul.f32 %v5895_v49, %v12428_v0  ;;  %v5904_v37 = vmul.f32 0.5, %v5902_v36 }
0x1872   :  { %8211 = vtanh.f32 %v12026_v63  ;;  %v5905_v45 = vmul.f32 0.5, %v5903_v34 }
0x1873   :  { %v12030_v47 = vadd.f32 %v5909_v58, %v5907_v41 }
0x1875   :  { %8213 = vtanh.f32 %v12030_v47 }
0x187c   :  { %v8212_v29 = vpop.eup %8211 }
0x187d   :  { %v5914_v42 = vmul.f32 %v8212_v29, %v5904_v37 }
0x187f   :  { %v8214_v28 = vpop.eup %8213 }
0x1880   :  { %v5915_v53 = vmul.f32 %v8214_v28, %v5905_v45 }
0x1882   :  { %v5916_v38 = vpack.c.bf16 %v5915_v53, %v5914_v42 }
0x1884   :  { %5959 = vmatmul.mubr.bf16.vlgmr.msra.gmra.mrb[92].mxu0 %v5916_v38  ;;  %v6573_v7 = vunpack.c.l.bf16 %v5916_v38  ;;  %v6574_v17 = vunpack.c.h.bf16 %v5916_v38  ;;  %6002 = vmatmul.mubr.bf16.vlgmr.msra.gmra.mrb[92].mxu1 %v5916_v38 }
0x1886   :  { %v6577_v52 = vrot.slane %v6573_v7, 1  ;;  %v6578_v48 = vrot.slane %v6573_v7, 2  ;;  %v6579_v20 = vrot.slane %v6573_v7, 3  ;;  %v6580_v33 = vrot.slane %v6573_v7, 4 }
0x1887   :  { %v6581_v59 = vrot.slane %v6573_v7, 5  ;;  %v6582_v56 = vrot.slane %v6573_v7, 6  ;;  %v6583_v30 = vrot.slane %v6573_v7, 7  ;;  %v6584_v60 = vrot.slane %v6574_v17, 1 }
0x1888   :  { %v6585_v50 = vrot.slane %v6574_v17, 2  ;;  %v6586_v46 = vrot.slane %v6574_v17, 3  ;;  %v6587_v62 = vrot.slane %v6574_v17, 4  ;;  %v6588_v14 = vrot.slane %v6574_v17, 5 }
0x1889   :  { %v6589_v12 = vrot.slane %v6574_v17, 6  ;;  %v6590_v43 = vrot.slane %v6574_v17, 7  ;;  %v6607_v32 = vadd.f32 %v6573_v7, %v6556_v15  ;;  %v6608_v26 = vadd.f32 %v6577_v52, %v6557_v18 }
0x188a   :  { %v6609_v11 = vadd.f32 %v6578_v48, %v6558_v23  ;;  %v6610_v22 = vadd.f32 %v6579_v20, %v6559_v57  ;;  %v6611_v2 = vadd.f32 %v6580_v33, %v6560_v6  ;;  %v6612_v21 = vadd.f32 %v6581_v59, %v6561_v4 }
0x188b   :  { %v6613_v55 = vadd.f32 %v6582_v56, %v6562_v19  ;;  %v6614_v51 = vadd.f32 %v6583_v30, %v6563_v9  ;;  %v6615_v61 = vadd.f32 %v6574_v17, %v6564_v27  ;;  %v6616_v39 = vadd.f32 %v6584_v60, %v6565_v44  ;;  %6623 = vst [vmem:[%s12241_s6 + $0x6] sm:$0x1] %v6607_v32 }
0x188c   :  { %6624 = vst [vmem:[%s12241_s6 + $0xe] sm:$0x1] %v6608_v26  ;;  %v6617_v1 = vadd.f32 %v6585_v50, %v6566_v25  ;;  %v6618_v49 = vadd.f32 %v6586_v46, %v6567_v31  ;;  %v6619_v58 = vadd.f32 %v6587_v62, %v6568_v5  ;;  %v6620_v0 = vadd.f32 %v6588_v14, %v6569_v8 }
0x188d   :  { %6625 = vst [vmem:[%s12241_s6 + $0x16] sm:$0x1] %v6609_v11  ;;  %6626 = vst [vmem:[%s12241_s6 + $0x1e] sm:$0x1] %v6610_v22  ;;  %v6621_v41 = vadd.f32 %v6589_v12, %v6570_v3  ;;  %v6622_v40 = vadd.f32 %v6590_v43, %v6571_v10 }
0x188e   :  { %6627 = vst [vmem:[%s12241_s6 + $0x26] sm:$0x1] %v6611_v2  ;;  %6628 = vst [vmem:[%s12241_s6 + $0x2e] sm:$0x1] %v6612_v21 }
0x188f   :  { %6629 = vst [vmem:[%s12241_s6 + $0x36] sm:$0x1] %v6613_v55  ;;  %6630 = vst [vmem:[%s12241_s6 + $0x3e] sm:$0x1] %v6614_v51  ;;  %v6639_v55 = vld [vmem:[%s12235_s0 + $0x7] sm:$0x1] }
0x1890   :  { %6631 = vst [vmem:[%s12241_s6 + $0x46] sm:$0x1] %v6615_v61  ;;  %6632 = vst [vmem:[%s12241_s6 + $0x4e] sm:$0x1] %v6616_v39  ;;  %v6641_v39 = vld [vmem:[%s12235_s0 + $0x17] sm:$0x1] }
0x1891   :  { %6633 = vst [vmem:[%s12241_s6 + $0x56] sm:$0x1] %v6617_v1  ;;  %6634 = vst [vmem:[%s12241_s6 + $0x5e] sm:$0x1] %v6618_v49  ;;  %v6642_v1 = vld [vmem:[%s12235_s0 + $0x1f] sm:$0x1] }
0x1892   :  { %6635 = vst [vmem:[%s12241_s6 + $0x66] sm:$0x1] %v6619_v58  ;;  %6636 = vst [vmem:[%s12241_s6 + $0x6e] sm:$0x1] %v6620_v0  ;;  %v6643_v49 = vld [vmem:[%s12235_s0 + $0x27] sm:$0x1] }
0x1893   :  { %6637 = vst [vmem:[%s12241_s6 + $0x76] sm:$0x1] %v6621_v41  ;;  %6638 = vst [vmem:[%s12241_s6 + $0x7e] sm:$0x1] %v6622_v40  ;;  %v6644_v58 = vld [vmem:[%s12235_s0 + $0x2f] sm:$0x1] }
0x1894   :  { %v6645_v0 = vld [vmem:[%s12235_s0 + $0x37] sm:$0x1]  ;;  %v6646_v41 = vld [vmem:[%s12235_s0 + $0x3f] sm:$0x1]  ;;  %v6647_v40 = vld [vmem:[%s12235_s0 + $0x47] sm:$0x1] }
0x1957   :  { %v5960_v13 = vpop.f32.mrb[92].mxu0  ;;  %v6003_v36 = vpop.f32.mrb[92].mxu1 }
0x1958   :  { %v7206_v34 = vadd.f32 %v5960_v13, %v12423_v24  ;;  %v5962_v29 = vpop.f32.mrb[93].mxu0  ;;  %v6005_v37 = vpop.f32.mrb[93].mxu1  ;;  %v7238_v23 = vadd.f32 %v6003_v36, %v12425_v54  ;;  %v6648_v13 = vld [vmem:[%s12235_s0 + $0x4f] sm:$0x1] }
0x1959   :  { %v7207_v45 = vadd.f32 %v5962_v29, %v12424_v16  ;;  %v5964_v28 = vpop.f32.mrb[94].mxu0  ;;  %v6007_v42 = vpop.f32.mrb[94].mxu1  ;;  %v7239_v19 = vadd.f32 %v6005_v37, %v12426_v35 }
0x195a   :  { %v6020_v53 = vmul.f32 0.5, %v7206_v34  ;;  %v7208_v38 = vadd.f32 %v5964_v28, %v12423_v24  ;;  %v5966_v15 = vpop.f32.mrb[95].mxu0  ;;  %v6009_v18 = vpop.f32.mrb[95].mxu1  ;;  %v7240_v4 = vadd.f32 %v6007_v42, %v12425_v54 }
0x195b   :  { %v6028_v7 = vmul.f32 0.5, %v7207_v45  ;;  %v7209_v17 = vadd.f32 %v5966_v15, %v12424_v16  ;;  %v6038_v24 = vmul.f32 0.5, %v7239_v19  ;;  %v7241_v9 = vadd.f32 %v6009_v18, %v12426_v35  ;;  %v6649_v45 = vld [vmem:[%s12235_s0 + $0x57] sm:$0x1]  ;;  %v6650_v15 = vld [vmem:[%s12235_s0 + $0x5f] sm:$0x1] }
0x195c   :  { %8215 = vtanh.f32 %v6020_v53  ;;  %v6021_v57 = vmul.f32 0.5, %v7208_v38 }
0x195d   :  { %8217 = vtanh.f32 %v6028_v7  ;;  %v6029_v6 = vmul.f32 0.5, %v7209_v17  ;;  %v6039_v48 = vmul.f32 0.5, %v7241_v9 }
0x195e   :  { %8219 = vtanh.f32 %v6021_v57  ;;  %v6651_v57 = vld [vmem:[%s12235_s0 + $0x67] sm:$0x1] }
0x195f   :  { %8221 = vtanh.f32 %v7238_v23 }
0x1960   :  { %8223 = vtanh.f32 %v6029_v6  ;;  %v6652_v6 = vld [vmem:[%s12235_s0 + $0x6f] sm:$0x1] }
0x1961   :  { %8225 = vtanh.f32 %v7240_v4 }
0x1962   :  { %8227 = vtanh.f32 %v6038_v24 }
0x1963   :  { %8229 = vtanh.f32 %v6039_v48 }
0x1966   :  { %v8216_v27 = vpop.eup %8215 }
0x1967   :  { %v8218_v44 = vpop.eup %8217  ;;  %v6024_v16 = vadd.f32 1.0, %v8216_v27  ;;  %v6653_v27 = vld [vmem:[%s12235_s0 + $0x77] sm:$0x1] }
0x1968   :  { %v6032_v52 = vadd.f32 1.0, %v8218_v44  ;;  %v8220_v20 = vpop.eup %8219  ;;  %v6654_v44 = vld [vmem:[%s12235_s0 + $0x7f] sm:$0x1] }
0x1969   :  { %v6026_v33 = vmul.f32 0.5, %v6024_v16  ;;  %v8222_v25 = vpop.eup %8221  ;;  %v6025_v56 = vadd.f32 1.0, %v8220_v20 }
0x196a   :  { %v6034_v59 = vmul.f32 0.5, %v6032_v52  ;;  %v8224_v54 = vpop.eup %8223 }
0x196b   :  { %v6048_v30 = vmul.f32 %v8222_v25, %v6026_v33  ;;  %v6027_v31 = vmul.f32 0.5, %v6025_v56  ;;  %v6033_v50 = vadd.f32 1.0, %v8224_v54  ;;  %v8226_v46 = vpop.eup %8225 }
0x196c   :  { %v6046_v60 = vmul.f32 %v6034_v59, %v12026_v63  ;;  %v8228_v8 = vpop.eup %8227 }
0x196d   :  { %v6035_v62 = vmul.f32 0.5, %v6033_v50  ;;  %v6049_v14 = vmul.f32 %v8226_v46, %v6027_v31  ;;  %v6042_v43 = vadd.f32 1.0, %v8228_v8  ;;  %v8230_v32 = vpop.eup %8229 }
0x196e   :  { %v6050_v35 = vadd.f32 %v6048_v30, %v6046_v60  ;;  %v6043_v3 = vadd.f32 1.0, %v8230_v32 }
0x196f   :  { %v6047_v5 = vmul.f32 %v6035_v62, %v12030_v47  ;;  %v6044_v26 = vmul.f32 0.5, %v6042_v43  ;;  %v6640_v47 = vld [vmem:[%s12235_s0 + $0xf] sm:$0x1] }
0x1970   :  { %8231 = vtanh.f32 %v6050_v35  ;;  %v6045_v63 = vmul.f32 0.5, %v6043_v3 }
0x1971   :  { %v6051_v12 = vadd.f32 %v6049_v14, %v6047_v5 }
0x1973   :  { %8233 = vtanh.f32 %v6051_v12 }
0x197a   :  { %v8232_v10 = vpop.eup %8231 }
0x197b   :  { %v6054_v11 = vmul.f32 %v8232_v10, %v6044_v26 }
0x197d   :  { %v8234_v22 = vpop.eup %8233 }
0x197e   :  { %v6055_v2 = vmul.f32 %v8234_v22, %v6045_v63 }
0x1980   :  { %v6056_v21 = vpack.c.bf16 %v6055_v2, %v6054_v11 }
0x1982   :  { %v6656_v51 = vunpack.c.l.bf16 %v6056_v21  ;;  %v6657_v61 = vunpack.c.h.bf16 %v6056_v21 }
0x1984   :  { %v6660_v36 = vrot.slane %v6656_v51, 1  ;;  %v6661_v34 = vrot.slane %v6656_v51, 2  ;;  %v6662_v29 = vrot.slane %v6656_v51, 3  ;;  %v6663_v37 = vrot.slane %v6656_v51, 4 }
0x1985   :  { %v6664_v28 = vrot.slane %v6656_v51, 5  ;;  %v6665_v42 = vrot.slane %v6656_v51, 6  ;;  %v6666_v53 = vrot.slane %v6656_v51, 7  ;;  %v6667_v38 = vrot.slane %v6657_v61, 1 }
0x1986   :  { %v6668_v18 = vrot.slane %v6657_v61, 2  ;;  %v6669_v7 = vrot.slane %v6657_v61, 3  ;;  %v6670_v17 = vrot.slane %v6657_v61, 4  ;;  %v6671_v23 = vrot.slane %v6657_v61, 5 }
0x1987   :  { %v6672_v4 = vrot.slane %v6657_v61, 6  ;;  %v6673_v19 = vrot.slane %v6657_v61, 7  ;;  %v6690_v24 = vadd.f32 %v6656_v51, %v6639_v55  ;;  %v6691_v9 = vadd.f32 %v6660_v36, %v6640_v47 }
0x1988   :  { %v6692_v16 = vadd.f32 %v6661_v34, %v6641_v39  ;;  %v6693_v52 = vadd.f32 %v6662_v29, %v6642_v1  ;;  %v6694_v48 = vadd.f32 %v6663_v37, %v6643_v49  ;;  %v6695_v20 = vadd.f32 %v6664_v28, %v6644_v58 }
0x1989   :  { %v6696_v33 = vadd.f32 %v6665_v42, %v6645_v0  ;;  %v6697_v25 = vadd.f32 %v6666_v53, %v6646_v41  ;;  %v6698_v59 = vadd.f32 %v6657_v61, %v6647_v40  ;;  %v6699_v56 = vadd.f32 %v6667_v38, %v6648_v13  ;;  %6706 = vst [vmem:[%s12241_s6 + $0x7] sm:$0x1] %v6690_v24 }
0x198a   :  { %6707 = vst [vmem:[%s12241_s6 + $0xf] sm:$0x1] %v6691_v9  ;;  %v6700_v54 = vadd.f32 %v6668_v18, %v6649_v45  ;;  %v6701_v30 = vadd.f32 %v6669_v7, %v6650_v15  ;;  %v6702_v60 = vadd.f32 %v6670_v17, %v6651_v57  ;;  %v6703_v31 = vadd.f32 %v6671_v23, %v6652_v6 }
0x198b   :  { %6708 = vst [vmem:[%s12241_s6 + $0x17] sm:$0x1] %v6692_v16  ;;  %6709 = vst [vmem:[%s12241_s6 + $0x1f] sm:$0x1] %v6693_v52  ;;  %v6704_v50 = vadd.f32 %v6672_v4, %v6653_v27  ;;  %v6705_v46 = vadd.f32 %v6673_v19, %v6654_v44 }
0x198c   :  { %6710 = vst [vmem:[%s12241_s6 + $0x27] sm:$0x1] %v6694_v48  ;;  %6711 = vst [vmem:[%s12241_s6 + $0x2f] sm:$0x1] %v6695_v20 }
0x198d   :  { %6712 = vst [vmem:[%s12241_s6 + $0x37] sm:$0x1] %v6696_v33  ;;  %6713 = vst [vmem:[%s12241_s6 + $0x3f] sm:$0x1] %v6697_v25 }
0x198e   :  { %6714 = vst [vmem:[%s12241_s6 + $0x47] sm:$0x1] %v6698_v59  ;;  %6715 = vst [vmem:[%s12241_s6 + $0x4f] sm:$0x1] %v6699_v56 }
0x198f   :  { %6716 = vst [vmem:[%s12241_s6 + $0x57] sm:$0x1] %v6700_v54  ;;  %6717 = vst [vmem:[%s12241_s6 + $0x5f] sm:$0x1] %v6701_v30 }
0x1990   :  { %6718 = vst [vmem:[%s12241_s6 + $0x67] sm:$0x1] %v6702_v60  ;;  %6719 = vst [vmem:[%s12241_s6 + $0x6f] sm:$0x1] %v6703_v31 }
0x1991   :  { %6720 = vst [vmem:[%s12241_s6 + $0x77] sm:$0x1] %v6704_v50  ;;  %6721 = vst [vmem:[%s12241_s6 + $0x7f] sm:$0x1] %v6705_v46 }

</bundles_post_ra>
